<compile_context>
chip_gen: v5e
topology: v5e:2x2
jax: 0.10.0
libtpu: 0.0.40
codegen_flags: <defaults>
</compile_context>

<pallas_src>
import functools

import jax
import jax.numpy as jnp
from jax.experimental import pallas as pl
from jax.experimental.pallas import tpu as pltpu

EPS = 1e-5
PAD = 1  # 1-pixel zero ring; the ring is re-zeroed after every conv


def _round_up(v, m):
    return (v + m - 1) // m * m


def _vmem_limit_bytes():
    # Use more VMEM on 128-MiB parts (v5e/v6e); stay well inside v7x's 64 MiB.
    try:
        cap = pltpu.get_tpu_info().vmem_capacity_bytes
    except Exception:
        cap = 64 * 1024 * 1024
    return int(min(cap * 3 // 4, 96 * 1024 * 1024))


# ----------------------------------------------------------------------------
# Fused kernel: conv1->bn1->relu -> conv2->bn2->relu -> conv3->bn3
#               (+ 1x1-conv->bn shortcut) -> residual add -> relu
# ----------------------------------------------------------------------------
def _res_conv_kernel(x_ref, w1_ref, w2_ref, w3_ref, ws_ref, s_ref, b_ref,
                     mask_ref, o_ref, cv_ref, acc_ref, *, Wc, Gr, Mp):
    Ck = cv_ref.shape[1]                     # canvas / contraction channels (mult of 128)
    Cp = acc_ref.shape[1]                    # output channels (mult of 128)
    s_all = s_ref[...]                       # (4, Cp) folded-BN scales
    b_all = b_ref[...]                       # (4, Cp) folded-BN biases

    # Guard rows must read as zeros: taps at offsets up to +/-(Wc+1) run past the
    # flattened canvas and land here.
    zg = jnp.zeros((Gr, Ck), cv_ref.dtype)
    cv_ref[pl.ds(0, Gr), :] = zg
    cv_ref[pl.ds(Gr + Mp, Gr), :] = zg
    # Conv-1 input: the halo-padded, flattened image canvas — upcast exactly once.
    cv_ref[pl.ds(Gr, Mp), :] = x_ref[...].astype(jnp.float32)

    offs = tuple(dy * Wc + dx for dy in (-1, 0, 1) for dx in (-1, 0, 1))

    def conv3x3_into_acc(w_ref):
        # 9 accumulating MXU matmuls on statically-offset ref slices of the canvas
        # (no concatenates / rolls; K rows beyond the conv's true channels are zero
        # in the padded weights, so reading the full canvas width is harmless).
        for k, s in enumerate(offs):
            tap = cv_ref[pl.ds(Gr + s, Mp), :].astype(jnp.bfloat16)
            contrib = jnp.dot(tap, w_ref[k], preferred_element_type=jnp.float32)
            if k == 0:
                acc_ref[...] = contrib
            else:
                acc_ref[...] += contrib

    def bn_relu_mask_store(scale, bias):
        # Folded BN + ReLU; the mask re-zeroes the pad ring (= next conv's padding)
        # and the Mp-tail, fused into the single canvas write-back.
        h = jnp.maximum(acc_ref[...] * scale + bias, 0.0) * mask_ref[...]
        cv_ref[pl.ds(Gr, Mp), pl.ds(0, Cp)] = h

    conv3x3_into_acc(w1_ref)                                   # conv1
    bn_relu_mask_store(s_all[0:1], b_all[0:1])                 # bn1 + relu
    conv3x3_into_acc(w2_ref)                                   # conv2
    bn_relu_mask_store(s_all[1:2], b_all[1:2])                 # bn2 + relu
    conv3x3_into_acc(w3_ref)                                   # conv3 (bn3 below)

    # Shortcut: 1x1 conv (bf16 MXU feed) + folded BN; residual add + ReLU in f32.
    ident = jnp.dot(x_ref[...], ws_ref[...], preferred_element_type=jnp.float32)
    out = (acc_ref[...] * s_all[2:3] + b_all[2:3]) + (ident * s_all[3:4] + b_all[3:4])
    o_ref[...] = jnp.maximum(out, 0.0).astype(o_ref.dtype)     # bf16 writeback


# ----------------------------------------------------------------------------
# BN folding (eval mode)
# ----------------------------------------------------------------------------
def fold_bn(gamma, beta, mean, var, conv_bias=None):
    scale = gamma / jnp.sqrt(var + EPS)
    b = jnp.zeros_like(mean) if conv_bias is None else conv_bias
    bias = scale * (b - mean) + beta
    return scale, bias


# ----------------------------------------------------------------------------
# Forward wrapper (accepts PyTorch-style NCHW)
# ----------------------------------------------------------------------------
@jax.jit
def res_conv_forward(x_nchw, p):
    N, Cin, H, W = x_nchw.shape
    Cout = p["w1"].shape[-1]
    match_short = Cin != Cout
    Cp = _round_up(Cout, 128)                  # lane-dense output channels
    Ck = max(_round_up(Cin, 128), Cp)          # canvas / contraction channel width
    Hc, Wc = H + 2 * PAD, W + 2 * PAD
    M = Hc * Wc
    Mp = _round_up(M, 16)                      # bf16-sublane-friendly canvas length
    Gr = _round_up(Wc + 1, 16)                 # guard rows: |max tap offset| = Wc + 1
    R = Mp + 2 * Gr                            # scratch canvas rows

    # NCHW -> NHWC (bf16 early: halves pad/reshape traffic), 1-px zero halo,
    # channel pad to Ck, flatten to (Mp, Ck).
    x = jnp.transpose(x_nchw, (0, 2, 3, 1)).astype(jnp.bfloat16)
    x = jnp.pad(x, ((0, 0), (PAD, PAD), (PAD, PAD), (0, Ck - Cin)))
    x = x.reshape(N, M, Ck)
    x = jnp.pad(x, ((0, 0), (0, Mp - M), (0, 0)))

    # Fold BN into per-channel affine (on true channels, then pad -> no NaN from pads).
    s1, b1 = fold_bn(p["g1"], p["be1"], p["m1"], p["v1"], p["cb1"])
    s2, b2 = fold_bn(p["g2"], p["be2"], p["m2"], p["v2"], p["cb2"])
    s3, b3 = fold_bn(p["g3"], p["be3"], p["m3"], p["v3"], p["cb3"])
    if match_short:
        ss, bs = fold_bn(p["gs"], p["bes"], p["ms"], p["vs"], None)
        ws = p["ws"].reshape(Cin, Cout)
    else:  # identity shortcut expressed as 1x1 identity conv with unit BN
        ss = jnp.ones((Cout,), jnp.float32)
        bs = jnp.zeros((Cout,), jnp.float32)
        ws = jnp.eye(Cin, Cout, dtype=jnp.float32)

    def padc(v):
        return jnp.pad(v, (0, Cp - Cout))

    s_all = jnp.stack([padc(s1), padc(s2), padc(s3), padc(ss)]).astype(jnp.float32)
    b_all = jnp.stack([padc(b1), padc(b2), padc(b3), padc(bs)]).astype(jnp.float32)

    def prep3x3(w):                            # (3,3,ci,Cout) -> (9, Ck, Cp) bf16
        ci = w.shape[2]
        w = jnp.pad(w, ((0, 0), (0, 0), (0, Ck - ci), (0, Cp - Cout)))
        return w.reshape(9, Ck, Cp).astype(jnp.bfloat16)

    w1, w2, w3 = prep3x3(p["w1"]), prep3x3(p["w2"]), prep3x3(p["w3"])
    ws_p = jnp.pad(ws, ((0, Ck - Cin), (0, Cp - Cout))).astype(jnp.bfloat16)

    # Interior mask on the flattened canvas (1 inside the true HxW region).
    rr = jnp.arange(Hc)
    cc = jnp.arange(Wc)
    inside = (((rr >= PAD) & (rr < PAD + H))[:, None]
              & ((cc >= PAD) & (cc < PAD + W))[None, :])
    mask = inside.astype(jnp.float32).reshape(M, 1)
    mask = jnp.pad(mask, ((0, Mp - M), (0, 0)))

    kernel = functools.partial(_res_conv_kernel, Wc=Wc, Gr=Gr, Mp=Mp)
    out = pl.pallas_call(
        kernel,
        out_shape=jax.ShapeDtypeStruct((N, Mp, Cp), jnp.bfloat16),
        grid=(N,),
        in_specs=[
            pl.BlockSpec((None, Mp, Ck), lambda n: (n, 0, 0)),   # x canvas (per image)
            pl.BlockSpec((9, Ck, Cp), lambda n: (0, 0, 0)),      # w1 (grid-invariant)
            pl.BlockSpec((9, Ck, Cp), lambda n: (0, 0, 0)),      # w2
            pl.BlockSpec((9, Ck, Cp), lambda n: (0, 0, 0)),      # w3
            pl.BlockSpec((Ck, Cp), lambda n: (0, 0)),            # shortcut 1x1 weight
            pl.BlockSpec((4, Cp), lambda n: (0, 0)),             # folded BN scales
            pl.BlockSpec((4, Cp), lambda n: (0, 0)),             # folded BN biases
            pl.BlockSpec((Mp, 1), lambda n: (0, 0)),             # interior mask
        ],
        out_specs=pl.BlockSpec((None, Mp, Cp), lambda n: (n, 0, 0)),
        scratch_shapes=[
            pltpu.VMEM((R, Ck), jnp.float32),     # guard-padded activation canvas
            pltpu.VMEM((Mp, Cp), jnp.float32),    # conv accumulator
        ],
        compiler_params=pltpu.CompilerParams(
            dimension_semantics=("parallel",),    # megacore-shard batch on v7x
            vmem_limit_bytes=_vmem_limit_bytes(),
        ),
    )(x, w1, w2, w3, ws_p, s_all, b_all, mask)

    # Slice interior / strip padding in bf16; final cast to f32 to match the module.
    out = out[:, :M, :Cout].reshape(N, Hc, Wc, Cout)[:, PAD:PAD + H, PAD:PAD + W, :]
    return jnp.transpose(out, (0, 3, 1, 2)).astype(jnp.float32)   # NHWC -> NCHW


# ----------------------------------------------------------------------------
# Parameter construction (deterministic, synthetic)
# ----------------------------------------------------------------------------
def init_params(key, in_ch, out_ch):
    ks = jax.random.split(key, 16)
    p = {}

    def nrm(k, shape, s=0.1):
        return jax.random.normal(k, shape, jnp.float32) * s

    # conv weights stored HWIO (3,3,Cin,Cout)
    p["w1"] = nrm(ks[0], (3, 3, in_ch, out_ch));  p["cb1"] = nrm(ks[1], (out_ch,), 0.05)
    p["w2"] = nrm(ks[2], (3, 3, out_ch, out_ch)); p["cb2"] = nrm(ks[3], (out_ch,), 0.05)
    p["w3"] = nrm(ks[4], (3, 3, out_ch, out_ch)); p["cb3"] = nrm(ks[5], (out_ch,), 0.05)
    p["ws"] = nrm(ks[6], (1, 1, in_ch, out_ch))   # shortcut 1x1, bias=False
    for i, name in enumerate(["1", "2", "3", "s"]):
        k = jax.random.split(ks[7 + i], 4)
        p["g" + name] = 1.0 + nrm(k[0], (out_ch,), 0.1)
        p["be" + name] = nrm(k[1], (out_ch,), 0.1)
        p["m" + name] = nrm(k[2], (out_ch,), 0.1)
        p["v" + name] = jnp.abs(nrm(k[3], (out_ch,), 0.2)) + 0.5
    return p


# ----------------------------------------------------------------------------
# Pure-JAX reference (correctness check)
# ----------------------------------------------------------------------------
def res_conv_reference(x_nchw, p):
    x = jnp.transpose(x_nchw, (0, 2, 3, 1)).astype(jnp.float32)

    def conv(h, w):
        return jax.lax.conv_general_dilated(
            h, w, (1, 1), "SAME", dimension_numbers=("NHWC", "HWIO", "NHWC"))

    def bn(h, g, be, m, v):
        return (h - m) / jnp.sqrt(v + EPS) * g + be

    h = jax.nn.relu(bn(conv(x, p["w1"]) + p["cb1"], p["g1"], p["be1"], p["m1"], p["v1"]))
    h = jax.nn.relu(bn(conv(h, p["w2"]) + p["cb2"], p["g2"], p["be2"], p["m2"], p["v2"]))
    h = bn(conv(h, p["w3"]) + p["cb3"], p["g3"], p["be3"], p["m3"], p["v3"])
    if p["w1"].shape[2] != p["w1"].shape[3]:
        ident = bn(conv(x, p["ws"]), p["gs"], p["bes"], p["ms"], p["vs"])
    else:
        ident = x
    out = jax.nn.relu(h + ident)
    return jnp.transpose(out, (0, 3, 1, 2))


if __name__ == "__main__":
    in_ch, out_ch = 4, 8
    key = jax.random.PRNGKey(0)
    kx, kp = jax.random.split(key)
    x = jax.random.normal(kx, (2, in_ch, 16, 16), jnp.float32)   # NCHW, like PyTorch
    params = init_params(kp, in_ch, out_ch)

    out = jax.block_until_ready(res_conv_forward(x, params))
    ref = jax.block_until_ready(res_conv_reference(x, params))

    assert out.shape == (2, out_ch, 16, 16), out.shape
    max_err = float(jnp.max(jnp.abs(out - ref)))
    # bf16 MXU feeds + bf16 writeback (f32 accumulation/residual) -> loose tolerance.
    assert jnp.allclose(out, ref, rtol=5e-2, atol=5e-2), max_err

    print("KERNEL_OK")
</pallas_src>

<mosaic_0001>
module attributes {stable_mosaic.version = 11 : i64} {
  func.func @_res_conv_kernel(%arg0: i32, %arg1: memref<1x336x128xbf16, #tpu.memory_space<vmem>>, %arg2: memref<9x128x128xbf16, #tpu.memory_space<vmem>>, %arg3: memref<9x128x128xbf16, #tpu.memory_space<vmem>>, %arg4: memref<9x128x128xbf16, #tpu.memory_space<vmem>>, %arg5: memref<128x128xbf16, #tpu.memory_space<vmem>>, %arg6: memref<4x128xf32, #tpu.memory_space<vmem>>, %arg7: memref<4x128xf32, #tpu.memory_space<vmem>>, %arg8: memref<336x1xf32, #tpu.memory_space<vmem>>, %arg9: memref<1x336x128xbf16, #tpu.memory_space<vmem>>, %arg10: memref<400x128xf32, #tpu.memory_space<vmem>>, %arg11: memref<336x128xf32, #tpu.memory_space<vmem>>) attributes {dimension_semantics = [#tpu.dimension_semantics<parallel>], iteration_bounds = array<i64: 2>, scalar_prefetch = 0 : i64, scratch_operands = 2 : i64, tpu.core_type = #tpu.core_type<tc>, window_params = [{transform_indices = @transform_0, window_bounds = array<i64: 1, 336, 128>}, {pipeline_mode = #tpu.pipeline_mode<synchronous>, transform_indices = @transform_1, window_bounds = array<i64: 9, 128, 128>}, {pipeline_mode = #tpu.pipeline_mode<synchronous>, transform_indices = @transform_2, window_bounds = array<i64: 9, 128, 128>}, {pipeline_mode = #tpu.pipeline_mode<synchronous>, transform_indices = @transform_3, window_bounds = array<i64: 9, 128, 128>}, {pipeline_mode = #tpu.pipeline_mode<synchronous>, transform_indices = @transform_4, window_bounds = array<i64: 128, 128>}, {pipeline_mode = #tpu.pipeline_mode<synchronous>, transform_indices = @transform_5, window_bounds = array<i64: 4, 128>}, {pipeline_mode = #tpu.pipeline_mode<synchronous>, transform_indices = @transform_6, window_bounds = array<i64: 4, 128>}, {pipeline_mode = #tpu.pipeline_mode<synchronous>, transform_indices = @transform_7, window_bounds = array<i64: 336, 1>}, {transform_indices = @transform_8, window_bounds = array<i64: 1, 336, 128>}]} {
    %c0 = arith.constant 0 : index
    %c0_0 = arith.constant 0 : index
    %0 = vector.load %arg6[%c0, %c0_0] : memref<4x128xf32, #tpu.memory_space<vmem>>, vector<4x128xf32>
    %c0_1 = arith.constant 0 : index
    %c0_2 = arith.constant 0 : index
    %1 = vector.load %arg7[%c0_1, %c0_2] : memref<4x128xf32, #tpu.memory_space<vmem>>, vector<4x128xf32>
    %cst = arith.constant 0.000000e+00 : f32
    %2 = vector.broadcast %cst : f32 to vector<32x128xf32>
    %c0_3 = arith.constant 0 : index
    %c0_4 = arith.constant 0 : index
    %3 = vector.load %arg10[%c0_3, %c0_4] : memref<400x128xf32, #tpu.memory_space<vmem>>, vector<32x128xf32>
    tpu.vector_store %arg10[%c0_3, %c0_4], %2 {strides = array<i32>} : memref<400x128xf32, #tpu.memory_space<vmem>>, vector<32x128xf32>,
    %c368 = arith.constant 368 : index
    %c0_5 = arith.constant 0 : index
    %4 = vector.load %arg10[%c368, %c0_5] : memref<400x128xf32, #tpu.memory_space<vmem>>, vector<32x128xf32>
    tpu.vector_store %arg10[%c368, %c0_5], %2 {strides = array<i32>} : memref<400x128xf32, #tpu.memory_space<vmem>>, vector<32x128xf32>,
    %c0_6 = arith.constant 0 : index
    %c0_7 = arith.constant 0 : index
    %c0_8 = arith.constant 0 : index
    %5 = vector.load %arg1[%c0_6, %c0_7, %c0_8] : memref<1x336x128xbf16, #tpu.memory_space<vmem>>, vector<1x336x128xbf16>
    %6 = vector.shape_cast %5 : vector<1x336x128xbf16> to vector<336x128xbf16>
    %7 = arith.extf %6 : vector<336x128xbf16> to vector<336x128xf32>
    %c32 = arith.constant 32 : index
    %c0_9 = arith.constant 0 : index
    %8 = vector.load %arg10[%c32, %c0_9] : memref<400x128xf32, #tpu.memory_space<vmem>>, vector<336x128xf32>
    tpu.vector_store %arg10[%c32, %c0_9], %7 {strides = array<i32>} : memref<400x128xf32, #tpu.memory_space<vmem>>, vector<336x128xf32>,
    %c13 = arith.constant 13 : index
    %c0_10 = arith.constant 0 : index
    %9 = vector.load %arg10[%c13, %c0_10] : memref<400x128xf32, #tpu.memory_space<vmem>>, vector<336x128xf32>
    %10 = arith.truncf %9 : vector<336x128xf32> to vector<336x128xbf16>
    %c0_11 = arith.constant 0 : index
    %c0_12 = arith.constant 0 : index
    %c0_13 = arith.constant 0 : index
    %11 = vector.load %arg2[%c0_11, %c0_12, %c0_13] : memref<9x128x128xbf16, #tpu.memory_space<vmem>>, vector<1x128x128xbf16>
    %12 = vector.shape_cast %11 : vector<1x128x128xbf16> to vector<128x128xbf16>
    %cst_14 = arith.constant dense<0.000000e+00> : vector<336x128xf32>
    %13 = tpu.matmul %10, %12, %cst_14 {dimension_numbers = #tpu.dot_dimension_numbers<[1], [0], [0], [1], [0, 0, 1, 1], [], []>} : vector<336x128xbf16>, vector<128x128xbf16>, vector<336x128xf32> -> vector<336x128xf32>
    %c0_15 = arith.constant 0 : index
    %c0_16 = arith.constant 0 : index
    %14 = vector.load %arg11[%c0_15, %c0_16] : memref<336x128xf32, #tpu.memory_space<vmem>>, vector<336x128xf32>
    tpu.vector_store %arg11[%c0_15, %c0_16], %13 {strides = array<i32>} : memref<336x128xf32, #tpu.memory_space<vmem>>, vector<336x128xf32>,
    %c14 = arith.constant 14 : index
    %c0_17 = arith.constant 0 : index
    %15 = vector.load %arg10[%c14, %c0_17] : memref<400x128xf32, #tpu.memory_space<vmem>>, vector<336x128xf32>
    %16 = arith.truncf %15 : vector<336x128xf32> to vector<336x128xbf16>
    %c1 = arith.constant 1 : index
    %c0_18 = arith.constant 0 : index
    %c0_19 = arith.constant 0 : index
    %17 = vector.load %arg2[%c1, %c0_18, %c0_19] : memref<9x128x128xbf16, #tpu.memory_space<vmem>>, vector<1x128x128xbf16>
    %18 = vector.shape_cast %17 : vector<1x128x128xbf16> to vector<128x128xbf16>
    %cst_20 = arith.constant dense<0.000000e+00> : vector<336x128xf32>
    %19 = tpu.matmul %16, %18, %cst_20 {dimension_numbers = #tpu.dot_dimension_numbers<[1], [0], [0], [1], [0, 0, 1, 1], [], []>} : vector<336x128xbf16>, vector<128x128xbf16>, vector<336x128xf32> -> vector<336x128xf32>
    %c0_21 = arith.constant 0 : index
    %c0_22 = arith.constant 0 : index
    %20 = vector.load %arg11[%c0_21, %c0_22] : memref<336x128xf32, #tpu.memory_space<vmem>>, vector<336x128xf32>
    %21 = arith.addf %20, %19 : vector<336x128xf32>
    %c0_23 = arith.constant 0 : index
    %c0_24 = arith.constant 0 : index
    %22 = vector.load %arg11[%c0_23, %c0_24] : memref<336x128xf32, #tpu.memory_space<vmem>>, vector<336x128xf32>
    tpu.vector_store %arg11[%c0_23, %c0_24], %21 {strides = array<i32>} : memref<336x128xf32, #tpu.memory_space<vmem>>, vector<336x128xf32>,
    %c15 = arith.constant 15 : index
    %c0_25 = arith.constant 0 : index
    %23 = vector.load %arg10[%c15, %c0_25] : memref<400x128xf32, #tpu.memory_space<vmem>>, vector<336x128xf32>
    %24 = arith.truncf %23 : vector<336x128xf32> to vector<336x128xbf16>
    %c2 = arith.constant 2 : index
    %c0_26 = arith.constant 0 : index
    %c0_27 = arith.constant 0 : index
    %25 = vector.load %arg2[%c2, %c0_26, %c0_27] : memref<9x128x128xbf16, #tpu.memory_space<vmem>>, vector<1x128x128xbf16>
    %26 = vector.shape_cast %25 : vector<1x128x128xbf16> to vector<128x128xbf16>
    %cst_28 = arith.constant dense<0.000000e+00> : vector<336x128xf32>
    %27 = tpu.matmul %24, %26, %cst_28 {dimension_numbers = #tpu.dot_dimension_numbers<[1], [0], [0], [1], [0, 0, 1, 1], [], []>} : vector<336x128xbf16>, vector<128x128xbf16>, vector<336x128xf32> -> vector<336x128xf32>
    %c0_29 = arith.constant 0 : index
    %c0_30 = arith.constant 0 : index
    %28 = vector.load %arg11[%c0_29, %c0_30] : memref<336x128xf32, #tpu.memory_space<vmem>>, vector<336x128xf32>
    %29 = arith.addf %28, %27 : vector<336x128xf32>
    %c0_31 = arith.constant 0 : index
    %c0_32 = arith.constant 0 : index
    %30 = vector.load %arg11[%c0_31, %c0_32] : memref<336x128xf32, #tpu.memory_space<vmem>>, vector<336x128xf32>
    tpu.vector_store %arg11[%c0_31, %c0_32], %29 {strides = array<i32>} : memref<336x128xf32, #tpu.memory_space<vmem>>, vector<336x128xf32>,
    %c31 = arith.constant 31 : index
    %c0_33 = arith.constant 0 : index
    %31 = vector.load %arg10[%c31, %c0_33] : memref<400x128xf32, #tpu.memory_space<vmem>>, vector<336x128xf32>
    %32 = arith.truncf %31 : vector<336x128xf32> to vector<336x128xbf16>
    %c3 = arith.constant 3 : index
    %c0_34 = arith.constant 0 : index
    %c0_35 = arith.constant 0 : index
    %33 = vector.load %arg2[%c3, %c0_34, %c0_35] : memref<9x128x128xbf16, #tpu.memory_space<vmem>>, vector<1x128x128xbf16>
    %34 = vector.shape_cast %33 : vector<1x128x128xbf16> to vector<128x128xbf16>
    %cst_36 = arith.constant dense<0.000000e+00> : vector<336x128xf32>
    %35 = tpu.matmul %32, %34, %cst_36 {dimension_numbers = #tpu.dot_dimension_numbers<[1], [0], [0], [1], [0, 0, 1, 1], [], []>} : vector<336x128xbf16>, vector<128x128xbf16>, vector<336x128xf32> -> vector<336x128xf32>
    %c0_37 = arith.constant 0 : index
    %c0_38 = arith.constant 0 : index
    %36 = vector.load %arg11[%c0_37, %c0_38] : memref<336x128xf32, #tpu.memory_space<vmem>>, vector<336x128xf32>
    %37 = arith.addf %36, %35 : vector<336x128xf32>
    %c0_39 = arith.constant 0 : index
    %c0_40 = arith.constant 0 : index
    %38 = vector.load %arg11[%c0_39, %c0_40] : memref<336x128xf32, #tpu.memory_space<vmem>>, vector<336x128xf32>
    tpu.vector_store %arg11[%c0_39, %c0_40], %37 {strides = array<i32>} : memref<336x128xf32, #tpu.memory_space<vmem>>, vector<336x128xf32>,
    %c32_41 = arith.constant 32 : index
    %c0_42 = arith.constant 0 : index
    %39 = vector.load %arg10[%c32_41, %c0_42] : memref<400x128xf32, #tpu.memory_space<vmem>>, vector<336x128xf32>
    %40 = arith.truncf %39 : vector<336x128xf32> to vector<336x128xbf16>
    %c4 = arith.constant 4 : index
    %c0_43 = arith.constant 0 : index
    %c0_44 = arith.constant 0 : index
    %41 = vector.load %arg2[%c4, %c0_43, %c0_44] : memref<9x128x128xbf16, #tpu.memory_space<vmem>>, vector<1x128x128xbf16>
    %42 = vector.shape_cast %41 : vector<1x128x128xbf16> to vector<128x128xbf16>
    %cst_45 = arith.constant dense<0.000000e+00> : vector<336x128xf32>
    %43 = tpu.matmul %40, %42, %cst_45 {dimension_numbers = #tpu.dot_dimension_numbers<[1], [0], [0], [1], [0, 0, 1, 1], [], []>} : vector<336x128xbf16>, vector<128x128xbf16>, vector<336x128xf32> -> vector<336x128xf32>
    %c0_46 = arith.constant 0 : index
    %c0_47 = arith.constant 0 : index
    %44 = vector.load %arg11[%c0_46, %c0_47] : memref<336x128xf32, #tpu.memory_space<vmem>>, vector<336x128xf32>
    %45 = arith.addf %44, %43 : vector<336x128xf32>
    %c0_48 = arith.constant 0 : index
    %c0_49 = arith.constant 0 : index
    %46 = vector.load %arg11[%c0_48, %c0_49] : memref<336x128xf32, #tpu.memory_space<vmem>>, vector<336x128xf32>
    tpu.vector_store %arg11[%c0_48, %c0_49], %45 {strides = array<i32>} : memref<336x128xf32, #tpu.memory_space<vmem>>, vector<336x128xf32>,
    %c33 = arith.constant 33 : index
    %c0_50 = arith.constant 0 : index
    %47 = vector.load %arg10[%c33, %c0_50] : memref<400x128xf32, #tpu.memory_space<vmem>>, vector<336x128xf32>
    %48 = arith.truncf %47 : vector<336x128xf32> to vector<336x128xbf16>
    %c5 = arith.constant 5 : index
    %c0_51 = arith.constant 0 : index
    %c0_52 = arith.constant 0 : index
    %49 = vector.load %arg2[%c5, %c0_51, %c0_52] : memref<9x128x128xbf16, #tpu.memory_space<vmem>>, vector<1x128x128xbf16>
    %50 = vector.shape_cast %49 : vector<1x128x128xbf16> to vector<128x128xbf16>
    %cst_53 = arith.constant dense<0.000000e+00> : vector<336x128xf32>
    %51 = tpu.matmul %48, %50, %cst_53 {dimension_numbers = #tpu.dot_dimension_numbers<[1], [0], [0], [1], [0, 0, 1, 1], [], []>} : vector<336x128xbf16>, vector<128x128xbf16>, vector<336x128xf32> -> vector<336x128xf32>
    %c0_54 = arith.constant 0 : index
    %c0_55 = arith.constant 0 : index
    %52 = vector.load %arg11[%c0_54, %c0_55] : memref<336x128xf32, #tpu.memory_space<vmem>>, vector<336x128xf32>
    %53 = arith.addf %52, %51 : vector<336x128xf32>
    %c0_56 = arith.constant 0 : index
    %c0_57 = arith.constant 0 : index
    %54 = vector.load %arg11[%c0_56, %c0_57] : memref<336x128xf32, #tpu.memory_space<vmem>>, vector<336x128xf32>
    tpu.vector_store %arg11[%c0_56, %c0_57], %53 {strides = array<i32>} : memref<336x128xf32, #tpu.memory_space<vmem>>, vector<336x128xf32>,
    %c49 = arith.constant 49 : index
    %c0_58 = arith.constant 0 : index
    %55 = vector.load %arg10[%c49, %c0_58] : memref<400x128xf32, #tpu.memory_space<vmem>>, vector<336x128xf32>
    %56 = arith.truncf %55 : vector<336x128xf32> to vector<336x128xbf16>
    %c6 = arith.constant 6 : index
    %c0_59 = arith.constant 0 : index
    %c0_60 = arith.constant 0 : index
    %57 = vector.load %arg2[%c6, %c0_59, %c0_60] : memref<9x128x128xbf16, #tpu.memory_space<vmem>>, vector<1x128x128xbf16>
    %58 = vector.shape_cast %57 : vector<1x128x128xbf16> to vector<128x128xbf16>
    %cst_61 = arith.constant dense<0.000000e+00> : vector<336x128xf32>
    %59 = tpu.matmul %56, %58, %cst_61 {dimension_numbers = #tpu.dot_dimension_numbers<[1], [0], [0], [1], [0, 0, 1, 1], [], []>} : vector<336x128xbf16>, vector<128x128xbf16>, vector<336x128xf32> -> vector<336x128xf32>
    %c0_62 = arith.constant 0 : index
    %c0_63 = arith.constant 0 : index
    %60 = vector.load %arg11[%c0_62, %c0_63] : memref<336x128xf32, #tpu.memory_space<vmem>>, vector<336x128xf32>
    %61 = arith.addf %60, %59 : vector<336x128xf32>
    %c0_64 = arith.constant 0 : index
    %c0_65 = arith.constant 0 : index
    %62 = vector.load %arg11[%c0_64, %c0_65] : memref<336x128xf32, #tpu.memory_space<vmem>>, vector<336x128xf32>
    tpu.vector_store %arg11[%c0_64, %c0_65], %61 {strides = array<i32>} : memref<336x128xf32, #tpu.memory_space<vmem>>, vector<336x128xf32>,
    %c50 = arith.constant 50 : index
    %c0_66 = arith.constant 0 : index
    %63 = vector.load %arg10[%c50, %c0_66] : memref<400x128xf32, #tpu.memory_space<vmem>>, vector<336x128xf32>
    %64 = arith.truncf %63 : vector<336x128xf32> to vector<336x128xbf16>
    %c7 = arith.constant 7 : index
    %c0_67 = arith.constant 0 : index
    %c0_68 = arith.constant 0 : index
    %65 = vector.load %arg2[%c7, %c0_67, %c0_68] : memref<9x128x128xbf16, #tpu.memory_space<vmem>>, vector<1x128x128xbf16>
    %66 = vector.shape_cast %65 : vector<1x128x128xbf16> to vector<128x128xbf16>
    %cst_69 = arith.constant dense<0.000000e+00> : vector<336x128xf32>
    %67 = tpu.matmul %64, %66, %cst_69 {dimension_numbers = #tpu.dot_dimension_numbers<[1], [0], [0], [1], [0, 0, 1, 1], [], []>} : vector<336x128xbf16>, vector<128x128xbf16>, vector<336x128xf32> -> vector<336x128xf32>
    %c0_70 = arith.constant 0 : index
    %c0_71 = arith.constant 0 : index
    %68 = vector.load %arg11[%c0_70, %c0_71] : memref<336x128xf32, #tpu.memory_space<vmem>>, vector<336x128xf32>
    %69 = arith.addf %68, %67 : vector<336x128xf32>
    %c0_72 = arith.constant 0 : index
    %c0_73 = arith.constant 0 : index
    %70 = vector.load %arg11[%c0_72, %c0_73] : memref<336x128xf32, #tpu.memory_space<vmem>>, vector<336x128xf32>
    tpu.vector_store %arg11[%c0_72, %c0_73], %69 {strides = array<i32>} : memref<336x128xf32, #tpu.memory_space<vmem>>, vector<336x128xf32>,
    %c51 = arith.constant 51 : index
    %c0_74 = arith.constant 0 : index
    %71 = vector.load %arg10[%c51, %c0_74] : memref<400x128xf32, #tpu.memory_space<vmem>>, vector<336x128xf32>
    %72 = arith.truncf %71 : vector<336x128xf32> to vector<336x128xbf16>
    %c8 = arith.constant 8 : index
    %c0_75 = arith.constant 0 : index
    %c0_76 = arith.constant 0 : index
    %73 = vector.load %arg2[%c8, %c0_75, %c0_76] : memref<9x128x128xbf16, #tpu.memory_space<vmem>>, vector<1x128x128xbf16>
    %74 = vector.shape_cast %73 : vector<1x128x128xbf16> to vector<128x128xbf16>
    %cst_77 = arith.constant dense<0.000000e+00> : vector<336x128xf32>
    %75 = tpu.matmul %72, %74, %cst_77 {dimension_numbers = #tpu.dot_dimension_numbers<[1], [0], [0], [1], [0, 0, 1, 1], [], []>} : vector<336x128xbf16>, vector<128x128xbf16>, vector<336x128xf32> -> vector<336x128xf32>
    %c0_78 = arith.constant 0 : index
    %c0_79 = arith.constant 0 : index
    %76 = vector.load %arg11[%c0_78, %c0_79] : memref<336x128xf32, #tpu.memory_space<vmem>>, vector<336x128xf32>
    %77 = arith.addf %76, %75 : vector<336x128xf32>
    %c0_80 = arith.constant 0 : index
    %c0_81 = arith.constant 0 : index
    %78 = vector.load %arg11[%c0_80, %c0_81] : memref<336x128xf32, #tpu.memory_space<vmem>>, vector<336x128xf32>
    tpu.vector_store %arg11[%c0_80, %c0_81], %77 {strides = array<i32>} : memref<336x128xf32, #tpu.memory_space<vmem>>, vector<336x128xf32>,
    %79 = vector.extract_strided_slice %0 {offsets = [0, 0], sizes = [1, 128], strides = [1, 1]} : vector<4x128xf32> to vector<1x128xf32>
    %80 = vector.extract_strided_slice %1 {offsets = [0, 0], sizes = [1, 128], strides = [1, 1]} : vector<4x128xf32> to vector<1x128xf32>
    %c0_82 = arith.constant 0 : index
    %c0_83 = arith.constant 0 : index
    %81 = vector.load %arg11[%c0_82, %c0_83] : memref<336x128xf32, #tpu.memory_space<vmem>>, vector<336x128xf32>
    %82 = vector.broadcast %79 : vector<1x128xf32> to vector<336x128xf32>
    %83 = arith.mulf %81, %82 : vector<336x128xf32>
    %84 = vector.broadcast %80 : vector<1x128xf32> to vector<336x128xf32>
    %85 = arith.addf %83, %84 : vector<336x128xf32>
    %cst_84 = arith.constant 0.000000e+00 : f32
    %86 = vector.broadcast %cst_84 : f32 to vector<336x128xf32>
    %87 = arith.maximumf %85, %86 : vector<336x128xf32>
    %c0_85 = arith.constant 0 : index
    %c0_86 = arith.constant 0 : index
    %88 = vector.load %arg8[%c0_85, %c0_86] : memref<336x1xf32, #tpu.memory_space<vmem>>, vector<336x1xf32>
    %89 = vector.broadcast %88 : vector<336x1xf32> to vector<336x128xf32>
    %90 = arith.mulf %87, %89 : vector<336x128xf32>
    %c32_87 = arith.constant 32 : index
    %c0_88 = arith.constant 0 : index
    %91 = vector.load %arg10[%c32_87, %c0_88] : memref<400x128xf32, #tpu.memory_space<vmem>>, vector<336x128xf32>
    tpu.vector_store %arg10[%c32_87, %c0_88], %90 {strides = array<i32>} : memref<400x128xf32, #tpu.memory_space<vmem>>, vector<336x128xf32>,
    %c13_89 = arith.constant 13 : index
    %c0_90 = arith.constant 0 : index
    %92 = vector.load %arg10[%c13_89, %c0_90] : memref<400x128xf32, #tpu.memory_space<vmem>>, vector<336x128xf32>
    %93 = arith.truncf %92 : vector<336x128xf32> to vector<336x128xbf16>
    %c0_91 = arith.constant 0 : index
    %c0_92 = arith.constant 0 : index
    %c0_93 = arith.constant 0 : index
    %94 = vector.load %arg3[%c0_91, %c0_92, %c0_93] : memref<9x128x128xbf16, #tpu.memory_space<vmem>>, vector<1x128x128xbf16>
    %95 = vector.shape_cast %94 : vector<1x128x128xbf16> to vector<128x128xbf16>
    %cst_94 = arith.constant dense<0.000000e+00> : vector<336x128xf32>
    %96 = tpu.matmul %93, %95, %cst_94 {dimension_numbers = #tpu.dot_dimension_numbers<[1], [0], [0], [1], [0, 0, 1, 1], [], []>} : vector<336x128xbf16>, vector<128x128xbf16>, vector<336x128xf32> -> vector<336x128xf32>
    %c0_95 = arith.constant 0 : index
    %c0_96 = arith.constant 0 : index
    %97 = vector.load %arg11[%c0_95, %c0_96] : memref<336x128xf32, #tpu.memory_space<vmem>>, vector<336x128xf32>
    tpu.vector_store %arg11[%c0_95, %c0_96], %96 {strides = array<i32>} : memref<336x128xf32, #tpu.memory_space<vmem>>, vector<336x128xf32>,
    %c14_97 = arith.constant 14 : index
    %c0_98 = arith.constant 0 : index
    %98 = vector.load %arg10[%c14_97, %c0_98] : memref<400x128xf32, #tpu.memory_space<vmem>>, vector<336x128xf32>
    %99 = arith.truncf %98 : vector<336x128xf32> to vector<336x128xbf16>
    %c1_99 = arith.constant 1 : index
    %c0_100 = arith.constant 0 : index
    %c0_101 = arith.constant 0 : index
    %100 = vector.load %arg3[%c1_99, %c0_100, %c0_101] : memref<9x128x128xbf16, #tpu.memory_space<vmem>>, vector<1x128x128xbf16>
    %101 = vector.shape_cast %100 : vector<1x128x128xbf16> to vector<128x128xbf16>
    %cst_102 = arith.constant dense<0.000000e+00> : vector<336x128xf32>
    %102 = tpu.matmul %99, %101, %cst_102 {dimension_numbers = #tpu.dot_dimension_numbers<[1], [0], [0], [1], [0, 0, 1, 1], [], []>} : vector<336x128xbf16>, vector<128x128xbf16>, vector<336x128xf32> -> vector<336x128xf32>
    %c0_103 = arith.constant 0 : index
    %c0_104 = arith.constant 0 : index
    %103 = vector.load %arg11[%c0_103, %c0_104] : memref<336x128xf32, #tpu.memory_space<vmem>>, vector<336x128xf32>
    %104 = arith.addf %103, %102 : vector<336x128xf32>
    %c0_105 = arith.constant 0 : index
    %c0_106 = arith.constant 0 : index
    %105 = vector.load %arg11[%c0_105, %c0_106] : memref<336x128xf32, #tpu.memory_space<vmem>>, vector<336x128xf32>
    tpu.vector_store %arg11[%c0_105, %c0_106], %104 {strides = array<i32>} : memref<336x128xf32, #tpu.memory_space<vmem>>, vector<336x128xf32>,
    %c15_107 = arith.constant 15 : index
    %c0_108 = arith.constant 0 : index
    %106 = vector.load %arg10[%c15_107, %c0_108] : memref<400x128xf32, #tpu.memory_space<vmem>>, vector<336x128xf32>
    %107 = arith.truncf %106 : vector<336x128xf32> to vector<336x128xbf16>
    %c2_109 = arith.constant 2 : index
    %c0_110 = arith.constant 0 : index
    %c0_111 = arith.constant 0 : index
    %108 = vector.load %arg3[%c2_109, %c0_110, %c0_111] : memref<9x128x128xbf16, #tpu.memory_space<vmem>>, vector<1x128x128xbf16>
    %109 = vector.shape_cast %108 : vector<1x128x128xbf16> to vector<128x128xbf16>
    %cst_112 = arith.constant dense<0.000000e+00> : vector<336x128xf32>
    %110 = tpu.matmul %107, %109, %cst_112 {dimension_numbers = #tpu.dot_dimension_numbers<[1], [0], [0], [1], [0, 0, 1, 1], [], []>} : vector<336x128xbf16>, vector<128x128xbf16>, vector<336x128xf32> -> vector<336x128xf32>
    %c0_113 = arith.constant 0 : index
    %c0_114 = arith.constant 0 : index
    %111 = vector.load %arg11[%c0_113, %c0_114] : memref<336x128xf32, #tpu.memory_space<vmem>>, vector<336x128xf32>
    %112 = arith.addf %111, %110 : vector<336x128xf32>
    %c0_115 = arith.constant 0 : index
    %c0_116 = arith.constant 0 : index
    %113 = vector.load %arg11[%c0_115, %c0_116] : memref<336x128xf32, #tpu.memory_space<vmem>>, vector<336x128xf32>
    tpu.vector_store %arg11[%c0_115, %c0_116], %112 {strides = array<i32>} : memref<336x128xf32, #tpu.memory_space<vmem>>, vector<336x128xf32>,
    %c31_117 = arith.constant 31 : index
    %c0_118 = arith.constant 0 : index
    %114 = vector.load %arg10[%c31_117, %c0_118] : memref<400x128xf32, #tpu.memory_space<vmem>>, vector<336x128xf32>
    %115 = arith.truncf %114 : vector<336x128xf32> to vector<336x128xbf16>
    %c3_119 = arith.constant 3 : index
    %c0_120 = arith.constant 0 : index
    %c0_121 = arith.constant 0 : index
    %116 = vector.load %arg3[%c3_119, %c0_120, %c0_121] : memref<9x128x128xbf16, #tpu.memory_space<vmem>>, vector<1x128x128xbf16>
    %117 = vector.shape_cast %116 : vector<1x128x128xbf16> to vector<128x128xbf16>
    %cst_122 = arith.constant dense<0.000000e+00> : vector<336x128xf32>
    %118 = tpu.matmul %115, %117, %cst_122 {dimension_numbers = #tpu.dot_dimension_numbers<[1], [0], [0], [1], [0, 0, 1, 1], [], []>} : vector<336x128xbf16>, vector<128x128xbf16>, vector<336x128xf32> -> vector<336x128xf32>
    %c0_123 = arith.constant 0 : index
    %c0_124 = arith.constant 0 : index
    %119 = vector.load %arg11[%c0_123, %c0_124] : memref<336x128xf32, #tpu.memory_space<vmem>>, vector<336x128xf32>
    %120 = arith.addf %119, %118 : vector<336x128xf32>
    %c0_125 = arith.constant 0 : index
    %c0_126 = arith.constant 0 : index
    %121 = vector.load %arg11[%c0_125, %c0_126] : memref<336x128xf32, #tpu.memory_space<vmem>>, vector<336x128xf32>
    tpu.vector_store %arg11[%c0_125, %c0_126], %120 {strides = array<i32>} : memref<336x128xf32, #tpu.memory_space<vmem>>, vector<336x128xf32>,
    %c32_127 = arith.constant 32 : index
    %c0_128 = arith.constant 0 : index
    %122 = vector.load %arg10[%c32_127, %c0_128] : memref<400x128xf32, #tpu.memory_space<vmem>>, vector<336x128xf32>
    %123 = arith.truncf %122 : vector<336x128xf32> to vector<336x128xbf16>
    %c4_129 = arith.constant 4 : index
    %c0_130 = arith.constant 0 : index
    %c0_131 = arith.constant 0 : index
    %124 = vector.load %arg3[%c4_129, %c0_130, %c0_131] : memref<9x128x128xbf16, #tpu.memory_space<vmem>>, vector<1x128x128xbf16>
    %125 = vector.shape_cast %124 : vector<1x128x128xbf16> to vector<128x128xbf16>
    %cst_132 = arith.constant dense<0.000000e+00> : vector<336x128xf32>
    %126 = tpu.matmul %123, %125, %cst_132 {dimension_numbers = #tpu.dot_dimension_numbers<[1], [0], [0], [1], [0, 0, 1, 1], [], []>} : vector<336x128xbf16>, vector<128x128xbf16>, vector<336x128xf32> -> vector<336x128xf32>
    %c0_133 = arith.constant 0 : index
    %c0_134 = arith.constant 0 : index
    %127 = vector.load %arg11[%c0_133, %c0_134] : memref<336x128xf32, #tpu.memory_space<vmem>>, vector<336x128xf32>
    %128 = arith.addf %127, %126 : vector<336x128xf32>
    %c0_135 = arith.constant 0 : index
    %c0_136 = arith.constant 0 : index
    %129 = vector.load %arg11[%c0_135, %c0_136] : memref<336x128xf32, #tpu.memory_space<vmem>>, vector<336x128xf32>
    tpu.vector_store %arg11[%c0_135, %c0_136], %128 {strides = array<i32>} : memref<336x128xf32, #tpu.memory_space<vmem>>, vector<336x128xf32>,
    %c33_137 = arith.constant 33 : index
    %c0_138 = arith.constant 0 : index
    %130 = vector.load %arg10[%c33_137, %c0_138] : memref<400x128xf32, #tpu.memory_space<vmem>>, vector<336x128xf32>
    %131 = arith.truncf %130 : vector<336x128xf32> to vector<336x128xbf16>
    %c5_139 = arith.constant 5 : index
    %c0_140 = arith.constant 0 : index
    %c0_141 = arith.constant 0 : index
    %132 = vector.load %arg3[%c5_139, %c0_140, %c0_141] : memref<9x128x128xbf16, #tpu.memory_space<vmem>>, vector<1x128x128xbf16>
    %133 = vector.shape_cast %132 : vector<1x128x128xbf16> to vector<128x128xbf16>
    %cst_142 = arith.constant dense<0.000000e+00> : vector<336x128xf32>
    %134 = tpu.matmul %131, %133, %cst_142 {dimension_numbers = #tpu.dot_dimension_numbers<[1], [0], [0], [1], [0, 0, 1, 1], [], []>} : vector<336x128xbf16>, vector<128x128xbf16>, vector<336x128xf32> -> vector<336x128xf32>
    %c0_143 = arith.constant 0 : index
    %c0_144 = arith.constant 0 : index
    %135 = vector.load %arg11[%c0_143, %c0_144] : memref<336x128xf32, #tpu.memory_space<vmem>>, vector<336x128xf32>
    %136 = arith.addf %135, %134 : vector<336x128xf32>
    %c0_145 = arith.constant 0 : index
    %c0_146 = arith.constant 0 : index
    %137 = vector.load %arg11[%c0_145, %c0_146] : memref<336x128xf32, #tpu.memory_space<vmem>>, vector<336x128xf32>
    tpu.vector_store %arg11[%c0_145, %c0_146], %136 {strides = array<i32>} : memref<336x128xf32, #tpu.memory_space<vmem>>, vector<336x128xf32>,
    %c49_147 = arith.constant 49 : index
    %c0_148 = arith.constant 0 : index
    %138 = vector.load %arg10[%c49_147, %c0_148] : memref<400x128xf32, #tpu.memory_space<vmem>>, vector<336x128xf32>
    %139 = arith.truncf %138 : vector<336x128xf32> to vector<336x128xbf16>
    %c6_149 = arith.constant 6 : index
    %c0_150 = arith.constant 0 : index
    %c0_151 = arith.constant 0 : index
    %140 = vector.load %arg3[%c6_149, %c0_150, %c0_151] : memref<9x128x128xbf16, #tpu.memory_space<vmem>>, vector<1x128x128xbf16>
    %141 = vector.shape_cast %140 : vector<1x128x128xbf16> to vector<128x128xbf16>
    %cst_152 = arith.constant dense<0.000000e+00> : vector<336x128xf32>
    %142 = tpu.matmul %139, %141, %cst_152 {dimension_numbers = #tpu.dot_dimension_numbers<[1], [0], [0], [1], [0, 0, 1, 1], [], []>} : vector<336x128xbf16>, vector<128x128xbf16>, vector<336x128xf32> -> vector<336x128xf32>
    %c0_153 = arith.constant 0 : index
    %c0_154 = arith.constant 0 : index
    %143 = vector.load %arg11[%c0_153, %c0_154] : memref<336x128xf32, #tpu.memory_space<vmem>>, vector<336x128xf32>
    %144 = arith.addf %143, %142 : vector<336x128xf32>
    %c0_155 = arith.constant 0 : index
    %c0_156 = arith.constant 0 : index
    %145 = vector.load %arg11[%c0_155, %c0_156] : memref<336x128xf32, #tpu.memory_space<vmem>>, vector<336x128xf32>
    tpu.vector_store %arg11[%c0_155, %c0_156], %144 {strides = array<i32>} : memref<336x128xf32, #tpu.memory_space<vmem>>, vector<336x128xf32>,
    %c50_157 = arith.constant 50 : index
    %c0_158 = arith.constant 0 : index
    %146 = vector.load %arg10[%c50_157, %c0_158] : memref<400x128xf32, #tpu.memory_space<vmem>>, vector<336x128xf32>
    %147 = arith.truncf %146 : vector<336x128xf32> to vector<336x128xbf16>
    %c7_159 = arith.constant 7 : index
    %c0_160 = arith.constant 0 : index
    %c0_161 = arith.constant 0 : index
    %148 = vector.load %arg3[%c7_159, %c0_160, %c0_161] : memref<9x128x128xbf16, #tpu.memory_space<vmem>>, vector<1x128x128xbf16>
    %149 = vector.shape_cast %148 : vector<1x128x128xbf16> to vector<128x128xbf16>
    %cst_162 = arith.constant dense<0.000000e+00> : vector<336x128xf32>
    %150 = tpu.matmul %147, %149, %cst_162 {dimension_numbers = #tpu.dot_dimension_numbers<[1], [0], [0], [1], [0, 0, 1, 1], [], []>} : vector<336x128xbf16>, vector<128x128xbf16>, vector<336x128xf32> -> vector<336x128xf32>
    %c0_163 = arith.constant 0 : index
    %c0_164 = arith.constant 0 : index
    %151 = vector.load %arg11[%c0_163, %c0_164] : memref<336x128xf32, #tpu.memory_space<vmem>>, vector<336x128xf32>
    %152 = arith.addf %151, %150 : vector<336x128xf32>
    %c0_165 = arith.constant 0 : index
    %c0_166 = arith.constant 0 : index
    %153 = vector.load %arg11[%c0_165, %c0_166] : memref<336x128xf32, #tpu.memory_space<vmem>>, vector<336x128xf32>
    tpu.vector_store %arg11[%c0_165, %c0_166], %152 {strides = array<i32>} : memref<336x128xf32, #tpu.memory_space<vmem>>, vector<336x128xf32>,
    %c51_167 = arith.constant 51 : index
    %c0_168 = arith.constant 0 : index
    %154 = vector.load %arg10[%c51_167, %c0_168] : memref<400x128xf32, #tpu.memory_space<vmem>>, vector<336x128xf32>
    %155 = arith.truncf %154 : vector<336x128xf32> to vector<336x128xbf16>
    %c8_169 = arith.constant 8 : index
    %c0_170 = arith.constant 0 : index
    %c0_171 = arith.constant 0 : index
    %156 = vector.load %arg3[%c8_169, %c0_170, %c0_171] : memref<9x128x128xbf16, #tpu.memory_space<vmem>>, vector<1x128x128xbf16>
    %157 = vector.shape_cast %156 : vector<1x128x128xbf16> to vector<128x128xbf16>
    %cst_172 = arith.constant dense<0.000000e+00> : vector<336x128xf32>
    %158 = tpu.matmul %155, %157, %cst_172 {dimension_numbers = #tpu.dot_dimension_numbers<[1], [0], [0], [1], [0, 0, 1, 1], [], []>} : vector<336x128xbf16>, vector<128x128xbf16>, vector<336x128xf32> -> vector<336x128xf32>
    %c0_173 = arith.constant 0 : index
    %c0_174 = arith.constant 0 : index
    %159 = vector.load %arg11[%c0_173, %c0_174] : memref<336x128xf32, #tpu.memory_space<vmem>>, vector<336x128xf32>
    %160 = arith.addf %159, %158 : vector<336x128xf32>
    %c0_175 = arith.constant 0 : index
    %c0_176 = arith.constant 0 : index
    %161 = vector.load %arg11[%c0_175, %c0_176] : memref<336x128xf32, #tpu.memory_space<vmem>>, vector<336x128xf32>
    tpu.vector_store %arg11[%c0_175, %c0_176], %160 {strides = array<i32>} : memref<336x128xf32, #tpu.memory_space<vmem>>, vector<336x128xf32>,
    %162 = vector.extract_strided_slice %0 {offsets = [1, 0], sizes = [1, 128], strides = [1, 1]} : vector<4x128xf32> to vector<1x128xf32>
    %163 = vector.extract_strided_slice %1 {offsets = [1, 0], sizes = [1, 128], strides = [1, 1]} : vector<4x128xf32> to vector<1x128xf32>
    %c0_177 = arith.constant 0 : index
    %c0_178 = arith.constant 0 : index
    %164 = vector.load %arg11[%c0_177, %c0_178] : memref<336x128xf32, #tpu.memory_space<vmem>>, vector<336x128xf32>
    %165 = vector.broadcast %162 : vector<1x128xf32> to vector<336x128xf32>
    %166 = arith.mulf %164, %165 : vector<336x128xf32>
    %167 = vector.broadcast %163 : vector<1x128xf32> to vector<336x128xf32>
    %168 = arith.addf %166, %167 : vector<336x128xf32>
    %cst_179 = arith.constant 0.000000e+00 : f32
    %169 = vector.broadcast %cst_179 : f32 to vector<336x128xf32>
    %170 = arith.maximumf %168, %169 : vector<336x128xf32>
    %c0_180 = arith.constant 0 : index
    %c0_181 = arith.constant 0 : index
    %171 = vector.load %arg8[%c0_180, %c0_181] : memref<336x1xf32, #tpu.memory_space<vmem>>, vector<336x1xf32>
    %172 = vector.broadcast %171 : vector<336x1xf32> to vector<336x128xf32>
    %173 = arith.mulf %170, %172 : vector<336x128xf32>
    %c32_182 = arith.constant 32 : index
    %c0_183 = arith.constant 0 : index
    %174 = vector.load %arg10[%c32_182, %c0_183] : memref<400x128xf32, #tpu.memory_space<vmem>>, vector<336x128xf32>
    tpu.vector_store %arg10[%c32_182, %c0_183], %173 {strides = array<i32>} : memref<400x128xf32, #tpu.memory_space<vmem>>, vector<336x128xf32>,
    %c13_184 = arith.constant 13 : index
    %c0_185 = arith.constant 0 : index
    %175 = vector.load %arg10[%c13_184, %c0_185] : memref<400x128xf32, #tpu.memory_space<vmem>>, vector<336x128xf32>
    %176 = arith.truncf %175 : vector<336x128xf32> to vector<336x128xbf16>
    %c0_186 = arith.constant 0 : index
    %c0_187 = arith.constant 0 : index
    %c0_188 = arith.constant 0 : index
    %177 = vector.load %arg4[%c0_186, %c0_187, %c0_188] : memref<9x128x128xbf16, #tpu.memory_space<vmem>>, vector<1x128x128xbf16>
    %178 = vector.shape_cast %177 : vector<1x128x128xbf16> to vector<128x128xbf16>
    %cst_189 = arith.constant dense<0.000000e+00> : vector<336x128xf32>
    %179 = tpu.matmul %176, %178, %cst_189 {dimension_numbers = #tpu.dot_dimension_numbers<[1], [0], [0], [1], [0, 0, 1, 1], [], []>} : vector<336x128xbf16>, vector<128x128xbf16>, vector<336x128xf32> -> vector<336x128xf32>
    %c0_190 = arith.constant 0 : index
    %c0_191 = arith.constant 0 : index
    %180 = vector.load %arg11[%c0_190, %c0_191] : memref<336x128xf32, #tpu.memory_space<vmem>>, vector<336x128xf32>
    tpu.vector_store %arg11[%c0_190, %c0_191], %179 {strides = array<i32>} : memref<336x128xf32, #tpu.memory_space<vmem>>, vector<336x128xf32>,
    %c14_192 = arith.constant 14 : index
    %c0_193 = arith.constant 0 : index
    %181 = vector.load %arg10[%c14_192, %c0_193] : memref<400x128xf32, #tpu.memory_space<vmem>>, vector<336x128xf32>
    %182 = arith.truncf %181 : vector<336x128xf32> to vector<336x128xbf16>
    %c1_194 = arith.constant 1 : index
    %c0_195 = arith.constant 0 : index
    %c0_196 = arith.constant 0 : index
    %183 = vector.load %arg4[%c1_194, %c0_195, %c0_196] : memref<9x128x128xbf16, #tpu.memory_space<vmem>>, vector<1x128x128xbf16>
    %184 = vector.shape_cast %183 : vector<1x128x128xbf16> to vector<128x128xbf16>
    %cst_197 = arith.constant dense<0.000000e+00> : vector<336x128xf32>
    %185 = tpu.matmul %182, %184, %cst_197 {dimension_numbers = #tpu.dot_dimension_numbers<[1], [0], [0], [1], [0, 0, 1, 1], [], []>} : vector<336x128xbf16>, vector<128x128xbf16>, vector<336x128xf32> -> vector<336x128xf32>
    %c0_198 = arith.constant 0 : index
    %c0_199 = arith.constant 0 : index
    %186 = vector.load %arg11[%c0_198, %c0_199] : memref<336x128xf32, #tpu.memory_space<vmem>>, vector<336x128xf32>
    %187 = arith.addf %186, %185 : vector<336x128xf32>
    %c0_200 = arith.constant 0 : index
    %c0_201 = arith.constant 0 : index
    %188 = vector.load %arg11[%c0_200, %c0_201] : memref<336x128xf32, #tpu.memory_space<vmem>>, vector<336x128xf32>
    tpu.vector_store %arg11[%c0_200, %c0_201], %187 {strides = array<i32>} : memref<336x128xf32, #tpu.memory_space<vmem>>, vector<336x128xf32>,
    %c15_202 = arith.constant 15 : index
    %c0_203 = arith.constant 0 : index
    %189 = vector.load %arg10[%c15_202, %c0_203] : memref<400x128xf32, #tpu.memory_space<vmem>>, vector<336x128xf32>
    %190 = arith.truncf %189 : vector<336x128xf32> to vector<336x128xbf16>
    %c2_204 = arith.constant 2 : index
    %c0_205 = arith.constant 0 : index
    %c0_206 = arith.constant 0 : index
    %191 = vector.load %arg4[%c2_204, %c0_205, %c0_206] : memref<9x128x128xbf16, #tpu.memory_space<vmem>>, vector<1x128x128xbf16>
    %192 = vector.shape_cast %191 : vector<1x128x128xbf16> to vector<128x128xbf16>
    %cst_207 = arith.constant dense<0.000000e+00> : vector<336x128xf32>
    %193 = tpu.matmul %190, %192, %cst_207 {dimension_numbers = #tpu.dot_dimension_numbers<[1], [0], [0], [1], [0, 0, 1, 1], [], []>} : vector<336x128xbf16>, vector<128x128xbf16>, vector<336x128xf32> -> vector<336x128xf32>
    %c0_208 = arith.constant 0 : index
    %c0_209 = arith.constant 0 : index
    %194 = vector.load %arg11[%c0_208, %c0_209] : memref<336x128xf32, #tpu.memory_space<vmem>>, vector<336x128xf32>
    %195 = arith.addf %194, %193 : vector<336x128xf32>
    %c0_210 = arith.constant 0 : index
    %c0_211 = arith.constant 0 : index
    %196 = vector.load %arg11[%c0_210, %c0_211] : memref<336x128xf32, #tpu.memory_space<vmem>>, vector<336x128xf32>
    tpu.vector_store %arg11[%c0_210, %c0_211], %195 {strides = array<i32>} : memref<336x128xf32, #tpu.memory_space<vmem>>, vector<336x128xf32>,
    %c31_212 = arith.constant 31 : index
    %c0_213 = arith.constant 0 : index
    %197 = vector.load %arg10[%c31_212, %c0_213] : memref<400x128xf32, #tpu.memory_space<vmem>>, vector<336x128xf32>
    %198 = arith.truncf %197 : vector<336x128xf32> to vector<336x128xbf16>
    %c3_214 = arith.constant 3 : index
    %c0_215 = arith.constant 0 : index
    %c0_216 = arith.constant 0 : index
    %199 = vector.load %arg4[%c3_214, %c0_215, %c0_216] : memref<9x128x128xbf16, #tpu.memory_space<vmem>>, vector<1x128x128xbf16>
    %200 = vector.shape_cast %199 : vector<1x128x128xbf16> to vector<128x128xbf16>
    %cst_217 = arith.constant dense<0.000000e+00> : vector<336x128xf32>
    %201 = tpu.matmul %198, %200, %cst_217 {dimension_numbers = #tpu.dot_dimension_numbers<[1], [0], [0], [1], [0, 0, 1, 1], [], []>} : vector<336x128xbf16>, vector<128x128xbf16>, vector<336x128xf32> -> vector<336x128xf32>
    %c0_218 = arith.constant 0 : index
    %c0_219 = arith.constant 0 : index
    %202 = vector.load %arg11[%c0_218, %c0_219] : memref<336x128xf32, #tpu.memory_space<vmem>>, vector<336x128xf32>
    %203 = arith.addf %202, %201 : vector<336x128xf32>
    %c0_220 = arith.constant 0 : index
    %c0_221 = arith.constant 0 : index
    %204 = vector.load %arg11[%c0_220, %c0_221] : memref<336x128xf32, #tpu.memory_space<vmem>>, vector<336x128xf32>
    tpu.vector_store %arg11[%c0_220, %c0_221], %203 {strides = array<i32>} : memref<336x128xf32, #tpu.memory_space<vmem>>, vector<336x128xf32>,
    %c32_222 = arith.constant 32 : index
    %c0_223 = arith.constant 0 : index
    %205 = vector.load %arg10[%c32_222, %c0_223] : memref<400x128xf32, #tpu.memory_space<vmem>>, vector<336x128xf32>
    %206 = arith.truncf %205 : vector<336x128xf32> to vector<336x128xbf16>
    %c4_224 = arith.constant 4 : index
    %c0_225 = arith.constant 0 : index
    %c0_226 = arith.constant 0 : index
    %207 = vector.load %arg4[%c4_224, %c0_225, %c0_226] : memref<9x128x128xbf16, #tpu.memory_space<vmem>>, vector<1x128x128xbf16>
    %208 = vector.shape_cast %207 : vector<1x128x128xbf16> to vector<128x128xbf16>
    %cst_227 = arith.constant dense<0.000000e+00> : vector<336x128xf32>
    %209 = tpu.matmul %206, %208, %cst_227 {dimension_numbers = #tpu.dot_dimension_numbers<[1], [0], [0], [1], [0, 0, 1, 1], [], []>} : vector<336x128xbf16>, vector<128x128xbf16>, vector<336x128xf32> -> vector<336x128xf32>
    %c0_228 = arith.constant 0 : index
    %c0_229 = arith.constant 0 : index
    %210 = vector.load %arg11[%c0_228, %c0_229] : memref<336x128xf32, #tpu.memory_space<vmem>>, vector<336x128xf32>
    %211 = arith.addf %210, %209 : vector<336x128xf32>
    %c0_230 = arith.constant 0 : index
    %c0_231 = arith.constant 0 : index
    %212 = vector.load %arg11[%c0_230, %c0_231] : memref<336x128xf32, #tpu.memory_space<vmem>>, vector<336x128xf32>
    tpu.vector_store %arg11[%c0_230, %c0_231], %211 {strides = array<i32>} : memref<336x128xf32, #tpu.memory_space<vmem>>, vector<336x128xf32>,
    %c33_232 = arith.constant 33 : index
    %c0_233 = arith.constant 0 : index
    %213 = vector.load %arg10[%c33_232, %c0_233] : memref<400x128xf32, #tpu.memory_space<vmem>>, vector<336x128xf32>
    %214 = arith.truncf %213 : vector<336x128xf32> to vector<336x128xbf16>
    %c5_234 = arith.constant 5 : index
    %c0_235 = arith.constant 0 : index
    %c0_236 = arith.constant 0 : index
    %215 = vector.load %arg4[%c5_234, %c0_235, %c0_236] : memref<9x128x128xbf16, #tpu.memory_space<vmem>>, vector<1x128x128xbf16>
    %216 = vector.shape_cast %215 : vector<1x128x128xbf16> to vector<128x128xbf16>
    %cst_237 = arith.constant dense<0.000000e+00> : vector<336x128xf32>
    %217 = tpu.matmul %214, %216, %cst_237 {dimension_numbers = #tpu.dot_dimension_numbers<[1], [0], [0], [1], [0, 0, 1, 1], [], []>} : vector<336x128xbf16>, vector<128x128xbf16>, vector<336x128xf32> -> vector<336x128xf32>
    %c0_238 = arith.constant 0 : index
    %c0_239 = arith.constant 0 : index
    %218 = vector.load %arg11[%c0_238, %c0_239] : memref<336x128xf32, #tpu.memory_space<vmem>>, vector<336x128xf32>
    %219 = arith.addf %218, %217 : vector<336x128xf32>
    %c0_240 = arith.constant 0 : index
    %c0_241 = arith.constant 0 : index
    %220 = vector.load %arg11[%c0_240, %c0_241] : memref<336x128xf32, #tpu.memory_space<vmem>>, vector<336x128xf32>
    tpu.vector_store %arg11[%c0_240, %c0_241], %219 {strides = array<i32>} : memref<336x128xf32, #tpu.memory_space<vmem>>, vector<336x128xf32>,
    %c49_242 = arith.constant 49 : index
    %c0_243 = arith.constant 0 : index
    %221 = vector.load %arg10[%c49_242, %c0_243] : memref<400x128xf32, #tpu.memory_space<vmem>>, vector<336x128xf32>
    %222 = arith.truncf %221 : vector<336x128xf32> to vector<336x128xbf16>
    %c6_244 = arith.constant 6 : index
    %c0_245 = arith.constant 0 : index
    %c0_246 = arith.constant 0 : index
    %223 = vector.load %arg4[%c6_244, %c0_245, %c0_246] : memref<9x128x128xbf16, #tpu.memory_space<vmem>>, vector<1x128x128xbf16>
    %224 = vector.shape_cast %223 : vector<1x128x128xbf16> to vector<128x128xbf16>
    %cst_247 = arith.constant dense<0.000000e+00> : vector<336x128xf32>
    %225 = tpu.matmul %222, %224, %cst_247 {dimension_numbers = #tpu.dot_dimension_numbers<[1], [0], [0], [1], [0, 0, 1, 1], [], []>} : vector<336x128xbf16>, vector<128x128xbf16>, vector<336x128xf32> -> vector<336x128xf32>
    %c0_248 = arith.constant 0 : index
    %c0_249 = arith.constant 0 : index
    %226 = vector.load %arg11[%c0_248, %c0_249] : memref<336x128xf32, #tpu.memory_space<vmem>>, vector<336x128xf32>
    %227 = arith.addf %226, %225 : vector<336x128xf32>
    %c0_250 = arith.constant 0 : index
    %c0_251 = arith.constant 0 : index
    %228 = vector.load %arg11[%c0_250, %c0_251] : memref<336x128xf32, #tpu.memory_space<vmem>>, vector<336x128xf32>
    tpu.vector_store %arg11[%c0_250, %c0_251], %227 {strides = array<i32>} : memref<336x128xf32, #tpu.memory_space<vmem>>, vector<336x128xf32>,
    %c50_252 = arith.constant 50 : index
    %c0_253 = arith.constant 0 : index
    %229 = vector.load %arg10[%c50_252, %c0_253] : memref<400x128xf32, #tpu.memory_space<vmem>>, vector<336x128xf32>
    %230 = arith.truncf %229 : vector<336x128xf32> to vector<336x128xbf16>
    %c7_254 = arith.constant 7 : index
    %c0_255 = arith.constant 0 : index
    %c0_256 = arith.constant 0 : index
    %231 = vector.load %arg4[%c7_254, %c0_255, %c0_256] : memref<9x128x128xbf16, #tpu.memory_space<vmem>>, vector<1x128x128xbf16>
    %232 = vector.shape_cast %231 : vector<1x128x128xbf16> to vector<128x128xbf16>
    %cst_257 = arith.constant dense<0.000000e+00> : vector<336x128xf32>
    %233 = tpu.matmul %230, %232, %cst_257 {dimension_numbers = #tpu.dot_dimension_numbers<[1], [0], [0], [1], [0, 0, 1, 1], [], []>} : vector<336x128xbf16>, vector<128x128xbf16>, vector<336x128xf32> -> vector<336x128xf32>
    %c0_258 = arith.constant 0 : index
    %c0_259 = arith.constant 0 : index
    %234 = vector.load %arg11[%c0_258, %c0_259] : memref<336x128xf32, #tpu.memory_space<vmem>>, vector<336x128xf32>
    %235 = arith.addf %234, %233 : vector<336x128xf32>
    %c0_260 = arith.constant 0 : index
    %c0_261 = arith.constant 0 : index
    %236 = vector.load %arg11[%c0_260, %c0_261] : memref<336x128xf32, #tpu.memory_space<vmem>>, vector<336x128xf32>
    tpu.vector_store %arg11[%c0_260, %c0_261], %235 {strides = array<i32>} : memref<336x128xf32, #tpu.memory_space<vmem>>, vector<336x128xf32>,
    %c51_262 = arith.constant 51 : index
    %c0_263 = arith.constant 0 : index
    %237 = vector.load %arg10[%c51_262, %c0_263] : memref<400x128xf32, #tpu.memory_space<vmem>>, vector<336x128xf32>
    %238 = arith.truncf %237 : vector<336x128xf32> to vector<336x128xbf16>
    %c8_264 = arith.constant 8 : index
    %c0_265 = arith.constant 0 : index
    %c0_266 = arith.constant 0 : index
    %239 = vector.load %arg4[%c8_264, %c0_265, %c0_266] : memref<9x128x128xbf16, #tpu.memory_space<vmem>>, vector<1x128x128xbf16>
    %240 = vector.shape_cast %239 : vector<1x128x128xbf16> to vector<128x128xbf16>
    %cst_267 = arith.constant dense<0.000000e+00> : vector<336x128xf32>
    %241 = tpu.matmul %238, %240, %cst_267 {dimension_numbers = #tpu.dot_dimension_numbers<[1], [0], [0], [1], [0, 0, 1, 1], [], []>} : vector<336x128xbf16>, vector<128x128xbf16>, vector<336x128xf32> -> vector<336x128xf32>
    %c0_268 = arith.constant 0 : index
    %c0_269 = arith.constant 0 : index
    %242 = vector.load %arg11[%c0_268, %c0_269] : memref<336x128xf32, #tpu.memory_space<vmem>>, vector<336x128xf32>
    %243 = arith.addf %242, %241 : vector<336x128xf32>
    %c0_270 = arith.constant 0 : index
    %c0_271 = arith.constant 0 : index
    %244 = vector.load %arg11[%c0_270, %c0_271] : memref<336x128xf32, #tpu.memory_space<vmem>>, vector<336x128xf32>
    tpu.vector_store %arg11[%c0_270, %c0_271], %243 {strides = array<i32>} : memref<336x128xf32, #tpu.memory_space<vmem>>, vector<336x128xf32>,
    %c0_272 = arith.constant 0 : index
    %c0_273 = arith.constant 0 : index
    %c0_274 = arith.constant 0 : index
    %245 = vector.load %arg1[%c0_272, %c0_273, %c0_274] : memref<1x336x128xbf16, #tpu.memory_space<vmem>>, vector<1x336x128xbf16>
    %246 = vector.shape_cast %245 : vector<1x336x128xbf16> to vector<336x128xbf16>
    %c0_275 = arith.constant 0 : index
    %c0_276 = arith.constant 0 : index
    %247 = vector.load %arg5[%c0_275, %c0_276] : memref<128x128xbf16, #tpu.memory_space<vmem>>, vector<128x128xbf16>
    %cst_277 = arith.constant dense<0.000000e+00> : vector<336x128xf32>
    %248 = tpu.matmul %246, %247, %cst_277 {dimension_numbers = #tpu.dot_dimension_numbers<[1], [0], [0], [1], [0, 0, 1, 1], [], []>} : vector<336x128xbf16>, vector<128x128xbf16>, vector<336x128xf32> -> vector<336x128xf32>
    %c0_278 = arith.constant 0 : index
    %c0_279 = arith.constant 0 : index
    %249 = vector.load %arg11[%c0_278, %c0_279] : memref<336x128xf32, #tpu.memory_space<vmem>>, vector<336x128xf32>
    %250 = vector.extract_strided_slice %0 {offsets = [2, 0], sizes = [1, 128], strides = [1, 1]} : vector<4x128xf32> to vector<1x128xf32>
    %251 = vector.broadcast %250 : vector<1x128xf32> to vector<336x128xf32>
    %252 = arith.mulf %249, %251 : vector<336x128xf32>
    %253 = vector.extract_strided_slice %1 {offsets = [2, 0], sizes = [1, 128], strides = [1, 1]} : vector<4x128xf32> to vector<1x128xf32>
    %254 = vector.broadcast %253 : vector<1x128xf32> to vector<336x128xf32>
    %255 = arith.addf %252, %254 : vector<336x128xf32>
    %256 = vector.extract_strided_slice %0 {offsets = [3, 0], sizes = [1, 128], strides = [1, 1]} : vector<4x128xf32> to vector<1x128xf32>
    %257 = vector.broadcast %256 : vector<1x128xf32> to vector<336x128xf32>
    %258 = arith.mulf %248, %257 : vector<336x128xf32>
    %259 = vector.extract_strided_slice %1 {offsets = [3, 0], sizes = [1, 128], strides = [1, 1]} : vector<4x128xf32> to vector<1x128xf32>
    %260 = vector.broadcast %259 : vector<1x128xf32> to vector<336x128xf32>
    %261 = arith.addf %258, %260 : vector<336x128xf32>
    %262 = arith.addf %255, %261 : vector<336x128xf32>
    %cst_280 = arith.constant 0.000000e+00 : f32
    %263 = vector.broadcast %cst_280 : f32 to vector<336x128xf32>
    %264 = arith.maximumf %262, %263 : vector<336x128xf32>
    %265 = arith.truncf %264 : vector<336x128xf32> to vector<336x128xbf16>
    %c0_281 = arith.constant 0 : index
    %c0_282 = arith.constant 0 : index
    %c0_283 = arith.constant 0 : index
    %266 = vector.load %arg9[%c0_281, %c0_282, %c0_283] : memref<1x336x128xbf16, #tpu.memory_space<vmem>>, vector<1x336x128xbf16>
    %267 = vector.shape_cast %266 : vector<1x336x128xbf16> to vector<336x128xbf16>
    %268 = vector.shape_cast %265 : vector<336x128xbf16> to vector<1x336x128xbf16>
    tpu.vector_store %arg9[%c0_281, %c0_282, %c0_283], %268 {strides = array<i32>} : memref<1x336x128xbf16, #tpu.memory_space<vmem>>, vector<1x336x128xbf16>,
    return
  }
  func.func @transform_0(%arg0: i32) -> (i32, i32, i32) {
    %c0_i32 = arith.constant 0 : i32
    %c0_i32_0 = arith.constant 0 : i32
    %c0_i32_1 = arith.constant 0 : i32
    return %arg0, %c0_i32, %c0_i32_0 : i32, i32, i32
  }
  func.func @transform_1(%arg0: i32) -> (i32, i32, i32) {
    %c0_i32 = arith.constant 0 : i32
    %c0_i32_0 = arith.constant 0 : i32
    %c0_i32_1 = arith.constant 0 : i32
    %c0_i32_2 = arith.constant 0 : i32
    return %c0_i32, %c0_i32_0, %c0_i32_1 : i32, i32, i32
  }
  func.func @transform_2(%arg0: i32) -> (i32, i32, i32) {
    %c0_i32 = arith.constant 0 : i32
    %c0_i32_0 = arith.constant 0 : i32
    %c0_i32_1 = arith.constant 0 : i32
    %c0_i32_2 = arith.constant 0 : i32
    return %c0_i32, %c0_i32_0, %c0_i32_1 : i32, i32, i32
  }
  func.func @transform_3(%arg0: i32) -> (i32, i32, i32) {
    %c0_i32 = arith.constant 0 : i32
    %c0_i32_0 = arith.constant 0 : i32
    %c0_i32_1 = arith.constant 0 : i32
    %c0_i32_2 = arith.constant 0 : i32
    return %c0_i32, %c0_i32_0, %c0_i32_1 : i32, i32, i32
  }
  func.func @transform_4(%arg0: i32) -> (i32, i32) {
    %c0_i32 = arith.constant 0 : i32
    %c0_i32_0 = arith.constant 0 : i32
    %c0_i32_1 = arith.constant 0 : i32
    return %c0_i32, %c0_i32_0 : i32, i32
  }
  func.func @transform_5(%arg0: i32) -> (i32, i32) {
    %c0_i32 = arith.constant 0 : i32
    %c0_i32_0 = arith.constant 0 : i32
    %c0_i32_1 = arith.constant 0 : i32
    return %c0_i32, %c0_i32_0 : i32, i32
  }
  func.func @transform_6(%arg0: i32) -> (i32, i32) {
    %c0_i32 = arith.constant 0 : i32
    %c0_i32_0 = arith.constant 0 : i32
    %c0_i32_1 = arith.constant 0 : i32
    return %c0_i32, %c0_i32_0 : i32, i32
  }
  func.func @transform_7(%arg0: i32) -> (i32, i32) {
    %c0_i32 = arith.constant 0 : i32
    %c0_i32_0 = arith.constant 0 : i32
    %c0_i32_1 = arith.constant 0 : i32
    return %c0_i32, %c0_i32_0 : i32, i32
  }
  func.func @transform_8(%arg0: i32) -> (i32, i32, i32) {
    %c0_i32 = arith.constant 0 : i32
    %c0_i32_0 = arith.constant 0 : i32
    %c0_i32_1 = arith.constant 0 : i32
    return %arg0, %c0_i32, %c0_i32_0 : i32, i32, i32
  }
}

</mosaic_0001>

<bundles_post_ra>
// kernel: res_conv_forward.1
= control target key start
LH: loop header
LB: loop body
LE: loop exit
PB: predicated region body
PF: predicated region fallthrough
CT: control target
= control target key end

     0   :  { %s13838_s27 = smov 0   ;;  %s17093_s0 = inlined_call_operand.vmem [shape: bf16[2,336,128], index: 0, kind: input, shape index: {}]   ;;  %s17094_s1 = inlined_call_operand.vmem [shape: bf16[9,128,128], index: 1, kind: input, shape index: {}]   ;;  %s17095_s2 = inlined_call_operand.vmem [shape: bf16[9,128,128], index: 2, kind: input, shape index: {}]   ;;  %s17096_s3 = inlined_call_operand.vmem [shape: bf16[9,128,128], index: 3, kind: input, shape index: {}]   ;;  %s17097_s4 = inlined_call_operand.vmem [shape: bf16[128,128], index: 4, kind: input, shape index: {}]   ;;  %s17098_s5 = inlined_call_operand.vmem [shape: f32[4,128], index: 5, kind: input, shape index: {}]   ;;  %s17099_s6 = inlined_call_operand.vmem [shape: f32[4,128], index: 6, kind: input, shape index: {}]   ;;  %s17100_s7 = inlined_call_operand.vmem [shape: f32[336,1], index: 7, kind: input, shape index: {}]   ;;  %s17101_s8 = inlined_call_operand.vmem [shape: bf16[2,336,128], index: 8, kind: output, shape index: {}]  }
   0x1 LB: > { %s11918_s28 = sadd.s32 4294967295, %s13789_s27   ;;  %p11922_p0 = scmp.ge.s32.totalorder %s13789_s27, 1  ;;  %s13789_s27 = sphi %s13838_s27, %s18_s27  }
   0x2   : > { %p262_p1 = scmp.lt.s32.totalorder %s13789_s27, 3 }
   0x4   : > { %p263_p2 = pnand %p11922_p0, %p262_p1 }
   0x6   : > { %266 = sbr.rel (%p263_p2) target bundleno = 2808 (0xaf8), region = 52 }
   0xb   : > { %v13298_v0 = vld [vmem:[%s17094_s1 + $0x38] sm:$0xff]  ;;  %p296_p3 = scmp.lt.s32.totalorder %s11918_s28, 1  ;;  %v13297_v4 = vld [vmem:[%s17094_s1 + $0x30] sm:$0xff]  ;;  %v13791_v6 = vmov 0.0   ;;  %v13296_v9 = vld [vmem:[%s17094_s1 + $0x28] sm:$0xff] }
   0xc   : > { %v13306_v1 = vld [vmem:[%s17094_s1 + $0x78] sm:$0xff]  ;;  %569 = vmatpush.bf16.msra.mxu0 %v13298_v0  ;;  %v13305_v5 = vld [vmem:[%s17094_s1 + $0x70] sm:$0xff]  ;;  %309 = vst [vmem:[#allocation2 + $0x8] sm:$0xff] %v13791_v6  ;;  %v13304_v10 = vld [vmem:[%s17094_s1 + $0x68] sm:$0xff] }
   0xd   : > { %v13314_v2 = vld [vmem:[%s17094_s1 + $0xb8] sm:$0xff]  ;;  %853 = vmatpush.bf16.msra.mxu1 %v13306_v1  ;;  %s17265_s28 = smov (!%p296_p3, %s11918_s28), 1  ;;  %v13313_v7 = vld [vmem:[%s17094_s1 + $0xb0] sm:$0xff]  ;;  %310 = vst [vmem:[#allocation2 + $0x10] sm:$0xff] %v13791_v6  ;;  %v13312_v11 = vld [vmem:[%s17094_s1 + $0xa8] sm:$0xff] }
   0xe   : > { %v13322_v3 = vld [vmem:[%s17094_s1 + $0xf8] sm:$0xff]  ;;  %1221 = vmatpush.bf16.msra.mxu2 %v13314_v2  ;;  %v13321_v8 = vld [vmem:[%s17094_s1 + $0xf0] sm:$0xff]  ;;  %311 = vst [vmem:[#allocation2 + $0x18] sm:$0xff] %v13791_v6  ;;  %s13765_s29 = smul.u32 168, %s17265_s28  ;;  %v13320_v12 = vld [vmem:[%s17094_s1 + $0xe8] sm:$0xff] }
   0xf   : > { %1589 = vmatpush.bf16.msra.mxu3 %v13322_v3  ;;  %312 = vst [vmem:[#allocation2 + $0x170] sm:$0xff] %v13791_v6  ;;  %v13295_v13 = vld [vmem:[%s17094_s1 + $0x20] sm:$0xff]  ;;  %v13294_v19 = vld [vmem:[%s17094_s1 + $0x18] sm:$0xff]  ;;  %v13293_v27 = vld [vmem:[%s17094_s1 + $0x10] sm:$0xff] }
  0x10   : > { %570 = vmatpush.bf16.msra.mxu0 %v13297_v4  ;;  %313 = vst [vmem:[#allocation2 + $0x178] sm:$0xff] %v13791_v6  ;;  %v13303_v14 = vld [vmem:[%s17094_s1 + $0x60] sm:$0xff]  ;;  %s13896_s18 = scalar_lea.vmem %s17093_s0, %s13765_s29  ;;  %v13302_v20 = vld [vmem:[%s17094_s1 + $0x58] sm:$0xff]  ;;  %v13301_v28 = vld [vmem:[%s17094_s1 + $0x50] sm:$0xff]  ;;  %s16806_s14 = scalar_lea.vmem %s17101_s8, %s13765_s29 }
  0x11   : > { %854 = vmatpush.bf16.msra.mxu1 %v13305_v5  ;;  %314 = vst [vmem:[#allocation2 + $0x180] sm:$0xff] %v13791_v6  ;;  %v13311_v15 = vld [vmem:[%s17094_s1 + $0xa0] sm:$0xff]  ;;  %v13725_v18 = vld [vmem:[%s13896_s18 + $0x8] sm:$0xff]   ;;  %v13310_v24 = vld [vmem:[%s17094_s1 + $0x98] sm:$0xff] }
  0x12   : > { %1222 = vmatpush.bf16.msra.mxu2 %v13313_v7  ;;  %v13319_v16 = vld [vmem:[%s17094_s1 + $0xe0] sm:$0xff]  ;;  %v13542_v23 = vunpack.c.l.bf16 %v13725_v18  ;;  %v13318_v25 = vld [vmem:[%s17094_s1 + $0xd8] sm:$0xff]  ;;  %v13543_v26 = vunpack.c.h.bf16 %v13725_v18  ;;  %v13309_v29 = vld [vmem:[%s17094_s1 + $0x90] sm:$0xff] }
  0x13   : > { %1590 = vmatpush.bf16.msra.mxu3 %v13321_v8  ;;  %v13537_v17 = vld [vmem:[%s13896_s18] sm:$0xff]   ;;  %v13317_v30 = vld [vmem:[%s17094_s1 + $0xd0] sm:$0xff]  ;;  %v13292_v31 = vld [vmem:[%s17094_s1 + $0x8] sm:$0xff] }
  0x14   : > { %571 = vmatpush.bf16.msra.mxu0 %v13296_v9  ;;  %v13538_v21 = vunpack.c.l.bf16 %v13537_v17  ;;  %v13539_v22 = vunpack.c.h.bf16 %v13537_v17  ;;  %402 = vst [vmem:[#allocation2 + $0x30] sm:$0xff] %v13542_v23  ;;  %v13300_v32 = vld [vmem:[%s17094_s1 + $0x48] sm:$0xff]  ;;  %v13291_v35 = vld [vmem:[%s17094_s1] sm:$0xff]  ;;  %v13726_v41 = vld [vmem:[%s13896_s18 + $0x10] sm:$0xff]  }
  0x15   : > { %855 = vmatpush.bf16.msra.mxu1 %v13304_v10  ;;  %403 = vst [vmem:[#allocation2 + $0x38] sm:$0xff] %v13543_v26  ;;  %v13308_v33 = vld [vmem:[%s17094_s1 + $0x88] sm:$0xff]  ;;  %v13299_v36 = vld [vmem:[%s17094_s1 + $0x40] sm:$0xff]  ;;  %v443_v40 = vld [vmem:[#allocation2 + $0x15] sm:$0xff]  ;;  %v13546_v45 = vunpack.c.l.bf16 %v13726_v41  ;;  %v13547_v46 = vunpack.c.h.bf16 %v13726_v41 }
  0x16   : > { %1223 = vmatpush.bf16.msra.mxu2 %v13312_v11  ;;  %400 = vst [vmem:[#allocation2 + $0x20] sm:$0xff] %v13538_v21  ;;  %v13316_v34 = vld [vmem:[%s17094_s1 + $0xc8] sm:$0xff]  ;;  %v13307_v37 = vld [vmem:[%s17094_s1 + $0x80] sm:$0xff]  ;;  %v726_v43 = vld [vmem:[#allocation2 + $0x16] sm:$0xff] }
  0x17   : > { %1591 = vmatpush.bf16.msra.mxu3 %v13320_v12  ;;  %401 = vst [vmem:[#allocation2 + $0x28] sm:$0xff] %v13539_v22  ;;  %v13315_v38 = vld [vmem:[%s17094_s1 + $0xc0] sm:$0xff]  ;;  %v442_v39 = vld [vmem:[#allocation2 + $0xd] sm:$0xff]  ;;  %v1094_v47 = vld [vmem:[#allocation2 + $0x17] sm:$0xff] }
  0x18   : > { %572 = vmatpush.bf16.msra.mxu0 %v13295_v13  ;;  %v725_v42 = vld [vmem:[#allocation2 + $0xe] sm:$0xff]  ;;  %v13330_v50 = vld [vmem:[%s17094_s1 + $0x138] sm:$0xff]  ;;  %404 = vst [vmem:[#allocation2 + $0x40] sm:$0xff] %v13546_v45  ;;  %v484_v51 = vpack.c.bf16 %v443_v40, %v442_v39  ;;  %v13728_v4 = vld [vmem:[%s13896_s18 + $0x20] sm:$0xff]  }
  0x19   : > { %856 = vmatpush.bf16.msra.mxu1 %v13303_v14  ;;  %v1093_v44 = vld [vmem:[#allocation2 + $0xf] sm:$0xff]  ;;  %v767_v52 = vpack.c.bf16 %v726_v43, %v725_v42  ;;  %405 = vst [vmem:[#allocation2 + $0x48] sm:$0xff] %v13547_v46  ;;  %v13727_v56 = vld [vmem:[%s13896_s18 + $0x18] sm:$0xff]   ;;  %v13554_v5 = vunpack.c.l.bf16 %v13728_v4  ;;  %v13555_v6 = vunpack.c.h.bf16 %v13728_v4 }
  0x1a   : > { %1224 = vmatpush.bf16.msra.mxu2 %v13311_v15  ;;  %v1135_v53 = vpack.c.bf16 %v1094_v47, %v1093_v44  ;;  %v13329_v55 = vld [vmem:[%s17094_s1 + $0x130] sm:$0xff]  ;;  %v13550_v57 = vunpack.c.l.bf16 %v13727_v56  ;;  %v13551_v58 = vunpack.c.h.bf16 %v13727_v56  ;;  %v13731_v41 = vld [vmem:[%s13896_s18 + $0x38] sm:$0xff]  }
  0x1b   : > { %1592 = vmatpush.bf16.msra.mxu3 %v13319_v16  ;;  %408 = vst [vmem:[#allocation2 + $0x60] sm:$0xff] %v13554_v5  ;;  %v13729_v16 = vld [vmem:[%s13896_s18 + $0x28] sm:$0xff]   ;;  %v13566_v42 = vunpack.c.l.bf16 %v13731_v41  ;;  %v13567_v43 = vunpack.c.h.bf16 %v13731_v41 }
  0x1c   : > { %573 = vmatpush.bf16.msra.mxu0 %v13294_v19  ;;  %406 = vst [vmem:[#allocation2 + $0x50] sm:$0xff] %v13550_v57  ;;  %v1464_v0 = vld [vmem:[#allocation2 + $0x37] sm:$0xff]  ;;  %v13558_v17 = vunpack.c.l.bf16 %v13729_v16  ;;  %v13559_v18 = vunpack.c.h.bf16 %v13729_v16 }
  0x1d   : > { %857 = vmatpush.bf16.msra.mxu1 %v13302_v20  ;;  %v1461_v48 = vld [vmem:[#allocation2 + $0x1f] sm:$0xff]  ;;  %407 = vst [vmem:[#allocation2 + $0x58] sm:$0xff] %v13551_v58  ;;  %v447_v8 = vld [vmem:[#allocation2 + $0x35] sm:$0xff] }
  0x1e   : > { %1225 = vmatpush.bf16.msra.mxu2 %v13310_v24  ;;  %v1462_v49 = vld [vmem:[#allocation2 + $0x27] sm:$0xff]  ;;  %v444_v59 = vld [vmem:[#allocation2 + $0x1d] sm:$0xff]  ;;  %v1463_v63 = vld [vmem:[#allocation2 + $0x2f] sm:$0xff]  ;;  %409 = vst [vmem:[#allocation2 + $0x68] sm:$0xff] %v13555_v6 }
  0x1f   : > { %1593 = vmatpush.bf16.msra.mxu3 %v13318_v25  ;;  %v1503_v54 = vpack.c.bf16 %v1462_v49, %v1461_v48  ;;  %v445_v60 = vld [vmem:[#allocation2 + $0x25] sm:$0xff]  ;;  %v1504_v3 = vpack.c.bf16 %v1464_v0, %v1463_v63  ;;  %v446_v7 = vld [vmem:[#allocation2 + $0x2d] sm:$0xff]  ;;  %v730_v10 = vld [vmem:[#allocation2 + $0x36] sm:$0xff]  ;;  %410 = vst [vmem:[#allocation2 + $0x70] sm:$0xff] %v13558_v17 }
  0x20   : > { %574 = vmatpush.bf16.msra.mxu0 %v13293_v27  ;;  %v727_v61 = vld [vmem:[#allocation2 + $0x1e] sm:$0xff]  ;;  %v728_v62 = vld [vmem:[#allocation2 + $0x26] sm:$0xff]  ;;  %v485_v1 = vpack.c.bf16 %v445_v60, %v444_v59  ;;  %v729_v9 = vld [vmem:[#allocation2 + $0x2e] sm:$0xff]  ;;  %v486_v13 = vpack.c.bf16 %v447_v8, %v446_v7  ;;  %411 = vst [vmem:[#allocation2 + $0x78] sm:$0xff] %v13559_v18 }
  0x21   : > { %858 = vmatpush.bf16.msra.mxu1 %v13301_v28  ;;  %v768_v2 = vpack.c.bf16 %v728_v62, %v727_v61  ;;  %v1465_v11 = vld [vmem:[#allocation2 + $0x3f] sm:$0xff]  ;;  %v1466_v12 = vld [vmem:[#allocation2 + $0x47] sm:$0xff]  ;;  %v769_v14 = vpack.c.bf16 %v730_v10, %v729_v9  ;;  %414 = vst [vmem:[#allocation2 + $0x90] sm:$0xff] %v13566_v42 }
  0x22   : > { %1226 = vmatpush.bf16.msra.mxu2 %v13309_v29  ;;  %v1505_v15 = vpack.c.bf16 %v1466_v12, %v1465_v11  ;;  %v448_v19 = vld [vmem:[#allocation2 + $0x3d] sm:$0xff]  ;;  %v449_v20 = vld [vmem:[#allocation2 + $0x45] sm:$0xff]  ;;  %v13730_v29 = vld [vmem:[%s13896_s18 + $0x30] sm:$0xff]   ;;  %415 = vst [vmem:[#allocation2 + $0x98] sm:$0xff] %v13567_v43 }
  0x23   : > { %1594 = vmatpush.bf16.msra.mxu3 %v13317_v30  ;;  %v731_v21 = vld [vmem:[#allocation2 + $0x3e] sm:$0xff]  ;;  %v732_v22 = vld [vmem:[#allocation2 + $0x46] sm:$0xff]  ;;  %v1467_v23 = vld [vmem:[#allocation2 + $0x4f] sm:$0xff]  ;;  %v487_v25 = vpack.c.bf16 %v449_v20, %v448_v19  ;;  %v13562_v30 = vunpack.c.l.bf16 %v13730_v29 }
  0x24   : > { %575 = vmatpush.bf16.msra.mxu0 %v13292_v31  ;;  %v1468_v24 = vld [vmem:[#allocation2 + $0x57] sm:$0xff]  ;;  %v770_v26 = vpack.c.bf16 %v732_v22, %v731_v21  ;;  %v13328_v28 = vld [vmem:[%s17094_s1 + $0x128] sm:$0xff]  ;;  %v13563_v31 = vunpack.c.h.bf16 %v13730_v29 }
  0x25   : > { %859 = vmatpush.bf16.msra.mxu1 %v13300_v32  ;;  %v1506_v27 = vpack.c.bf16 %v1468_v24, %v1467_v23  ;;  %v450_v32 = vld [vmem:[#allocation2 + $0x4d] sm:$0xff]  ;;  %412 = vst [vmem:[#allocation2 + $0x80] sm:$0xff] %v13562_v30  ;;  %v452_v44 = vld [vmem:[#allocation2 + $0x5d] sm:$0xff]  ;;  %v453_v45 = vld [vmem:[#allocation2 + $0x65] sm:$0xff] }
  0x26   : > { %1227 = vmatpush.bf16.msra.mxu2 %v13308_v33  ;;  %v451_v33 = vld [vmem:[#allocation2 + $0x55] sm:$0xff]  ;;  %413 = vst [vmem:[#allocation2 + $0x88] sm:$0xff] %v13563_v31  ;;  %v735_v46 = vld [vmem:[#allocation2 + $0x5e] sm:$0xff]  ;;  %v736_v47 = vld [vmem:[#allocation2 + $0x66] sm:$0xff] }
  0x27   : > { %1595 = vmatpush.bf16.msra.mxu3 %v13316_v34  ;;  %v733_v34 = vld [vmem:[#allocation2 + $0x4e] sm:$0xff]  ;;  %v1472_v49 = vld [vmem:[#allocation2 + $0x77] sm:$0xff] }
  0x28   : > { %576 = vmatpush.bf16.msra.mxu0 %v13291_v35  ;;  %v734_v35 = vld [vmem:[#allocation2 + $0x56] sm:$0xff]  ;;  %v454_v56 = vld [vmem:[#allocation2 + $0x6d] sm:$0xff] }
  0x29   : > { %860 = vmatpush.bf16.msra.mxu1 %v13299_v36  ;;  %v1469_v36 = vld [vmem:[#allocation2 + $0x5f] sm:$0xff]  ;;  %v771_v39 = vpack.c.bf16 %v734_v35, %v733_v34  ;;  %v1471_v48 = vld [vmem:[#allocation2 + $0x6f] sm:$0xff]  ;;  %v1476_v11 = vld [vmem:[#allocation2 + $0x97] sm:$0xff] }
  0x2a   : > { %1228 = vmatpush.bf16.msra.mxu2 %v13307_v37  ;;  %v1470_v37 = vld [vmem:[#allocation2 + $0x67] sm:$0xff]  ;;  %v455_v57 = vld [vmem:[#allocation2 + $0x75] sm:$0xff] }
  0x2b   : > { %1596 = vmatpush.bf16.msra.mxu3 %v13315_v38  ;;  %577 = vmatmul.bf16.vlgmr.msra.gmra.mxu0 %v484_v51  ;;  %v488_v38 = vpack.c.bf16 %v451_v33, %v450_v32  ;;  %v1507_v40 = vpack.c.bf16 %v1470_v37, %v1469_v36  ;;  %v772_v51 = vpack.c.bf16 %v736_v47, %v735_v46  ;;  %v737_v58 = vld [vmem:[#allocation2 + $0x6e] sm:$0xff]  ;;  %v738_v59 = vld [vmem:[#allocation2 + $0x76] sm:$0xff] }
  0x2c   : > { %1957 = vmatpush.bf16.msrb.mxu0 %v13330_v50  ;;  %861 = vmatmul.bf16.vlgmr.msra.gmra.mxu1 %v767_v52  ;;  %v489_v50 = vpack.c.bf16 %v453_v45, %v452_v44  ;;  %v1508_v52 = vpack.c.bf16 %v1472_v49, %v1471_v48  ;;  %v1473_v60 = vld [vmem:[#allocation2 + $0x7f] sm:$0xff]  ;;  %v490_v62 = vpack.c.bf16 %v455_v57, %v454_v56  ;;  %v459_v19 = vld [vmem:[#allocation2 + $0x95] sm:$0xff] }
  0x2d   : > { %1229 = vmatmul.bf16.vlgmr.msra.gmra.mxu2 %v1135_v53  ;;  %v13732_v53 = vld [vmem:[%s13896_s18 + $0x40] sm:$0xff]   ;;  %v773_v63 = vpack.c.bf16 %v738_v59, %v737_v58  ;;  %v1475_v10 = vld [vmem:[#allocation2 + $0x8f] sm:$0xff]  ;;  %v13735_v36 = vld [vmem:[%s13896_s18 + $0x58] sm:$0xff]  }
  0x2e   : > { %1597 = vmatmul.bf16.vlgmr.msra.gmra.mxu3 %v1503_v54  ;;  %v1474_v61 = vld [vmem:[#allocation2 + $0x87] sm:$0xff]  ;;  %v456_v6 = vld [vmem:[#allocation2 + $0x7d] sm:$0xff] }
  0x2f   : > { %v1509_v0 = vpack.c.bf16 %v1474_v61, %v1473_v60  ;;  %v457_v7 = vld [vmem:[#allocation2 + $0x85] sm:$0xff]  ;;  %v458_v18 = vld [vmem:[#allocation2 + $0x8d] sm:$0xff]  ;;  %v742_v21 = vld [vmem:[#allocation2 + $0x96] sm:$0xff] }
  0x30   : > { %1958 = vmatpush.bf16.msrb.mxu0 %v13329_v55  ;;  %v13571_v55 = vunpack.c.h.bf16 %v13732_v53  ;;  %v739_v8 = vld [vmem:[#allocation2 + $0x7e] sm:$0xff]  ;;  %v740_v9 = vld [vmem:[#allocation2 + $0x86] sm:$0xff]  ;;  %v491_v12 = vpack.c.bf16 %v457_v7, %v456_v6  ;;  %v741_v20 = vld [vmem:[#allocation2 + $0x8e] sm:$0xff]  ;;  %v492_v24 = vpack.c.bf16 %v459_v19, %v458_v18 }
  0x32   : > { %417 = vst [vmem:[#allocation2 + $0xa8] sm:$0xff] %v13571_v55 }
  0x34   : > { %1959 = vmatpush.bf16.msrb.mxu0 %v13328_v28 }
  0x3b   : > { %582 = vmatmul.bf16.gmra.mxu0 %v485_v1  ;;  %v13327_v1 = vld [vmem:[%s17094_s1 + $0x120] sm:$0xff] }
  0x3c   : > { %866 = vmatmul.bf16.gmra.mxu1 %v768_v2  ;;  %1960 = vmatpush.bf16.msrb.mxu0 %v13327_v1  ;;  %v13733_v2 = vld [vmem:[%s13896_s18 + $0x48] sm:$0xff]  }
  0x3d   : > { %1234 = vmatmul.bf16.gmra.mxu2 %v1503_v54  ;;  %v13570_v54 = vunpack.c.l.bf16 %v13732_v53  ;;  %v13574_v4 = vunpack.c.l.bf16 %v13733_v2  ;;  %v13575_v5 = vunpack.c.h.bf16 %v13733_v2 }
  0x3e   : > { %1602 = vmatmul.bf16.gmra.mxu3 %v1504_v3 }
  0x3f   : > { %416 = vst [vmem:[#allocation2 + $0xa0] sm:$0xff] %v13570_v54 }
  0x40   : > { %418 = vst [vmem:[#allocation2 + $0xb0] sm:$0xff] %v13574_v4 }
  0x41   : > { %419 = vst [vmem:[#allocation2 + $0xb8] sm:$0xff] %v13575_v5 }
  0x46   : > { %v1477_v22 = vld [vmem:[#allocation2 + $0x9f] sm:$0xff]  ;;  %v1478_v23 = vld [vmem:[#allocation2 + $0xa7] sm:$0xff] }
  0x47   : > { %v1511_v28 = vpack.c.bf16 %v1478_v23, %v1477_v22  ;;  %v460_v41 = vld [vmem:[#allocation2 + $0x9d] sm:$0xff]  ;;  %v461_v42 = vld [vmem:[#allocation2 + $0xa5] sm:$0xff]  ;;  %v1479_v45 = vld [vmem:[#allocation2 + $0xaf] sm:$0xff] }
  0x48   : > { %v743_v43 = vld [vmem:[#allocation2 + $0x9e] sm:$0xff]  ;;  %v744_v44 = vld [vmem:[#allocation2 + $0xa6] sm:$0xff]  ;;  %v493_v49 = vpack.c.bf16 %v461_v42, %v460_v41  ;;  %v463_v5 = vld [vmem:[#allocation2 + $0xb5] sm:$0xff] }
  0x49   : > { %v1480_v46 = vld [vmem:[#allocation2 + $0xb7] sm:$0xff]  ;;  %v462_v4 = vld [vmem:[#allocation2 + $0xad] sm:$0xff] }
  0x4a   : > { %v1512_v54 = vpack.c.bf16 %v1480_v46, %v1479_v45  ;;  %v745_v6 = vld [vmem:[#allocation2 + $0xae] sm:$0xff]  ;;  %v746_v7 = vld [vmem:[#allocation2 + $0xb6] sm:$0xff] }
  0x4b   : > { %587 = vmatmul.bf16.gmra.mxu0 %v486_v13  ;;  %v774_v13 = vpack.c.bf16 %v740_v9, %v739_v8 }
  0x4c   : > { %871 = vmatmul.bf16.gmra.mxu1 %v769_v14  ;;  %v1510_v14 = vpack.c.bf16 %v1476_v11, %v1475_v10 }
  0x4d   : > { %1239 = vmatmul.bf16.gmra.mxu2 %v1504_v3  ;;  %v13338_v3 = vld [vmem:[%s17094_s1 + $0x178] sm:$0xff] }
  0x4e   : > { %1607 = vmatmul.bf16.gmra.mxu3 %v1505_v15  ;;  %2325 = vmatpush.bf16.msrb.mxu1 %v13338_v3 }
  0x5b   : > { %592 = vmatmul.bf16.gmra.mxu0 %v487_v25  ;;  %v775_v25 = vpack.c.bf16 %v742_v21, %v741_v20 }
  0x5c   : > { %876 = vmatmul.bf16.gmra.mxu1 %v770_v26 }
  0x5d   : > { %1244 = vmatmul.bf16.gmra.mxu2 %v1505_v15  ;;  %v13734_v15 = vld [vmem:[%s13896_s18 + $0x50] sm:$0xff]  }
  0x5e   : > { %1612 = vmatmul.bf16.gmra.mxu3 %v1506_v27  ;;  %v13578_v16 = vunpack.c.l.bf16 %v13734_v15  ;;  %v13579_v17 = vunpack.c.h.bf16 %v13734_v15 }
  0x60   : > { %420 = vst [vmem:[#allocation2 + $0xc0] sm:$0xff] %v13578_v16 }
  0x61   : > { %421 = vst [vmem:[#allocation2 + $0xc8] sm:$0xff] %v13579_v17 }
  0x67   : > { %v1481_v8 = vld [vmem:[#allocation2 + $0xbf] sm:$0xff] }
  0x68   : > { %v1482_v9 = vld [vmem:[#allocation2 + $0xc7] sm:$0xff] }
  0x69   : > { %v1513_v17 = vpack.c.bf16 %v1482_v9, %v1481_v8 }
  0x6b   : > { %597 = vmatmul.bf16.gmra.mxu0 %v488_v38  ;;  %v13326_v38 = vld [vmem:[%s17094_s1 + $0x118] sm:$0xff] }
  0x6c   : > { %881 = vmatmul.bf16.gmra.mxu1 %v771_v39  ;;  %v13582_v39 = vunpack.c.l.bf16 %v13735_v36  ;;  %1961 = vmatpush.bf16.msrb.mxu0 %v13326_v38 }
  0x6d   : > { %1249 = vmatmul.bf16.gmra.mxu2 %v1506_v27 }
  0x6e   : > { %1617 = vmatmul.bf16.gmra.mxu3 %v1507_v40  ;;  %422 = vst [vmem:[#allocation2 + $0xd0] sm:$0xff] %v13582_v39 }
  0x7b   : > { %602 = vmatmul.bf16.gmra.mxu0 %v489_v50  ;;  %v776_v50 = vpack.c.bf16 %v744_v44, %v743_v43 }
  0x7c   : > { %886 = vmatmul.bf16.gmra.mxu1 %v772_v51 }
  0x7d   : > { %1254 = vmatmul.bf16.gmra.mxu2 %v1507_v40  ;;  %v13583_v40 = vunpack.c.h.bf16 %v13735_v36 }
  0x7e   : > { %1622 = vmatmul.bf16.gmra.mxu3 %v1508_v52 }
  0x7f   : > { %423 = vst [vmem:[#allocation2 + $0xd8] sm:$0xff] %v13583_v40 }
  0x8b   : > { %607 = vmatmul.bf16.gmra.mxu0 %v490_v62  ;;  %v13337_v62 = vld [vmem:[%s17094_s1 + $0x170] sm:$0xff] }
  0x8c   : > { %891 = vmatmul.bf16.gmra.mxu1 %v773_v63 }
  0x8d   : > { %1259 = vmatmul.bf16.gmra.mxu2 %v1508_v52  ;;  %2326 = vmatpush.bf16.msrb.mxu1 %v13337_v62  ;;  %v750_v62 = vld [vmem:[#allocation2 + $0xd6] sm:$0xff] }
  0x8e   : > { %1627 = vmatmul.bf16.gmra.mxu3 %v1509_v0 }
  0x9b   : > { %612 = vmatmul.bf16.gmra.mxu0 %v491_v12  ;;  %v494_v12 = vpack.c.bf16 %v463_v5, %v462_v4 }
  0x9c   : > { %896 = vmatmul.bf16.gmra.mxu1 %v774_v13  ;;  %v777_v13 = vpack.c.bf16 %v746_v7, %v745_v6 }
  0x9d   : > { %1264 = vmatmul.bf16.gmra.mxu2 %v1509_v0  ;;  %v13736_v0 = vld [vmem:[%s13896_s18 + $0x60] sm:$0xff]  }
  0x9e   : > { %1632 = vmatmul.bf16.gmra.mxu3 %v1510_v14  ;;  %v13586_v2 = vunpack.c.l.bf16 %v13736_v0  ;;  %v13587_v3 = vunpack.c.h.bf16 %v13736_v0 }
  0xa0   : > { %424 = vst [vmem:[#allocation2 + $0xe0] sm:$0xff] %v13586_v2 }
  0xa1   : > { %425 = vst [vmem:[#allocation2 + $0xe8] sm:$0xff] %v13587_v3 }
  0xa8   : > { %v578_v26 = vpop.f32.mrf.mxu0  ;;  %v1486_v0 = vld [vmem:[#allocation2 + $0xe7] sm:$0xff] }
  0xa9   : > { %v862_v27 = vpop.f32.mrf.mxu1 }
  0xaa   : > { %v1009_v29 = vadd.f32 %v862_v27, %v578_v26  ;;  %v13737_v26 = vld [vmem:[%s13896_s18 + $0x68] sm:$0xff]  }
  0xab   : > { %617 = vmatmul.bf16.gmra.mxu0 %v492_v24 }
  0xac   : > { %901 = vmatmul.bf16.gmra.mxu1 %v775_v25 }
  0xad   : > { %1269 = vmatmul.bf16.gmra.mxu2 %v1510_v14 }
  0xae   : > { %1637 = vmatmul.bf16.gmra.mxu3 %v1511_v28 }
  0xb0   : > { %v1230_v30 = vpop.f32.mrf.mxu2  ;;  %v580_v33 = vpop.f32.mrf.mxu0 }
  0xb1   : > { %v1598_v31 = vpop.f32.mrf.mxu3  ;;  %v1377_v32 = vadd.f32 %v1230_v30, %v1009_v29  ;;  %v864_v34 = vpop.f32.mrf.mxu1  ;;  %v13591_v29 = vunpack.c.h.bf16 %v13737_v26  ;;  %v464_v30 = vld [vmem:[#allocation2 + $0xbd] sm:$0xff] }
  0xb2   : > { %v1010_v35 = vadd.f32 %v864_v34, %v580_v33  ;;  %v748_v33 = vld [vmem:[#allocation2 + $0xc6] sm:$0xff]  ;;  %v1483_v34 = vld [vmem:[#allocation2 + $0xcf] sm:$0xff] }
  0xb3   : > { %v13979_v37 = vadd.f32 %v1598_v31, %v1377_v32  ;;  %v465_v31 = vld [vmem:[#allocation2 + $0xc5] sm:$0xff]  ;;  %427 = vst [vmem:[#allocation2 + $0xf8] sm:$0xff] %v13591_v29 }
  0xb4   : > { %v747_v32 = vld [vmem:[#allocation2 + $0xbe] sm:$0xff]  ;;  %v495_v39 = vpack.c.bf16 %v465_v31, %v464_v30 }
  0xb5   : > { %v778_v40 = vpack.c.bf16 %v748_v33, %v747_v32 }
  0xb8   : > { %v1232_v47 = vpop.f32.mrf.mxu2  ;;  %v583_v52 = vpop.f32.mrf.mxu0 }
  0xb9   : > { %v1600_v48 = vpop.f32.mrf.mxu3  ;;  %v1378_v51 = vadd.f32 %v1232_v47, %v1010_v35  ;;  %v867_v53 = vpop.f32.mrf.mxu1  ;;  %v1484_v35 = vld [vmem:[#allocation2 + $0xd7] sm:$0xff] }
  0xba   : > { %v1011_v55 = vadd.f32 %v867_v53, %v583_v52  ;;  %v1514_v44 = vpack.c.bf16 %v1484_v35, %v1483_v34  ;;  %v13325_v47 = vld [vmem:[%s17094_s1 + $0x110] sm:$0xff] }
  0xbb   : > { %v13984_v56 = vadd.f32 %v1600_v48, %v1378_v51  ;;  %622 = vmatmul.bf16.gmra.mxu0 %v493_v49 }
  0xbc   : > { %906 = vmatmul.bf16.gmra.mxu1 %v776_v50  ;;  %1962 = vmatpush.bf16.msrb.mxu0 %v13325_v47 }
  0xbd   : > { %1274 = vmatmul.bf16.gmra.mxu2 %v1511_v28  ;;  %v13590_v28 = vunpack.c.l.bf16 %v13737_v26  ;;  %v751_v26 = vld [vmem:[#allocation2 + $0xde] sm:$0xff] }
  0xbe   : > { %1642 = vmatmul.bf16.gmra.mxu3 %v1512_v54 }
  0xbf   : > { %426 = vst [vmem:[#allocation2 + $0xf0] sm:$0xff] %v13590_v28  ;;  %v752_v28 = vld [vmem:[#allocation2 + $0xe6] sm:$0xff] }
  0xc0   : > { %v1235_v57 = vpop.f32.mrf.mxu2  ;;  %v585_v60 = vpop.f32.mrf.mxu0  ;;  %v780_v34 = vpack.c.bf16 %v752_v28, %v751_v26 }
  0xc1   : > { %v1603_v58 = vpop.f32.mrf.mxu3  ;;  %v1379_v59 = vadd.f32 %v1235_v57, %v1011_v55  ;;  %v869_v61 = vpop.f32.mrf.mxu1 }
  0xc2   : > { %v1012_v63 = vadd.f32 %v869_v61, %v585_v60  ;;  %v467_v60 = vld [vmem:[#allocation2 + $0xd5] sm:$0xff] }
  0xc3   : > { %v13990_v1 = vadd.f32 %v1603_v58, %v1379_v59  ;;  %v466_v59 = vld [vmem:[#allocation2 + $0xcd] sm:$0xff] }
  0xc4   : > { %v749_v61 = vld [vmem:[#allocation2 + $0xce] sm:$0xff]  ;;  %v496_v4 = vpack.c.bf16 %v467_v60, %v466_v59 }
  0xc5   : > { %v779_v5 = vpack.c.bf16 %v750_v62, %v749_v61 }
  0xc6   : > { %v1487_v29 = vld [vmem:[#allocation2 + $0xef] sm:$0xff]  ;;  %v1488_v30 = vld [vmem:[#allocation2 + $0xf7] sm:$0xff] }
  0xc8   : > { %v1237_v10 = vpop.f32.mrf.mxu2  ;;  %v588_v15 = vpop.f32.mrf.mxu0 }
  0xc9   : > { %v1605_v11 = vpop.f32.mrf.mxu3  ;;  %v1380_v14 = vadd.f32 %v1237_v10, %v1012_v63  ;;  %v872_v16 = vpop.f32.mrf.mxu1  ;;  %v1485_v63 = vld [vmem:[#allocation2 + $0xdf] sm:$0xff] }
  0xca   : > { %v1013_v18 = vadd.f32 %v872_v16, %v588_v15  ;;  %v1515_v9 = vpack.c.bf16 %v1486_v0, %v1485_v63 }
  0xcb   : > { %v13992_v19 = vadd.f32 %v1605_v11, %v1380_v14  ;;  %627 = vmatmul.bf16.gmra.mxu0 %v494_v12  ;;  %v13336_v12 = vld [vmem:[%s17094_s1 + $0x168] sm:$0xff] }
  0xcc   : > { %911 = vmatmul.bf16.gmra.mxu1 %v777_v13 }
  0xcd   : > { %1279 = vmatmul.bf16.gmra.mxu2 %v1512_v54  ;;  %v13738_v54 = vld [vmem:[%s13896_s18 + $0x70] sm:$0xff]   ;;  %2327 = vmatpush.bf16.msrb.mxu1 %v13336_v12 }
  0xce   : > { %1647 = vmatmul.bf16.gmra.mxu3 %v1513_v17  ;;  %v13594_v57 = vunpack.c.l.bf16 %v13738_v54  ;;  %v13595_v58 = vunpack.c.h.bf16 %v13738_v54  ;;  %v471_v54 = vld [vmem:[#allocation2 + $0xf5] sm:$0xff] }
  0xd0   : > { %v1240_v20 = vpop.f32.mrf.mxu2  ;;  %v590_v23 = vpop.f32.mrf.mxu0  ;;  %428 = vst [vmem:[#allocation2 + $0x100] sm:$0xff] %v13594_v57  ;;  %v753_v57 = vld [vmem:[#allocation2 + $0xee] sm:$0xff] }
  0xd1   : > { %v1608_v21 = vpop.f32.mrf.mxu3  ;;  %v1381_v22 = vadd.f32 %v1240_v20, %v1013_v18  ;;  %v874_v24 = vpop.f32.mrf.mxu1  ;;  %429 = vst [vmem:[#allocation2 + $0x108] sm:$0xff] %v13595_v58  ;;  %v13739_v20 = vld [vmem:[%s13896_s18 + $0x78] sm:$0xff]  }
  0xd2   : > { %v1014_v25 = vadd.f32 %v874_v24, %v590_v23  ;;  %v13599_v23 = vunpack.c.h.bf16 %v13739_v20  ;;  %v468_v24 = vld [vmem:[#allocation2 + $0xdd] sm:$0xff] }
  0xd3   : > { %v13995_v27 = vadd.f32 %v1608_v21, %v1381_v22  ;;  %v13598_v22 = vunpack.c.l.bf16 %v13739_v20  ;;  %v754_v58 = vld [vmem:[#allocation2 + $0xf6] sm:$0xff] }
  0xd4   : > { %431 = vst [vmem:[#allocation2 + $0x118] sm:$0xff] %v13599_v23  ;;  %v781_v0 = vpack.c.bf16 %v754_v58, %v753_v57 }
  0xd5   : > { %430 = vst [vmem:[#allocation2 + $0x110] sm:$0xff] %v13598_v22 }
  0xd7   : > { %v1489_v59 = vld [vmem:[#allocation2 + $0xff] sm:$0xff] }
  0xd8   : > { %v1242_v36 = vpop.f32.mrf.mxu2  ;;  %v593_v42 = vpop.f32.mrf.mxu0  ;;  %v1490_v60 = vld [vmem:[#allocation2 + $0x107] sm:$0xff]  ;;  %v472_v23 = vld [vmem:[#allocation2 + $0xfd] sm:$0xff] }
  0xd9   : > { %v1610_v38 = vpop.f32.mrf.mxu3  ;;  %v1382_v41 = vadd.f32 %v1242_v36, %v1014_v25  ;;  %v877_v43 = vpop.f32.mrf.mxu1  ;;  %v469_v25 = vld [vmem:[#allocation2 + $0xe5] sm:$0xff] }
  0xda   : > { %v1015_v45 = vadd.f32 %v877_v43, %v593_v42  ;;  %v497_v33 = vpack.c.bf16 %v469_v25, %v468_v24  ;;  %v473_v24 = vld [vmem:[#allocation2 + $0x105] sm:$0xff] }
  0xdb   : > { %v13997_v46 = vadd.f32 %v1610_v38, %v1382_v41  ;;  %632 = vmatmul.bf16.gmra.mxu0 %v495_v39  ;;  %v1516_v39 = vpack.c.bf16 %v1488_v30, %v1487_v29  ;;  %v755_v25 = vld [vmem:[#allocation2 + $0xfe] sm:$0xff]  ;;  %v756_v26 = vld [vmem:[#allocation2 + $0x106] sm:$0xff] }
  0xdc   : > { %916 = vmatmul.bf16.gmra.mxu1 %v778_v40  ;;  %v1491_v28 = vld [vmem:[#allocation2 + $0x10f] sm:$0xff]  ;;  %v1492_v29 = vld [vmem:[#allocation2 + $0x117] sm:$0xff] }
  0xdd   : > { %1284 = vmatmul.bf16.gmra.mxu2 %v1513_v17  ;;  %v474_v58 = vld [vmem:[#allocation2 + $0x10d] sm:$0xff] }
  0xde   : > { %1652 = vmatmul.bf16.gmra.mxu3 %v1514_v44 }
  0xe0   : > { %v1245_v48 = vpop.f32.mrf.mxu2  ;;  %v595_v51 = vpop.f32.mrf.mxu0 }
  0xe1   : > { %v1613_v49 = vpop.f32.mrf.mxu3  ;;  %v1383_v50 = vadd.f32 %v1245_v48, %v1015_v45  ;;  %v879_v52 = vpop.f32.mrf.mxu1 }
  0xe2   : > { %v1016_v53 = vadd.f32 %v879_v52, %v595_v51 }
  0xe3   : > { %v14003_v55 = vadd.f32 %v1613_v49, %v1383_v50  ;;  %v13740_v49 = vld [vmem:[%s13896_s18 + $0x80] sm:$0xff]  }
  0xe4   : > { %v13602_v51 = vunpack.c.l.bf16 %v13740_v49  ;;  %v13603_v52 = vunpack.c.h.bf16 %v13740_v49 }
  0xe6   : > { %432 = vst [vmem:[#allocation2 + $0x120] sm:$0xff] %v13602_v51  ;;  %v13742_v51 = vld [vmem:[%s13896_s18 + $0x90] sm:$0xff]  }
  0xe7   : > { %433 = vst [vmem:[#allocation2 + $0x128] sm:$0xff] %v13603_v52  ;;  %v13611_v57 = vunpack.c.h.bf16 %v13742_v51 }
  0xe8   : > { %v1247_v2 = vpop.f32.mrf.mxu2  ;;  %v598_v7 = vpop.f32.mrf.mxu0 }
  0xe9   : > { %v1615_v3 = vpop.f32.mrf.mxu3  ;;  %v1384_v6 = vadd.f32 %v1247_v2, %v1016_v53  ;;  %v882_v8 = vpop.f32.mrf.mxu1  ;;  %v470_v53 = vld [vmem:[#allocation2 + $0xed] sm:$0xff]  ;;  %437 = vst [vmem:[#allocation2 + $0x148] sm:$0xff] %v13611_v57 }
  0xea   : > { %v1017_v10 = vadd.f32 %v882_v8, %v598_v7  ;;  %v498_v63 = vpack.c.bf16 %v471_v54, %v470_v53  ;;  %v13354_v53 = vld [vmem:[%s17094_s1 + $0x1f8] sm:$0xff]  ;;  %v13610_v54 = vunpack.c.l.bf16 %v13742_v51 }
  0xeb   : > { %v14005_v11 = vadd.f32 %v1615_v3, %v1384_v6  ;;  %637 = vmatmul.bf16.gmra.mxu0 %v496_v4  ;;  %v13324_v6 = vld [vmem:[%s17094_s1 + $0x108] sm:$0xff]  ;;  %3061 = vmatpush.bf16.msrb.mxu3 %v13354_v53  ;;  %v13345_v53 = vld [vmem:[%s17094_s1 + $0x1b0] sm:$0xff] }
  0xec   : > { %921 = vmatmul.bf16.gmra.mxu1 %v779_v5  ;;  %v1517_v5 = vpack.c.bf16 %v1490_v60, %v1489_v59  ;;  %1963 = vmatpush.bf16.msrb.mxu0 %v13324_v6  ;;  %v475_v59 = vld [vmem:[#allocation2 + $0x115] sm:$0xff]  ;;  %436 = vst [vmem:[#allocation2 + $0x140] sm:$0xff] %v13610_v54 }
  0xed   : > { %1289 = vmatmul.bf16.gmra.mxu2 %v1514_v44  ;;  %v757_v60 = vld [vmem:[#allocation2 + $0x10e] sm:$0xff] }
  0xee   : > { %1657 = vmatmul.bf16.gmra.mxu3 %v1515_v9 }
  0xf0   : > { %v1250_v13 = vpop.f32.mrf.mxu2  ;;  %v600_v16 = vpop.f32.mrf.mxu0 }
  0xf1   : > { %v1618_v14 = vpop.f32.mrf.mxu3  ;;  %v1385_v15 = vadd.f32 %v1250_v13, %v1017_v10  ;;  %v884_v17 = vpop.f32.mrf.mxu1 }
  0xf2   : > { %v1018_v18 = vadd.f32 %v884_v17, %v600_v16  ;;  %v13741_v16 = vld [vmem:[%s13896_s18 + $0x88] sm:$0xff]  }
  0xf3   : > { %v14011_v21 = vadd.f32 %v1618_v14, %v1385_v15  ;;  %v13606_v20 = vunpack.c.l.bf16 %v13741_v16  ;;  %v13607_v22 = vunpack.c.h.bf16 %v13741_v16 }
  0xf5   : > { %434 = vst [vmem:[#allocation2 + $0x130] sm:$0xff] %v13606_v20 }
  0xf6   : > { %435 = vst [vmem:[#allocation2 + $0x138] sm:$0xff] %v13607_v22  ;;  %v13743_v22 = vld [vmem:[%s13896_s18 + $0x98] sm:$0xff]  }
  0xf8   : > { %v1252_v31 = vpop.f32.mrf.mxu2  ;;  %v603_v36 = vpop.f32.mrf.mxu0 }
  0xf9   : > { %v1620_v32 = vpop.f32.mrf.mxu3  ;;  %v1386_v35 = vadd.f32 %v1252_v31, %v1018_v18  ;;  %v887_v38 = vpop.f32.mrf.mxu1  ;;  %v13335_v18 = vld [vmem:[%s17094_s1 + $0x160] sm:$0xff] }
  0xfa   : > { %v1019_v40 = vadd.f32 %v887_v38, %v603_v36  ;;  %2328 = vmatpush.bf16.msrb.mxu1 %v13335_v18  ;;  %v1518_v38 = vpack.c.bf16 %v1492_v29, %v1491_v28  ;;  %v476_v28 = vld [vmem:[#allocation2 + $0x11d] sm:$0xff]  ;;  %v477_v29 = vld [vmem:[#allocation2 + $0x125] sm:$0xff] }
  0xfb   : > { %v14013_v41 = vadd.f32 %v1620_v32, %v1386_v35  ;;  %642 = vmatmul.bf16.gmra.mxu0 %v497_v33  ;;  %v499_v32 = vpack.c.bf16 %v473_v24, %v472_v23  ;;  %v782_v33 = vpack.c.bf16 %v756_v26, %v755_v25  ;;  %v13323_v24 = vld [vmem:[%s17094_s1 + $0x100] sm:$0xff]  ;;  %v13614_v25 = vunpack.c.l.bf16 %v13743_v22 }
  0xfc   : > { %926 = vmatmul.bf16.gmra.mxu1 %v780_v34  ;;  %v13615_v26 = vunpack.c.h.bf16 %v13743_v22  ;;  %1964 = vmatpush.bf16.msrb.mxu0 %v13323_v24 }
  0xfd   : > { %1294 = vmatmul.bf16.gmra.mxu2 %v1515_v9  ;;  %438 = vst [vmem:[#allocation2 + $0x150] sm:$0xff] %v13614_v25 }
  0xfe   : > { %1662 = vmatmul.bf16.gmra.mxu3 %v1516_v39  ;;  %439 = vst [vmem:[#allocation2 + $0x158] sm:$0xff] %v13615_v26 }
 0x100   : > { %v1255_v42 = vpop.f32.mrf.mxu2  ;;  %v605_v45 = vpop.f32.mrf.mxu0 }
 0x101   : > { %v1623_v43 = vpop.f32.mrf.mxu3  ;;  %v1387_v44 = vadd.f32 %v1255_v42, %v1019_v40  ;;  %v889_v47 = vpop.f32.mrf.mxu1 }
 0x102   : > { %v1020_v48 = vadd.f32 %v889_v47, %v605_v45 }
 0x103   : > { %v14016_v50 = vadd.f32 %v1623_v43, %v1387_v44 }
 0x108   : > { %v1257_v61 = vpop.f32.mrf.mxu2  ;;  %v608_v3 = vpop.f32.mrf.mxu0 }
 0x109   : > { %v1625_v62 = vpop.f32.mrf.mxu3  ;;  %v1388_v2 = vadd.f32 %v1257_v61, %v1020_v48  ;;  %v892_v4 = vpop.f32.mrf.mxu1  ;;  %v13346_v48 = vld [vmem:[%s17094_s1 + $0x1b8] sm:$0xff] }
 0x10a   : > { %v1021_v7 = vadd.f32 %v892_v4, %v608_v3  ;;  %2693 = vmatpush.bf16.msrb.mxu2 %v13346_v48  ;;  %v758_v61 = vld [vmem:[#allocation2 + $0x116] sm:$0xff]  ;;  %v500_v3 = vpack.c.bf16 %v475_v59, %v474_v58 }
 0x10b   : > { %v14021_v8 = vadd.f32 %v1625_v62, %v1388_v2  ;;  %647 = vmatmul.bf16.gmra.mxu0 %v498_v63  ;;  %v1493_v62 = vld [vmem:[#allocation2 + $0x11f] sm:$0xff]  ;;  %v1494_v63 = vld [vmem:[#allocation2 + $0x127] sm:$0xff]  ;;  %v783_v4 = vpack.c.bf16 %v758_v61, %v757_v60  ;;  %v13353_v60 = vld [vmem:[%s17094_s1 + $0x1f0] sm:$0xff] }
 0x10c   : > { %931 = vmatmul.bf16.gmra.mxu1 %v781_v0  ;;  %v13334_v48 = vld [vmem:[%s17094_s1 + $0x158] sm:$0xff]  ;;  %v13744_v61 = vld [vmem:[%s13896_s18 + $0xa0] sm:$0xff]   ;;  %3062 = vmatpush.bf16.msrb.mxu3 %v13353_v60 }
 0x10d   : > { %1299 = vmatmul.bf16.gmra.mxu2 %v1516_v39  ;;  %2329 = vmatpush.bf16.msrb.mxu1 %v13334_v48  ;;  %v480_v48 = vld [vmem:[#allocation2 + $0x13d] sm:$0xff] }
 0x10e   : > { %1667 = vmatmul.bf16.gmra.mxu3 %v1517_v5  ;;  %2694 = vmatpush.bf16.msrb.mxu2 %v13345_v53  ;;  %v764_v53 = vld [vmem:[#allocation2 + $0x146] sm:$0xff] }
 0x110   : > { %v1260_v9 = vpop.f32.mrf.mxu2  ;;  %v610_v13 = vpop.f32.mrf.mxu0 }
 0x111   : > { %v1628_v10 = vpop.f32.mrf.mxu3  ;;  %v1389_v12 = vadd.f32 %v1260_v9, %v1021_v7  ;;  %v894_v14 = vpop.f32.mrf.mxu1  ;;  %v1519_v9 = vpack.c.bf16 %v1494_v63, %v1493_v62  ;;  %v13344_v63 = vld [vmem:[%s17094_s1 + $0x1a8] sm:$0xff] }
 0x112   : > { %v1022_v15 = vadd.f32 %v894_v14, %v610_v13  ;;  %2695 = vmatpush.bf16.msrb.mxu2 %v13344_v63 }
 0x113   : > { %v14024_v17 = vadd.f32 %v1628_v10, %v1389_v12 }
 0x118   : > { %v1262_v30 = vpop.f32.mrf.mxu2  ;;  %v613_v35 = vpop.f32.mrf.mxu0 }
 0x119   : > { %v1630_v31 = vpop.f32.mrf.mxu3  ;;  %v1390_v34 = vadd.f32 %v1262_v30, %v1022_v15  ;;  %v897_v36 = vpop.f32.mrf.mxu1  ;;  %v759_v30 = vld [vmem:[#allocation2 + $0x11e] sm:$0xff] }
 0x11a   : > { %v1023_v39 = vadd.f32 %v897_v36, %v613_v35  ;;  %v501_v36 = vpack.c.bf16 %v477_v29, %v476_v28  ;;  %v13351_v28 = vld [vmem:[%s17094_s1 + $0x1e0] sm:$0xff] }
 0x11b   : > { %v14029_v40 = vadd.f32 %v1630_v31, %v1390_v34  ;;  %652 = vmatmul.bf16.gmra.mxu0 %v499_v32  ;;  %v760_v31 = vld [vmem:[#allocation2 + $0x126] sm:$0xff]  ;;  %v1495_v32 = vld [vmem:[#allocation2 + $0x12f] sm:$0xff] }
 0x11c   : > { %936 = vmatmul.bf16.gmra.mxu1 %v782_v33  ;;  %v1496_v33 = vld [vmem:[#allocation2 + $0x137] sm:$0xff] }
 0x11d   : > { %1304 = vmatmul.bf16.gmra.mxu2 %v1517_v5 }
 0x11e   : > { %1672 = vmatmul.bf16.gmra.mxu3 %v1518_v38 }
 0x120   : > { %v1265_v42 = vpop.f32.mrf.mxu2  ;;  %v615_v45 = vpop.f32.mrf.mxu0 }
 0x121   : > { %v1633_v43 = vpop.f32.mrf.mxu3  ;;  %v1391_v44 = vadd.f32 %v1265_v42, %v1023_v39  ;;  %v899_v47 = vpop.f32.mrf.mxu1 }
 0x122   : > { %v1024_v49 = vadd.f32 %v899_v47, %v615_v45 }
 0x123   : > { %v14035_v52 = vadd.f32 %v1633_v43, %v1391_v44  ;;  %v1520_v44 = vpack.c.bf16 %v1496_v33, %v1495_v32 }
 0x128   : > { %v1267_v0 = vpop.f32.mrf.mxu2  ;;  %v618_v6 = vpop.f32.mrf.mxu0 }
 0x129   : > { %v1635_v2 = vpop.f32.mrf.mxu3  ;;  %v1392_v5 = vadd.f32 %v1267_v0, %v1024_v49  ;;  %v902_v7 = vpop.f32.mrf.mxu1  ;;  %v13618_v0 = vunpack.c.l.bf16 %v13744_v61 }
 0x12a   : > { %v1025_v10 = vadd.f32 %v902_v7, %v618_v6  ;;  %v762_v6 = vld [vmem:[#allocation2 + $0x136] sm:$0xff]  ;;  %v1497_v7 = vld [vmem:[#allocation2 + $0x13f] sm:$0xff] }
 0x12b   : > { %v14040_v12 = vadd.f32 %v1635_v2, %v1392_v5  ;;  %657 = vmatmul.bf16.gmra.mxu0 %v500_v3  ;;  %v13619_v2 = vunpack.c.h.bf16 %v13744_v61  ;;  %v478_v3 = vld [vmem:[#allocation2 + $0x12d] sm:$0xff]  ;;  %440 = vst [vmem:[#allocation2 + $0x160] sm:$0xff] %v13618_v0 }
 0x12c   : > { %941 = vmatmul.bf16.gmra.mxu1 %v783_v4  ;;  %v479_v4 = vld [vmem:[#allocation2 + $0x135] sm:$0xff] }
 0x12d   : > { %1309 = vmatmul.bf16.gmra.mxu2 %v1518_v38  ;;  %v784_v38 = vpack.c.bf16 %v760_v31, %v759_v30  ;;  %v761_v5 = vld [vmem:[#allocation2 + $0x12e] sm:$0xff]  ;;  %441 = vst [vmem:[#allocation2 + $0x168] sm:$0xff] %v13619_v2  ;;  %v13342_v30 = vld [vmem:[%s17094_s1 + $0x198] sm:$0xff]  ;;  %v13339_v2 = vld [vmem:[%s17094_s1 + $0x180] sm:$0xff] }
 0x12e   : > { %1677 = vmatmul.bf16.gmra.mxu3 %v1519_v9  ;;  %v13350_v31 = vld [vmem:[%s17094_s1 + $0x1d8] sm:$0xff] }
 0x130   : > { %v1270_v13 = vpop.f32.mrf.mxu2  ;;  %v620_v16 = vpop.f32.mrf.mxu0 }
 0x131   : > { %v1638_v14 = vpop.f32.mrf.mxu3  ;;  %v1393_v15 = vadd.f32 %v1270_v13, %v1025_v10  ;;  %v904_v18 = vpop.f32.mrf.mxu1  ;;  %v13352_v10 = vld [vmem:[%s17094_s1 + $0x1e8] sm:$0xff] }
 0x132   : > { %v1026_v20 = vadd.f32 %v904_v18, %v620_v16  ;;  %v785_v16 = vpack.c.bf16 %v762_v6, %v761_v5  ;;  %3063 = vmatpush.bf16.msrb.mxu3 %v13352_v10  ;;  %v13343_v18 = vld [vmem:[%s17094_s1 + $0x1a0] sm:$0xff] }
 0x133   : > { %v14043_v23 = vadd.f32 %v1638_v14, %v1393_v15  ;;  %v502_v15 = vpack.c.bf16 %v479_v4, %v478_v3  ;;  %2696 = vmatpush.bf16.msrb.mxu2 %v13343_v18  ;;  %v13347_v10 = vld [vmem:[%s17094_s1 + $0x1c0] sm:$0xff] }
 0x136   : > { %3064 = vmatpush.bf16.msrb.mxu3 %v13351_v28  ;;  %v482_v28 = vld [vmem:[#allocation2 + $0x14d] sm:$0xff] }
 0x137   : > { %2697 = vmatpush.bf16.msrb.mxu2 %v13342_v30  ;;  %v483_v30 = vld [vmem:[#allocation2 + $0x155] sm:$0xff] }
 0x138   : > { %v1272_v34 = vpop.f32.mrf.mxu2  ;;  %v623_v42 = vpop.f32.mrf.mxu0 }
 0x139   : > { %v1640_v35 = vpop.f32.mrf.mxu3  ;;  %v1394_v39 = vadd.f32 %v1272_v34, %v1026_v20  ;;  %v907_v43 = vpop.f32.mrf.mxu1  ;;  %v13341_v34 = vld [vmem:[%s17094_s1 + $0x190] sm:$0xff] }
 0x13a   : > { %v1027_v45 = vadd.f32 %v907_v43, %v623_v42  ;;  %3065 = vmatpush.bf16.msrb.mxu3 %v13350_v31  ;;  %v13333_v42 = vld [vmem:[%s17094_s1 + $0x150] sm:$0xff] }
 0x13b   : > { %v14048_v47 = vadd.f32 %v1640_v35, %v1394_v39  ;;  %662 = vmatmul.bf16.gmra.mxu0 %v501_v36  ;;  %2698 = vmatpush.bf16.msrb.mxu2 %v13341_v34  ;;  %v13349_v43 = vld [vmem:[%s17094_s1 + $0x1d0] sm:$0xff] }
 0x13c   : > { %946 = vmatmul.bf16.gmra.mxu1 %v784_v38  ;;  %v765_v31 = vld [vmem:[#allocation2 + $0x14e] sm:$0xff] }
 0x13d   : > { %1314 = vmatmul.bf16.gmra.mxu2 %v1519_v9  ;;  %v1498_v9 = vld [vmem:[#allocation2 + $0x147] sm:$0xff]  ;;  %2330 = vmatpush.bf16.msrb.mxu1 %v13333_v42 }
 0x13e   : > { %1682 = vmatmul.bf16.gmra.mxu3 %v1520_v44  ;;  %v1521_v25 = vpack.c.bf16 %v1498_v9, %v1497_v7  ;;  %v13331_v9 = vld [vmem:[%s17094_s1 + $0x140] sm:$0xff] }
 0x13f   : > { %3066 = vmatpush.bf16.msrb.mxu3 %v13349_v43 }
 0x140   : > { %v1275_v49 = vpop.f32.mrf.mxu2  ;;  %v625_v57 = vpop.f32.mrf.mxu0 }
 0x141   : > { %v1643_v51 = vpop.f32.mrf.mxu3  ;;  %v1395_v54 = vadd.f32 %v1275_v49, %v1027_v45  ;;  %v909_v58 = vpop.f32.mrf.mxu1  ;;  %v13340_v45 = vld [vmem:[%s17094_s1 + $0x188] sm:$0xff] }
 0x142   : > { %v1028_v59 = vadd.f32 %v909_v58, %v625_v57  ;;  %v481_v49 = vld [vmem:[#allocation2 + $0x145] sm:$0xff]  ;;  %v1500_v57 = vld [vmem:[#allocation2 + $0x157] sm:$0xff]  ;;  %2699 = vmatpush.bf16.msrb.mxu2 %v13340_v45 }
 0x143   : > { %v14060_v62 = vadd.f32 %v1643_v51, %v1395_v54  ;;  %v763_v51 = vld [vmem:[#allocation2 + $0x13e] sm:$0xff]  ;;  %v1499_v54 = vld [vmem:[#allocation2 + $0x14f] sm:$0xff]  ;;  %v503_v63 = vpack.c.bf16 %v481_v49, %v480_v48 }
 0x144   : > { %v13332_v58 = vld [vmem:[%s17094_s1 + $0x148] sm:$0xff]  ;;  %v786_v0 = vpack.c.bf16 %v764_v53, %v763_v51  ;;  %v1522_v6 = vpack.c.bf16 %v1500_v57, %v1499_v54 }
 0x145   : > { %2331 = vmatpush.bf16.msrb.mxu1 %v13332_v58 }
 0x146   : > { %2700 = vmatpush.bf16.msrb.mxu2 %v13339_v2  ;;  %v2197_v2 = vld [vmem:[#allocation2 + $0x21] sm:$0xff] }
 0x148   : > { %v1277_v13 = vpop.f32.mrf.mxu2  ;;  %v628_v22 = vpop.f32.mrf.mxu0 }
 0x149   : > { %v1645_v14 = vpop.f32.mrf.mxu3  ;;  %v1396_v20 = vadd.f32 %v1277_v13, %v1028_v59  ;;  %v912_v24 = vpop.f32.mrf.mxu1  ;;  %v13348_v59 = vld [vmem:[%s17094_s1 + $0x1c8] sm:$0xff]  ;;  %2332 = vmatpush.bf16.msrb.mxu1 %v13331_v9 }
 0x14a   : > { %v1029_v26 = vadd.f32 %v912_v24, %v628_v22  ;;  %3067 = vmatpush.bf16.msrb.mxu3 %v13348_v59 }
 0x14b   : > { %v14074_v29 = vadd.f32 %v1645_v14, %v1396_v20  ;;  %667 = vmatmul.bf16.gmra.mxu0 %v502_v15  ;;  %v13362_v14 = vld [vmem:[%s17094_s1 + $0x238] sm:$0xff] }
 0x14c   : > { %951 = vmatmul.bf16.gmra.mxu1 %v785_v16  ;;  %3429 = vmatpush.bf16.msra.mxu0 %v13362_v14 }
 0x14d   : > { %1319 = vmatmul.bf16.gmra.mxu2 %v1520_v44 }
 0x14e   : > { %1687 = vmatmul.bf16.gmra.mxu3 %v1521_v25 }
 0x14f   : > { %3068 = vmatpush.bf16.msrb.mxu3 %v13347_v10 }
 0x150   : > { %v1280_v32 = vpop.f32.mrf.mxu2  ;;  %v630_v36 = vpop.f32.mrf.mxu0 }
 0x151   : > { %v1648_v33 = vpop.f32.mrf.mxu3  ;;  %v1397_v35 = vadd.f32 %v1280_v32, %v1029_v26  ;;  %v914_v38 = vpop.f32.mrf.mxu1  ;;  %v1501_v32 = vld [vmem:[#allocation2 + $0x15f] sm:$0xff] }
 0x152   : > { %v1030_v39 = vadd.f32 %v914_v38, %v630_v36  ;;  %v504_v36 = vpack.c.bf16 %v483_v30, %v482_v28 }
 0x153   : > { %v14091_v44 = vadd.f32 %v1648_v33, %v1397_v35  ;;  %v1502_v33 = vld [vmem:[#allocation2 + $0x167] sm:$0xff] }
 0x154   : > { %v1523_v45 = vpack.c.bf16 %v1502_v33, %v1501_v32 }
 0x158   : > { %v1282_v60 = vpop.f32.mrf.mxu2  ;;  %v633_v4 = vpop.f32.mrf.mxu0 }
 0x159   : > { %v1650_v61 = vpop.f32.mrf.mxu3  ;;  %v1398_v3 = vadd.f32 %v1282_v60, %v1030_v39  ;;  %v917_v5 = vpop.f32.mrf.mxu1 }
 0x15a   : > { %v1031_v7 = vadd.f32 %v917_v5, %v633_v4  ;;  %v2566_v4 = vld [vmem:[#allocation2 + $0x39] sm:$0xff] }
 0x15b   : > { %v14111_v13 = vadd.f32 %v1650_v61, %v1398_v3  ;;  %672 = vmatmul.bf16.gmra.mxu0 %v503_v63  ;;  %v1829_v61 = vld [vmem:[#allocation2 + $0x20] sm:$0xff]  ;;  %v1830_v63 = vld [vmem:[#allocation2 + $0x28] sm:$0xff]  ;;  %v2933_v5 = vld [vmem:[#allocation2 + $0x32] sm:$0xff] }
 0x15c   : > { %956 = vmatmul.bf16.gmra.mxu1 %v786_v0  ;;  %v2565_v0 = vld [vmem:[#allocation2 + $0x31] sm:$0xff]  ;;  %v2198_v3 = vld [vmem:[#allocation2 + $0x29] sm:$0xff] }
 0x15d   : > { %1324 = vmatmul.bf16.gmra.mxu2 %v1521_v25  ;;  %v766_v25 = vld [vmem:[#allocation2 + $0x156] sm:$0xff]  ;;  %v2239_v14 = vpack.c.bf16 %v2198_v3, %v2197_v2 }
 0x15e   : > { %1692 = vmatmul.bf16.gmra.mxu3 %v1522_v6  ;;  %v787_v38 = vpack.c.bf16 %v766_v25, %v765_v31 }
 0x160   : > { %v1285_v15 = vpop.f32.mrf.mxu2  ;;  %v635_v20 = vpop.f32.mrf.mxu0 }
 0x161   : > { %v1653_v16 = vpop.f32.mrf.mxu3  ;;  %v1399_v18 = vadd.f32 %v1285_v15, %v1031_v7  ;;  %v919_v22 = vpop.f32.mrf.mxu1  ;;  %v2934_v7 = vld [vmem:[#allocation2 + $0x3a] sm:$0xff] }
 0x162   : > { %v1032_v24 = vadd.f32 %v919_v22, %v635_v20  ;;  %v2607_v20 = vpack.c.bf16 %v2566_v4, %v2565_v0  ;;  %v2975_v22 = vpack.c.bf16 %v2934_v7, %v2933_v5 }
 0x163   : > { %v14116_v26 = vadd.f32 %v1653_v16, %v1399_v18 }
 0x168   : > { %v1287_v34 = vpop.f32.mrf.mxu2  ;;  %v638_v42 = vpop.f32.mrf.mxu0 }
 0x169   : > { %v1655_v35 = vpop.f32.mrf.mxu3  ;;  %v1400_v39 = vadd.f32 %v1287_v34, %v1032_v24  ;;  %v922_v43 = vpop.f32.mrf.mxu1 }
 0x16a   : > { %v1033_v48 = vadd.f32 %v922_v43, %v638_v42  ;;  %v2567_v42 = vld [vmem:[#allocation2 + $0x41] sm:$0xff]  ;;  %v2568_v43 = vld [vmem:[#allocation2 + $0x49] sm:$0xff] }
 0x16b   : > { %v14118_v49 = vadd.f32 %v1655_v35, %v1400_v39  ;;  %677 = vmatmul.bf16.gmra.mxu0 %v504_v36  ;;  %v13361_v36 = vld [vmem:[%s17094_s1 + $0x230] sm:$0xff]  ;;  %v1832_v39 = vld [vmem:[#allocation2 + $0x38] sm:$0xff] }
 0x16c   : > { %961 = vmatmul.bf16.gmra.mxu1 %v787_v38  ;;  %v1831_v38 = vld [vmem:[#allocation2 + $0x30] sm:$0xff]  ;;  %3430 = vmatpush.bf16.msra.mxu0 %v13361_v36 }
 0x16d   : > { %1329 = vmatmul.bf16.gmra.mxu2 %v1522_v6  ;;  %v1871_v6 = vpack.c.bf16 %v1830_v63, %v1829_v61  ;;  %v2608_v61 = vpack.c.bf16 %v2568_v43, %v2567_v42 }
 0x16e   : > { %1697 = vmatmul.bf16.gmra.mxu3 %v1523_v45  ;;  %v2935_v45 = vld [vmem:[#allocation2 + $0x42] sm:$0xff] }
 0x170   : > { %v1290_v51 = vpop.f32.mrf.mxu2  ;;  %v640_v57 = vpop.f32.mrf.mxu0 }
 0x171   : > { %v1658_v53 = vpop.f32.mrf.mxu3  ;;  %v1401_v54 = vadd.f32 %v1290_v51, %v1033_v48  ;;  %v924_v58 = vpop.f32.mrf.mxu1  ;;  %v2936_v48 = vld [vmem:[#allocation2 + $0x4a] sm:$0xff] }
 0x172   : > { %v1034_v59 = vadd.f32 %v924_v58, %v640_v57  ;;  %v2976_v63 = vpack.c.bf16 %v2936_v48, %v2935_v45 }
 0x173   : > { %v14120_v60 = vadd.f32 %v1658_v53, %v1401_v54  ;;  %v1872_v54 = vpack.c.bf16 %v1832_v39, %v1831_v38 }
 0x175   : > { %17106 = vst [vmem:[#allocation4_spill] sm:$0xff] %v14120_v60  ;;  %v14394_v60 = vld [vmem:[%s17100_s7 + $0xa0] sm:$0xff] }
 0x178   : > { %v1292_v9 = vpop.f32.mrf.mxu2  ;;  %v643_v16 = vpop.f32.mrf.mxu0 }
 0x179   : > { %v1660_v10 = vpop.f32.mrf.mxu3  ;;  %v1402_v15 = vadd.f32 %v1292_v9, %v1034_v59  ;;  %v927_v18 = vpop.f32.mrf.mxu1 }
 0x17a   : > { %v1035_v24 = vadd.f32 %v927_v18, %v643_v16  ;;  %v2569_v16 = vld [vmem:[#allocation2 + $0x51] sm:$0xff]  ;;  %v2570_v18 = vld [vmem:[#allocation2 + $0x59] sm:$0xff] }
 0x17b   : > { %v14122_v28 = vadd.f32 %v1660_v10, %v1402_v15  ;;  %1965 = vmatmul.bf16.vlgmr.msrb.gmra.mxu0 %v1871_v6  ;;  %v1834_v15 = vld [vmem:[#allocation2 + $0x48] sm:$0xff] }
 0x17c   : > { %2333 = vmatmul.bf16.vlgmr.msrb.gmra.mxu1 %v2239_v14  ;;  %v1833_v14 = vld [vmem:[#allocation2 + $0x40] sm:$0xff] }
 0x17d   : > { %17107 = vst [vmem:[#allocation5_spill] sm:$0xff] %v14122_v28  ;;  %2701 = vmatmul.bf16.vlgmr.msrb.gmra.mxu2 %v2607_v20 }
 0x17e   : > { %3069 = vmatmul.bf16.vlgmr.msrb.gmra.mxu3 %v2975_v22  ;;  %v2937_v22 = vld [vmem:[#allocation2 + $0x52] sm:$0xff] }
 0x180   : > { %v1295_v30 = vpop.f32.mrf.mxu2  ;;  %v645_v32 = vpop.f32.mrf.mxu0 }
 0x181   : > { %v1663_v31 = vpop.f32.mrf.mxu3  ;;  %v1403_v25 = vadd.f32 %v1295_v30, %v1035_v24  ;;  %v929_v33 = vpop.f32.mrf.mxu1  ;;  %v2938_v24 = vld [vmem:[#allocation2 + $0x5a] sm:$0xff] }
 0x182   : > { %v1036_v34 = vadd.f32 %v929_v33, %v645_v32  ;;  %v2977_v36 = vpack.c.bf16 %v2938_v24, %v2937_v22 }
 0x183   : > { %v14124_v35 = vadd.f32 %v1663_v31, %v1403_v25  ;;  %v1873_v25 = vpack.c.bf16 %v1834_v15, %v1833_v14 }
 0x185   : > { %17108 = vst [vmem:[#allocation6_spill] sm:$0xff] %v14124_v35 }
 0x188   : > { %v1297_v51 = vpop.f32.mrf.mxu2  ;;  %v648_v58 = vpop.f32.mrf.mxu0 }
 0x189   : > { %v1665_v53 = vpop.f32.mrf.mxu3  ;;  %v1404_v57 = vadd.f32 %v1297_v51, %v1036_v34  ;;  %v932_v59 = vpop.f32.mrf.mxu1  ;;  %v2609_v34 = vpack.c.bf16 %v2570_v18, %v2569_v16 }
 0x18a   : > { %v1037_v0 = vadd.f32 %v932_v59, %v648_v58  ;;  %v1836_v58 = vld [vmem:[#allocation2 + $0x58] sm:$0xff]  ;;  %v2571_v59 = vld [vmem:[#allocation2 + $0x61] sm:$0xff] }
 0x18b   : > { %v14129_v2 = vadd.f32 %v1665_v53, %v1404_v57  ;;  %1970 = vmatmul.bf16.gmra.mxu0 %v1872_v54  ;;  %v1835_v57 = vld [vmem:[#allocation2 + $0x50] sm:$0xff] }
 0x18c   : > { %2338 = vmatmul.bf16.gmra.mxu1 %v2607_v20 }
 0x18d   : > { %17109 = vst [vmem:[#allocation7_spill] sm:$0xff] %v14129_v2  ;;  %2706 = vmatmul.bf16.gmra.mxu2 %v2608_v61 }
 0x18e   : > { %3074 = vmatmul.bf16.gmra.mxu3 %v2976_v63  ;;  %v2572_v63 = vld [vmem:[#allocation2 + $0x69] sm:$0xff] }
 0x18f   : > { %v2610_v14 = vpack.c.bf16 %v2572_v63, %v2571_v59 }
 0x190   : > { %v1300_v3 = vpop.f32.mrf.mxu2  ;;  %v650_v7 = vpop.f32.mrf.mxu0 }
 0x191   : > { %v1668_v4 = vpop.f32.mrf.mxu3  ;;  %v1405_v5 = vadd.f32 %v1300_v3, %v1037_v0  ;;  %v934_v9 = vpop.f32.mrf.mxu1  ;;  %v2939_v0 = vld [vmem:[#allocation2 + $0x62] sm:$0xff]  ;;  %v2940_v3 = vld [vmem:[#allocation2 + $0x6a] sm:$0xff] }
 0x192   : > { %v1038_v10 = vadd.f32 %v934_v9, %v650_v7  ;;  %v1874_v7 = vpack.c.bf16 %v1836_v58, %v1835_v57  ;;  %v2978_v15 = vpack.c.bf16 %v2940_v3, %v2939_v0 }
 0x193   : > { %v14131_v6 = vadd.f32 %v1668_v4, %v1405_v5 }
 0x195   : > { %17110 = vst [vmem:[#allocation8_spill] sm:$0xff] %v14131_v6 }
 0x198   : > { %v1302_v30 = vpop.f32.mrf.mxu2  ;;  %v653_v32 = vpop.f32.mrf.mxu0 }
 0x199   : > { %v1670_v31 = vpop.f32.mrf.mxu3  ;;  %v1406_v20 = vadd.f32 %v1302_v30, %v1038_v10  ;;  %v937_v33 = vpop.f32.mrf.mxu1 }
 0x19a   : > { %v1039_v38 = vadd.f32 %v937_v33, %v653_v32 }
 0x19b   : > { %v14133_v39 = vadd.f32 %v1670_v31, %v1406_v20  ;;  %1975 = vmatmul.bf16.gmra.mxu0 %v1873_v25  ;;  %v13360_v20 = vld [vmem:[%s17094_s1 + $0x228] sm:$0xff] }
 0x19c   : > { %2343 = vmatmul.bf16.gmra.mxu1 %v2608_v61  ;;  %3431 = vmatpush.bf16.msra.mxu0 %v13360_v20  ;;  %v2944_v20 = vld [vmem:[#allocation2 + $0x8a] sm:$0xff] }
 0x19d   : > { %17111 = vst [vmem:[#allocation9_spill] sm:$0xff] %v14133_v39  ;;  %2711 = vmatmul.bf16.gmra.mxu2 %v2609_v34  ;;  %v13368_v39 = vld [vmem:[%s17095_s2 + $0x28] sm:$0xff] }
 0x19e   : > { %3079 = vmatmul.bf16.gmra.mxu3 %v2977_v36  ;;  %v1837_v36 = vld [vmem:[#allocation2 + $0x60] sm:$0xff] }
 0x1a0   : > { %v1305_v42 = vpop.f32.mrf.mxu2  ;;  %v655_v48 = vpop.f32.mrf.mxu0 }
 0x1a1   : > { %v1673_v43 = vpop.f32.mrf.mxu3  ;;  %v1407_v45 = vadd.f32 %v1305_v42, %v1039_v38  ;;  %v939_v51 = vpop.f32.mrf.mxu1  ;;  %v1838_v38 = vld [vmem:[#allocation2 + $0x68] sm:$0xff]  ;;  %v2573_v42 = vld [vmem:[#allocation2 + $0x71] sm:$0xff] }
 0x1a2   : > { %v1040_v53 = vadd.f32 %v939_v51, %v655_v48 }
 0x1a3   : > { %v14135_v54 = vadd.f32 %v1673_v43, %v1407_v45  ;;  %v2574_v43 = vld [vmem:[#allocation2 + $0x79] sm:$0xff] }
 0x1a4   : > { %v2942_v45 = vld [vmem:[#allocation2 + $0x7a] sm:$0xff]  ;;  %v2611_v63 = vpack.c.bf16 %v2574_v43, %v2573_v42 }
 0x1a5   : > { %17112 = vst [vmem:[#allocation10_spill] sm:$0xff] %v14135_v54 }
 0x1a8   : > { %v1307_v4 = vpop.f32.mrf.mxu2  ;;  %v658_v9 = vpop.f32.mrf.mxu0 }
 0x1a9   : > { %v1675_v5 = vpop.f32.mrf.mxu3  ;;  %v1408_v61 = vadd.f32 %v1307_v4, %v1040_v53  ;;  %v942_v10 = vpop.f32.mrf.mxu1  ;;  %v1875_v53 = vpack.c.bf16 %v1838_v38, %v1837_v36 }
 0x1aa   : > { %v1041_v16 = vadd.f32 %v942_v10, %v658_v9 }
 0x1ab   : > { %v14137_v18 = vadd.f32 %v1675_v5, %v1408_v61  ;;  %1980 = vmatmul.bf16.gmra.mxu0 %v1874_v7 }
 0x1ac   : > { %2348 = vmatmul.bf16.gmra.mxu1 %v2609_v34  ;;  %v2941_v34 = vld [vmem:[#allocation2 + $0x72] sm:$0xff] }
 0x1ad   : > { %17113 = vst [vmem:[#allocation11_spill] sm:$0xff] %v14137_v18  ;;  %2716 = vmatmul.bf16.gmra.mxu2 %v2610_v14  ;;  %v2979_v0 = vpack.c.bf16 %v2942_v45, %v2941_v34 }
 0x1ae   : > { %3084 = vmatmul.bf16.gmra.mxu3 %v2978_v15 }
 0x1b0   : > { %v1310_v22 = vpop.f32.mrf.mxu2  ;;  %v660_v31 = vpop.f32.mrf.mxu0 }
 0x1b1   : > { %v1678_v24 = vpop.f32.mrf.mxu3  ;;  %v1409_v30 = vadd.f32 %v1310_v22, %v1041_v16  ;;  %v944_v25 = vpop.f32.mrf.mxu1  ;;  %v1839_v22 = vld [vmem:[#allocation2 + $0x70] sm:$0xff] }
 0x1b2   : > { %v1042_v32 = vadd.f32 %v944_v25, %v660_v31  ;;  %v2576_v31 = vld [vmem:[#allocation2 + $0x89] sm:$0xff] }
 0x1b3   : > { %v14142_v33 = vadd.f32 %v1678_v24, %v1409_v30  ;;  %v1840_v24 = vld [vmem:[#allocation2 + $0x78] sm:$0xff]  ;;  %v2575_v30 = vld [vmem:[#allocation2 + $0x81] sm:$0xff] }
 0x1b4   : > { %v2943_v25 = vld [vmem:[#allocation2 + $0x82] sm:$0xff]  ;;  %v1876_v38 = vpack.c.bf16 %v1840_v24, %v1839_v22  ;;  %v2612_v34 = vpack.c.bf16 %v2576_v31, %v2575_v30  ;;  %v2946_v22 = vld [vmem:[#allocation2 + $0x9a] sm:$0xff] }
 0x1b5   : > { %17114 = vst [vmem:[#allocation12_spill] sm:$0xff] %v14142_v33  ;;  %v2980_v45 = vpack.c.bf16 %v2944_v20, %v2943_v25  ;;  %v13357_v33 = vld [vmem:[%s17094_s1 + $0x210] sm:$0xff] }
 0x1b8   : > { %v1312_v48 = vpop.f32.mrf.mxu2  ;;  %v663_v58 = vpop.f32.mrf.mxu0 }
 0x1b9   : > { %v1680_v51 = vpop.f32.mrf.mxu3  ;;  %v1410_v57 = vadd.f32 %v1312_v48, %v1042_v32  ;;  %v947_v59 = vpop.f32.mrf.mxu1 }
 0x1ba   : > { %v1043_v3 = vadd.f32 %v947_v59, %v663_v58 }
 0x1bb   : > { %v14144_v4 = vadd.f32 %v1680_v51, %v1410_v57  ;;  %1985 = vmatmul.bf16.gmra.mxu0 %v1875_v53 }
 0x1bc   : > { %2353 = vmatmul.bf16.gmra.mxu1 %v2610_v14 }
 0x1bd   : > { %17115 = vst [vmem:[#allocation13_spill] sm:$0xff] %v14144_v4  ;;  %2721 = vmatmul.bf16.gmra.mxu2 %v2611_v63 }
 0x1be   : > { %3089 = vmatmul.bf16.gmra.mxu3 %v2979_v0 }
 0x1c0   : > { %v1315_v5 = vpop.f32.mrf.mxu2  ;;  %v665_v9 = vpop.f32.mrf.mxu0 }
 0x1c1   : > { %v1683_v7 = vpop.f32.mrf.mxu3  ;;  %v1411_v61 = vadd.f32 %v1315_v5, %v1043_v3  ;;  %v949_v10 = vpop.f32.mrf.mxu1 }
 0x1c2   : > { %v1044_v15 = vadd.f32 %v949_v10, %v665_v9  ;;  %v2577_v9 = vld [vmem:[#allocation2 + $0x91] sm:$0xff]  ;;  %v2578_v10 = vld [vmem:[#allocation2 + $0x99] sm:$0xff] }
 0x1c3   : > { %v14146_v16 = vadd.f32 %v1683_v7, %v1411_v61  ;;  %v1841_v7 = vld [vmem:[#allocation2 + $0x80] sm:$0xff]  ;;  %v1842_v61 = vld [vmem:[#allocation2 + $0x88] sm:$0xff] }
 0x1c4   : > { %v1877_v31 = vpack.c.bf16 %v1842_v61, %v1841_v7  ;;  %v1844_v7 = vld [vmem:[#allocation2 + $0x98] sm:$0xff]  ;;  %v2579_v61 = vld [vmem:[#allocation2 + $0xa1] sm:$0xff] }
 0x1c5   : > { %17116 = vst [vmem:[#allocation14_spill] sm:$0xff] %v14146_v16 }
 0x1c8   : > { %v1317_v32 = vpop.f32.mrf.mxu2  ;;  %v668_v42 = vpop.f32.mrf.mxu0 }
 0x1c9   : > { %v1685_v36 = vpop.f32.mrf.mxu3  ;;  %v1412_v14 = vadd.f32 %v1317_v32, %v1044_v15  ;;  %v952_v43 = vpop.f32.mrf.mxu1  ;;  %v2945_v15 = vld [vmem:[#allocation2 + $0x92] sm:$0xff]  ;;  %v2613_v32 = vpack.c.bf16 %v2578_v10, %v2577_v9  ;;  %v13792_v9 = vmov 0   ;;  %v2580_v10 = vld [vmem:[#allocation2 + $0xa9] sm:$0xff] }
 0x1ca   : > { %v1045_v48 = vadd.f32 %v952_v43, %v668_v42  ;;  %v13359_v42 = vld [vmem:[%s17094_s1 + $0x220] sm:$0xff]  ;;  %13776 = vset.pattern.permute.xlu0 %v13792_v9  ;;  %13777 = vset.pattern.permute.xlu1 %v13792_v9 }
 0x1cb   : > { %v14148_v51 = vadd.f32 %v1685_v36, %v1412_v14  ;;  %1990 = vmatmul.bf16.gmra.mxu0 %v1876_v38  ;;  %v2981_v36 = vpack.c.bf16 %v2946_v22, %v2945_v15  ;;  %v2947_v15 = vld [vmem:[#allocation2 + $0xa2] sm:$0xff]  ;;  %v2948_v22 = vld [vmem:[#allocation2 + $0xaa] sm:$0xff]  ;;  %13778 = vset.pattern.permute.xlu2 %v13792_v9 }
 0x1cc   : > { %2358 = vmatmul.bf16.gmra.mxu1 %v2611_v63  ;;  %3432 = vmatpush.bf16.msra.mxu0 %v13359_v42  ;;  %v1845_v9 = vld [vmem:[#allocation2 + $0xa0] sm:$0xff] }
 0x1cd   : > { %17117 = vst [vmem:[#allocation15_spill] sm:$0xff] %v14148_v51  ;;  %2726 = vmatmul.bf16.gmra.mxu2 %v2612_v34 }
 0x1ce   : > { %3094 = vmatmul.bf16.gmra.mxu3 %v2980_v45 }
 0x1d0   : > { %v1320_v53 = vpop.f32.mrf.mxu2  ;;  %v670_v59 = vpop.f32.mrf.mxu0 }
 0x1d1   : > { %v1688_v57 = vpop.f32.mrf.mxu3  ;;  %v1413_v58 = vadd.f32 %v1320_v53, %v1045_v48  ;;  %v954_v0 = vpop.f32.mrf.mxu1 }
 0x1d2   : > { %v1046_v3 = vadd.f32 %v954_v0, %v670_v59  ;;  %v13370_v0 = vld [vmem:[%s17095_s2 + $0x38] sm:$0xff] }
 0x1d3   : > { %v14150_v5 = vadd.f32 %v1688_v57, %v1413_v58  ;;  %4302 = vmatpush.bf16.msra.mxu1 %v13370_v0 }
 0x1d5   : > { %17118 = vst [vmem:[#allocation16_spill] sm:$0xff] %v14150_v5  ;;  %v14262_v5 = vld [vmem:[%s17100_s7 + $0x20] sm:$0xff] }
 0x1d6   : > { %3903 = vperm.xlu2 %13778, %v14262_v5  }
 0x1d8   : > { %v1322_v24 = vpop.f32.mrf.mxu2  ;;  %v673_v25 = vpop.f32.mrf.mxu0 }
 0x1d9   : > { %v1690_v30 = vpop.f32.mrf.mxu3  ;;  %v1414_v63 = vadd.f32 %v1322_v24, %v1046_v3  ;;  %v957_v20 = vpop.f32.mrf.mxu1  ;;  %v14165_v3 = vld [vmem:[%s17100_s7] sm:$0xff] }
 0x1da   : > { %v1047_v38 = vadd.f32 %v957_v20, %v673_v25  ;;  %3883 = vperm.xlu0 %13776, %v14165_v3  }
 0x1db   : > { %v14152_v14 = vadd.f32 %v1690_v30, %v1414_v63  ;;  %1995 = vmatmul.bf16.gmra.mxu0 %v1877_v31 }
 0x1dc   : > { %2363 = vmatmul.bf16.gmra.mxu1 %v2612_v34  ;;  %v1843_v34 = vld [vmem:[#allocation2 + $0x90] sm:$0xff] }
 0x1dd   : > { %17119 = vst [vmem:[#allocation17_spill] sm:$0xff] %v14152_v14  ;;  %2731 = vmatmul.bf16.gmra.mxu2 %v2613_v32  ;;  %v1878_v31 = vpack.c.bf16 %v1844_v7, %v1843_v34 }
 0x1de   : > { %3099 = vmatmul.bf16.gmra.mxu3 %v2981_v36  ;;  %v2614_v36 = vpack.c.bf16 %v2580_v10, %v2579_v61  ;;  %v14186_v61 = vld [vmem:[%s17100_s7 + $0x30] sm:$0xff]  ;;  %v1846_v10 = vld [vmem:[#allocation2 + $0xa8] sm:$0xff] }
 0x1e0   : > { %v1325_v43 = vpop.f32.mrf.mxu2  ;;  %v675_v53 = vpop.f32.mrf.mxu0 }
 0x1e1   : > { %v1693_v45 = vpop.f32.mrf.mxu3  ;;  %v1415_v48 = vadd.f32 %v1325_v43, %v1047_v38  ;;  %v959_v57 = vpop.f32.mrf.mxu1  ;;  %v2982_v38 = vpack.c.bf16 %v2948_v22, %v2947_v15  ;;  %v2581_v15 = vld [vmem:[#allocation2 + $0xb1] sm:$0xff]  ;;  %v2582_v22 = vld [vmem:[#allocation2 + $0xb9] sm:$0xff] }
 0x1e2   : > { %v1048_v58 = vadd.f32 %v959_v57, %v675_v53 }
 0x1e3   : > { %v14157_v59 = vadd.f32 %v1693_v45, %v1415_v48  ;;  %v14173_v45 = vld [vmem:[%s17100_s7 + $0x8] sm:$0xff] }
 0x1e4   : > { %3888 = vperm.xlu0 %13776, %v14173_v45  }
 0x1e5   : > { %17120 = vst [vmem:[#allocation18_spill] sm:$0xff] %v14157_v59 }
 0x1e8   : > { %v1327_v24 = vpop.f32.mrf.mxu2  ;;  %v678_v25 = vpop.f32.mrf.mxu0 }
 0x1e9   : > { %v1695_v30 = vpop.f32.mrf.mxu3  ;;  %v1416_v63 = vadd.f32 %v1327_v24, %v1048_v58  ;;  %v962_v20 = vpop.f32.mrf.mxu1  ;;  %v2949_v24 = vld [vmem:[#allocation2 + $0xb2] sm:$0xff] }
 0x1ea   : > { %v1049_v42 = vadd.f32 %v962_v20, %v678_v25  ;;  %v1879_v25 = vpack.c.bf16 %v1846_v10, %v1845_v9 }
 0x1eb   : > { %v14168_v43 = vadd.f32 %v1695_v30, %v1416_v63  ;;  %2000 = vmatmul.bf16.gmra.mxu0 %v1878_v31  ;;  %v2950_v30 = vld [vmem:[#allocation2 + $0xba] sm:$0xff] }
 0x1ec   : > { %2368 = vmatmul.bf16.gmra.mxu1 %v2613_v32  ;;  %v14181_v32 = vld [vmem:[%s17100_s7 + $0x10] sm:$0xff]  ;;  %3913 = vperm.xlu0 %13776, %v14186_v61  }
 0x1ed   : > { %17121 = vst [vmem:[#allocation19_spill] sm:$0xff] %v14168_v43  ;;  %2736 = vmatmul.bf16.gmra.mxu2 %v2614_v36  ;;  %3893 = vperm.xlu1 %13777, %v14181_v32  }
 0x1ee   : > { %3104 = vmatmul.bf16.gmra.mxu3 %v2982_v38 }
 0x1f0   : > { %v1330_v48 = vpop.f32.mrf.mxu2  ;;  %v680_v58 = vpop.f32.mrf.mxu0 }
 0x1f1   : > { %v1698_v53 = vpop.f32.mrf.mxu3  ;;  %v1417_v57 = vadd.f32 %v1330_v48, %v1049_v42  ;;  %v964_v0 = vpop.f32.mrf.mxu1  ;;  %v2615_v48 = vpack.c.bf16 %v2582_v22, %v2581_v15 }
 0x1f2   : > { %v1050_v34 = vadd.f32 %v964_v0, %v680_v58 }
 0x1f3   : > { %v14176_v7 = vadd.f32 %v1698_v53, %v1417_v57  ;;  %v2983_v53 = vpack.c.bf16 %v2950_v30, %v2949_v24 }
 0x1f5   : > { %17122 = vst [vmem:[#allocation20_spill] sm:$0xff] %v14176_v7  ;;  %v14196_v7 = vld [vmem:[%s17100_s7 + $0x18] sm:$0xff] }
 0x1f6   : > { %3898 = vperm.xlu1 %13777, %v14196_v7  }
 0x1f8   : > { %v1332_v31 = vpop.f32.mrf.mxu2  ;;  %v1966_v38 = vpop.f32.mrf.mxu0 }
 0x1f9   : > { %v1700_v63 = vpop.f32.mrf.mxu3  ;;  %v1418_v20 = vadd.f32 %v1332_v31, %v1050_v34  ;;  %v2334_v42 = vpop.f32.mrf.mxu1  ;;  %v2113_v57 = vadd.f32 %v1966_v38, %v13979_v37  ;;  %v14201_v34 = vld [vmem:[%s17100_s7 + $0x48] sm:$0xff]  ;;  %v13358_v31 = vld [vmem:[%s17094_s1 + $0x218] sm:$0xff] }
 0x1fa   : > { %3928 = vperm.xlu0 %13776, %v14201_v34   ;;  %v1848_v38 = vld [vmem:[#allocation2 + $0xb8] sm:$0xff]  ;;  %3433 = vmatpush.bf16.msra.mxu0 %v13358_v31  ;;  %v14229_v31 = vld [vmem:[%s17100_s7 + $0x50] sm:$0xff] }
 0x1fb   : > { %v14191_v58 = vadd.f32 %v1700_v63, %v1418_v20  ;;  %v2481_v0 = vadd.f32 %v2334_v42, %v2113_v57  ;;  %2005 = vmatmul.bf16.gmra.mxu0 %v1879_v25  ;;  %v14214_v63 = vld [vmem:[%s17100_s7 + $0x38] sm:$0xff]  ;;  %v14219_v25 = vld [vmem:[%s17100_s7 + $0x60] sm:$0xff]  ;;  %v1847_v20 = vld [vmem:[#allocation2 + $0xb0] sm:$0xff] }
 0x1fc   : > { %2373 = vmatmul.bf16.gmra.mxu1 %v2614_v36  ;;  %v2584_v42 = vld [vmem:[#allocation2 + $0xc9] sm:$0xff] }
 0x1fd   : > { %17123 = vst [vmem:[#allocation21_spill] sm:$0xff] %v14191_v58  ;;  %2741 = vmatmul.bf16.gmra.mxu2 %v2615_v48  ;;  %v2952_v57 = vld [vmem:[#allocation2 + $0xca] sm:$0xff] }
 0x1fe   : > { %3109 = vmatmul.bf16.gmra.mxu3 %v2983_v53  ;;  %v2951_v53 = vld [vmem:[#allocation2 + $0xc2] sm:$0xff]  ;;  %3918 = vperm.xlu1 %13777, %v14214_v63  }
 0x1ff   : > { %3434 = vmatpush.bf16.msra.mxu0 %v13357_v33  ;;  %v14333_v33 = vld [vmem:[%s17100_s7 + $0xc8] sm:$0xff] }
 0x200   : > { %v2702_v37 = vpop.f32.mrf.mxu2  ;;  %v1968_v36 = vpop.f32.mrf.mxu0 }
 0x201   : > { %v3070_v9 = vpop.f32.mrf.mxu3  ;;  %v2849_v10 = vadd.f32 %v2702_v37, %v2481_v0  ;;  %v2336_v15 = vpop.f32.mrf.mxu1  ;;  %v2114_v22 = vadd.f32 %v1968_v36, %v13984_v56  ;;  %v2583_v56 = vld [vmem:[#allocation2 + $0xc1] sm:$0xff] }
 0x202   : > { %3943 = vperm.xlu0 %13776, %v14219_v25  }
 0x203   : > { %v14206_v24 = vadd.f32 %v3070_v9, %v2849_v10  ;;  %v2482_v30 = vadd.f32 %v2336_v15, %v2114_v22  ;;  %v1880_v9 = vpack.c.bf16 %v1848_v38, %v1847_v20  ;;  %v2616_v22 = vpack.c.bf16 %v2584_v42, %v2583_v56 }
 0x205   : > { %17124 = vst [vmem:[#allocation22_spill] sm:$0xff] %v14206_v24  ;;  %v2984_v24 = vpack.c.bf16 %v2952_v57, %v2951_v53  ;;  %v14247_v57 = vld [vmem:[%s17100_s7 + $0x68] sm:$0xff] }
 0x206   : > { %3933 = vperm.xlu1 %13777, %v14229_v31  }
 0x208   : > { %v2704_v0 = vpop.f32.mrf.mxu2  ;;  %v1971_v36 = vpop.f32.mrf.mxu0 }
 0x209   : > { %v3072_v37 = vpop.f32.mrf.mxu3  ;;  %v2850_v10 = vadd.f32 %v2704_v0, %v2482_v30  ;;  %v2339_v15 = vpop.f32.mrf.mxu1  ;;  %v2115_v58 = vadd.f32 %v1971_v36, %v13990_v1  ;;  %v14234_v30 = vld [vmem:[%s17100_s7 + $0x78] sm:$0xff]  ;;  %v1849_v0 = vld [vmem:[#allocation2 + $0xc0] sm:$0xff] }
 0x20a   : > { %3958 = vperm.xlu0 %13776, %v14234_v30   ;;  %v2953_v36 = vld [vmem:[#allocation2 + $0xd2] sm:$0xff] }
 0x20b   : > { %v14224_v43 = vadd.f32 %v3072_v37, %v2850_v10  ;;  %v2483_v59 = vadd.f32 %v2339_v15, %v2115_v58  ;;  %2010 = vmatmul.bf16.gmra.mxu0 %v1880_v9  ;;  %v1850_v37 = vld [vmem:[#allocation2 + $0xc8] sm:$0xff]  ;;  %v2585_v9 = vld [vmem:[#allocation2 + $0xd1] sm:$0xff]  ;;  %v2586_v10 = vld [vmem:[#allocation2 + $0xd9] sm:$0xff] }
 0x20c   : > { %2378 = vmatmul.bf16.gmra.mxu1 %v2615_v48 }
 0x20d   : > { %17125 = vst [vmem:[#allocation23_spill] sm:$0xff] %v14224_v43  ;;  %2746 = vmatmul.bf16.gmra.mxu2 %v2616_v22 }
 0x20e   : > { %3114 = vmatmul.bf16.gmra.mxu3 %v2984_v24  ;;  %v13369_v24 = vld [vmem:[%s17095_s2 + $0x30] sm:$0xff]  ;;  %3948 = vperm.xlu1 %13777, %v14247_v57  }
 0x20f   : > { %4303 = vmatpush.bf16.msra.mxu1 %v13369_v24  ;;  %v2617_v24 = vpack.c.bf16 %v2586_v10, %v2585_v9 }
 0x210   : > { %v2707_v1 = vpop.f32.mrf.mxu2  ;;  %v1973_v48 = vpop.f32.mrf.mxu0 }
 0x211   : > { %v3075_v58 = vpop.f32.mrf.mxu3  ;;  %v2851_v20 = vadd.f32 %v2707_v1, %v2483_v59  ;;  %v2341_v38 = vpop.f32.mrf.mxu1  ;;  %v2116_v56 = vadd.f32 %v1973_v48, %v13992_v19  ;;  %v14252_v59 = vld [vmem:[%s17100_s7 + $0x90] sm:$0xff]  ;;  %v2954_v19 = vld [vmem:[#allocation2 + $0xda] sm:$0xff] }
 0x212   : > { %3973 = vperm.xlu0 %13776, %v14252_v59  }
 0x213   : > { %v14242_v42 = vadd.f32 %v3075_v58, %v2851_v20  ;;  %v2484_v53 = vadd.f32 %v2341_v38, %v2116_v56  ;;  %v1881_v58 = vpack.c.bf16 %v1850_v37, %v1849_v0  ;;  %v2985_v56 = vpack.c.bf16 %v2954_v19, %v2953_v36  ;;  %4304 = vmatpush.bf16.msra.mxu1 %v13368_v39  ;;  %v14373_v39 = vld [vmem:[%s17100_s7 + $0x88] sm:$0xff] }
 0x215   : > { %17126 = vst [vmem:[#allocation24_spill] sm:$0xff] %v14242_v42 }
 0x218   : > { %v2709_v15 = vpop.f32.mrf.mxu2  ;;  %v1976_v48 = vpop.f32.mrf.mxu0 }
 0x219   : > { %v3077_v1 = vpop.f32.mrf.mxu3  ;;  %v2852_v20 = vadd.f32 %v2709_v15, %v2484_v53  ;;  %v2344_v38 = vpop.f32.mrf.mxu1  ;;  %v2117_v42 = vadd.f32 %v1976_v48, %v13995_v27  ;;  %v14267_v53 = vld [vmem:[%s17100_s7 + $0x80] sm:$0xff]  ;;  %v14272_v27 = vld [vmem:[%s17100_s7 + $0xa8] sm:$0xff] }
 0x21a   : > { %3963 = vperm.xlu1 %13777, %v14267_v53   ;;  %3988 = vperm.xlu0 %13776, %v14272_v27   ;;  %v14283_v15 = vld [vmem:[%s17100_s7 + $0x28] sm:$0xff] }
 0x21b   : > { %v14257_v43 = vadd.f32 %v3077_v1, %v2852_v20  ;;  %v2485_v14 = vadd.f32 %v2344_v38, %v2117_v42  ;;  %2015 = vmatmul.bf16.gmra.mxu0 %v1881_v58  ;;  %v14288_v1 = vld [vmem:[%s17100_s7 + $0x98] sm:$0xff]  ;;  %v1851_v58 = vld [vmem:[#allocation2 + $0xd0] sm:$0xff]  ;;  %v2587_v20 = vld [vmem:[#allocation2 + $0xe1] sm:$0xff]  ;;  %3908 = vperm.xlu2 %13778, %v14283_v15  }
 0x21c   : > { %2383 = vmatmul.bf16.gmra.mxu1 %v2616_v22  ;;  %v2588_v48 = vld [vmem:[#allocation2 + $0xe9] sm:$0xff] }
 0x21d   : > { %17127 = vst [vmem:[#allocation25_spill] sm:$0xff] %v14257_v43  ;;  %2751 = vmatmul.bf16.gmra.mxu2 %v2617_v24  ;;  %v2955_v38 = vld [vmem:[#allocation2 + $0xe2] sm:$0xff] }
 0x21e   : > { %3119 = vmatmul.bf16.gmra.mxu3 %v2985_v56  ;;  %v2956_v56 = vld [vmem:[#allocation2 + $0xea] sm:$0xff] }
 0x21f   : > { %v2986_v43 = vpack.c.bf16 %v2956_v56, %v2955_v38 }
 0x220   : > { %v2712_v22 = vpop.f32.mrf.mxu2  ;;  %v1978_v37 = vpop.f32.mrf.mxu0 }
 0x221   : > { %v3080_v42 = vpop.f32.mrf.mxu3  ;;  %v2853_v0 = vadd.f32 %v2712_v22, %v2485_v14  ;;  %v2346_v9 = vpop.f32.mrf.mxu1  ;;  %v2118_v10 = vadd.f32 %v1978_v37, %v13997_v46  ;;  %v14293_v14 = vld [vmem:[%s17100_s7 + $0xc0] sm:$0xff]  ;;  %v1852_v46 = vld [vmem:[#allocation2 + $0xd8] sm:$0xff] }
 0x222   : > { %3978 = vperm.xlu1 %13777, %v14288_v1   ;;  %4003 = vperm.xlu0 %13776, %v14293_v14  }
 0x223   : > { %v14278_v36 = vadd.f32 %v3080_v42, %v2853_v0  ;;  %v2486_v19 = vadd.f32 %v2346_v9, %v2118_v10  ;;  %v1882_v0 = vpack.c.bf16 %v1852_v46, %v1851_v58 }
 0x225   : > { %17128 = vst [vmem:[#allocation26_spill] sm:$0xff] %v14278_v36  ;;  %v2618_v36 = vpack.c.bf16 %v2588_v48, %v2587_v20 }
 0x228   : > { %v2714_v22 = vpop.f32.mrf.mxu2  ;;  %v1981_v9 = vpop.f32.mrf.mxu0 }
 0x229   : > { %v3082_v42 = vpop.f32.mrf.mxu3  ;;  %v2854_v37 = vadd.f32 %v2714_v22, %v2486_v19  ;;  %v2349_v10 = vpop.f32.mrf.mxu1  ;;  %v2119_v51 = vadd.f32 %v1981_v9, %v14003_v55  ;;  %v14307_v19 = vld [vmem:[%s17100_s7 + $0x40] sm:$0xff]  ;;  %v14312_v55 = vld [vmem:[%s17100_s7 + $0xb0] sm:$0xff]  ;;  %v14328_v22 = vld [vmem:[%s17100_s7 + $0x58] sm:$0xff] }
 0x22a   : > { %3923 = vperm.xlu2 %13778, %v14307_v19   ;;  %3993 = vperm.xlu1 %13777, %v14312_v55   ;;  %v2957_v9 = vld [vmem:[#allocation2 + $0xf2] sm:$0xff] }
 0x22b   : > { %v14299_v16 = vadd.f32 %v3082_v42, %v2854_v37  ;;  %v2487_v4 = vadd.f32 %v2349_v10, %v2119_v51  ;;  %2020 = vmatmul.bf16.gmra.mxu0 %v1882_v0  ;;  %v14319_v51 = vld [vmem:[%s17100_s7 + $0xd8] sm:$0xff]  ;;  %v1853_v42 = vld [vmem:[#allocation2 + $0xe0] sm:$0xff] }
 0x22c   : > { %2388 = vmatmul.bf16.gmra.mxu1 %v2617_v24  ;;  %4018 = vperm.xlu0 %13776, %v14319_v51   ;;  %v2589_v0 = vld [vmem:[#allocation2 + $0xf1] sm:$0xff]  ;;  %v2590_v37 = vld [vmem:[#allocation2 + $0xf9] sm:$0xff] }
 0x22d   : > { %17129 = vst [vmem:[#allocation27_spill] sm:$0xff] %v14299_v16  ;;  %2756 = vmatmul.bf16.gmra.mxu2 %v2618_v36  ;;  %v2958_v10 = vld [vmem:[#allocation2 + $0xfa] sm:$0xff] }
 0x22e   : > { %3124 = vmatmul.bf16.gmra.mxu3 %v2986_v43  ;;  %v2987_v16 = vpack.c.bf16 %v2958_v10, %v2957_v9 }
 0x230   : > { %v2717_v43 = vpop.f32.mrf.mxu2  ;;  %v1983_v46 = vpop.f32.mrf.mxu0 }
 0x231   : > { %v3085_v24 = vpop.f32.mrf.mxu3  ;;  %v2855_v58 = vadd.f32 %v2717_v43, %v2487_v4  ;;  %v2351_v20 = vpop.f32.mrf.mxu1  ;;  %v2120_v48 = vadd.f32 %v1983_v46, %v14005_v11  ;;  %v14338_v4 = vld [vmem:[%s17100_s7 + $0xf0] sm:$0xff]  ;;  %v1854_v11 = vld [vmem:[#allocation2 + $0xe8] sm:$0xff] }
 0x232   : > { %3938 = vperm.xlu2 %13778, %v14328_v22   ;;  %4008 = vperm.xlu1 %13777, %v14333_v33  }
 0x233   : > { %v14323_v38 = vadd.f32 %v3085_v24, %v2855_v58  ;;  %v2488_v56 = vadd.f32 %v2351_v20, %v2120_v48  ;;  %v1883_v58 = vpack.c.bf16 %v1854_v11, %v1853_v42  ;;  %v14362_v42 = vld [vmem:[%s17100_s7 + $0x108] sm:$0xff] }
 0x234   : > { %4033 = vperm.xlu0 %13776, %v14338_v4  }
 0x235   : > { %17130 = vst [vmem:[#allocation28_spill] sm:$0xff] %v14323_v38  ;;  %v2619_v38 = vpack.c.bf16 %v2590_v37, %v2589_v0 }
 0x238   : > { %v2719_v43 = vpop.f32.mrf.mxu2  ;;  %v1986_v20 = vpop.f32.mrf.mxu0 }
 0x239   : > { %v3087_v24 = vpop.f32.mrf.mxu3  ;;  %v2856_v46 = vadd.f32 %v2719_v43, %v2488_v56  ;;  %v2354_v48 = vpop.f32.mrf.mxu1  ;;  %v2121_v18 = vadd.f32 %v1986_v20, %v14011_v21  ;;  %v14352_v56 = vld [vmem:[%s17100_s7 + $0x70] sm:$0xff]  ;;  %v14357_v21 = vld [vmem:[%s17100_s7 + $0xe0] sm:$0xff]  ;;  %v14378_v43 = vld [vmem:[%s17100_s7 + $0xf8] sm:$0xff] }
 0x23a   : > { %3953 = vperm.xlu2 %13778, %v14352_v56   ;;  %4023 = vperm.xlu1 %13777, %v14357_v21   ;;  %v2959_v20 = vld [vmem:[#allocation2 + $0x102] sm:$0xff] }
 0x23b   : > { %v14344_v54 = vadd.f32 %v3087_v24, %v2856_v46  ;;  %v2489_v6 = vadd.f32 %v2354_v48, %v2121_v18  ;;  %2025 = vmatmul.bf16.gmra.mxu0 %v1883_v58  ;;  %v1855_v24 = vld [vmem:[#allocation2 + $0xf0] sm:$0xff]  ;;  %v2591_v58 = vld [vmem:[#allocation2 + $0x101] sm:$0xff] }
 0x23c   : > { %2393 = vmatmul.bf16.gmra.mxu1 %v2618_v36  ;;  %4048 = vperm.xlu0 %13776, %v14362_v42   ;;  %v2592_v46 = vld [vmem:[#allocation2 + $0x109] sm:$0xff] }
 0x23d   : > { %17131 = vst [vmem:[#allocation29_spill] sm:$0xff] %v14344_v54  ;;  %2761 = vmatmul.bf16.gmra.mxu2 %v2619_v38  ;;  %v2960_v48 = vld [vmem:[#allocation2 + $0x10a] sm:$0xff] }
 0x23e   : > { %3129 = vmatmul.bf16.gmra.mxu3 %v2987_v16  ;;  %v2988_v54 = vpack.c.bf16 %v2960_v48, %v2959_v20  ;;  %v14415_v48 = vld [vmem:[%s17100_s7 + $0xb8] sm:$0xff] }
 0x240   : > { %v2722_v18 = vpop.f32.mrf.mxu2  ;;  %v1988_v11 = vpop.f32.mrf.mxu0 }
 0x241   : > { %v3090_v16 = vpop.f32.mrf.mxu3  ;;  %v2857_v36 = vadd.f32 %v2722_v18, %v2489_v6  ;;  %v2356_v0 = vpop.f32.mrf.mxu1  ;;  %v2122_v37 = vadd.f32 %v1988_v11, %v14013_v41  ;;  %v14383_v6 = vld [vmem:[%s17100_s7 + $0x120] sm:$0xff]  ;;  %v1856_v41 = vld [vmem:[#allocation2 + $0xf8] sm:$0xff] }
 0x242   : > { %3968 = vperm.xlu2 %13778, %v14373_v39   ;;  %4038 = vperm.xlu1 %13777, %v14378_v43  }
 0x243   : > { %v14368_v9 = vadd.f32 %v3090_v16, %v2857_v36  ;;  %v2490_v10 = vadd.f32 %v2356_v0, %v2122_v37  ;;  %v1884_v36 = vpack.c.bf16 %v1856_v41, %v1855_v24 }
 0x244   : > { %4063 = vperm.xlu0 %13776, %v14383_v6  }
 0x245   : > { %17132 = vst [vmem:[#allocation30_spill] sm:$0xff] %v14368_v9  ;;  %v2620_v9 = vpack.c.bf16 %v2592_v46, %v2591_v58 }
 0x248   : > { %v2724_v18 = vpop.f32.mrf.mxu2  ;;  %v1991_v0 = vpop.f32.mrf.mxu0 }
 0x249   : > { %v3092_v16 = vpop.f32.mrf.mxu3  ;;  %v2858_v11 = vadd.f32 %v2724_v18, %v2490_v10  ;;  %v2359_v37 = vpop.f32.mrf.mxu1  ;;  %v2123_v2 = vadd.f32 %v1991_v0, %v14016_v50  ;;  %v14399_v10 = vld [vmem:[%s17100_s7 + $0x110] sm:$0xff]  ;;  %v14404_v50 = vld [vmem:[%s17100_s7 + $0x138] sm:$0xff]  ;;  %v14420_v18 = vld [vmem:[%s17100_s7 + $0x128] sm:$0xff] }
 0x24a   : > { %17134 = vst [vmem:[#allocation32_spill] sm:$0xff] %v14399_v10  ;;  %3983 = vperm.xlu2 %13778, %v14394_v60   ;;  %4053 = vperm.xlu1 %13777, %v14399_v10   ;;  %v2961_v0 = vld [vmem:[#allocation2 + $0x112] sm:$0xff] }
 0x24b   : > { %v14389_v35 = vadd.f32 %v3092_v16, %v2858_v11  ;;  %v2491_v28 = vadd.f32 %v2359_v37, %v2123_v2  ;;  %2030 = vmatmul.bf16.gmra.mxu0 %v1884_v36  ;;  %17135 = vst [vmem:[#allocation33_spill] sm:$0xff] %v14404_v50  ;;  %v1857_v16 = vld [vmem:[#allocation2 + $0x100] sm:$0xff]  ;;  %v1858_v36 = vld [vmem:[#allocation2 + $0x108] sm:$0xff] }
 0x24c   : > { %2398 = vmatmul.bf16.gmra.mxu1 %v2619_v38  ;;  %4078 = vperm.xlu0 %13776, %v14404_v50   ;;  %17137 = vst [vmem:[#allocation35_spill] sm:$0xff] %v14420_v18  ;;  %v2594_v11 = vld [vmem:[#allocation2 + $0x119] sm:$0xff] }
 0x24d   : > { %17133 = vst [vmem:[#allocation31_spill] sm:$0xff] %v14389_v35  ;;  %2766 = vmatmul.bf16.gmra.mxu2 %v2620_v9  ;;  %v2962_v37 = vld [vmem:[#allocation2 + $0x11a] sm:$0xff]  ;;  %v13356_v35 = vld [vmem:[%s17094_s1 + $0x208] sm:$0xff] }
 0x24e   : > { %3134 = vmatmul.bf16.gmra.mxu3 %v2988_v54  ;;  %3435 = vmatpush.bf16.msra.mxu0 %v13356_v35 }
 0x250   : > { %v2727_v2 = vpop.f32.mrf.mxu2  ;;  %v1993_v24 = vpop.f32.mrf.mxu0 }
 0x251   : > { %v3095_v54 = vpop.f32.mrf.mxu3  ;;  %v2859_v38 = vadd.f32 %v2727_v2, %v2491_v28  ;;  %v2361_v41 = vpop.f32.mrf.mxu1  ;;  %v2124_v58 = vadd.f32 %v1993_v24, %v14021_v8  ;;  %v2593_v28 = vld [vmem:[#allocation2 + $0x111] sm:$0xff] }
 0x252   : > { %3998 = vperm.xlu2 %13778, %v14415_v48   ;;  %4068 = vperm.xlu1 %13777, %v14420_v18  }
 0x253   : > { %v14410_v46 = vadd.f32 %v3095_v54, %v2859_v38  ;;  %v2492_v20 = vadd.f32 %v2361_v41, %v2124_v58  ;;  %v1885_v54 = vpack.c.bf16 %v1858_v36, %v1857_v16  ;;  %v2621_v58 = vpack.c.bf16 %v2594_v11, %v2593_v28  ;;  %v13367_v11 = vld [vmem:[%s17095_s2 + $0x20] sm:$0xff] }
 0x254   : > { %7616 = vperm.xlu0 %13776, %v14165_v3   ;;  %v14434_v3 = vld [vmem:[%s17100_s7 + $0xd0] sm:$0xff]  ;;  %4305 = vmatpush.bf16.msra.mxu1 %v13367_v11 }
 0x255   : > { %17136 = vst [vmem:[#allocation34_spill] sm:$0xff] %v14410_v46  ;;  %v2989_v46 = vpack.c.bf16 %v2962_v37, %v2961_v0  ;;  %v14453_v0 = vld [vmem:[%s17100_s7 + $0xe8] sm:$0xff]  ;;  %v1860_v37 = vld [vmem:[#allocation2 + $0x118] sm:$0xff] }
 0x258   : > { %v2729_v8 = vpop.f32.mrf.mxu2  ;;  %v1996_v24 = vpop.f32.mrf.mxu0 }
 0x259   : > { %v3097_v2 = vpop.f32.mrf.mxu3  ;;  %v2860_v38 = vadd.f32 %v2729_v8, %v2492_v20  ;;  %v2364_v41 = vpop.f32.mrf.mxu1  ;;  %v2125_v50 = vadd.f32 %v1996_v24, %v14024_v17  ;;  %v14439_v20 = vld [vmem:[%s17100_s7 + $0x140] sm:$0xff] }
 0x25a   : > { %4013 = vperm.xlu2 %13778, %v14434_v3   ;;  %4083 = vperm.xlu1 %13777, %v14439_v20   ;;  %v2595_v8 = vld [vmem:[#allocation2 + $0x121] sm:$0xff] }
 0x25b   : > { %v14429_v10 = vadd.f32 %v3097_v2, %v2860_v38  ;;  %v2493_v18 = vadd.f32 %v2364_v41, %v2125_v50  ;;  %2035 = vmatmul.bf16.gmra.mxu0 %v1885_v54  ;;  %v2963_v2 = vld [vmem:[#allocation2 + $0x122] sm:$0xff]  ;;  %v2964_v54 = vld [vmem:[#allocation2 + $0x12a] sm:$0xff] }
 0x25c   : > { %2403 = vmatmul.bf16.gmra.mxu1 %v2620_v9  ;;  %7631 = vperm.xlu0 %13776, %v14196_v7   ;;  %v1859_v7 = vld [vmem:[#allocation2 + $0x110] sm:$0xff] }
 0x25d   : > { %2771 = vmatmul.bf16.gmra.mxu2 %v2621_v58  ;;  %v1886_v24 = vpack.c.bf16 %v1860_v37, %v1859_v7 }
 0x25e   : > { %3139 = vmatmul.bf16.gmra.mxu3 %v2989_v46 }
 0x260   : > { %v2732_v17 = vpop.f32.mrf.mxu2  ;;  %v1998_v50 = vpop.f32.mrf.mxu0 }
 0x261   : > { %v3100_v35 = vpop.f32.mrf.mxu3  ;;  %v2861_v9 = vadd.f32 %v2732_v17, %v2493_v18  ;;  %v2366_v46 = vpop.f32.mrf.mxu1  ;;  %v2126_v16 = vadd.f32 %v1998_v50, %v14029_v40  ;;  %v2596_v18 = vld [vmem:[#allocation2 + $0x129] sm:$0xff]  ;;  %v2990_v50 = vpack.c.bf16 %v2964_v54, %v2963_v2  ;;  %v2597_v54 = vld [vmem:[#allocation2 + $0x131] sm:$0xff] }
 0x262   : > { %4028 = vperm.xlu2 %13778, %v14453_v0   ;;  %7621 = vperm.xlu1 %13777, %v14173_v45   ;;  %v14464_v45 = vld [vmem:[%s17100_s7 + $0x100] sm:$0xff]  ;;  %v1862_v2 = vld [vmem:[#allocation2 + $0x128] sm:$0xff] }
 0x263   : > { %v14445_v36 = vadd.f32 %v3100_v35, %v2861_v9  ;;  %v2494_v28 = vadd.f32 %v2366_v46, %v2126_v16  ;;  %v2622_v9 = vpack.c.bf16 %v2596_v18, %v2595_v8 }
 0x264   : > { %7646 = vperm.xlu0 %13776, %v14186_v61  }
 0x265   : > { %17138 = vst [vmem:[#allocation36_spill] sm:$0xff] %v14445_v36 }
 0x268   : > { %v2734_v40 = vpop.f32.mrf.mxu2  ;;  %v2001_v17 = vpop.f32.mrf.mxu0 }
 0x269   : > { %v3102_v38 = vpop.f32.mrf.mxu3  ;;  %v2862_v41 = vadd.f32 %v2734_v40, %v2494_v28  ;;  %v2369_v35 = vpop.f32.mrf.mxu1  ;;  %v2127_v46 = vadd.f32 %v2001_v17, %v14035_v52  ;;  %v2598_v40 = vld [vmem:[#allocation2 + $0x139] sm:$0xff] }
 0x26a   : > { %4043 = vperm.xlu2 %13778, %v14464_v45   ;;  %7636 = vperm.xlu1 %13777, %v14262_v5   ;;  %v13386_v5 = vld [vmem:[%s17095_s2 + $0xb8] sm:$0xff] }
 0x26b   : > { %v14459_v16 = vadd.f32 %v3102_v38, %v2862_v41  ;;  %v2495_v36 = vadd.f32 %v2369_v35, %v2127_v46  ;;  %2040 = vmatmul.bf16.gmra.mxu0 %v1886_v24  ;;  %4954 = vmatpush.bf16.msra.mxu3 %v13386_v5  ;;  %v2965_v38 = vld [vmem:[#allocation2 + $0x132] sm:$0xff] }
 0x26c   : > { %2408 = vmatmul.bf16.gmra.mxu1 %v2621_v58  ;;  %7661 = vperm.xlu0 %13776, %v14201_v34   ;;  %v13378_v58 = vld [vmem:[%s17095_s2 + $0x78] sm:$0xff] }
 0x26d   : > { %2776 = vmatmul.bf16.gmra.mxu2 %v2622_v9  ;;  %v14481_v34 = vld [vmem:[%s17100_s7 + $0x118] sm:$0xff] }
 0x26e   : > { %3144 = vmatmul.bf16.gmra.mxu3 %v2990_v50  ;;  %4586 = vmatpush.bf16.msra.mxu2 %v13378_v58 }
 0x270   : > { %v2737_v61 = vpop.f32.mrf.mxu2  ;;  %v2003_v11 = vpop.f32.mrf.mxu0 }
 0x271   : > { %v3105_v52 = vpop.f32.mrf.mxu3  ;;  %v2863_v28 = vadd.f32 %v2737_v61, %v2495_v36  ;;  %v2371_v7 = vpop.f32.mrf.mxu1  ;;  %v2128_v37 = vadd.f32 %v2003_v11, %v14040_v12  ;;  %v1861_v36 = vld [vmem:[#allocation2 + $0x120] sm:$0xff]  ;;  %v2623_v61 = vpack.c.bf16 %v2598_v40, %v2597_v54  ;;  %v1864_v54 = vld [vmem:[#allocation2 + $0x138] sm:$0xff] }
 0x272   : > { %v2966_v12 = vld [vmem:[#allocation2 + $0x13a] sm:$0xff]  ;;  %4058 = vperm.xlu2 %13778, %v14481_v34   ;;  %7651 = vperm.xlu1 %13777, %v14214_v63   ;;  %v1887_v17 = vpack.c.bf16 %v1862_v2, %v1861_v36  ;;  %v14492_v63 = vld [vmem:[%s17100_s7 + $0x130] sm:$0xff] }
 0x273   : > { %v14473_v8 = vadd.f32 %v3105_v52, %v2863_v28  ;;  %v2496_v18 = vadd.f32 %v2371_v7, %v2128_v37  ;;  %v2991_v52 = vpack.c.bf16 %v2966_v12, %v2965_v38  ;;  %v13355_v36 = vld [vmem:[%s17094_s1 + $0x200] sm:$0xff]  ;;  %v2600_v38 = vld [vmem:[#allocation2 + $0x149] sm:$0xff] }
 0x274   : > { %7676 = vperm.xlu0 %13776, %v14219_v25   ;;  %v2599_v40 = vld [vmem:[#allocation2 + $0x141] sm:$0xff]  ;;  %3436 = vmatpush.bf16.msra.mxu0 %v13355_v36 }
 0x275   : > { %v2967_v12 = vld [vmem:[#allocation2 + $0x142] sm:$0xff] }
 0x276   : > { %v1865_v36 = vld [vmem:[#allocation2 + $0x140] sm:$0xff] }
 0x278   : > { %v2739_v24 = vpop.f32.mrf.mxu2  ;;  %v2006_v50 = vpop.f32.mrf.mxu0 }
 0x279   : > { %v3107_v41 = vpop.f32.mrf.mxu3  ;;  %v2864_v35 = vadd.f32 %v2739_v24, %v2496_v18  ;;  %v2374_v46 = vpop.f32.mrf.mxu1  ;;  %v2129_v28 = vadd.f32 %v2006_v50, %v14043_v23  ;;  %v2968_v24 = vld [vmem:[#allocation2 + $0x14a] sm:$0xff] }
 0x27a   : > { %4073 = vperm.xlu2 %13778, %v14492_v63   ;;  %7666 = vperm.xlu1 %13777, %v14229_v31   ;;  %v14506_v31 = vld [vmem:[%s17100_s7 + $0x148] sm:$0xff] }
 0x27b   : > { %v14487_v11 = vadd.f32 %v3107_v41, %v2864_v35  ;;  %v2497_v7 = vadd.f32 %v2374_v46, %v2129_v28  ;;  %2045 = vmatmul.bf16.gmra.mxu0 %v1887_v17  ;;  %v2992_v28 = vpack.c.bf16 %v2968_v24, %v2967_v12 }
 0x27c   : > { %2413 = vmatmul.bf16.gmra.mxu1 %v2622_v9  ;;  %7691 = vperm.xlu0 %13776, %v14234_v30   ;;  %v1863_v30 = vld [vmem:[#allocation2 + $0x130] sm:$0xff] }
 0x27d   : > { %2781 = vmatmul.bf16.gmra.mxu2 %v2623_v61  ;;  %v1888_v17 = vpack.c.bf16 %v1864_v54, %v1863_v30  ;;  %v2601_v30 = vld [vmem:[#allocation2 + $0x151] sm:$0xff] }
 0x27e   : > { %3149 = vmatmul.bf16.gmra.mxu3 %v2991_v52  ;;  %v2624_v52 = vpack.c.bf16 %v2600_v38, %v2599_v40  ;;  %v2969_v54 = vld [vmem:[#allocation2 + $0x152] sm:$0xff]  ;;  %v2970_v40 = vld [vmem:[#allocation2 + $0x15a] sm:$0xff] }
 0x280   : > { %v2742_v25 = vpop.f32.mrf.mxu2  ;;  %v2008_v37 = vpop.f32.mrf.mxu0 }
 0x281   : > { %v3110_v23 = vpop.f32.mrf.mxu3  ;;  %v2865_v58 = vadd.f32 %v2742_v25, %v2497_v7  ;;  %v2376_v5 = vpop.f32.mrf.mxu1  ;;  %v2130_v9 = vadd.f32 %v2008_v37, %v14048_v47 }
 0x282   : > { %4088 = vperm.xlu2 %13778, %v14506_v31   ;;  %7681 = vperm.xlu1 %13777, %v14247_v57   ;;  %v13366_v57 = vld [vmem:[%s17095_s2 + $0x18] sm:$0xff] }
 0x283   : > { %v14498_v18 = vadd.f32 %v3110_v23, %v2865_v58  ;;  %v2498_v2 = vadd.f32 %v2376_v5, %v2130_v9  ;;  %4306 = vmatpush.bf16.msra.mxu1 %v13366_v57  ;;  %v2603_v57 = vld [vmem:[#allocation2 + $0x161] sm:$0xff] }
 0x284   : > { %7706 = vperm.xlu0 %13776, %v14252_v59  }
 0x288   : > { %v2744_v47 = vpop.f32.mrf.mxu2  ;;  %v2011_v50 = vpop.f32.mrf.mxu0 }
 0x289   : > { %v3112_v41 = vpop.f32.mrf.mxu3  ;;  %v2866_v35 = vadd.f32 %v2744_v47, %v2498_v2  ;;  %v2379_v46 = vpop.f32.mrf.mxu1  ;;  %v2131_v7 = vadd.f32 %v2011_v50, %v14060_v62  ;;  %v1866_v2 = vld [vmem:[#allocation2 + $0x148] sm:$0xff]  ;;  %v2993_v47 = vpack.c.bf16 %v2970_v40, %v2969_v54 }
 0x28a   : > { %7626 = vperm.xlu2 %13778, %v14181_v32   ;;  %7696 = vperm.xlu1 %13777, %v14267_v53   ;;  %v2602_v32 = vld [vmem:[#allocation2 + $0x159] sm:$0xff]  ;;  %v1889_v38 = vpack.c.bf16 %v1866_v2, %v1865_v36 }
 0x28b   : > { %v14512_v25 = vadd.f32 %v3112_v41, %v2866_v35  ;;  %v2499_v23 = vadd.f32 %v2379_v46, %v2131_v7  ;;  %2050 = vmatmul.bf16.gmra.mxu0 %v1888_v17  ;;  %v2625_v24 = vpack.c.bf16 %v2602_v32, %v2601_v30  ;;  %v13377_v17 = vld [vmem:[%s17095_s2 + $0x70] sm:$0xff] }
 0x28c   : > { %2418 = vmatmul.bf16.gmra.mxu1 %v2623_v61  ;;  %7721 = vperm.xlu0 %13776, %v14272_v27   ;;  %v1867_v7 = vld [vmem:[#allocation2 + $0x150] sm:$0xff] }
 0x28d   : > { %2786 = vmatmul.bf16.gmra.mxu2 %v2624_v52 }
 0x28e   : > { %3154 = vmatmul.bf16.gmra.mxu3 %v2992_v28  ;;  %4587 = vmatpush.bf16.msra.mxu2 %v13377_v17 }
 0x290   : > { %v2747_v59 = vpop.f32.mrf.mxu2  ;;  %v2013_v37 = vpop.f32.mrf.mxu0 }
 0x291   : > { %v3115_v58 = vpop.f32.mrf.mxu3  ;;  %v2867_v62 = vadd.f32 %v2747_v59, %v2499_v23  ;;  %v14520_v5 = vpop.f32.mrf.mxu1  ;;  %v14523_v61 = vadd.f32 %v2013_v37, %v14074_v29  ;;  %v1868_v23 = vld [vmem:[#allocation2 + $0x158] sm:$0xff]  ;;  %v2971_v59 = vld [vmem:[#allocation2 + $0x162] sm:$0xff] }
 0x292   : > { %7641 = vperm.xlu2 %13778, %v14283_v15   ;;  %7711 = vperm.xlu1 %13777, %v14288_v1   ;;  %v13385_v1 = vld [vmem:[%s17095_s2 + $0xb0] sm:$0xff] }
 0x293   : > { %v14525_v9 = vadd.f32 %v3115_v58, %v2867_v62  ;;  %4955 = vmatpush.bf16.msra.mxu3 %v13385_v1  ;;  %v2972_v58 = vld [vmem:[#allocation2 + $0x16a] sm:$0xff]  ;;  %v1890_v62 = vpack.c.bf16 %v1868_v23, %v1867_v7  ;;  %v17141_v23 = vld [vmem:[#allocation33_spill] sm:$0xff] }
 0x294   : > { %7736 = vperm.xlu0 %13776, %v14293_v14   ;;  %v2994_v2 = vpack.c.bf16 %v2972_v58, %v2971_v59  ;;  %v17142_v58 = vld [vmem:[#allocation5_spill] sm:$0xff] }
 0x298   : > { %v14529_v53 = vpop.f32.mrf.mxu2  ;;  %v2016_v29 = vpop.f32.mrf.mxu0 }
 0x299   : > { %v14531_v27 = vpop.f32.mrf.mxu3  ;;  %v2384_v12 = vpop.f32.mrf.mxu1  ;;  %v2133_v41 = vadd.f32 %v2016_v29, %v14091_v44  ;;  %v1869_v29 = vld [vmem:[#allocation2 + $0x160] sm:$0xff] }
 0x29a   : > { %7656 = vperm.xlu2 %13778, %v14307_v19   ;;  %7726 = vperm.xlu1 %13777, %v14312_v55   ;;  %v2604_v19 = vld [vmem:[#allocation2 + $0x169] sm:$0xff] }
 0x29b   : > { %v2501_v15 = vadd.f32 %v2384_v12, %v2133_v41  ;;  %2055 = vmatmul.bf16.gmra.mxu0 %v1889_v38  ;;  %v2626_v36 = vpack.c.bf16 %v2604_v19, %v2603_v57  ;;  %v1870_v12 = vld [vmem:[#allocation2 + $0x168] sm:$0xff]  ;;  %v2974_v41 = vld [vmem:[#allocation2 + $0x17a] sm:$0xff] }
 0x29c   : > { %2423 = vmatmul.bf16.gmra.mxu1 %v2624_v52  ;;  %7751 = vperm.xlu0 %13776, %v14319_v51   ;;  %v1891_v17 = vpack.c.bf16 %v1870_v12, %v1869_v29  ;;  %v17144_v29 = vld [vmem:[#allocation6_spill] sm:$0xff] }
 0x29d   : > { %2791 = vmatmul.bf16.gmra.mxu2 %v2625_v24 }
 0x29e   : > { %3159 = vmatmul.bf16.gmra.mxu3 %v2993_v47  ;;  %v2606_v47 = vld [vmem:[#allocation2 + $0x179] sm:$0xff] }
 0x2a0   : > { %v2752_v44 = vpop.f32.mrf.mxu2  ;;  %v2018_v50 = vpop.f32.mrf.mxu0 }
 0x2a1   : > { %v3120_v14 = vpop.f32.mrf.mxu3  ;;  %v2869_v35 = vadd.f32 %v2752_v44, %v2501_v15  ;;  %v14544_v46 = vpop.f32.mrf.mxu1  ;;  %v14547_v52 = vadd.f32 %v2018_v50, %v14111_v13 }
 0x2a2   : > { %7671 = vperm.xlu2 %13778, %v14328_v22   ;;  %7741 = vperm.xlu1 %13777, %v14333_v33  }
 0x2a3   : > { %v14549_v28 = vadd.f32 %v3120_v14, %v2869_v35  ;;  %v13365_v14 = vld [vmem:[%s17095_s2 + $0x10] sm:$0xff] }
 0x2a4   : > { %7766 = vperm.xlu0 %13776, %v14338_v4   ;;  %v17139_v35 = vld [vmem:[#allocation4_spill] sm:$0xff]  ;;  %4307 = vmatpush.bf16.msra.mxu1 %v13365_v14 }
 0x2a5   : > { %v3304_v14 = vld [vmem:[#allocation2 + $0x4b] sm:$0xff] }
 0x2a8   : > { %v14553_v55 = vpop.f32.mrf.mxu2  ;;  %v2021_v13 = vpop.f32.mrf.mxu0 }
 0x2a9   : > { %v14555_v51 = vpop.f32.mrf.mxu3  ;;  %v2389_v37 = vpop.f32.mrf.mxu1  ;;  %v2135_v30 = vadd.f32 %v2021_v13, %v14116_v26 }
 0x2aa   : > { %7686 = vperm.xlu2 %13778, %v14352_v56   ;;  %7756 = vperm.xlu1 %13777, %v14357_v21   ;;  %v2973_v56 = vld [vmem:[#allocation2 + $0x172] sm:$0xff] }
 0x2ab   : > { %v2503_v32 = vadd.f32 %v2389_v37, %v2135_v30  ;;  %2060 = vmatmul.bf16.gmra.mxu0 %v1890_v62  ;;  %v2995_v44 = vpack.c.bf16 %v2974_v41, %v2973_v56  ;;  %v13376_v37 = vld [vmem:[%s17095_s2 + $0x68] sm:$0xff] }
 0x2ac   : > { %2428 = vmatmul.bf16.gmra.mxu1 %v2625_v24  ;;  %7781 = vperm.xlu0 %13776, %v14362_v42   ;;  %v2605_v24 = vld [vmem:[#allocation2 + $0x171] sm:$0xff]  ;;  %v17143_v30 = vld [vmem:[#allocation35_spill] sm:$0xff] }
 0x2ad   : > { %2796 = vmatmul.bf16.gmra.mxu2 %v2626_v36  ;;  %v2627_v1 = vpack.c.bf16 %v2606_v47, %v2605_v24 }
 0x2ae   : > { %3164 = vmatmul.bf16.gmra.mxu3 %v2994_v2  ;;  %v3302_v2 = vld [vmem:[#allocation2 + $0x3b] sm:$0xff]  ;;  %4588 = vmatpush.bf16.msra.mxu2 %v13376_v37 }
 0x2b0   : > { %v2757_v22 = vpop.f32.mrf.mxu2  ;;  %v2023_v54 = vpop.f32.mrf.mxu0 }
 0x2b1   : > { %v3125_v33 = vpop.f32.mrf.mxu3  ;;  %v2871_v4 = vadd.f32 %v2757_v22, %v2503_v32  ;;  %v14562_v40 = vpop.f32.mrf.mxu1  ;;  %v14565_v38 = vadd.f32 %v2023_v54, %v14118_v49 }
 0x2b2   : > { %7701 = vperm.xlu2 %13778, %v14373_v39   ;;  %7771 = vperm.xlu1 %13777, %v14378_v43   ;;  %v17140_v43 = vld [vmem:[#allocation32_spill] sm:$0xff] }
 0x2b3   : > { %v14567_v26 = vadd.f32 %v3125_v33, %v2871_v4 }
 0x2b4   : > { %7796 = vperm.xlu0 %13776, %v14383_v6  }
 0x2b8   : > { %v14571_v21 = vpop.f32.mrf.mxu2  ;;  %v2026_v49 = vpop.f32.mrf.mxu0 }
 0x2b9   : > { %v14573_v42 = vpop.f32.mrf.mxu3  ;;  %v2394_v15 = vpop.f32.mrf.mxu1  ;;  %v2137_v50 = vadd.f32 %v2026_v49, %v17139_v35  ;;  %v17145_v49 = vld [vmem:[#allocation7_spill] sm:$0xff] }
 0x2ba   : > { %7716 = vperm.xlu2 %13778, %v14394_v60   ;;  %7786 = vperm.xlu1 %13777, %v17140_v43   ;;  %v13384_v60 = vld [vmem:[%s17095_s2 + $0xa8] sm:$0xff]  ;;  %v17146_v43 = vld [vmem:[#allocation8_spill] sm:$0xff] }
 0x2bb   : > { %v2505_v39 = vadd.f32 %v2394_v15, %v2137_v50  ;;  %2065 = vmatmul.bf16.gmra.mxu0 %v1891_v17  ;;  %4956 = vmatpush.bf16.msra.mxu3 %v13384_v60 }
 0x2bc   : > { %2433 = vmatmul.bf16.gmra.mxu1 %v2626_v36  ;;  %7811 = vperm.xlu0 %13776, %v17141_v23   ;;  %v3301_v36 = vld [vmem:[#allocation2 + $0x33] sm:$0xff] }
 0x2bd   : > { %2801 = vmatmul.bf16.gmra.mxu2 %v2627_v1  ;;  %v3343_v33 = vpack.c.bf16 %v3302_v2, %v3301_v36  ;;  %v13364_v2 = vld [vmem:[%s17095_s2 + $0x8] sm:$0xff] }
 0x2be   : > { %3169 = vmatmul.bf16.gmra.mxu3 %v2995_v44  ;;  %v3303_v44 = vld [vmem:[#allocation2 + $0x43] sm:$0xff]  ;;  %4308 = vmatpush.bf16.msra.mxu1 %v13364_v2 }
 0x2c0   : > { %v2762_v6 = vpop.f32.mrf.mxu2  ;;  %v2028_v19 = vpop.f32.mrf.mxu0 }
 0x2c1   : > { %v3130_v7 = vpop.f32.mrf.mxu3  ;;  %v2873_v57 = vadd.f32 %v2762_v6, %v2505_v39  ;;  %v14583_v59 = vpop.f32.mrf.mxu1  ;;  %v14586_v62 = vadd.f32 %v2028_v19, %v17142_v58 }
 0x2c2   : > { %7731 = vperm.xlu2 %13778, %v14415_v48   ;;  %7801 = vperm.xlu1 %13777, %v17143_v30   ;;  %v3305_v30 = vld [vmem:[#allocation2 + $0x53] sm:$0xff] }
 0x2c3   : > { %v14588_v13 = vadd.f32 %v3130_v7, %v2873_v57 }
 0x2c8   : > { %v14598_v32 = vpop.f32.mrf.mxu2  ;;  %v2031_v4 = vpop.f32.mrf.mxu0 }
 0x2c9   : > { %v14600_v22 = vpop.f32.mrf.mxu3  ;;  %v2399_v54 = vpop.f32.mrf.mxu1  ;;  %v2139_v12 = vadd.f32 %v2031_v4, %v17144_v29 }
 0x2ca   : > { %7746 = vperm.xlu2 %13778, %v14434_v3   ;;  %7816 = vperm.xlu1 %13777, %v14439_v20   ;;  %v3344_v20 = vpack.c.bf16 %v3304_v14, %v3303_v44 }
 0x2cb   : > { %v2507_v24 = vadd.f32 %v2399_v54, %v2139_v12  ;;  %3437 = vmatmul.bf16.vlgmr.msra.gmra.mxu0 %v3343_v33  ;;  %v3306_v33 = vld [vmem:[#allocation2 + $0x5b] sm:$0xff] }
 0x2cc   : > { %v3345_v54 = vpack.c.bf16 %v3306_v33, %v3305_v30 }
 0x2d0   : > { %v2767_v47 = vpop.f32.mrf.mxu2  ;;  %v2033_v41 = vpop.f32.mrf.mxu0 }
 0x2d1   : > { %v3135_v56 = vpop.f32.mrf.mxu3  ;;  %v2875_v48 = vadd.f32 %v2767_v47, %v2507_v24  ;;  %v14605_v17 = vpop.f32.mrf.mxu1  ;;  %v14608_v15 = vadd.f32 %v2033_v41, %v17145_v49  ;;  %v17148_v24 = vld [vmem:[#allocation10_spill] sm:$0xff] }
 0x2d2   : > { %7761 = vperm.xlu2 %13778, %v14453_v0   ;;  %v17147_v0 = vld [vmem:[#allocation9_spill] sm:$0xff] }
 0x2d3   : > { %v14610_v1 = vadd.f32 %v3135_v56, %v2875_v48  ;;  %v13375_v48 = vld [vmem:[%s17095_s2 + $0x60] sm:$0xff] }
 0x2d4   : > { %4589 = vmatpush.bf16.msra.mxu2 %v13375_v48  ;;  %v3309_v48 = vld [vmem:[#allocation2 + $0x73] sm:$0xff] }
 0x2d8   : > { %v14613_v35 = vpop.f32.mrf.mxu2  ;;  %v2036_v50 = vpop.f32.mrf.mxu0 }
 0x2d9   : > { %v14615_v3 = vpop.f32.mrf.mxu3  ;;  %v2404_v39 = vpop.f32.mrf.mxu1  ;;  %v2141_v6 = vadd.f32 %v2036_v50, %v17146_v43  ;;  %v17149_v50 = vld [vmem:[#allocation11_spill] sm:$0xff] }
 0x2da   : > { %7776 = vperm.xlu2 %13778, %v14464_v45  }
 0x2db   : > { %v2509_v7 = vadd.f32 %v2404_v39, %v2141_v6  ;;  %3442 = vmatmul.bf16.gmra.mxu0 %v3344_v20  ;;  %v13383_v20 = vld [vmem:[%s17095_s2 + $0xa0] sm:$0xff] }
 0x2dc   : > { %4957 = vmatpush.bf16.msra.mxu3 %v13383_v20  ;;  %v3307_v6 = vld [vmem:[#allocation2 + $0x63] sm:$0xff] }
 0x2e0   : > { %v2772_v23 = vpop.f32.mrf.mxu2  ;;  %v2038_v58 = vpop.f32.mrf.mxu0 }
 0x2e1   : > { %v3140_v57 = vpop.f32.mrf.mxu3  ;;  %v2877_v19 = vadd.f32 %v2772_v23, %v2509_v7  ;;  %v14619_v37 = vpop.f32.mrf.mxu1  ;;  %v14622_v60 = vadd.f32 %v2038_v58, %v17147_v0  ;;  %v3308_v7 = vld [vmem:[#allocation2 + $0x6b] sm:$0xff] }
 0x2e2   : > { %7791 = vperm.xlu2 %13778, %v14481_v34   ;;  %v17152_v0 = vld [vmem:[#allocation12_spill] sm:$0xff] }
 0x2e3   : > { %v14624_v36 = vadd.f32 %v3140_v57, %v2877_v19  ;;  %v3346_v57 = vpack.c.bf16 %v3308_v7, %v3307_v6  ;;  %v17159_v6 = vld [vmem:[#allocation14_spill] sm:$0xff] }
 0x2e8   : > { %v14630_v45 = vpop.f32.mrf.mxu2  ;;  %v2041_v29 = vpop.f32.mrf.mxu0 }
 0x2e9   : > { %v14632_v4 = vpop.f32.mrf.mxu3  ;;  %v2409_v12 = vpop.f32.mrf.mxu1  ;;  %v2143_v47 = vadd.f32 %v2041_v29, %v17148_v24 }
 0x2ea   : > { %7806 = vperm.xlu2 %13778, %v14492_v63  }
 0x2eb   : > { %v2511_v56 = vadd.f32 %v2409_v12, %v2143_v47  ;;  %3447 = vmatmul.bf16.gmra.mxu0 %v3345_v54  ;;  %v17154_v47 = vld [vmem:[#allocation13_spill] sm:$0xff] }
 0x2f0   : > { %v2777_v41 = vpop.f32.mrf.mxu2  ;;  %v2043_v44 = vpop.f32.mrf.mxu0 }
 0x2f1   : > { %v3145_v34 = vpop.f32.mrf.mxu3  ;;  %v2879_v49 = vadd.f32 %v2777_v41, %v2511_v56  ;;  %v14639_v14 = vpop.f32.mrf.mxu1  ;;  %v14645_v39 = vadd.f32 %v2043_v44, %v17149_v50  ;;  %v3310_v41 = vld [vmem:[#allocation2 + $0x7b] sm:$0xff] }
 0x2f2   : > { %7821 = vperm.xlu2 %13778, %v14506_v31   ;;  %v3347_v44 = vpack.c.bf16 %v3310_v41, %v3309_v48  ;;  %v3312_v48 = vld [vmem:[#allocation2 + $0x8b] sm:$0xff] }
 0x2f3   : > { %v14647_v43 = vadd.f32 %v3145_v34, %v2879_v49 }
 0x2f8   : > { %v14650_v63 = vpop.f32.mrf.mxu2  ;;  %v2046_v19 = vpop.f32.mrf.mxu0 }
 0x2f9   : > { %17150 = vst [vmem:[#allocation4_spill] sm:$0xff] %v14650_v63  ;;  %v14652_v23 = vpop.f32.mrf.mxu3  ;;  %v2414_v58 = vpop.f32.mrf.mxu1  ;;  %v2145_v2 = vadd.f32 %v2046_v19, %v17152_v0  ;;  %v13363_v19 = vld [vmem:[%s17095_s2] sm:$0xff] }
 0x2fa   : > { %17151 = vst [vmem:[#allocation32_spill] sm:$0xff] %v14652_v23  ;;  %4309 = vmatpush.bf16.msra.mxu1 %v13363_v19 }
 0x2fb   : > { %v2513_v30 = vadd.f32 %v2414_v58, %v2145_v2  ;;  %3452 = vmatmul.bf16.gmra.mxu0 %v3346_v57 }
 0x300   : > { %v2782_v33 = vpop.f32.mrf.mxu2  ;;  %v2048_v12 = vpop.f32.mrf.mxu0 }
 0x301   : > { %v3150_v54 = vpop.f32.mrf.mxu3  ;;  %v2881_v29 = vadd.f32 %v2782_v33, %v2513_v30  ;;  %v14655_v24 = vpop.f32.mrf.mxu1  ;;  %v14658_v56 = vadd.f32 %v2048_v12, %v17154_v47  ;;  %v3311_v47 = vld [vmem:[#allocation2 + $0x83] sm:$0xff] }
 0x302   : > { %17153 = vst [vmem:[#allocation33_spill] sm:$0xff] %v14655_v24 }
 0x303   : > { %17155 = vst [vmem:[#allocation5_spill] sm:$0xff] %v14658_v56  ;;  %v14660_v31 = vadd.f32 %v3150_v54, %v2881_v29  ;;  %v17161_v54 = vld [vmem:[#allocation15_spill] sm:$0xff] }
 0x305   : > { %17156 = vst [vmem:[#allocation35_spill] sm:$0xff] %v14660_v31 }
 0x308   : > { %v14662_v34 = vpop.f32.mrf.mxu2  ;;  %v2051_v20 = vpop.f32.mrf.mxu0 }
 0x309   : > { %17157 = vst [vmem:[#allocation6_spill] sm:$0xff] %v14662_v34  ;;  %v14664_v49 = vpop.f32.mrf.mxu3  ;;  %v2419_v50 = vpop.f32.mrf.mxu1  ;;  %v2147_v7 = vadd.f32 %v2051_v20, %v17159_v6  ;;  %v3348_v20 = vpack.c.bf16 %v3312_v48, %v3311_v47  ;;  %v13372_v48 = vld [vmem:[%s17095_s2 + $0x48] sm:$0xff] }
 0x30a   : > { %17158 = vst [vmem:[#allocation7_spill] sm:$0xff] %v14664_v49  ;;  %v4176_v49 = vld [vmem:[#allocation2 + $0x15] sm:$0xff] }
 0x30b   : > { %v2515_v57 = vadd.f32 %v2419_v50, %v2147_v7  ;;  %3457 = vmatmul.bf16.gmra.mxu0 %v3347_v44  ;;  %v13374_v50 = vld [vmem:[%s17095_s2 + $0x58] sm:$0xff] }
 0x30c   : > { %4590 = vmatpush.bf16.msra.mxu2 %v13374_v50 }
 0x310   : > { %v2787_v58 = vpop.f32.mrf.mxu2  ;;  %v2053_v30 = vpop.f32.mrf.mxu0 }
 0x311   : > { %v3155_v0 = vpop.f32.mrf.mxu3  ;;  %v2883_v2 = vadd.f32 %v2787_v58, %v2515_v57  ;;  %v14670_v33 = vpop.f32.mrf.mxu1  ;;  %v14673_v29 = vadd.f32 %v2053_v30, %v17161_v54  ;;  %v17166_v57 = vld [vmem:[#allocation16_spill] sm:$0xff]  ;;  %v13382_v58 = vld [vmem:[%s17095_s2 + $0x98] sm:$0xff] }
 0x312   : > { %17160 = vst [vmem:[#allocation8_spill] sm:$0xff] %v14670_v33  ;;  %4958 = vmatpush.bf16.msra.mxu3 %v13382_v58  ;;  %v13381_v30 = vld [vmem:[%s17095_s2 + $0x90] sm:$0xff] }
 0x313   : > { %17162 = vst [vmem:[#allocation9_spill] sm:$0xff] %v14673_v29  ;;  %v14675_v12 = vadd.f32 %v3155_v0, %v2883_v2  ;;  %v13373_v2 = vld [vmem:[%s17095_s2 + $0x50] sm:$0xff] }
 0x314   : > { %4591 = vmatpush.bf16.msra.mxu2 %v13373_v2  ;;  %v13371_v2 = vld [vmem:[%s17095_s2 + $0x40] sm:$0xff]  ;;  %v4175_v29 = vld [vmem:[#allocation2 + $0xd] sm:$0xff] }
 0x315   : > { %17163 = vst [vmem:[#allocation10_spill] sm:$0xff] %v14675_v12 }
 0x316   : > { %4959 = vmatpush.bf16.msra.mxu3 %v13381_v30  ;;  %v3313_v30 = vld [vmem:[#allocation2 + $0x93] sm:$0xff] }
 0x318   : > { %v14677_v41 = vpop.f32.mrf.mxu2  ;;  %v2056_v6 = vpop.f32.mrf.mxu0  ;;  %4592 = vmatpush.bf16.msra.mxu2 %v13372_v48  ;;  %v4459_v48 = vld [vmem:[#allocation2 + $0x16] sm:$0xff] }
 0x319   : > { %17164 = vst [vmem:[#allocation11_spill] sm:$0xff] %v14677_v41  ;;  %v14679_v44 = vpop.f32.mrf.mxu3  ;;  %v2424_v7 = vpop.f32.mrf.mxu1  ;;  %v2149_v19 = vadd.f32 %v2056_v6, %v17166_v57 }
 0x31a   : > { %17165 = vst [vmem:[#allocation12_spill] sm:$0xff] %v14679_v44 }
 0x31b   : > { %v2517_v0 = vadd.f32 %v2424_v7, %v2149_v19  ;;  %3462 = vmatmul.bf16.gmra.mxu0 %v3348_v20  ;;  %v17168_v7 = vld [vmem:[#allocation17_spill] sm:$0xff]  ;;  %v13380_v19 = vld [vmem:[%s17095_s2 + $0x88] sm:$0xff] }
 0x31c   : > { %4960 = vmatpush.bf16.msra.mxu3 %v13380_v19  ;;  %4593 = vmatpush.bf16.msra.mxu2 %v13371_v2  ;;  %v4827_v19 = vld [vmem:[#allocation2 + $0x17] sm:$0xff]  ;;  %v17173_v2 = vld [vmem:[#allocation18_spill] sm:$0xff] }
 0x320   : > { %v2792_v54 = vpop.f32.mrf.mxu2  ;;  %v2058_v6 = vpop.f32.mrf.mxu0 }
 0x321   : > { %v3160_v47 = vpop.f32.mrf.mxu3  ;;  %v2885_v50 = vadd.f32 %v2792_v54, %v2517_v0  ;;  %v14697_v20 = vpop.f32.mrf.mxu1  ;;  %v14700_v57 = vadd.f32 %v2058_v6, %v17168_v7  ;;  %v3314_v0 = vld [vmem:[#allocation2 + $0x9b] sm:$0xff]  ;;  %v4458_v6 = vld [vmem:[#allocation2 + $0xe] sm:$0xff] }
 0x322   : > { %17167 = vst [vmem:[#allocation13_spill] sm:$0xff] %v14697_v20  ;;  %v13379_v54 = vld [vmem:[%s17095_s2 + $0x80] sm:$0xff]  ;;  %v4500_v7 = vpack.c.bf16 %v4459_v48, %v4458_v6  ;;  %v4217_v6 = vpack.c.bf16 %v4176_v49, %v4175_v29 }
 0x323   : > { %17169 = vst [vmem:[#allocation14_spill] sm:$0xff] %v14700_v57  ;;  %v14705_v58 = vadd.f32 %v3160_v47, %v2885_v50  ;;  %v3349_v47 = vpack.c.bf16 %v3314_v0, %v3313_v30  ;;  %4961 = vmatpush.bf16.msra.mxu3 %v13379_v54  ;;  %v4826_v50 = vld [vmem:[#allocation2 + $0xf] sm:$0xff] }
 0x324   : > { %4594 = vmatmul.bf16.vlgmr.msra.gmra.mxu2 %v4500_v7  ;;  %v4868_v41 = vpack.c.bf16 %v4827_v19, %v4826_v50  ;;  %4310 = vmatmul.bf16.vlgmr.msra.gmra.mxu1 %v4217_v6  ;;  %v17175_v54 = vld [vmem:[#allocation19_spill] sm:$0xff] }
 0x325   : > { %17170 = vst [vmem:[#allocation15_spill] sm:$0xff] %v14705_v58  ;;  %v3315_v50 = vld [vmem:[#allocation2 + $0xa3] sm:$0xff] }
 0x326   : > { %4962 = vmatmul.bf16.vlgmr.msra.gmra.mxu3 %v4868_v41 }
 0x328   : > { %v14713_v20 = vpop.f32.mrf.mxu2  ;;  %v2061_v58 = vpop.f32.mrf.mxu0 }
 0x329   : > { %17171 = vst [vmem:[#allocation16_spill] sm:$0xff] %v14713_v20  ;;  %v14715_v57 = vpop.f32.mrf.mxu3  ;;  %v2429_v44 = vpop.f32.mrf.mxu1  ;;  %v2151_v12 = vadd.f32 %v2061_v58, %v17173_v2  ;;  %v3316_v58 = vld [vmem:[#allocation2 + $0xab] sm:$0xff]  ;;  %v13394_v2 = vld [vmem:[%s17095_s2 + $0xf8] sm:$0xff] }
 0x32a   : > { %17172 = vst [vmem:[#allocation17_spill] sm:$0xff] %v14715_v57  ;;  %5322 = vmatpush.bf16.msrb.mxu0 %v13394_v2 }
 0x32b   : > { %v2519_v33 = vadd.f32 %v2429_v44, %v2151_v12  ;;  %3467 = vmatmul.bf16.gmra.mxu0 %v3349_v47  ;;  %v3350_v44 = vpack.c.bf16 %v3316_v58, %v3315_v50  ;;  %v17180_v47 = vld [vmem:[#allocation20_spill] sm:$0xff] }
 0x330   : > { %v2797_v48 = vpop.f32.mrf.mxu2  ;;  %v2063_v30 = vpop.f32.mrf.mxu0 }
 0x331   : > { %v3165_v20 = vpop.f32.mrf.mxu3  ;;  %v2887_v57 = vadd.f32 %v2797_v48, %v2519_v33  ;;  %v14718_v0 = vpop.f32.mrf.mxu1  ;;  %v14721_v34 = vadd.f32 %v2063_v30, %v17175_v54  ;;  %v17181_v54 = vld [vmem:[#allocation21_spill] sm:$0xff] }
 0x332   : > { %17174 = vst [vmem:[#allocation18_spill] sm:$0xff] %v14718_v0 }
 0x333   : > { %17176 = vst [vmem:[#allocation19_spill] sm:$0xff] %v14721_v34  ;;  %v14723_v7 = vadd.f32 %v3165_v20, %v2887_v57  ;;  %v13402_v20 = vld [vmem:[%s17095_s2 + $0x138] sm:$0xff]  ;;  %v17186_v34 = vld [vmem:[#allocation24_spill] sm:$0xff] }
 0x334   : > { %5690 = vmatpush.bf16.msrb.mxu1 %v13402_v20  ;;  %v17184_v20 = vld [vmem:[#allocation22_spill] sm:$0xff] }
 0x335   : > { %17177 = vst [vmem:[#allocation37_spill] sm:$0xff] %v14723_v7 }
 0x338   : > { %v14725_v41 = vpop.f32.mrf.mxu2  ;;  %v2066_v49 = vpop.f32.mrf.mxu0 }
 0x339   : > { %17178 = vst [vmem:[#allocation38_spill] sm:$0xff] %v14725_v41  ;;  %v14727_v12 = vpop.f32.mrf.mxu3  ;;  %v2434_v29 = vpop.f32.mrf.mxu1  ;;  %v2153_v19 = vadd.f32 %v2066_v49, %v17180_v47  ;;  %v3317_v49 = vld [vmem:[#allocation2 + $0xb3] sm:$0xff]  ;;  %v307_v47 = vld [vmem:[%s17099_s6] sm:$0xf]  ;;  %v17185_v41 = vld [vmem:[#allocation23_spill] sm:$0xff] }
 0x33a   : > { %17179 = vst [vmem:[#allocation39_spill] sm:$0xff] %v14727_v12 }
 0x33b   : > { %v2521_v33 = vadd.f32 %v2434_v29, %v2153_v19  ;;  %3472 = vmatmul.bf16.gmra.mxu0 %v3350_v44  ;;  %v306_v44 = vld [vmem:[%s17098_s5] sm:$0xf] }
 0x33c   : > { %v3318_v29 = vld [vmem:[#allocation2 + $0xbb] sm:$0xff]  ;;  %v14747_v19 = vperm.slane %v306_v44, 0 }
 0x33d   : > { %v3351_v2 = vpack.c.bf16 %v3318_v29, %v3317_v49  ;;  %v3319_v49 = vld [vmem:[#allocation2 + $0xc3] sm:$0xff]  ;;  %v3320_v29 = vld [vmem:[#allocation2 + $0xcb] sm:$0xff] }
 0x340   : > { %v2802_v57 = vpop.f32.mrf.mxu2  ;;  %v2068_v30 = vpop.f32.mrf.mxu0 }
 0x341   : > { %v3170_v6 = vpop.f32.mrf.mxu3  ;;  %v2889_v48 = vadd.f32 %v2802_v57, %v2521_v33  ;;  %v14737_v50 = vadd.f32 %v2068_v30, %v17181_v54  ;;  %v14750_v30 = vperm.slane %v307_v47, 0  ;;  %v3884_v54 = vpop.permute.xlu0 %3883 }
 0x343   : > { %17182 = vst [vmem:[#allocation20_spill] sm:$0xff] %v14737_v50  ;;  %v14739_v58 = vadd.f32 %v3170_v6, %v2889_v48 }
 0x345   : > { %17183 = vst [vmem:[#allocation21_spill] sm:$0xff] %v14739_v58 }
 0x348   : > { %v3438_v33 = vpop.f32.mrf.mxu0 }
 0x349   : > { %v3585_v57 = vadd.f32 %v3438_v33, %v17184_v20  ;;  %v3352_v20 = vpack.c.bf16 %v3320_v29, %v3319_v49  ;;  %v3889_v0 = vpop.permute.xlu0 %3888 }
 0x34b   : > { %v3712_v6 = vmul.f32 %v14747_v19, %v3585_v57  ;;  %3477 = vmatmul.bf16.gmra.mxu0 %v3351_v2 }
 0x34d   : > { %v3755_v48 = vadd.f32 %v14750_v30, %v3712_v6 }
 0x34f   : > { %v3797_v58 = vmax.f32 %v3755_v48, 0.0 }
 0x350   : > { %v3440_v50 = vpop.f32.mrf.mxu0 }
 0x351   : > { %v4091_v12 = vmul.f32 %v3884_v54, %v3797_v58  ;;  %v3586_v7 = vadd.f32 %v3440_v50, %v17185_v41  ;;  %v17187_v54 = vld [vmem:[#allocation25_spill] sm:$0xff] }
 0x353   : > { %4133 = vst [vmem:[#allocation2 + $0x20] sm:$0xff] %v4091_v12  ;;  %v3713_v44 = vmul.f32 %v14747_v19, %v3586_v7  ;;  %v3894_v12 = vpop.permute.xlu1 %3893 }
 0x355   : > { %v3756_v33 = vadd.f32 %v14750_v30, %v3713_v44 }
 0x357   : > { %v3798_v47 = vmax.f32 %v3756_v33, 0.0 }
 0x358   : > { %v3443_v57 = vpop.f32.mrf.mxu0 }
 0x359   : > { %v4092_v2 = vmul.f32 %v3889_v0, %v3798_v47  ;;  %v3587_v6 = vadd.f32 %v3443_v57, %v17186_v34 }
 0x35a   : > { %v4177_v44 = vld [vmem:[#allocation2 + $0x1d] sm:$0xff] }
 0x35b   : > { %4134 = vst [vmem:[#allocation2 + $0x28] sm:$0xff] %v4092_v2  ;;  %v3714_v48 = vmul.f32 %v14747_v19, %v3587_v6  ;;  %3482 = vmatmul.bf16.gmra.mxu0 %v3352_v20  ;;  %v4460_v33 = vld [vmem:[#allocation2 + $0x1e] sm:$0xff]  ;;  %v13393_v2 = vld [vmem:[%s17095_s2 + $0xf0] sm:$0xff] }
 0x35c   : > { %v4828_v49 = vld [vmem:[#allocation2 + $0x1f] sm:$0xff]  ;;  %v13401_v6 = vld [vmem:[%s17095_s2 + $0x130] sm:$0xff]  ;;  %5323 = vmatpush.bf16.msrb.mxu0 %v13393_v2 }
 0x35d   : > { %v3757_v41 = vadd.f32 %v14750_v30, %v3714_v48  ;;  %v3321_v48 = vld [vmem:[#allocation2 + $0xd3] sm:$0xff]  ;;  %5691 = vmatpush.bf16.msrb.mxu1 %v13401_v6 }
 0x35f   : > { %v3799_v50 = vmax.f32 %v3757_v41, 0.0  ;;  %v3322_v41 = vld [vmem:[#allocation2 + $0xdb] sm:$0xff] }
 0x360   : > { %v3445_v7 = vpop.f32.mrf.mxu0 }
 0x361   : > { %v4093_v58 = vmul.f32 %v3894_v12, %v3799_v50  ;;  %v3588_v31 = vadd.f32 %v3445_v7, %v17187_v54  ;;  %v3899_v50 = vpop.permute.xlu1 %3898  ;;  %v17188_v54 = vld [vmem:[#allocation26_spill] sm:$0xff] }
 0x362   : > { %v4178_v29 = vld [vmem:[#allocation2 + $0x25] sm:$0xff] }
 0x363   : > { %v4461_v24 = vld [vmem:[#allocation2 + $0x26] sm:$0xff]  ;;  %4135 = vst [vmem:[#allocation2 + $0x30] sm:$0xff] %v4093_v58  ;;  %v3715_v34 = vmul.f32 %v14747_v19, %v3588_v31  ;;  %v4218_v47 = vpack.c.bf16 %v4178_v29, %v4177_v44  ;;  %v3353_v31 = vpack.c.bf16 %v3322_v41, %v3321_v48  ;;  %v3904_v29 = vpop.permute.xlu2 %3903 }
 0x364   : > { %v4829_v0 = vld [vmem:[#allocation2 + $0x27] sm:$0xff]  ;;  %v4501_v57 = vpack.c.bf16 %v4461_v24, %v4460_v33 }
 0x365   : > { %v14762_v20 = vpack.c.bf16 %v4829_v0, %v4828_v49  ;;  %v3758_v12 = vadd.f32 %v14750_v30, %v3715_v34  ;;  %4315 = vmatmul.bf16.gmra.mxu1 %v4218_v47 }
 0x366   : > { %4599 = vmatmul.bf16.gmra.mxu2 %v4501_v57  ;;  %v17189_v57 = vld [vmem:[#allocation27_spill] sm:$0xff] }
 0x367   : > { %4967 = vmatmul.bf16.gmra.mxu3 %v14762_v20  ;;  %v3800_v24 = vmax.f32 %v3758_v12, 0.0 }
 0x368   : > { %v3448_v7 = vpop.f32.mrf.mxu0 }
 0x369   : > { %v4094_v58 = vmul.f32 %v3899_v50, %v3800_v24  ;;  %v3589_v44 = vadd.f32 %v3448_v7, %v17188_v54  ;;  %v3323_v54 = vld [vmem:[#allocation2 + $0xe3] sm:$0xff] }
 0x36a   : > { %v4179_v12 = vld [vmem:[#allocation2 + $0x2d] sm:$0xff] }
 0x36b   : > { %4136 = vst [vmem:[#allocation2 + $0x38] sm:$0xff] %v4094_v58  ;;  %v3716_v33 = vmul.f32 %v14747_v19, %v3589_v44  ;;  %3487 = vmatmul.bf16.gmra.mxu0 %v3353_v31  ;;  %v4462_v48 = vld [vmem:[#allocation2 + $0x2e] sm:$0xff] }
 0x36c   : > { %v4830_v6 = vld [vmem:[#allocation2 + $0x2f] sm:$0xff] }
 0x36d   : > { %v3759_v49 = vadd.f32 %v14750_v30, %v3716_v33  ;;  %v3324_v44 = vld [vmem:[#allocation2 + $0xeb] sm:$0xff] }
 0x36f   : > { %v3801_v0 = vmax.f32 %v3759_v49, 0.0 }
 0x370   : > { %v3450_v34 = vpop.f32.mrf.mxu0 }
 0x371   : > { %v4095_v47 = vmul.f32 %v3904_v29, %v3801_v0  ;;  %v3590_v2 = vadd.f32 %v3450_v34, %v17189_v57  ;;  %v3354_v29 = vpack.c.bf16 %v3324_v44, %v3323_v54  ;;  %v3909_v0 = vpop.permute.xlu2 %3908 }
 0x372   : > { %v4180_v41 = vld [vmem:[#allocation2 + $0x35] sm:$0xff] }
 0x373   : > { %v4463_v56 = vld [vmem:[#allocation2 + $0x36] sm:$0xff]  ;;  %4137 = vst [vmem:[#allocation2 + $0x40] sm:$0xff] %v4095_v47  ;;  %v3717_v50 = vmul.f32 %v14747_v19, %v3590_v2  ;;  %v4219_v7 = vpack.c.bf16 %v4180_v41, %v4179_v12 }
 0x374   : > { %v4831_v24 = vld [vmem:[#allocation2 + $0x37] sm:$0xff]  ;;  %v4502_v58 = vpack.c.bf16 %v4463_v56, %v4462_v48  ;;  %v3914_v48 = vpop.permute.xlu0 %3913 }
 0x375   : > { %v14777_v31 = vpack.c.bf16 %v4831_v24, %v4830_v6  ;;  %v3760_v33 = vadd.f32 %v14750_v30, %v3717_v50  ;;  %4320 = vmatmul.bf16.gmra.mxu1 %v4219_v7  ;;  %v17190_v47 = vld [vmem:[#allocation28_spill] sm:$0xff]  ;;  %v17191_v24 = vld [vmem:[#allocation29_spill] sm:$0xff] }
 0x376   : > { %4604 = vmatmul.bf16.gmra.mxu2 %v4502_v58 }
 0x377   : > { %4972 = vmatmul.bf16.gmra.mxu3 %v14777_v31  ;;  %v3802_v49 = vmax.f32 %v3760_v33, 0.0 }
 0x378   : > { %v3453_v34 = vpop.f32.mrf.mxu0 }
 0x379   : > { %v4096_v57 = vmul.f32 %v3909_v0, %v3802_v49  ;;  %v3591_v23 = vadd.f32 %v3453_v34, %v17190_v47  ;;  %v3326_v47 = vld [vmem:[#allocation2 + $0xfb] sm:$0xff] }
 0x37a   : > { %v4181_v7 = vld [vmem:[#allocation2 + $0x3d] sm:$0xff] }
 0x37b   : > { %4138 = vst [vmem:[#allocation2 + $0x48] sm:$0xff] %v4096_v57  ;;  %v3718_v56 = vmul.f32 %v14747_v19, %v3591_v23  ;;  %3492 = vmatmul.bf16.gmra.mxu0 %v3354_v29  ;;  %v4464_v58 = vld [vmem:[#allocation2 + $0x3e] sm:$0xff]  ;;  %v3325_v57 = vld [vmem:[#allocation2 + $0xf3] sm:$0xff] }
 0x37c   : > { %v4832_v54 = vld [vmem:[#allocation2 + $0x3f] sm:$0xff] }
 0x37d   : > { %v3761_v2 = vadd.f32 %v14750_v30, %v3718_v56 }
 0x37f   : > { %v3803_v12 = vmax.f32 %v3761_v2, 0.0 }
 0x380   : > { %v3455_v6 = vpop.f32.mrf.mxu0 }
 0x381   : > { %v4097_v41 = vmul.f32 %v3914_v48, %v3803_v12  ;;  %v3592_v50 = vadd.f32 %v3455_v6, %v17191_v24  ;;  %v3355_v12 = vpack.c.bf16 %v3326_v47, %v3325_v57  ;;  %v3919_v48 = vpop.permute.xlu1 %3918 }
 0x382   : > { %v4182_v44 = vld [vmem:[#allocation2 + $0x45] sm:$0xff] }
 0x383   : > { %v4465_v33 = vld [vmem:[#allocation2 + $0x46] sm:$0xff]  ;;  %4139 = vst [vmem:[#allocation2 + $0x50] sm:$0xff] %v4097_v41  ;;  %v3719_v0 = vmul.f32 %v14747_v19, %v3592_v50  ;;  %v4220_v34 = vpack.c.bf16 %v4182_v44, %v4181_v7  ;;  %v3924_v44 = vpop.permute.xlu2 %3923 }
 0x384   : > { %v4833_v49 = vld [vmem:[#allocation2 + $0x47] sm:$0xff]  ;;  %v4503_v23 = vpack.c.bf16 %v4465_v33, %v4464_v58 }
 0x385   : > { %v14786_v29 = vpack.c.bf16 %v4833_v49, %v4832_v54  ;;  %v3762_v56 = vadd.f32 %v14750_v30, %v3719_v0  ;;  %4325 = vmatmul.bf16.gmra.mxu1 %v4220_v34  ;;  %v17192_v41 = vld [vmem:[#allocation30_spill] sm:$0xff]  ;;  %v13392_v7 = vld [vmem:[%s17095_s2 + $0xe8] sm:$0xff] }
 0x386   : > { %4609 = vmatmul.bf16.gmra.mxu2 %v4503_v23  ;;  %5324 = vmatpush.bf16.msrb.mxu0 %v13392_v7  ;;  %v17193_v0 = vld [vmem:[#allocation31_spill] sm:$0xff] }
 0x387   : > { %4977 = vmatmul.bf16.gmra.mxu3 %v14786_v29  ;;  %v3804_v2 = vmax.f32 %v3762_v56, 0.0  ;;  %v3328_v7 = vld [vmem:[#allocation2 + $0x10b] sm:$0xff] }
 0x388   : > { %v3458_v6 = vpop.f32.mrf.mxu0 }
 0x389   : > { %v4098_v24 = vmul.f32 %v3919_v48, %v3804_v2  ;;  %v3593_v63 = vadd.f32 %v3458_v6, %v17192_v41  ;;  %v13400_v41 = vld [vmem:[%s17095_s2 + $0x128] sm:$0xff] }
 0x38a   : > { %v4183_v23 = vld [vmem:[#allocation2 + $0x4d] sm:$0xff]  ;;  %5692 = vmatpush.bf16.msrb.mxu1 %v13400_v41 }
 0x38b   : > { %4140 = vst [vmem:[#allocation2 + $0x58] sm:$0xff] %v4098_v24  ;;  %v3720_v50 = vmul.f32 %v14747_v19, %v3593_v63  ;;  %3497 = vmatmul.bf16.gmra.mxu0 %v3355_v12  ;;  %v4466_v57 = vld [vmem:[#allocation2 + $0x4e] sm:$0xff] }
 0x38c   : > { %v4834_v47 = vld [vmem:[#allocation2 + $0x4f] sm:$0xff] }
 0x38d   : > { %v3763_v58 = vadd.f32 %v14750_v30, %v3720_v50  ;;  %v3327_v50 = vld [vmem:[#allocation2 + $0x103] sm:$0xff] }
 0x38f   : > { %v3805_v54 = vmax.f32 %v3763_v58, 0.0 }
 0x390   : > { %v3460_v33 = vpop.f32.mrf.mxu0 }
 0x391   : > { %v4099_v49 = vmul.f32 %v3924_v44, %v3805_v54  ;;  %v3594_v34 = vadd.f32 %v3460_v33, %v17193_v0  ;;  %v3356_v44 = vpack.c.bf16 %v3328_v7, %v3327_v50  ;;  %v3929_v33 = vpop.permute.xlu0 %3928 }
 0x392   : > { %v4184_v56 = vld [vmem:[#allocation2 + $0x55] sm:$0xff] }
 0x393   : > { %v4467_v2 = vld [vmem:[#allocation2 + $0x56] sm:$0xff]  ;;  %4141 = vst [vmem:[#allocation2 + $0x60] sm:$0xff] %v4099_v49  ;;  %v3721_v12 = vmul.f32 %v14747_v19, %v3594_v34  ;;  %v4221_v48 = vpack.c.bf16 %v4184_v56, %v4183_v23  ;;  %v17195_v34 = vld [vmem:[#allocation34_spill] sm:$0xff] }
 0x394   : > { %v4835_v63 = vld [vmem:[#allocation2 + $0x57] sm:$0xff]  ;;  %v4504_v6 = vpack.c.bf16 %v4467_v2, %v4466_v57  ;;  %v3934_v2 = vpop.permute.xlu1 %3933 }
 0x395   : > { %v14798_v24 = vpack.c.bf16 %v4835_v63, %v4834_v47  ;;  %v3764_v58 = vadd.f32 %v14750_v30, %v3721_v12  ;;  %4330 = vmatmul.bf16.gmra.mxu1 %v4221_v48 }
 0x396   : > { %4614 = vmatmul.bf16.gmra.mxu2 %v4504_v6 }
 0x397   : > { %17194 = vst [vmem:[#allocation22_spill] sm:$0xff] %v14798_v24  ;;  %4982 = vmatmul.bf16.gmra.mxu3 %v14798_v24  ;;  %v3806_v54 = vmax.f32 %v3764_v58, 0.0 }
 0x398   : > { %v3463_v49 = vpop.f32.mrf.mxu0 }
 0x399   : > { %v4100_v0 = vmul.f32 %v3929_v33, %v3806_v54  ;;  %v3595_v23 = vadd.f32 %v3463_v49, %v17195_v34  ;;  %v3329_v34 = vld [vmem:[#allocation2 + $0x113] sm:$0xff] }
 0x39a   : > { %v4185_v6 = vld [vmem:[#allocation2 + $0x5d] sm:$0xff] }
 0x39b   : > { %4142 = vst [vmem:[#allocation2 + $0x68] sm:$0xff] %v4100_v0  ;;  %v3722_v57 = vmul.f32 %v14747_v19, %v3595_v23  ;;  %3502 = vmatmul.bf16.gmra.mxu0 %v3356_v44  ;;  %v4468_v41 = vld [vmem:[#allocation2 + $0x5e] sm:$0xff] }
 0x39c   : > { %v4836_v50 = vld [vmem:[#allocation2 + $0x5f] sm:$0xff] }
 0x39d   : > { %v3765_v47 = vadd.f32 %v14750_v30, %v3722_v57  ;;  %v3330_v23 = vld [vmem:[#allocation2 + $0x11b] sm:$0xff] }
 0x39f   : > { %v3807_v56 = vmax.f32 %v3765_v47, 0.0  ;;  %v3357_v47 = vpack.c.bf16 %v3330_v23, %v3329_v34 }
 0x3a0   : > { %v3465_v63 = vpop.f32.mrf.mxu0 }
 0x3a1   : > { %v4101_v12 = vmul.f32 %v3934_v2, %v3807_v56  ;;  %v3596_v48 = vadd.f32 %v3465_v63, %v14429_v10  ;;  %v3939_v56 = vpop.permute.xlu2 %3938 }
 0x3a2   : > { %v4186_v7 = vld [vmem:[#allocation2 + $0x65] sm:$0xff] }
 0x3a3   : > { %v4469_v58 = vld [vmem:[#allocation2 + $0x66] sm:$0xff]  ;;  %4143 = vst [vmem:[#allocation2 + $0x70] sm:$0xff] %v4101_v12  ;;  %v3723_v33 = vmul.f32 %v14747_v19, %v3596_v48  ;;  %v4222_v49 = vpack.c.bf16 %v4186_v7, %v4185_v6  ;;  %v17196_v12 = vld [vmem:[#allocation36_spill] sm:$0xff]  ;;  %v14815_v48 = vpop.f32.mrf.mxu1  ;;  %v14817_v6 = vpop.f32.mrf.mxu2 }
 0x3a4   : > { %v4837_v54 = vld [vmem:[#allocation2 + $0x67] sm:$0xff]  ;;  %v4505_v0 = vpack.c.bf16 %v4469_v58, %v4468_v41  ;;  %17197 = vst [vmem:[#allocation23_spill] sm:$0xff] %v14817_v6 }
 0x3a5   : > { %v14810_v44 = vpack.c.bf16 %v4837_v54, %v4836_v50  ;;  %v3766_v57 = vadd.f32 %v14750_v30, %v3723_v33  ;;  %4335 = vmatmul.bf16.gmra.mxu1 %v4222_v49  ;;  %v14820_v50 = vpop.f32.mrf.mxu3  ;;  %v3944_v54 = vpop.permute.xlu0 %3943  ;;  %v3332_v6 = vld [vmem:[#allocation2 + $0x12b] sm:$0xff] }
 0x3a6   : > { %4619 = vmatmul.bf16.gmra.mxu2 %v4505_v0  ;;  %17198 = vst [vmem:[#allocation24_spill] sm:$0xff] %v14820_v50  ;;  %v3331_v50 = vld [vmem:[#allocation2 + $0x123] sm:$0xff] }
 0x3a7   : > { %4987 = vmatmul.bf16.gmra.mxu3 %v14810_v44  ;;  %v3808_v10 = vmax.f32 %v3766_v57, 0.0 }
 0x3a8   : > { %v3468_v2 = vpop.f32.mrf.mxu0 }
 0x3a9   : > { %v4102_v63 = vmul.f32 %v3939_v56, %v3808_v10  ;;  %v3597_v24 = vadd.f32 %v3468_v2, %v17196_v12 }
 0x3aa   : > { %v4187_v34 = vld [vmem:[#allocation2 + $0x6d] sm:$0xff] }
 0x3ab   : > { %4144 = vst [vmem:[#allocation2 + $0x78] sm:$0xff] %v4102_v63  ;;  %v3724_v41 = vmul.f32 %v14747_v19, %v3597_v24  ;;  %3507 = vmatmul.bf16.gmra.mxu0 %v3357_v47  ;;  %v4470_v23 = vld [vmem:[#allocation2 + $0x6e] sm:$0xff] }
 0x3ac   : > { %v4838_v57 = vld [vmem:[#allocation2 + $0x6f] sm:$0xff] }
 0x3ad   : > { %v3767_v7 = vadd.f32 %v14750_v30, %v3724_v41  ;;  %v4311_v41 = vpop.f32.mrf.mxu1 }
 0x3af   : > { %v3809_v58 = vmax.f32 %v3767_v7, 0.0  ;;  %v4595_v7 = vpop.f32.mrf.mxu2 }
 0x3b0   : > { %v3470_v33 = vpop.f32.mrf.mxu0 }
 0x3b1   : > { %v4103_v49 = vmul.f32 %v3944_v54, %v3809_v58  ;;  %v3598_v0 = vadd.f32 %v3470_v33, %v14459_v16  ;;  %v4742_v58 = vadd.f32 %v4595_v7, %v4311_v41  ;;  %v4963_v54 = vpop.f32.mrf.mxu3 }
 0x3b2   : > { %v4188_v10 = vld [vmem:[#allocation2 + $0x75] sm:$0xff] }
 0x3b3   : > { %v4471_v56 = vld [vmem:[#allocation2 + $0x76] sm:$0xff]  ;;  %4145 = vst [vmem:[#allocation2 + $0x80] sm:$0xff] %v4103_v49  ;;  %v3725_v24 = vmul.f32 %v14747_v19, %v3598_v0  ;;  %v4223_v47 = vpack.c.bf16 %v4188_v10, %v4187_v34  ;;  %v14829_v33 = vadd.f32 %v4963_v54, %v4742_v58  ;;  %v3358_v0 = vpack.c.bf16 %v3332_v6, %v3331_v50  ;;  %v3949_v34 = vpop.permute.xlu1 %3948  ;;  %v3954_v50 = vpop.permute.xlu2 %3953 }
 0x3b4   : > { %v4839_v2 = vld [vmem:[#allocation2 + $0x77] sm:$0xff]  ;;  %v4506_v63 = vpack.c.bf16 %v4471_v56, %v4470_v23 }
 0x3b5   : > { %v14825_v12 = vpack.c.bf16 %v4839_v2, %v4838_v57  ;;  %v3768_v16 = vadd.f32 %v14750_v30, %v3725_v24  ;;  %4340 = vmatmul.bf16.gmra.mxu1 %v4223_v47  ;;  %v13391_v2 = vld [vmem:[%s17095_s2 + $0xe0] sm:$0xff] }
 0x3b6   : > { %4624 = vmatmul.bf16.gmra.mxu2 %v4506_v63  ;;  %v13399_v24 = vld [vmem:[%s17095_s2 + $0x120] sm:$0xff]  ;;  %5325 = vmatpush.bf16.msrb.mxu0 %v13391_v2  ;;  %v3333_v2 = vld [vmem:[#allocation2 + $0x133] sm:$0xff] }
 0x3b7   : > { %4992 = vmatmul.bf16.gmra.mxu3 %v14825_v12  ;;  %v3810_v49 = vmax.f32 %v3768_v16, 0.0  ;;  %5693 = vmatpush.bf16.msrb.mxu1 %v13399_v24  ;;  %v3334_v24 = vld [vmem:[#allocation2 + $0x13b] sm:$0xff] }
 0x3b8   : > { %v3473_v23 = vpop.f32.mrf.mxu0 }
 0x3b9   : > { %v4104_v57 = vmul.f32 %v3949_v34, %v3810_v49  ;;  %v3599_v10 = vadd.f32 %v3473_v23, %v14473_v8 }
 0x3ba   : > { %v4189_v7 = vld [vmem:[#allocation2 + $0x7d] sm:$0xff] }
 0x3bb   : > { %4146 = vst [vmem:[#allocation2 + $0x88] sm:$0xff] %v4104_v57  ;;  %v3726_v56 = vmul.f32 %v14747_v19, %v3599_v10  ;;  %3512 = vmatmul.bf16.gmra.mxu0 %v3358_v0  ;;  %v4472_v58 = vld [vmem:[#allocation2 + $0x7e] sm:$0xff] }
 0x3bc   : > { %v4840_v16 = vld [vmem:[#allocation2 + $0x7f] sm:$0xff] }
 0x3bd   : > { %v3769_v47 = vadd.f32 %v14750_v30, %v3726_v56  ;;  %v13410_v56 = vld [vmem:[%s17095_s2 + $0x178] sm:$0xff] }
 0x3be   : > { %6058 = vmatpush.bf16.msrb.mxu2 %v13410_v56 }
 0x3bf   : > { %v3811_v6 = vmax.f32 %v3769_v47, 0.0 }
 0x3c0   : > { %v3475_v63 = vpop.f32.mrf.mxu0 }
 0x3c1   : > { %v4105_v8 = vmul.f32 %v3954_v50, %v3811_v6  ;;  %v3600_v41 = vadd.f32 %v3475_v63, %v14487_v11  ;;  %v3359_v6 = vpack.c.bf16 %v3334_v24, %v3333_v2  ;;  %v3959_v50 = vpop.permute.xlu0 %3958 }
 0x3c2   : > { %v4190_v54 = vld [vmem:[#allocation2 + $0x85] sm:$0xff] }
 0x3c3   : > { %v4473_v49 = vld [vmem:[#allocation2 + $0x86] sm:$0xff]  ;;  %4147 = vst [vmem:[#allocation2 + $0x90] sm:$0xff] %v4105_v8  ;;  %v3727_v34 = vmul.f32 %v14747_v19, %v3600_v41  ;;  %v4224_v23 = vpack.c.bf16 %v4190_v54, %v4189_v7 }
 0x3c4   : > { %v4841_v0 = vld [vmem:[#allocation2 + $0x87] sm:$0xff]  ;;  %v4507_v57 = vpack.c.bf16 %v4473_v49, %v4472_v58  ;;  %v13418_v58 = vld [vmem:[%s17095_s2 + $0x1b8] sm:$0xff]  ;;  %v3964_v49 = vpop.permute.xlu1 %3963 }
 0x3c5   : > { %v4875_v10 = vpack.c.bf16 %v4841_v0, %v4840_v16  ;;  %v3770_v11 = vadd.f32 %v14750_v30, %v3727_v34  ;;  %4345 = vmatmul.bf16.gmra.mxu1 %v4224_v23  ;;  %6426 = vmatpush.bf16.msrb.mxu3 %v13418_v58  ;;  %v3969_v58 = vpop.permute.xlu2 %3968 }
 0x3c6   : > { %4629 = vmatmul.bf16.gmra.mxu2 %v4507_v57 }
 0x3c7   : > { %4997 = vmatmul.bf16.gmra.mxu3 %v4875_v10  ;;  %v3812_v47 = vmax.f32 %v3770_v11, 0.0 }
 0x3c8   : > { %v3478_v63 = vpop.f32.mrf.mxu0 }
 0x3c9   : > { %v4106_v8 = vmul.f32 %v3959_v50, %v3812_v47  ;;  %v3601_v41 = vadd.f32 %v3478_v63, %v14498_v18  ;;  %v3335_v63 = vld [vmem:[#allocation2 + $0x143] sm:$0xff] }
 0x3ca   : > { %v4191_v57 = vld [vmem:[#allocation2 + $0x8d] sm:$0xff] }
 0x3cb   : > { %4148 = vst [vmem:[#allocation2 + $0x98] sm:$0xff] %v4106_v8  ;;  %v3728_v7 = vmul.f32 %v14747_v19, %v3601_v41  ;;  %3517 = vmatmul.bf16.gmra.mxu0 %v3359_v6  ;;  %v4474_v10 = vld [vmem:[#allocation2 + $0x8e] sm:$0xff] }
 0x3cc   : > { %v4842_v18 = vld [vmem:[#allocation2 + $0x8f] sm:$0xff] }
 0x3cd   : > { %v3771_v16 = vadd.f32 %v14750_v30, %v3728_v7  ;;  %v3336_v8 = vld [vmem:[#allocation2 + $0x14b] sm:$0xff] }
 0x3ce   : > { %v3360_v7 = vpack.c.bf16 %v3336_v8, %v3335_v63 }
 0x3cf   : > { %v3813_v54 = vmax.f32 %v3771_v16, 0.0 }
 0x3d0   : > { %v3480_v0 = vpop.f32.mrf.mxu0 }
 0x3d1   : > { %v4107_v34 = vmul.f32 %v3964_v49, %v3813_v54  ;;  %v3602_v23 = vadd.f32 %v3480_v0, %v14512_v25  ;;  %v2500_v54 = vadd.f32 %v14520_v5, %v14523_v61  ;;  %v14866_v61 = vpop.f32.mrf.mxu3 }
 0x3d2   : > { %v4192_v56 = vld [vmem:[#allocation2 + $0x95] sm:$0xff] }
 0x3d3   : > { %v4475_v2 = vld [vmem:[#allocation2 + $0x96] sm:$0xff]  ;;  %4149 = vst [vmem:[#allocation2 + $0xa0] sm:$0xff] %v4107_v34  ;;  %v3729_v11 = vmul.f32 %v14747_v19, %v3602_v23  ;;  %v4225_v47 = vpack.c.bf16 %v4192_v56, %v4191_v57  ;;  %v14858_v34 = vpop.f32.mrf.mxu1  ;;  %v2868_v23 = vadd.f32 %v14529_v53, %v2500_v54  ;;  %v3974_v56 = vpop.permute.xlu0 %3973 }
 0x3d4   : > { %v4843_v24 = vld [vmem:[#allocation2 + $0x97] sm:$0xff]  ;;  %v4508_v6 = vpack.c.bf16 %v4475_v2, %v4474_v10 }
 0x3d5   : > { %v4876_v50 = vpack.c.bf16 %v4843_v24, %v4842_v18  ;;  %v3772_v41 = vadd.f32 %v14750_v30, %v3729_v11  ;;  %4350 = vmatmul.bf16.gmra.mxu1 %v4225_v47  ;;  %v3236_v18 = vadd.f32 %v14531_v27, %v2868_v23  ;;  %v14864_v24 = vpop.f32.mrf.mxu2  ;;  %v13398_v54 = vld [vmem:[%s17095_s2 + $0x118] sm:$0xff] }
 0x3d6   : > { %4634 = vmatmul.bf16.gmra.mxu2 %v4508_v6  ;;  %5694 = vmatpush.bf16.msrb.mxu1 %v13398_v54 }
 0x3d7   : > { %5002 = vmatmul.bf16.gmra.mxu3 %v4876_v50  ;;  %v3814_v25 = vmax.f32 %v3772_v41, 0.0 }
 0x3d8   : > { %v3483_v16 = vpop.f32.mrf.mxu0 }
 0x3d9   : > { %v4108_v49 = vmul.f32 %v3969_v58, %v3814_v25  ;;  %v3603_v0 = vadd.f32 %v3483_v16, %v14525_v9  ;;  %v13390_v16 = vld [vmem:[%s17095_s2 + $0xd8] sm:$0xff] }
 0x3da   : > { %v4193_v47 = vld [vmem:[#allocation2 + $0x9d] sm:$0xff]  ;;  %5326 = vmatpush.bf16.msrb.mxu0 %v13390_v16 }
 0x3db   : > { %4150 = vst [vmem:[#allocation2 + $0xa8] sm:$0xff] %v4108_v49  ;;  %v3730_v57 = vmul.f32 %v14747_v19, %v3603_v0  ;;  %3522 = vmatmul.bf16.gmra.mxu0 %v3360_v7  ;;  %v4476_v6 = vld [vmem:[#allocation2 + $0x9e] sm:$0xff]  ;;  %v3337_v49 = vld [vmem:[#allocation2 + $0x153] sm:$0xff] }
 0x3dc   : > { %v4844_v53 = vld [vmem:[#allocation2 + $0x9f] sm:$0xff] }
 0x3dd   : > { %v3773_v10 = vadd.f32 %v14750_v30, %v3730_v57  ;;  %v3338_v0 = vld [vmem:[#allocation2 + $0x15b] sm:$0xff]  ;;  %v3979_v57 = vpop.permute.xlu1 %3978 }
 0x3df   : > { %v3815_v2 = vmax.f32 %v3773_v10, 0.0 }
 0x3e0   : > { %v3485_v5 = vpop.f32.mrf.mxu0 }
 0x3e1   : > { %v4109_v9 = vmul.f32 %v3974_v56, %v3815_v2  ;;  %v3604_v11 = vadd.f32 %v3485_v5, %v3236_v18  ;;  %v3361_v18 = vpack.c.bf16 %v3338_v0, %v3337_v49  ;;  %v2502_v5 = vadd.f32 %v14544_v46, %v14547_v52  ;;  %v13389_v52 = vld [vmem:[%s17095_s2 + $0xd0] sm:$0xff] }
 0x3e2   : > { %v4316_v50 = vpop.f32.mrf.mxu1  ;;  %v4194_v63 = vld [vmem:[#allocation2 + $0xa5] sm:$0xff]  ;;  %5327 = vmatpush.bf16.msrb.mxu0 %v13389_v52 }
 0x3e3   : > { %v4477_v8 = vld [vmem:[#allocation2 + $0xa6] sm:$0xff]  ;;  %4151 = vst [vmem:[#allocation2 + $0xb0] sm:$0xff] %v4109_v9  ;;  %v3731_v25 = vmul.f32 %v14747_v19, %v3604_v11  ;;  %v4226_v27 = vpack.c.bf16 %v4194_v63, %v4193_v47  ;;  %v2870_v63 = vadd.f32 %v14553_v55, %v2502_v5 }
 0x3e4   : > { %v4845_v41 = vld [vmem:[#allocation2 + $0xa7] sm:$0xff]  ;;  %v4509_v7 = vpack.c.bf16 %v4477_v8, %v4476_v6 }
 0x3e5   : > { %v4877_v58 = vpack.c.bf16 %v4845_v41, %v4844_v53  ;;  %v3774_v23 = vadd.f32 %v14750_v30, %v3731_v25  ;;  %4355 = vmatmul.bf16.gmra.mxu1 %v4226_v27  ;;  %v3238_v27 = vadd.f32 %v14555_v51, %v2870_v63  ;;  %v3339_v63 = vld [vmem:[#allocation2 + $0x163] sm:$0xff] }
 0x3e6   : > { %4639 = vmatmul.bf16.gmra.mxu2 %v4509_v7  ;;  %v3984_v7 = vpop.permute.xlu2 %3983 }
 0x3e7   : > { %5007 = vmatmul.bf16.gmra.mxu3 %v4877_v58  ;;  %v3816_v10 = vmax.f32 %v3774_v23, 0.0 }
 0x3e8   : > { %v3488_v56 = vpop.f32.mrf.mxu0 }
 0x3e9   : > { %v4600_v2 = vpop.f32.mrf.mxu2  ;;  %v4110_v9 = vmul.f32 %v3979_v57, %v3816_v10  ;;  %v3605_v11 = vadd.f32 %v3488_v56, %v14549_v28 }
 0x3ea   : > { %v4744_v47 = vadd.f32 %v4600_v2, %v4316_v50  ;;  %v4968_v6 = vpop.f32.mrf.mxu3  ;;  %v4318_v53 = vpop.f32.mrf.mxu1  ;;  %v4195_v49 = vld [vmem:[#allocation2 + $0xad] sm:$0xff] }
 0x3eb   : > { %4152 = vst [vmem:[#allocation2 + $0xb8] sm:$0xff] %v4110_v9  ;;  %v3732_v8 = vmul.f32 %v14747_v19, %v3605_v11  ;;  %3527 = vmatmul.bf16.gmra.mxu0 %v3361_v18  ;;  %v4478_v0 = vld [vmem:[#allocation2 + $0xae] sm:$0xff] }
 0x3ec   : > { %v14881_v41 = vadd.f32 %v4968_v6, %v4744_v47  ;;  %v4846_v23 = vld [vmem:[#allocation2 + $0xaf] sm:$0xff] }
 0x3ed   : > { %v3775_v25 = vadd.f32 %v14750_v30, %v3732_v8  ;;  %v13409_v11 = vld [vmem:[%s17095_s2 + $0x170] sm:$0xff]  ;;  %v13388_v6 = vld [vmem:[%s17095_s2 + $0xc8] sm:$0xff] }
 0x3ee   : > { %v13417_v47 = vld [vmem:[%s17095_s2 + $0x1b0] sm:$0xff]  ;;  %6059 = vmatpush.bf16.msrb.mxu2 %v13409_v11  ;;  %5328 = vmatpush.bf16.msrb.mxu0 %v13388_v6 }
 0x3ef   : > { %v3817_v46 = vmax.f32 %v3775_v25, 0.0  ;;  %v3340_v8 = vld [vmem:[#allocation2 + $0x16b] sm:$0xff]  ;;  %6427 = vmatpush.bf16.msrb.mxu3 %v13417_v47 }
 0x3f0   : > { %v3490_v28 = vpop.f32.mrf.mxu0 }
 0x3f1   : > { %v4602_v50 = vpop.f32.mrf.mxu2  ;;  %v4111_v58 = vmul.f32 %v3984_v7, %v3817_v46  ;;  %v3606_v55 = vadd.f32 %v3490_v28, %v3238_v27  ;;  %v3989_v27 = vpop.permute.xlu0 %3988  ;;  %v3362_v46 = vpack.c.bf16 %v3340_v8, %v3339_v63 }
 0x3f2   : > { %v4745_v16 = vadd.f32 %v4602_v50, %v4318_v53  ;;  %v4970_v54 = vpop.f32.mrf.mxu3  ;;  %v4321_v57 = vpop.f32.mrf.mxu1  ;;  %v4196_v10 = vld [vmem:[#allocation2 + $0xb5] sm:$0xff]  ;;  %v13387_v50 = vld [vmem:[%s17095_s2 + $0xc0] sm:$0xff] }
 0x3f3   : > { %v4479_v18 = vld [vmem:[#allocation2 + $0xb6] sm:$0xff]  ;;  %4153 = vst [vmem:[#allocation2 + $0xc0] sm:$0xff] %v4111_v58  ;;  %v3733_v56 = vmul.f32 %v14747_v19, %v3606_v55  ;;  %v4227_v5 = vpack.c.bf16 %v4196_v10, %v4195_v49  ;;  %v2504_v58 = vadd.f32 %v14562_v40, %v14565_v38  ;;  %5329 = vmatpush.bf16.msrb.mxu0 %v13387_v50  ;;  %v3994_v40 = vpop.permute.xlu1 %3993 }
 0x3f4   : > { %v4847_v51 = vld [vmem:[#allocation2 + $0xb7] sm:$0xff]  ;;  %v14889_v2 = vadd.f32 %v4970_v54, %v4745_v16  ;;  %v4510_v9 = vpack.c.bf16 %v4479_v18, %v4478_v0 }
 0x3f5   : > { %v4878_v53 = vpack.c.bf16 %v4847_v51, %v4846_v23  ;;  %v3776_v25 = vadd.f32 %v14750_v30, %v3733_v56  ;;  %4360 = vmatmul.bf16.gmra.mxu1 %v4227_v5  ;;  %v2872_v23 = vadd.f32 %v14571_v21, %v2504_v58  ;;  %v3341_v50 = vld [vmem:[#allocation2 + $0x173] sm:$0xff]  ;;  %v3342_v58 = vld [vmem:[#allocation2 + $0x17b] sm:$0xff] }
 0x3f6   : > { %4644 = vmatmul.bf16.gmra.mxu2 %v4510_v9 }
 0x3f7   : > { %5012 = vmatmul.bf16.gmra.mxu3 %v4878_v53  ;;  %v3818_v7 = vmax.f32 %v3776_v25, 0.0  ;;  %v3240_v56 = vadd.f32 %v14573_v42, %v2872_v23 }
 0x3f8   : > { %v3493_v52 = vpop.f32.mrf.mxu0 }
 0x3f9   : > { %v4605_v28 = vpop.f32.mrf.mxu2  ;;  %v4112_v55 = vmul.f32 %v3989_v27, %v3818_v7  ;;  %v3607_v16 = vadd.f32 %v3493_v52, %v14567_v26 }
 0x3fa   : > { %v4746_v54 = vadd.f32 %v4605_v28, %v4321_v57  ;;  %v4973_v49 = vpop.f32.mrf.mxu3  ;;  %v4323_v0 = vpop.f32.mrf.mxu1  ;;  %v4197_v21 = vld [vmem:[#allocation2 + $0xbd] sm:$0xff] }
 0x3fb   : > { %4154 = vst [vmem:[#allocation2 + $0xc8] sm:$0xff] %v4112_v55  ;;  %v3734_v10 = vmul.f32 %v14747_v19, %v3607_v16  ;;  %3532 = vmatmul.bf16.gmra.mxu0 %v3362_v46  ;;  %v4480_v6 = vld [vmem:[#allocation2 + $0xbe] sm:$0xff]  ;;  %v3999_v16 = vpop.permute.xlu2 %3998 }
 0x3fc   : > { %v14909_v18 = vadd.f32 %v4973_v49, %v4746_v54  ;;  %v4848_v52 = vld [vmem:[#allocation2 + $0xbf] sm:$0xff]  ;;  %v3363_v49 = vpack.c.bf16 %v3342_v58, %v3341_v50 }
 0x3fd   : > { %v3777_v51 = vadd.f32 %v14750_v30, %v3734_v10  ;;  %v2506_v10 = vadd.f32 %v14583_v59, %v14586_v62  ;;  %v4004_v62 = vpop.permute.xlu0 %4003 }
 0x3ff   : > { %v3819_v38 = vmax.f32 %v3777_v51, 0.0 }
 0x400   : > { %v3495_v5 = vpop.f32.mrf.mxu0 }
 0x401   : > { %v4607_v26 = vpop.f32.mrf.mxu2  ;;  %v4113_v57 = vmul.f32 %v3994_v40, %v3819_v38  ;;  %v3608_v9 = vadd.f32 %v3495_v5, %v3240_v56 }
 0x402   : > { %v4747_v11 = vadd.f32 %v4607_v26, %v4323_v0  ;;  %v4975_v47 = vpop.f32.mrf.mxu3  ;;  %v4326_v53 = vpop.f32.mrf.mxu1  ;;  %v4198_v63 = vld [vmem:[#allocation2 + $0xc5] sm:$0xff]  ;;  %v2874_v26 = vadd.f32 %v14598_v32, %v2506_v10 }
 0x403   : > { %v4481_v8 = vld [vmem:[#allocation2 + $0xc6] sm:$0xff]  ;;  %4155 = vst [vmem:[#allocation2 + $0xd0] sm:$0xff] %v4113_v57  ;;  %v3735_v27 = vmul.f32 %v14747_v19, %v3608_v9  ;;  %v4228_v42 = vpack.c.bf16 %v4198_v63, %v4197_v21 }
 0x404   : > { %v4849_v25 = vld [vmem:[#allocation2 + $0xc7] sm:$0xff]  ;;  %v14914_v7 = vadd.f32 %v4975_v47, %v4747_v11  ;;  %v4511_v46 = vpack.c.bf16 %v4481_v8, %v4480_v6  ;;  %v13397_v11 = vld [vmem:[%s17095_s2 + $0x110] sm:$0xff] }
 0x405   : > { %v4879_v28 = vpack.c.bf16 %v4849_v25, %v4848_v52  ;;  %v3778_v55 = vadd.f32 %v14750_v30, %v3735_v27  ;;  %4365 = vmatmul.bf16.gmra.mxu1 %v4228_v42 }
 0x406   : > { %4649 = vmatmul.bf16.gmra.mxu2 %v4511_v46  ;;  %5695 = vmatpush.bf16.msrb.mxu1 %v13397_v11 }
 0x407   : > { %5017 = vmatmul.bf16.gmra.mxu3 %v4879_v28  ;;  %v3820_v54 = vmax.f32 %v3778_v55, 0.0 }
 0x408   : > { %v3498_v0 = vpop.f32.mrf.mxu0 }
 0x409   : > { %v4610_v23 = vpop.f32.mrf.mxu2  ;;  %v4114_v51 = vmul.f32 %v3999_v16, %v3820_v54  ;;  %v3609_v56 = vadd.f32 %v3498_v0, %v14588_v13  ;;  %v3242_v13 = vadd.f32 %v14600_v22, %v2874_v26  ;;  %v4009_v0 = vpop.permute.xlu1 %4008 }
 0x40a   : > { %v4748_v40 = vadd.f32 %v4610_v23, %v4326_v53  ;;  %v4978_v38 = vpop.f32.mrf.mxu3  ;;  %v4328_v5 = vpop.f32.mrf.mxu1  ;;  %v4199_v25 = vld [vmem:[#allocation2 + $0xcd] sm:$0xff] }
 0x40b   : > { %4156 = vst [vmem:[#allocation2 + $0xd8] sm:$0xff] %v4114_v51  ;;  %v3736_v57 = vmul.f32 %v14747_v19, %v3609_v56  ;;  %3537 = vmatmul.bf16.gmra.mxu0 %v3363_v49  ;;  %v4482_v27 = vld [vmem:[#allocation2 + $0xce] sm:$0xff]  ;;  %v2508_v56 = vadd.f32 %v14605_v17, %v14608_v15 }
 0x40c   : > { %v14922_v9 = vadd.f32 %v4978_v38, %v4748_v40  ;;  %v4850_v16 = vld [vmem:[#allocation2 + $0xcf] sm:$0xff] }
 0x40d   : > { %v3779_v59 = vadd.f32 %v14750_v30, %v3736_v57  ;;  %v2876_v11 = vadd.f32 %v14613_v35, %v2508_v56  ;;  %v13416_v17 = vld [vmem:[%s17095_s2 + $0x1a8] sm:$0xff]  ;;  %v2510_v56 = vadd.f32 %v14619_v37, %v14622_v60 }
 0x40e   : > { %6428 = vmatpush.bf16.msrb.mxu3 %v13416_v17 }
 0x40f   : > { %v3821_v47 = vmax.f32 %v3779_v59, 0.0  ;;  %v3244_v35 = vadd.f32 %v14615_v3, %v2876_v11  ;;  %v2878_v11 = vadd.f32 %v14630_v45, %v2510_v56 }
 0x410   : > { %v3500_v21 = vpop.f32.mrf.mxu0 }
 0x411   : > { %v4612_v6 = vpop.f32.mrf.mxu2  ;;  %v4115_v32 = vmul.f32 %v4004_v62, %v3821_v47  ;;  %v3610_v53 = vadd.f32 %v3500_v21, %v3242_v13  ;;  %v13408_v13 = vld [vmem:[%s17095_s2 + $0x168] sm:$0xff]  ;;  %v3246_v37 = vadd.f32 %v14632_v4, %v2878_v11 }
 0x412   : > { %v4749_v63 = vadd.f32 %v4612_v6, %v4328_v5  ;;  %v4980_v8 = vpop.f32.mrf.mxu3  ;;  %v4331_v42 = vpop.f32.mrf.mxu1  ;;  %v4200_v46 = vld [vmem:[#allocation2 + $0xd5] sm:$0xff]  ;;  %6060 = vmatpush.bf16.msrb.mxu2 %v13408_v13 }
 0x413   : > { %v4483_v52 = vld [vmem:[#allocation2 + $0xd6] sm:$0xff]  ;;  %4157 = vst [vmem:[#allocation2 + $0xe0] sm:$0xff] %v4115_v32  ;;  %v3737_v50 = vmul.f32 %v14747_v19, %v3610_v53  ;;  %v4229_v55 = vpack.c.bf16 %v4200_v46, %v4199_v25 }
 0x414   : > { %v4851_v28 = vld [vmem:[#allocation2 + $0xd7] sm:$0xff]  ;;  %v14930_v58 = vadd.f32 %v4980_v8, %v4749_v63  ;;  %v4512_v22 = vpack.c.bf16 %v4483_v52, %v4482_v27 }
 0x415   : > { %v14932_v54 = vpack.c.bf16 %v4851_v28, %v4850_v16  ;;  %v3780_v49 = vadd.f32 %v14750_v30, %v3737_v50  ;;  %4370 = vmatmul.bf16.gmra.mxu1 %v4229_v55 }
 0x416   : > { %4654 = vmatmul.bf16.gmra.mxu2 %v4512_v22 }
 0x417   : > { %5022 = vmatmul.bf16.gmra.mxu3 %v14932_v54  ;;  %v3822_v23 = vmax.f32 %v3780_v49, 0.0 }
 0x418   : > { %v3503_v10 = vpop.f32.mrf.mxu0 }
 0x419   : > { %v4615_v51 = vpop.f32.mrf.mxu2  ;;  %v4116_v40 = vmul.f32 %v4009_v0, %v3822_v23  ;;  %v3611_v38 = vadd.f32 %v3503_v10, %v14610_v1  ;;  %v4014_v1 = vpop.permute.xlu2 %4013 }
 0x41a   : > { %v4750_v5 = vadd.f32 %v4615_v51, %v4331_v42  ;;  %v4983_v26 = vpop.f32.mrf.mxu3  ;;  %v4333_v57 = vpop.f32.mrf.mxu1  ;;  %v4201_v8 = vld [vmem:[#allocation2 + $0xdd] sm:$0xff] }
 0x41b   : > { %4158 = vst [vmem:[#allocation2 + $0xe8] sm:$0xff] %v4116_v40  ;;  %v3738_v59 = vmul.f32 %v14747_v19, %v3611_v38  ;;  %5330 = vmatmul.bf16.vlgmr.msrb.gmra.mxu0 %v14762_v20  ;;  %v4484_v25 = vld [vmem:[#allocation2 + $0xde] sm:$0xff]  ;;  %v4019_v0 = vpop.permute.xlu0 %4018 }
 0x41c   : > { %v14941_v62 = vadd.f32 %v4983_v26, %v4750_v5  ;;  %v4852_v22 = vld [vmem:[#allocation2 + $0xdf] sm:$0xff] }
 0x41d   : > { %v3781_v15 = vadd.f32 %v14750_v30, %v3738_v59 }
 0x41f   : > { %v3823_v47 = vmax.f32 %v3781_v15, 0.0  ;;  %v4024_v15 = vpop.permute.xlu1 %4023 }
 0x420   : > { %v3505_v21 = vpop.f32.mrf.mxu0 }
 0x421   : > { %v4617_v6 = vpop.f32.mrf.mxu2  ;;  %v4117_v32 = vmul.f32 %v4014_v1, %v3823_v47  ;;  %v3612_v20 = vadd.f32 %v3505_v21, %v3244_v35 }
 0x422   : > { %v4751_v53 = vadd.f32 %v4617_v6, %v4333_v57  ;;  %v4985_v63 = vpop.f32.mrf.mxu3  ;;  %v4336_v27 = vpop.f32.mrf.mxu1  ;;  %v4202_v42 = vld [vmem:[#allocation2 + $0xe5] sm:$0xff] }
 0x423   : > { %v4485_v46 = vld [vmem:[#allocation2 + $0xe6] sm:$0xff]  ;;  %4159 = vst [vmem:[#allocation2 + $0xf0] sm:$0xff] %v4117_v32  ;;  %v3739_v28 = vmul.f32 %v14747_v19, %v3612_v20  ;;  %v4230_v55 = vpack.c.bf16 %v4202_v42, %v4201_v8 }
 0x424   : > { %v4853_v52 = vld [vmem:[#allocation2 + $0xe7] sm:$0xff]  ;;  %v14953_v50 = vadd.f32 %v4985_v63, %v4751_v53  ;;  %v4513_v3 = vpack.c.bf16 %v4485_v46, %v4484_v25 }
 0x425   : > { %v14955_v16 = vpack.c.bf16 %v4853_v52, %v4852_v22  ;;  %v3782_v49 = vadd.f32 %v14750_v30, %v3739_v28  ;;  %4375 = vmatmul.bf16.gmra.mxu1 %v4230_v55  ;;  %v4029_v28 = vpop.permute.xlu2 %4028 }
 0x426   : > { %4659 = vmatmul.bf16.gmra.mxu2 %v4513_v3 }
 0x427   : > { %5027 = vmatmul.bf16.gmra.mxu3 %v14955_v16  ;;  %v3824_v23 = vmax.f32 %v3782_v49, 0.0  ;;  %v2512_v49 = vadd.f32 %v14639_v14, %v14645_v39  ;;  %v4034_v39 = vpop.permute.xlu0 %4033 }
 0x428   : > { %v3508_v10 = vpop.f32.mrf.mxu0 }
 0x429   : > { %v4620_v51 = vpop.f32.mrf.mxu2  ;;  %v4118_v40 = vmul.f32 %v4019_v0, %v3824_v23  ;;  %v3613_v38 = vadd.f32 %v3508_v10, %v14624_v36 }
 0x42a   : > { %v4752_v5 = vadd.f32 %v4620_v51, %v4336_v27  ;;  %v4988_v26 = vpop.f32.mrf.mxu3  ;;  %v4338_v57 = vpop.f32.mrf.mxu1  ;;  %v4203_v45 = vld [vmem:[#allocation2 + $0xed] sm:$0xff] }
 0x42b   : > { %4160 = vst [vmem:[#allocation2 + $0xf8] sm:$0xff] %v4118_v40  ;;  %v3740_v59 = vmul.f32 %v14747_v19, %v3613_v38  ;;  %5335 = vmatmul.bf16.gmra.mxu0 %v14777_v31  ;;  %v4486_v32 = vld [vmem:[#allocation2 + $0xee] sm:$0xff] }
 0x42c   : > { %v14964_v13 = vadd.f32 %v4988_v26, %v4752_v5  ;;  %v4854_v42 = vld [vmem:[#allocation2 + $0xef] sm:$0xff] }
 0x42d   : > { %v3783_v17 = vadd.f32 %v14750_v30, %v3740_v59  ;;  %v17199_v40 = vld [vmem:[#allocation4_spill] sm:$0xff] }
 0x42e   : > { %v2880_v38 = vadd.f32 %v17199_v40, %v2512_v49  ;;  %v17202_v49 = vld [vmem:[#allocation33_spill] sm:$0xff] }
 0x42f   : > { %v3825_v60 = vmax.f32 %v3783_v17, 0.0 }
 0x430   : > { %v3510_v1 = vpop.f32.mrf.mxu0 }
 0x431   : > { %v4622_v36 = vpop.f32.mrf.mxu2  ;;  %v4119_v35 = vmul.f32 %v4024_v15, %v3825_v60  ;;  %v3614_v47 = vadd.f32 %v3510_v1, %v3246_v37 }
 0x432   : > { %v4753_v21 = vadd.f32 %v4622_v36, %v4338_v57  ;;  %v4990_v6 = vpop.f32.mrf.mxu3  ;;  %v4341_v20 = vpop.f32.mrf.mxu1  ;;  %v4204_v53 = vld [vmem:[#allocation2 + $0xf5] sm:$0xff]  ;;  %v13396_v57 = vld [vmem:[%s17095_s2 + $0x108] sm:$0xff] }
 0x433   : > { %v4487_v63 = vld [vmem:[#allocation2 + $0xf6] sm:$0xff]  ;;  %4161 = vst [vmem:[#allocation2 + $0x100] sm:$0xff] %v4119_v35  ;;  %v3741_v31 = vmul.f32 %v14747_v19, %v3614_v47  ;;  %v4231_v27 = vpack.c.bf16 %v4204_v53, %v4203_v45  ;;  %5696 = vmatpush.bf16.msrb.mxu1 %v13396_v57 }
 0x434   : > { %v4855_v8 = vld [vmem:[#allocation2 + $0xf7] sm:$0xff]  ;;  %v14970_v25 = vadd.f32 %v4990_v6, %v4753_v21  ;;  %v4514_v4 = vpack.c.bf16 %v4487_v63, %v4486_v32 }
 0x435   : > { %v14972_v46 = vpack.c.bf16 %v4855_v8, %v4854_v42  ;;  %v3784_v52 = vadd.f32 %v14750_v30, %v3741_v31  ;;  %4380 = vmatmul.bf16.gmra.mxu1 %v4231_v27  ;;  %v13407_v31 = vld [vmem:[%s17095_s2 + $0x160] sm:$0xff] }
 0x436   : > { %4664 = vmatmul.bf16.gmra.mxu2 %v4514_v4  ;;  %v13415_v27 = vld [vmem:[%s17095_s2 + $0x1a0] sm:$0xff] }
 0x437   : > { %5032 = vmatmul.bf16.gmra.mxu3 %v14972_v46  ;;  %v3826_v55 = vmax.f32 %v3784_v52, 0.0  ;;  %6061 = vmatpush.bf16.msrb.mxu2 %v13407_v31  ;;  %v4039_v52 = vpop.permute.xlu1 %4038 }
 0x438   : > { %v3513_v3 = vpop.f32.mrf.mxu0  ;;  %6429 = vmatpush.bf16.msrb.mxu3 %v13415_v27 }
 0x439   : > { %v4625_v22 = vpop.f32.mrf.mxu2  ;;  %v4120_v0 = vmul.f32 %v4029_v28, %v3826_v55  ;;  %v3615_v23 = vadd.f32 %v3513_v3, %v14647_v43  ;;  %v17200_v43 = vld [vmem:[#allocation32_spill] sm:$0xff] }
 0x43a   : > { %v4754_v10 = vadd.f32 %v4625_v22, %v4341_v20  ;;  %v4993_v51 = vpop.f32.mrf.mxu3  ;;  %v4343_v56 = vpop.f32.mrf.mxu1  ;;  %v3248_v11 = vadd.f32 %v17200_v43, %v2880_v38  ;;  %v4205_v35 = vld [vmem:[#allocation2 + $0xfd] sm:$0xff] }
 0x43b   : > { %4162 = vst [vmem:[#allocation2 + $0x108] sm:$0xff] %v4120_v0  ;;  %v3742_v5 = vmul.f32 %v14747_v19, %v3615_v23  ;;  %5340 = vmatmul.bf16.gmra.mxu0 %v14786_v29  ;;  %v4488_v47 = vld [vmem:[#allocation2 + $0xfe] sm:$0xff] }
 0x43c   : > { %v14981_v26 = vadd.f32 %v4993_v51, %v4754_v10  ;;  %v4856_v8 = vld [vmem:[#allocation2 + $0xff] sm:$0xff]  ;;  %v17203_v10 = vld [vmem:[#allocation35_spill] sm:$0xff] }
 0x43d   : > { %v3785_v14 = vadd.f32 %v14750_v30, %v3742_v5  ;;  %v17201_v22 = vld [vmem:[#allocation5_spill] sm:$0xff]  ;;  %v17204_v5 = vld [vmem:[#allocation6_spill] sm:$0xff] }
 0x43e   : > { %v2514_v0 = vadd.f32 %v17202_v49, %v17201_v22  ;;  %v17205_v43 = vld [vmem:[#allocation22_spill] sm:$0xff] }
 0x43f   : > { %v3827_v59 = vmax.f32 %v3785_v14, 0.0 }
 0x440   : > { %v3515_v17 = vpop.f32.mrf.mxu0  ;;  %v2882_v57 = vadd.f32 %v17204_v5, %v2514_v0 }
 0x441   : > { %v4627_v15 = vpop.f32.mrf.mxu2  ;;  %v4121_v37 = vmul.f32 %v4034_v39, %v3827_v59  ;;  %v3616_v60 = vadd.f32 %v3515_v17, %v3248_v11  ;;  %v4044_v59 = vpop.permute.xlu2 %4043  ;;  %v17206_v17 = vld [vmem:[#allocation7_spill] sm:$0xff] }
 0x442   : > { %v4755_v1 = vadd.f32 %v4627_v15, %v4343_v56  ;;  %v4995_v36 = vpop.f32.mrf.mxu3  ;;  %v4346_v29 = vpop.f32.mrf.mxu1  ;;  %v4206_v21 = vld [vmem:[#allocation2 + $0x105] sm:$0xff]  ;;  %v3250_v15 = vadd.f32 %v17206_v17, %v2882_v57 }
 0x443   : > { %v4489_v6 = vld [vmem:[#allocation2 + $0x106] sm:$0xff]  ;;  %4163 = vst [vmem:[#allocation2 + $0x110] sm:$0xff] %v4121_v37  ;;  %v3743_v32 = vmul.f32 %v14747_v19, %v3616_v60  ;;  %v4232_v53 = vpack.c.bf16 %v4206_v21, %v4205_v35 }
 0x444   : > { %v4857_v45 = vld [vmem:[#allocation2 + $0x107] sm:$0xff]  ;;  %v14990_v20 = vadd.f32 %v4995_v36, %v4755_v1  ;;  %v4515_v63 = vpack.c.bf16 %v4489_v6, %v4488_v47 }
 0x445   : > { %v14998_v4 = vpack.c.bf16 %v4857_v45, %v4856_v8  ;;  %v3786_v42 = vadd.f32 %v14750_v30, %v3743_v32  ;;  %4385 = vmatmul.bf16.gmra.mxu1 %v4232_v53 }
 0x446   : > { %4669 = vmatmul.bf16.gmra.mxu2 %v4515_v63 }
 0x447   : > { %5037 = vmatmul.bf16.gmra.mxu3 %v14998_v4  ;;  %v3828_v28 = vmax.f32 %v3786_v42, 0.0 }
 0x448   : > { %v3518_v55 = vpop.f32.mrf.mxu0 }
 0x449   : > { %v4630_v3 = vpop.f32.mrf.mxu2  ;;  %v4122_v23 = vmul.f32 %v4039_v52, %v3828_v28  ;;  %v3617_v51 = vadd.f32 %v3518_v55, %v17203_v10  ;;  %v17208_v10 = vld [vmem:[#allocation8_spill] sm:$0xff] }
 0x44a   : > { %v4756_v56 = vadd.f32 %v4630_v3, %v4346_v29  ;;  %v4998_v40 = vpop.f32.mrf.mxu3  ;;  %v4348_v38 = vpop.f32.mrf.mxu1  ;;  %v4207_v21 = vld [vmem:[#allocation2 + $0x10d] sm:$0xff] }
 0x44b   : > { %4164 = vst [vmem:[#allocation2 + $0x118] sm:$0xff] %v4122_v23  ;;  %v3744_v14 = vmul.f32 %v14747_v19, %v3617_v51  ;;  %5345 = vmatmul.bf16.gmra.mxu0 %v17205_v43  ;;  %v4490_v6 = vld [vmem:[#allocation2 + $0x10e] sm:$0xff]  ;;  %v4049_v3 = vpop.permute.xlu0 %4048  ;;  %v17207_v23 = vld [vmem:[#allocation9_spill] sm:$0xff] }
 0x44c   : > { %v15007_v39 = vadd.f32 %v4998_v40, %v4756_v56  ;;  %v4858_v52 = vld [vmem:[#allocation2 + $0x10f] sm:$0xff]  ;;  %v2516_v51 = vadd.f32 %v17208_v10, %v17207_v23  ;;  %v17209_v40 = vld [vmem:[#allocation10_spill] sm:$0xff]  ;;  %v4059_v10 = vpop.permute.xlu2 %4058 }
 0x44d   : > { %v3787_v11 = vadd.f32 %v14750_v30, %v3744_v14  ;;  %v17210_v43 = vld [vmem:[#allocation11_spill] sm:$0xff] }
 0x44f   : > { %v3829_v37 = vmax.f32 %v3787_v11, 0.0  ;;  %v2884_v11 = vadd.f32 %v17210_v43, %v2516_v51  ;;  %v17214_v43 = vld [vmem:[#allocation15_spill] sm:$0xff] }
 0x450   : > { %v3520_v60 = vpop.f32.mrf.mxu0 }
 0x451   : > { %v4632_v1 = vpop.f32.mrf.mxu2  ;;  %v4123_v36 = vmul.f32 %v4044_v59, %v3829_v37  ;;  %v3618_v35 = vadd.f32 %v3520_v60, %v3250_v15  ;;  %v4054_v37 = vpop.permute.xlu1 %4053  ;;  %v17211_v60 = vld [vmem:[#allocation12_spill] sm:$0xff] }
 0x452   : > { %v4757_v47 = vadd.f32 %v4632_v1, %v4348_v38  ;;  %v5000_v29 = vpop.f32.mrf.mxu3  ;;  %v4351_v45 = vpop.f32.mrf.mxu1  ;;  %v4208_v32 = vld [vmem:[#allocation2 + $0x115] sm:$0xff]  ;;  %v3252_v1 = vadd.f32 %v17211_v60, %v2884_v11 }
 0x453   : > { %v4491_v53 = vld [vmem:[#allocation2 + $0x116] sm:$0xff]  ;;  %4165 = vst [vmem:[#allocation2 + $0x120] sm:$0xff] %v4123_v36  ;;  %v3745_v8 = vmul.f32 %v14747_v19, %v3618_v35  ;;  %v4233_v27 = vpack.c.bf16 %v4208_v32, %v4207_v21 }
 0x454   : > { %v4859_v63 = vld [vmem:[#allocation2 + $0x117] sm:$0xff]  ;;  %v15013_v31 = vadd.f32 %v5000_v29, %v4757_v47  ;;  %v4516_v42 = vpack.c.bf16 %v4491_v53, %v4490_v6 }
 0x455   : > { %v15015_v28 = vpack.c.bf16 %v4859_v63, %v4858_v52  ;;  %v3788_v55 = vadd.f32 %v14750_v30, %v3745_v8  ;;  %4390 = vmatmul.bf16.gmra.mxu1 %v4233_v27  ;;  %v17215_v60 = vld [vmem:[#allocation16_spill] sm:$0xff] }
 0x456   : > { %4674 = vmatmul.bf16.gmra.mxu2 %v4516_v42 }
 0x457   : > { %5042 = vmatmul.bf16.gmra.mxu3 %v15015_v28  ;;  %v3830_v22 = vmax.f32 %v3788_v55, 0.0 }
 0x458   : > { %v3523_v49 = vpop.f32.mrf.mxu0 }
 0x459   : > { %v4635_v0 = vpop.f32.mrf.mxu2  ;;  %v4124_v56 = vmul.f32 %v4049_v3, %v3830_v22  ;;  %v3619_v38 = vadd.f32 %v3523_v49, %v17209_v40  ;;  %v13395_v49 = vld [vmem:[%s17095_s2 + $0x100] sm:$0xff] }
 0x45a   : > { %v4758_v5 = vadd.f32 %v4635_v0, %v4351_v45  ;;  %v5003_v57 = vpop.f32.mrf.mxu3  ;;  %v4353_v14 = vpop.f32.mrf.mxu1  ;;  %v4209_v32 = vld [vmem:[#allocation2 + $0x11d] sm:$0xff]  ;;  %5697 = vmatpush.bf16.msrb.mxu1 %v13395_v49 }
 0x45b   : > { %4166 = vst [vmem:[#allocation2 + $0x128] sm:$0xff] %v4124_v56  ;;  %v3746_v59 = vmul.f32 %v14747_v19, %v3619_v38  ;;  %5350 = vmatmul.bf16.gmra.mxu0 %v14810_v44  ;;  %v4492_v53 = vld [vmem:[#allocation2 + $0x11e] sm:$0xff] }
 0x45c   : > { %v15024_v17 = vadd.f32 %v5003_v57, %v4758_v5  ;;  %v4860_v22 = vld [vmem:[#allocation2 + $0x11f] sm:$0xff] }
 0x45d   : > { %v3789_v15 = vadd.f32 %v14750_v30, %v3746_v59  ;;  %v17212_v38 = vld [vmem:[#allocation14_spill] sm:$0xff]  ;;  %v17213_v5 = vld [vmem:[#allocation13_spill] sm:$0xff] }
 0x45e   : > { %v2518_v57 = vadd.f32 %v17213_v5, %v17212_v38  ;;  %v13414_v5 = vld [vmem:[%s17095_s2 + $0x198] sm:$0xff] }
 0x45f   : > { %v3831_v36 = vmax.f32 %v3789_v15, 0.0  ;;  %6430 = vmatpush.bf16.msrb.mxu3 %v13414_v5 }
 0x460   : > { %v3525_v35 = vpop.f32.mrf.mxu0 }
 0x461   : > { %v4637_v47 = vpop.f32.mrf.mxu2  ;;  %v4125_v29 = vmul.f32 %v4054_v37, %v3831_v36  ;;  %v3620_v21 = vadd.f32 %v3525_v35, %v3252_v1  ;;  %v2886_v1 = vadd.f32 %v17215_v60, %v2518_v57 }
 0x462   : > { %v4759_v6 = vadd.f32 %v4637_v47, %v4353_v14  ;;  %v5005_v45 = vpop.f32.mrf.mxu3  ;;  %v4356_v63 = vpop.f32.mrf.mxu1  ;;  %v4210_v8 = vld [vmem:[#allocation2 + $0x125] sm:$0xff]  ;;  %v13406_v47 = vld [vmem:[%s17095_s2 + $0x158] sm:$0xff] }
 0x463   : > { %v4493_v27 = vld [vmem:[#allocation2 + $0x126] sm:$0xff]  ;;  %4167 = vst [vmem:[#allocation2 + $0x130] sm:$0xff] %v4125_v29  ;;  %v3747_v44 = vmul.f32 %v14747_v19, %v3620_v21  ;;  %v4234_v55 = vpack.c.bf16 %v4210_v8, %v4209_v32  ;;  %6062 = vmatpush.bf16.msrb.mxu2 %v13406_v47  ;;  %v4064_v21 = vpop.permute.xlu0 %4063 }
 0x464   : > { %v4861_v42 = vld [vmem:[#allocation2 + $0x127] sm:$0xff]  ;;  %v15030_v52 = vadd.f32 %v5005_v45, %v4759_v6  ;;  %v4517_v3 = vpack.c.bf16 %v4493_v27, %v4492_v53  ;;  %v17216_v6 = vld [vmem:[#allocation17_spill] sm:$0xff] }
 0x465   : > { %v15035_v0 = vpack.c.bf16 %v4861_v42, %v4860_v22  ;;  %v3790_v23 = vadd.f32 %v14750_v30, %v3747_v44  ;;  %4395 = vmatmul.bf16.gmra.mxu1 %v4234_v55  ;;  %v3254_v45 = vadd.f32 %v17216_v6, %v2886_v1  ;;  %v5206_v47 = vld [vmem:[#allocation2 + $0x7f] sm:$0xff] }
 0x466   : > { %4679 = vmatmul.bf16.gmra.mxu2 %v4517_v3 }
 0x467   : > { %5047 = vmatmul.bf16.gmra.mxu3 %v15035_v0  ;;  %v3832_v51 = vmax.f32 %v3790_v23, 0.0 }
 0x468   : > { %v3528_v56 = vpop.f32.mrf.mxu0 }
 0x469   : > { %v4640_v40 = vpop.f32.mrf.mxu2  ;;  %v4126_v14 = vmul.f32 %v4059_v10, %v3832_v51  ;;  %v3621_v11 = vadd.f32 %v3528_v56, %v17214_v43  ;;  %v5207_v43 = vld [vmem:[#allocation2 + $0x87] sm:$0xff] }
 0x46a   : > { %v4760_v59 = vadd.f32 %v4640_v40, %v4356_v63  ;;  %v5008_v15 = vpop.f32.mrf.mxu3  ;;  %v4358_v37 = vpop.f32.mrf.mxu1  ;;  %v4211_v55 = vld [vmem:[#allocation2 + $0x12d] sm:$0xff] }
 0x46b   : > { %4168 = vst [vmem:[#allocation2 + $0x138] sm:$0xff] %v4126_v14  ;;  %v3748_v36 = vmul.f32 %v14747_v19, %v3621_v11  ;;  %5355 = vmatmul.bf16.gmra.mxu0 %v14825_v12  ;;  %v4494_v3 = vld [vmem:[#allocation2 + $0x12e] sm:$0xff]  ;;  %v4069_v11 = vpop.permute.xlu1 %4068 }
 0x46c   : > { %v15044_v35 = vadd.f32 %v5008_v15, %v4760_v59  ;;  %v4862_v38 = vld [vmem:[#allocation2 + $0x12f] sm:$0xff] }
 0x46d   : > { %v3791_v29 = vadd.f32 %v14750_v30, %v3748_v36  ;;  %v17217_v15 = vld [vmem:[#allocation19_spill] sm:$0xff] }
 0x46f   : > { %v3833_v32 = vmax.f32 %v3791_v29, 0.0 }
 0x470   : > { %v3530_v53 = vpop.f32.mrf.mxu0 }
 0x471   : > { %v4642_v63 = vpop.f32.mrf.mxu2  ;;  %v4127_v8 = vmul.f32 %v4064_v21, %v3833_v32  ;;  %v3622_v27 = vadd.f32 %v3530_v53, %v3254_v45  ;;  %v17219_v21 = vld [vmem:[#allocation37_spill] sm:$0xff]  ;;  %v5242_v53 = vpack.c.bf16 %v5207_v43, %v5206_v47 }
 0x472   : > { %v4761_v42 = vadd.f32 %v4642_v63, %v4358_v37  ;;  %v5010_v44 = vpop.f32.mrf.mxu3  ;;  %v4361_v12 = vpop.f32.mrf.mxu1  ;;  %v4212_v22 = vld [vmem:[#allocation2 + $0x135] sm:$0xff]  ;;  %v17218_v37 = vld [vmem:[#allocation18_spill] sm:$0xff] }
 0x473   : > { %v4495_v49 = vld [vmem:[#allocation2 + $0x136] sm:$0xff]  ;;  %4169 = vst [vmem:[#allocation2 + $0x140] sm:$0xff] %v4127_v8  ;;  %v3749_v10 = vmul.f32 %v14747_v19, %v3622_v27  ;;  %v4235_v56 = vpack.c.bf16 %v4212_v22, %v4211_v55  ;;  %v2520_v60 = vadd.f32 %v17218_v37, %v17217_v15  ;;  %v13412_v22 = vld [vmem:[%s17095_s2 + $0x188] sm:$0xff] }
 0x474   : > { %v4863_v23 = vld [vmem:[#allocation2 + $0x137] sm:$0xff]  ;;  %v15053_v51 = vadd.f32 %v5010_v44, %v4761_v42  ;;  %v4518_v40 = vpack.c.bf16 %v4495_v49, %v4494_v3  ;;  %v17220_v42 = vld [vmem:[#allocation38_spill] sm:$0xff] }
 0x475   : > { %v15058_v57 = vpack.c.bf16 %v4863_v23, %v4862_v38  ;;  %v3792_v14 = vadd.f32 %v14750_v30, %v3749_v10  ;;  %4400 = vmatmul.bf16.gmra.mxu1 %v4235_v56  ;;  %v13405_v63 = vld [vmem:[%s17095_s2 + $0x150] sm:$0xff]  ;;  %v2888_v44 = vadd.f32 %v17220_v42, %v2520_v60  ;;  %v4074_v23 = vpop.permute.xlu2 %4073  ;;  %v17221_v10 = vld [vmem:[#allocation39_spill] sm:$0xff]  ;;  %v13403_v60 = vld [vmem:[%s17095_s2 + $0x140] sm:$0xff] }
 0x476   : > { %4684 = vmatmul.bf16.gmra.mxu2 %v4518_v40  ;;  %v13413_v8 = vld [vmem:[%s17095_s2 + $0x190] sm:$0xff] }
 0x477   : > { %5052 = vmatmul.bf16.gmra.mxu3 %v15058_v57  ;;  %v3834_v59 = vmax.f32 %v3792_v14, 0.0  ;;  %6063 = vmatpush.bf16.msrb.mxu2 %v13405_v63  ;;  %v3256_v56 = vadd.f32 %v17221_v10, %v2888_v44  ;;  %v5209_v44 = vld [vmem:[#allocation2 + $0x97] sm:$0xff] }
 0x478   : > { %v3533_v1 = vpop.f32.mrf.mxu0  ;;  %6431 = vmatpush.bf16.msrb.mxu3 %v13413_v8  ;;  %v13426_v8 = vld [vmem:[%s17095_s2 + $0x1f8] sm:$0xff] }
 0x479   : > { %v4645_v36 = vpop.f32.mrf.mxu2  ;;  %v4128_v29 = vmul.f32 %v4069_v11, %v3834_v59  ;;  %v3623_v6 = vadd.f32 %v3533_v1, %v17219_v21  ;;  %v13411_v1 = vld [vmem:[%s17095_s2 + $0x180] sm:$0xff]  ;;  %6794 = vmatpush.bf16.msra.mxu0 %v13426_v8 }
 0x47a   : > { %v4762_v45 = vadd.f32 %v4645_v36, %v4361_v12  ;;  %v5013_v32 = vpop.f32.mrf.mxu3  ;;  %v4363_v27 = vpop.f32.mrf.mxu1  ;;  %v13404_v12 = vld [vmem:[%s17095_s2 + $0x148] sm:$0xff]  ;;  %v4213_v14 = vld [vmem:[#allocation2 + $0x13d] sm:$0xff] }
 0x47b   : > { %4170 = vst [vmem:[#allocation2 + $0x148] sm:$0xff] %v4128_v29  ;;  %v3750_v55 = vmul.f32 %v14747_v19, %v3623_v6  ;;  %5360 = vmatmul.bf16.gmra.mxu0 %v5242_v53  ;;  %6064 = vmatpush.bf16.msrb.mxu2 %v13404_v12  ;;  %v4496_v37 = vld [vmem:[#allocation2 + $0x13e] sm:$0xff]  ;;  %v4079_v12 = vpop.permute.xlu0 %4078 }
 0x47c   : > { %v15073_v3 = vadd.f32 %v5013_v32, %v4762_v45  ;;  %6432 = vmatpush.bf16.msrb.mxu3 %v13412_v22  ;;  %v4864_v63 = vld [vmem:[#allocation2 + $0x13f] sm:$0xff] }
 0x47d   : > { %v3793_v49 = vadd.f32 %v14750_v30, %v3750_v55  ;;  %v13434_v55 = vld [vmem:[%s17095_s2 + $0x238] sm:$0xff] }
 0x47e   : > { %7162 = vmatpush.bf16.msra.mxu1 %v13434_v55 }
 0x47f   : > { %v3835_v40 = vmax.f32 %v3793_v49, 0.0  ;;  %6065 = vmatpush.bf16.msrb.mxu2 %v13403_v60  ;;  %v17222_v49 = vld [vmem:[#allocation20_spill] sm:$0xff] }
 0x480   : > { %v3535_v38 = vpop.f32.mrf.mxu0  ;;  %6433 = vmatpush.bf16.msrb.mxu3 %v13411_v1 }
 0x481   : > { %v4647_v5 = vpop.f32.mrf.mxu2  ;;  %v4129_v43 = vmul.f32 %v4074_v23, %v3835_v40  ;;  %v3624_v11 = vadd.f32 %v3535_v38, %v3256_v56  ;;  %v2522_v23 = vadd.f32 %v14815_v48, %v17222_v49  ;;  %v5208_v40 = vld [vmem:[#allocation2 + $0x8f] sm:$0xff] }
 0x482   : > { %v4763_v59 = vadd.f32 %v4647_v5, %v4363_v27  ;;  %v5015_v15 = vpop.f32.mrf.mxu3  ;;  %v4366_v36 = vpop.f32.mrf.mxu1  ;;  %v4214_v47 = vld [vmem:[#allocation2 + $0x145] sm:$0xff]  ;;  %v17223_v5 = vld [vmem:[#allocation21_spill] sm:$0xff] }
 0x483   : > { %v4497_v29 = vld [vmem:[#allocation2 + $0x146] sm:$0xff]  ;;  %4171 = vst [vmem:[#allocation2 + $0x150] sm:$0xff] %v4129_v43  ;;  %v3751_v6 = vmul.f32 %v14747_v19, %v3624_v11  ;;  %v4236_v32 = vpack.c.bf16 %v4214_v47, %v4213_v14 }
 0x484   : > { %v4865_v21 = vld [vmem:[#allocation2 + $0x147] sm:$0xff]  ;;  %v15090_v45 = vadd.f32 %v5015_v15, %v4763_v59  ;;  %v4519_v53 = vpack.c.bf16 %v4497_v29, %v4496_v37  ;;  %v5243_v59 = vpack.c.bf16 %v5209_v44, %v5208_v40  ;;  %v4084_v29 = vpop.permute.xlu1 %4083 }
 0x485   : > { %v15095_v27 = vpack.c.bf16 %v4865_v21, %v4864_v63  ;;  %v3794_v42 = vadd.f32 %v14750_v30, %v3751_v6  ;;  %4405 = vmatmul.bf16.gmra.mxu1 %v4236_v32  ;;  %v17224_v37 = vld [vmem:[#allocation23_spill] sm:$0xff]  ;;  %v17225_v21 = vld [vmem:[#allocation24_spill] sm:$0xff] }
 0x486   : > { %4689 = vmatmul.bf16.gmra.mxu2 %v4519_v53  ;;  %v2890_v60 = vadd.f32 %v17224_v37, %v2522_v23 }
 0x487   : > { %5057 = vmatmul.bf16.gmra.mxu3 %v15095_v27  ;;  %v3836_v22 = vmax.f32 %v3794_v42, 0.0 }
 0x488   : > { %v3538_v10 = vpop.f32.mrf.mxu0  ;;  %v3258_v6 = vadd.f32 %v17225_v21, %v2890_v60 }
 0x489   : > { %v4650_v56 = vpop.f32.mrf.mxu2  ;;  %v4130_v38 = vmul.f32 %v4079_v12, %v3836_v22  ;;  %v3625_v14 = vadd.f32 %v3538_v10, %v17223_v5 }
 0x48a   : > { %v4764_v43 = vadd.f32 %v4650_v56, %v4366_v36  ;;  %v5018_v11 = vpop.f32.mrf.mxu3  ;;  %v4368_v15 = vpop.f32.mrf.mxu1  ;;  %v4215_v55 = vld [vmem:[#allocation2 + $0x14d] sm:$0xff] }
 0x48b   : > { %4172 = vst [vmem:[#allocation2 + $0x158] sm:$0xff] %v4130_v38  ;;  %v3752_v1 = vmul.f32 %v14747_v19, %v3625_v14  ;;  %5365 = vmatmul.bf16.gmra.mxu0 %v5243_v59  ;;  %v4498_v12 = vld [vmem:[#allocation2 + $0x14e] sm:$0xff] }
 0x48c   : > { %v15107_v47 = vadd.f32 %v5018_v11, %v4764_v43  ;;  %v4866_v14 = vld [vmem:[#allocation2 + $0x14f] sm:$0xff]  ;;  %v5211_v59 = vld [vmem:[#allocation2 + $0xa7] sm:$0xff] }
 0x48d   : > { %v3795_v48 = vadd.f32 %v14750_v30, %v3752_v1 }
 0x48f   : > { %v3837_v32 = vmax.f32 %v3795_v48, 0.0  ;;  %v5210_v48 = vld [vmem:[#allocation2 + $0x9f] sm:$0xff] }
 0x490   : > { %v3540_v53 = vpop.f32.mrf.mxu0 }
 0x491   : > { %v4652_v63 = vpop.f32.mrf.mxu2  ;;  %v4131_v36 = vmul.f32 %v4084_v29, %v3837_v32  ;;  %v3626_v8 = vadd.f32 %v3540_v53, %v3258_v6  ;;  %v5244_v32 = vpack.c.bf16 %v5211_v59, %v5210_v48 }
 0x492   : > { %v4765_v42 = vadd.f32 %v4652_v63, %v4368_v15  ;;  %v5020_v44 = vpop.f32.mrf.mxu3  ;;  %v4371_v22 = vpop.f32.mrf.mxu1  ;;  %v4216_v49 = vld [vmem:[#allocation2 + $0x155] sm:$0xff] }
 0x493   : > { %v4499_v23 = vld [vmem:[#allocation2 + $0x156] sm:$0xff]  ;;  %4173 = vst [vmem:[#allocation2 + $0x160] sm:$0xff] %v4131_v36  ;;  %v3753_v56 = vmul.f32 %v14747_v19, %v3626_v8  ;;  %v4237_v38 = vpack.c.bf16 %v4216_v49, %v4215_v55  ;;  %v4089_v15 = vpop.permute.xlu2 %4088  ;;  %v5563_v8 = vld [vmem:[#allocation2 + $0x28] sm:$0xff] }
 0x494   : > { %v4867_v10 = vld [vmem:[#allocation2 + $0x157] sm:$0xff]  ;;  %v15112_v40 = vadd.f32 %v5020_v44, %v4765_v42  ;;  %v4520_v5 = vpack.c.bf16 %v4499_v23, %v4498_v12  ;;  %v5931_v42 = vld [vmem:[#allocation2 + $0x29] sm:$0xff]  ;;  %v5930_v23 = vld [vmem:[#allocation2 + $0x21] sm:$0xff] }
 0x495   : > { %v15114_v43 = vpack.c.bf16 %v4867_v10, %v4866_v14  ;;  %v3796_v11 = vadd.f32 %v14750_v30, %v3753_v56  ;;  %4410 = vmatmul.bf16.gmra.mxu1 %v4237_v38  ;;  %v6299_v12 = vld [vmem:[#allocation2 + $0x39] sm:$0xff]  ;;  %v5972_v56 = vpack.c.bf16 %v5931_v42, %v5930_v23  ;;  %v6298_v38 = vld [vmem:[#allocation2 + $0x31] sm:$0xff] }
 0x496   : > { %4694 = vmatmul.bf16.gmra.mxu2 %v4520_v5  ;;  %v6340_v5 = vpack.c.bf16 %v6299_v12, %v6298_v38  ;;  %v5213_v14 = vld [vmem:[#allocation2 + $0xb7] sm:$0xff]  ;;  %v5215_v38 = vld [vmem:[#allocation2 + $0xc7] sm:$0xff] }
 0x497   : > { %5062 = vmatmul.bf16.gmra.mxu3 %v15114_v43  ;;  %v3838_v37 = vmax.f32 %v3796_v11, 0.0 }
 0x498   : > { %v5331_v1 = vpop.f32.mrf.mxu0 }
 0x499   : > { %v4655_v60 = vpop.f32.mrf.mxu2  ;;  %v4132_v19 = vmul.f32 %v4089_v15, %v3838_v37  ;;  %v15119_v6 = vadd.f32 %v5331_v1, %v14829_v33  ;;  %v5212_v15 = vld [vmem:[#allocation2 + $0xaf] sm:$0xff] }
 0x49a   : > { %v4766_v29 = vadd.f32 %v4655_v60, %v4371_v22  ;;  %v5023_v21 = vpop.f32.mrf.mxu3  ;;  %v4373_v53 = vpop.f32.mrf.mxu1  ;;  %v5562_v22 = vld [vmem:[#allocation2 + $0x20] sm:$0xff]  ;;  %v5245_v48 = vpack.c.bf16 %v5213_v14, %v5212_v15 }
 0x49b   : > { %4174 = vst [vmem:[#allocation2 + $0x168] sm:$0xff] %v4132_v19  ;;  %5370 = vmatmul.bf16.gmra.mxu0 %v5244_v32  ;;  %v5604_v33 = vpack.c.bf16 %v5563_v8, %v5562_v22  ;;  %v13433_v32 = vld [vmem:[%s17095_s2 + $0x230] sm:$0xff]  ;;  %v5565_v8 = vld [vmem:[#allocation2 + $0x38] sm:$0xff] }
 0x49c   : > { %v15121_v30 = vadd.f32 %v5023_v21, %v4766_v29  ;;  %v13425_v21 = vld [vmem:[%s17095_s2 + $0x1f0] sm:$0xff]  ;;  %7163 = vmatpush.bf16.msra.mxu1 %v13433_v32 }
 0x49d   : > { %6795 = vmatpush.bf16.msra.mxu0 %v13425_v21 }
 0x4a0   : > { %v15123_v36 = vpop.f32.mrf.mxu0 }
 0x4a1   : > { %v4657_v63 = vpop.f32.mrf.mxu2 }
 0x4a2   : > { %v4767_v44 = vadd.f32 %v4657_v63, %v4373_v53  ;;  %v5025_v55 = vpop.f32.mrf.mxu3  ;;  %v4376_v49 = vpop.f32.mrf.mxu1 }
 0x4a4   : > { %v15125_v10 = vadd.f32 %v5025_v55, %v4767_v44  ;;  %v6301_v55 = vld [vmem:[#allocation2 + $0x49] sm:$0xff] }
 0x4a5   : > { %5698 = vmatmul.bf16.vlgmr.msrb.gmra.mxu1 %v5604_v33  ;;  %v6300_v33 = vld [vmem:[#allocation2 + $0x41] sm:$0xff] }
 0x4a6   : > { %6066 = vmatmul.bf16.vlgmr.msrb.gmra.mxu2 %v5972_v56  ;;  %v6341_v56 = vpack.c.bf16 %v6301_v55, %v6300_v33  ;;  %v5566_v55 = vld [vmem:[#allocation2 + $0x40] sm:$0xff] }
 0x4a7   : > { %6434 = vmatmul.bf16.vlgmr.msrb.gmra.mxu3 %v6340_v5 }
 0x4a8   : > { %v5336_v59 = vpop.f32.mrf.mxu0 }
 0x4a9   : > { %v4660_v11 = vpop.f32.mrf.mxu2  ;;  %v15128_v1 = vadd.f32 %v5336_v59, %v14881_v41  ;;  %v5214_v59 = vld [vmem:[#allocation2 + $0xbf] sm:$0xff] }
 0x4aa   : > { %v4768_v37 = vadd.f32 %v4660_v11, %v4376_v49  ;;  %v5028_v60 = vpop.f32.mrf.mxu3  ;;  %v4378_v19 = vpop.f32.mrf.mxu1  ;;  %v5564_v49 = vld [vmem:[#allocation2 + $0x30] sm:$0xff] }
 0x4ab   : > { %5375 = vmatmul.bf16.gmra.mxu0 %v5245_v48  ;;  %v5605_v23 = vpack.c.bf16 %v5565_v8, %v5564_v49  ;;  %v6302_v49 = vld [vmem:[#allocation2 + $0x51] sm:$0xff] }
 0x4ac   : > { %v15130_v29 = vadd.f32 %v5028_v60, %v4768_v37  ;;  %v5246_v60 = vpack.c.bf16 %v5215_v38, %v5214_v59 }
 0x4b0   : > { %v5338_v63 = vpop.f32.mrf.mxu0 }
 0x4b1   : > { %v4662_v53 = vpop.f32.mrf.mxu2  ;;  %v15139_v44 = vadd.f32 %v5338_v63, %v14889_v2 }
 0x4b2   : > { %v4769_v41 = vadd.f32 %v4662_v53, %v4378_v19  ;;  %v5030_v42 = vpop.f32.mrf.mxu3  ;;  %v4381_v12 = vpop.f32.mrf.mxu1  ;;  %v5567_v53 = vld [vmem:[#allocation2 + $0x48] sm:$0xff] }
 0x4b4   : > { %v15141_v22 = vadd.f32 %v5030_v42, %v4769_v41  ;;  %v6303_v41 = vld [vmem:[#allocation2 + $0x59] sm:$0xff] }
 0x4b5   : > { %5703 = vmatmul.bf16.gmra.mxu1 %v5605_v23  ;;  %v6342_v23 = vpack.c.bf16 %v6303_v41, %v6302_v49 }
 0x4b6   : > { %6071 = vmatmul.bf16.gmra.mxu2 %v6340_v5 }
 0x4b7   : > { %6439 = vmatmul.bf16.gmra.mxu3 %v6341_v56 }
 0x4b8   : > { %v5341_v11 = vpop.f32.mrf.mxu0 }
 0x4b9   : > { %v4665_v14 = vpop.f32.mrf.mxu2  ;;  %v15144_v2 = vadd.f32 %v5341_v11, %v14909_v18  ;;  %v5606_v18 = vpack.c.bf16 %v5567_v53, %v5566_v55  ;;  %v6305_v53 = vld [vmem:[#allocation2 + $0x69] sm:$0xff] }
 0x4ba   : > { %v4770_v15 = vadd.f32 %v4665_v14, %v4381_v12  ;;  %v5033_v37 = vpop.f32.mrf.mxu3  ;;  %v4383_v48 = vpop.f32.mrf.mxu1 }
 0x4bb   : > { %5380 = vmatmul.bf16.gmra.mxu0 %v5246_v60 }
 0x4bc   : > { %v15146_v19 = vadd.f32 %v5033_v37, %v4770_v15 }
 0x4c0   : > { %v5343_v32 = vpop.f32.mrf.mxu0 }
 0x4c1   : > { %v4667_v21 = vpop.f32.mrf.mxu2  ;;  %v15149_v8 = vadd.f32 %v5343_v32, %v14914_v7 }
 0x4c2   : > { %v4771_v63 = vadd.f32 %v4667_v21, %v4383_v48  ;;  %v5035_v5 = vpop.f32.mrf.mxu3  ;;  %v4386_v42 = vpop.f32.mrf.mxu1  ;;  %v5569_v48 = vld [vmem:[#allocation2 + $0x58] sm:$0xff] }
 0x4c4   : > { %v15151_v12 = vadd.f32 %v5035_v5, %v4771_v63  ;;  %v5568_v5 = vld [vmem:[#allocation2 + $0x50] sm:$0xff] }
 0x4c5   : > { %5708 = vmatmul.bf16.gmra.mxu1 %v5606_v18 }
 0x4c6   : > { %6076 = vmatmul.bf16.gmra.mxu2 %v6341_v56 }
 0x4c7   : > { %6444 = vmatmul.bf16.gmra.mxu3 %v6342_v23 }
 0x4c8   : > { %v5346_v38 = vpop.f32.mrf.mxu0 }
 0x4c9   : > { %v4670_v33 = vpop.f32.mrf.mxu2  ;;  %v15154_v59 = vadd.f32 %v5346_v38, %v14922_v9  ;;  %v5607_v9 = vpack.c.bf16 %v5569_v48, %v5568_v5 }
 0x4ca   : > { %v4772_v14 = vadd.f32 %v4670_v33, %v4386_v42  ;;  %v5038_v11 = vpop.f32.mrf.mxu3  ;;  %v4388_v7 = vpop.f32.mrf.mxu1  ;;  %v6304_v42 = vld [vmem:[#allocation2 + $0x61] sm:$0xff] }
 0x4cb   : > { %5385 = vmatmul.bf16.gmra.mxu0 %v14932_v54  ;;  %v6343_v55 = vpack.c.bf16 %v6305_v53, %v6304_v42  ;;  %v13424_v54 = vld [vmem:[%s17095_s2 + $0x1e8] sm:$0xff] }
 0x4cc   : > { %v15156_v15 = vadd.f32 %v5038_v11, %v4772_v14  ;;  %6796 = vmatpush.bf16.msra.mxu0 %v13424_v54 }
 0x4d0   : > { %v5348_v60 = vpop.f32.mrf.mxu0 }
 0x4d1   : > { %v4672_v37 = vpop.f32.mrf.mxu2  ;;  %v15160_v56 = vadd.f32 %v5348_v60, %v14930_v58  ;;  %v5571_v60 = vld [vmem:[#allocation2 + $0x68] sm:$0xff] }
 0x4d2   : > { %v4773_v21 = vadd.f32 %v4672_v37, %v4388_v7  ;;  %v5040_v32 = vpop.f32.mrf.mxu3  ;;  %v4391_v63 = vpop.f32.mrf.mxu1 }
 0x4d4   : > { %v15162_v41 = vadd.f32 %v5040_v32, %v4773_v21 }
 0x4d5   : > { %5713 = vmatmul.bf16.gmra.mxu1 %v5607_v9 }
 0x4d6   : > { %6081 = vmatmul.bf16.gmra.mxu2 %v6342_v23  ;;  %v13432_v23 = vld [vmem:[%s17095_s2 + $0x228] sm:$0xff] }
 0x4d7   : > { %6449 = vmatmul.bf16.gmra.mxu3 %v6343_v55  ;;  %7164 = vmatpush.bf16.msra.mxu1 %v13432_v23 }
 0x4d8   : > { %v5351_v49 = vpop.f32.mrf.mxu0 }
 0x4d9   : > { %v4675_v18 = vpop.f32.mrf.mxu2  ;;  %v15168_v38 = vadd.f32 %v5351_v49, %v14941_v62  ;;  %v6307_v62 = vld [vmem:[#allocation2 + $0x79] sm:$0xff] }
 0x4da   : > { %v4774_v58 = vadd.f32 %v4675_v18, %v4391_v63  ;;  %v5043_v33 = vpop.f32.mrf.mxu3  ;;  %v4393_v14 = vpop.f32.mrf.mxu1  ;;  %v5570_v63 = vld [vmem:[#allocation2 + $0x60] sm:$0xff] }
 0x4db   : > { %5390 = vmatmul.bf16.gmra.mxu0 %v14955_v16  ;;  %v5608_v9 = vpack.c.bf16 %v5571_v60, %v5570_v63  ;;  %v6306_v16 = vld [vmem:[#allocation2 + $0x71] sm:$0xff] }
 0x4dc   : > { %v15170_v11 = vadd.f32 %v5043_v33, %v4774_v58  ;;  %v6344_v42 = vpack.c.bf16 %v6307_v62, %v6306_v16 }
 0x4e0   : > { %v5353_v37 = vpop.f32.mrf.mxu0 }
 0x4e1   : > { %v4677_v7 = vpop.f32.mrf.mxu2  ;;  %v15177_v32 = vadd.f32 %v5353_v37, %v14953_v50  ;;  %v5573_v37 = vld [vmem:[#allocation2 + $0x78] sm:$0xff] }
 0x4e2   : > { %v4775_v48 = vadd.f32 %v4677_v7, %v4393_v14  ;;  %v5045_v21 = vpop.f32.mrf.mxu3  ;;  %v4396_v53 = vpop.f32.mrf.mxu1 }
 0x4e4   : > { %v15179_v5 = vadd.f32 %v5045_v21, %v4775_v48  ;;  %v6309_v21 = vld [vmem:[#allocation2 + $0x89] sm:$0xff] }
 0x4e5   : > { %5718 = vmatmul.bf16.gmra.mxu1 %v5608_v9  ;;  %v6308_v9 = vld [vmem:[#allocation2 + $0x81] sm:$0xff] }
 0x4e6   : > { %6086 = vmatmul.bf16.gmra.mxu2 %v6343_v55  ;;  %v6345_v16 = vpack.c.bf16 %v6309_v21, %v6308_v9  ;;  %v6311_v21 = vld [vmem:[#allocation2 + $0x99] sm:$0xff]  ;;  %v6310_v9 = vld [vmem:[#allocation2 + $0x91] sm:$0xff] }
 0x4e7   : > { %6454 = vmatmul.bf16.gmra.mxu3 %v6344_v42 }
 0x4e8   : > { %v5356_v18 = vpop.f32.mrf.mxu0 }
 0x4e9   : > { %v4680_v54 = vpop.f32.mrf.mxu2  ;;  %v15182_v33 = vadd.f32 %v5356_v18, %v14964_v13 }
 0x4ea   : > { %v4776_v49 = vadd.f32 %v4680_v54, %v4396_v53  ;;  %v5048_v58 = vpop.f32.mrf.mxu3  ;;  %v4398_v50 = vpop.f32.mrf.mxu1  ;;  %v5572_v53 = vld [vmem:[#allocation2 + $0x70] sm:$0xff] }
 0x4eb   : > { %5395 = vmatmul.bf16.gmra.mxu0 %v14972_v46  ;;  %v5609_v13 = vpack.c.bf16 %v5573_v37, %v5572_v53  ;;  %v5575_v37 = vld [vmem:[#allocation2 + $0x88] sm:$0xff] }
 0x4ec   : > { %v15184_v14 = vadd.f32 %v5048_v58, %v4776_v49 }
 0x4f0   : > { %v5358_v7 = vpop.f32.mrf.mxu0 }
 0x4f1   : > { %v4682_v23 = vpop.f32.mrf.mxu2  ;;  %v15188_v55 = vadd.f32 %v5358_v7, %v14970_v25 }
 0x4f2   : > { %v4777_v60 = vadd.f32 %v4682_v23, %v4398_v50  ;;  %v5050_v48 = vpop.f32.mrf.mxu3  ;;  %v4401_v62 = vpop.f32.mrf.mxu1 }
 0x4f4   : > { %v15190_v63 = vadd.f32 %v5050_v48, %v4777_v60 }
 0x4f5   : > { %5723 = vmatmul.bf16.gmra.mxu1 %v5609_v13 }
 0x4f6   : > { %6091 = vmatmul.bf16.gmra.mxu2 %v6344_v42 }
 0x4f7   : > { %6459 = vmatmul.bf16.gmra.mxu3 %v6345_v16 }
 0x4f8   : > { %v5361_v54 = vpop.f32.mrf.mxu0 }
 0x4f9   : > { %v4685_v46 = vpop.f32.mrf.mxu2  ;;  %v15193_v58 = vadd.f32 %v5361_v54, %v14981_v26  ;;  %v6346_v54 = vpack.c.bf16 %v6311_v21, %v6310_v9  ;;  %v5577_v21 = vld [vmem:[#allocation2 + $0x98] sm:$0xff] }
 0x4fa   : > { %v4778_v18 = vadd.f32 %v4685_v46, %v4401_v62  ;;  %v5053_v49 = vpop.f32.mrf.mxu3  ;;  %v4403_v25 = vpop.f32.mrf.mxu1  ;;  %v5574_v62 = vld [vmem:[#allocation2 + $0x80] sm:$0xff] }
 0x4fb   : > { %5400 = vmatmul.bf16.gmra.mxu0 %v14998_v4  ;;  %v5610_v26 = vpack.c.bf16 %v5575_v37, %v5574_v62  ;;  %v13423_v46 = vld [vmem:[%s17095_s2 + $0x1e0] sm:$0xff] }
 0x4fc   : > { %v15195_v50 = vadd.f32 %v5053_v49, %v4778_v18  ;;  %v13431_v4 = vld [vmem:[%s17095_s2 + $0x220] sm:$0xff]  ;;  %6797 = vmatpush.bf16.msra.mxu0 %v13423_v46  ;;  %v5576_v46 = vld [vmem:[#allocation2 + $0x90] sm:$0xff] }
 0x4fd   : > { %7165 = vmatpush.bf16.msra.mxu1 %v13431_v4 }
 0x500   : > { %v5363_v7 = vpop.f32.mrf.mxu0 }
 0x501   : > { %v4687_v23 = vpop.f32.mrf.mxu2  ;;  %v15199_v42 = vadd.f32 %v5363_v7, %v14990_v20 }
 0x502   : > { %v4779_v60 = vadd.f32 %v4687_v23, %v4403_v25  ;;  %v5055_v48 = vpop.f32.mrf.mxu3  ;;  %v4406_v53 = vpop.f32.mrf.mxu1 }
 0x504   : > { %v15201_v13 = vadd.f32 %v5055_v48, %v4779_v60  ;;  %v13442_v60 = vld [vmem:[%s17096_s3 + $0x38] sm:$0xff] }
 0x505   : > { %5728 = vmatmul.bf16.gmra.mxu1 %v5610_v26  ;;  %8035 = vmatpush.bf16.msra.mxu2 %v13442_v60 }
 0x506   : > { %6096 = vmatmul.bf16.gmra.mxu2 %v6345_v16 }
 0x507   : > { %6464 = vmatmul.bf16.gmra.mxu3 %v6346_v54 }
 0x508   : > { %v5366_v18 = vpop.f32.mrf.mxu0 }
 0x509   : > { %v4690_v20 = vpop.f32.mrf.mxu2  ;;  %v15210_v23 = vadd.f32 %v5366_v18, %v15007_v39  ;;  %v6313_v39 = vld [vmem:[#allocation2 + $0xa9] sm:$0xff]  ;;  %v13450_v18 = vld [vmem:[%s17096_s3 + $0x78] sm:$0xff] }
 0x50a   : > { %v4780_v49 = vadd.f32 %v4690_v20, %v4406_v53  ;;  %v5058_v25 = vpop.f32.mrf.mxu3  ;;  %v4408_v7 = vpop.f32.mrf.mxu1  ;;  %v5611_v20 = vpack.c.bf16 %v5577_v21, %v5576_v46  ;;  %8319 = vmatpush.bf16.msra.mxu3 %v13450_v18  ;;  %v5579_v46 = vld [vmem:[#allocation2 + $0xa8] sm:$0xff] }
 0x50b   : > { %5405 = vmatmul.bf16.gmra.mxu0 %v15015_v28  ;;  %v6312_v28 = vld [vmem:[#allocation2 + $0xa1] sm:$0xff] }
 0x50c   : > { %v15212_v37 = vadd.f32 %v5058_v25, %v4780_v49  ;;  %v6347_v49 = vpack.c.bf16 %v6313_v39, %v6312_v28  ;;  %v6315_v28 = vld [vmem:[#allocation2 + $0xb9] sm:$0xff] }
 0x510   : > { %v5368_v48 = vpop.f32.mrf.mxu0 }
 0x511   : > { %v4692_v16 = vpop.f32.mrf.mxu2  ;;  %v15219_v53 = vadd.f32 %v5368_v48, %v15013_v31 }
 0x512   : > { %v4781_v62 = vadd.f32 %v4692_v16, %v4408_v7  ;;  %v5060_v26 = vpop.f32.mrf.mxu3  ;;  %v4411_v9 = vpop.f32.mrf.mxu1 }
 0x514   : > { %v15221_v4 = vadd.f32 %v5060_v26, %v4781_v62 }
 0x515   : > { %5733 = vmatmul.bf16.gmra.mxu1 %v5611_v20 }
 0x516   : > { %6101 = vmatmul.bf16.gmra.mxu2 %v6346_v54 }
 0x517   : > { %6469 = vmatmul.bf16.gmra.mxu3 %v6347_v49 }
 0x518   : > { %v5371_v7 = vpop.f32.mrf.mxu0 }
 0x519   : > { %v4695_v25 = vpop.f32.mrf.mxu2  ;;  %v15227_v16 = vadd.f32 %v5371_v7, %v15024_v17  ;;  %v4743_v17 = vadd.f32 %v14864_v24, %v14858_v34 }
 0x51a   : > { %v4782_v31 = vadd.f32 %v4695_v25, %v4411_v9  ;;  %v5063_v60 = vpop.f32.mrf.mxu3  ;;  %v4413_v48 = vpop.f32.mrf.mxu1  ;;  %v5578_v9 = vld [vmem:[#allocation2 + $0xa0] sm:$0xff] }
 0x51b   : > { %5410 = vmatmul.bf16.gmra.mxu0 %v15035_v0  ;;  %v6314_v0 = vld [vmem:[#allocation2 + $0xb1] sm:$0xff] }
 0x51c   : > { %v15229_v62 = vadd.f32 %v5063_v60, %v4782_v31  ;;  %v5612_v31 = vpack.c.bf16 %v5579_v46, %v5578_v9  ;;  %v6348_v60 = vpack.c.bf16 %v6315_v28, %v6314_v0  ;;  %v5581_v46 = vld [vmem:[#allocation2 + $0xb8] sm:$0xff] }
 0x51e   : > { %17226 = vst [vmem:[#allocation25_spill] sm:$0xff] %v15229_v62 }
 0x520   : > { %v5373_v26 = vpop.f32.mrf.mxu0 }
 0x521   : > { %v4697_v21 = vpop.f32.mrf.mxu2  ;;  %v15233_v54 = vadd.f32 %v5373_v26, %v15030_v52 }
 0x522   : > { %v4783_v39 = vadd.f32 %v4697_v21, %v4413_v48  ;;  %v5065_v20 = vpop.f32.mrf.mxu3  ;;  %v5699_v18 = vpop.f32.mrf.mxu1  ;;  %v5111_v48 = vadd.f32 %v14866_v61, %v4743_v17  ;;  %v13430_v61 = vld [vmem:[%s17095_s2 + $0x218] sm:$0xff]  ;;  %v6317_v17 = vld [vmem:[#allocation2 + $0xc9] sm:$0xff] }
 0x523   : > { %v5846_v7 = vadd.f32 %v5699_v18, %v15119_v6  ;;  %7166 = vmatpush.bf16.msra.mxu1 %v13430_v61 }
 0x524   : > { %v15237_v25 = vadd.f32 %v5065_v20, %v4783_v39  ;;  %v5479_v26 = vadd.f32 %v15123_v36, %v5111_v48 }
 0x525   : > { %5738 = vmatmul.bf16.gmra.mxu1 %v5612_v31 }
 0x526   : > { %6106 = vmatmul.bf16.gmra.mxu2 %v6347_v49  ;;  %v13422_v49 = vld [vmem:[%s17095_s2 + $0x1d8] sm:$0xff] }
 0x527   : > { %6474 = vmatmul.bf16.gmra.mxu3 %v6348_v60  ;;  %6798 = vmatpush.bf16.msra.mxu0 %v13422_v49 }
 0x528   : > { %v5376_v52 = vpop.f32.mrf.mxu0 }
 0x529   : > { %v6067_v21 = vpop.f32.mrf.mxu2  ;;  %v15243_v62 = vadd.f32 %v5376_v52, %v15044_v35  ;;  %v6316_v52 = vld [vmem:[#allocation2 + $0xc1] sm:$0xff] }
 0x52a   : > { %v6214_v34 = vadd.f32 %v6067_v21, %v5846_v7  ;;  %v6435_v24 = vpop.f32.mrf.mxu3  ;;  %v5701_v39 = vpop.f32.mrf.mxu1  ;;  %v5580_v7 = vld [vmem:[#allocation2 + $0xb0] sm:$0xff]  ;;  %v6349_v21 = vpack.c.bf16 %v6317_v17, %v6316_v52 }
 0x52b   : > { %v5847_v6 = vadd.f32 %v5701_v39, %v5479_v26  ;;  %5415 = vmatmul.bf16.gmra.mxu0 %v15058_v57  ;;  %v5613_v48 = vpack.c.bf16 %v5581_v46, %v5580_v7  ;;  %v13421_v46 = vld [vmem:[%s17095_s2 + $0x1d0] sm:$0xff] }
 0x52c   : > { %v15245_v20 = vadd.f32 %v6435_v24, %v6214_v34  ;;  %6799 = vmatpush.bf16.msra.mxu0 %v13421_v46  ;;  %v6318_v52 = vld [vmem:[#allocation2 + $0xd1] sm:$0xff] }
 0x530   : > { %v5378_v35 = vpop.f32.mrf.mxu0 }
 0x531   : > { %v6069_v36 = vpop.f32.mrf.mxu2  ;;  %v15255_v28 = vadd.f32 %v5378_v35, %v15053_v51 }
 0x532   : > { %v6215_v18 = vadd.f32 %v6069_v36, %v5847_v6  ;;  %v6437_v9 = vpop.f32.mrf.mxu3  ;;  %v5704_v57 = vpop.f32.mrf.mxu1  ;;  %v5583_v36 = vld [vmem:[#allocation2 + $0xc8] sm:$0xff] }
 0x533   : > { %v5848_v0 = vadd.f32 %v5704_v57, %v15128_v1  ;;  %v13441_v1 = vld [vmem:[%s17096_s3 + $0x30] sm:$0xff]  ;;  %v5582_v57 = vld [vmem:[#allocation2 + $0xc0] sm:$0xff] }
 0x534   : > { %v15257_v31 = vadd.f32 %v6437_v9, %v6215_v18  ;;  %8036 = vmatpush.bf16.msra.mxu2 %v13441_v1  ;;  %v6319_v9 = vld [vmem:[#allocation2 + $0xd9] sm:$0xff] }
 0x535   : > { %5743 = vmatmul.bf16.gmra.mxu1 %v5613_v48  ;;  %v5614_v48 = vpack.c.bf16 %v5583_v36, %v5582_v57  ;;  %v5585_v36 = vld [vmem:[#allocation2 + $0xd8] sm:$0xff] }
 0x536   : > { %6111 = vmatmul.bf16.gmra.mxu2 %v6348_v60  ;;  %v13449_v60 = vld [vmem:[%s17096_s3 + $0x70] sm:$0xff] }
 0x537   : > { %6479 = vmatmul.bf16.gmra.mxu3 %v6349_v21 }
 0x538   : > { %v5381_v26 = vpop.f32.mrf.mxu0  ;;  %8320 = vmatpush.bf16.msra.mxu3 %v13449_v60 }
 0x539   : > { %v6072_v34 = vpop.f32.mrf.mxu2  ;;  %v15261_v51 = vadd.f32 %v5381_v26, %v15073_v3  ;;  %v13420_v26 = vld [vmem:[%s17095_s2 + $0x1c8] sm:$0xff] }
 0x53a   : > { %v6216_v24 = vadd.f32 %v6072_v34, %v5848_v0  ;;  %v6440_v39 = vpop.f32.mrf.mxu3  ;;  %v5706_v6 = vpop.f32.mrf.mxu1  ;;  %v6350_v34 = vpack.c.bf16 %v6319_v9, %v6318_v52  ;;  %6800 = vmatpush.bf16.msra.mxu0 %v13420_v26  ;;  %v6320_v52 = vld [vmem:[#allocation2 + $0xe1] sm:$0xff] }
 0x53b   : > { %v5849_v61 = vadd.f32 %v5706_v6, %v15139_v44  ;;  %5420 = vmatmul.bf16.gmra.mxu0 %v15095_v27 }
 0x53c   : > { %v15263_v49 = vadd.f32 %v6440_v39, %v6216_v24  ;;  %v13419_v39 = vld [vmem:[%s17095_s2 + $0x1c0] sm:$0xff] }
 0x53e   : > { %6801 = vmatpush.bf16.msra.mxu0 %v13419_v39 }
 0x540   : > { %v5383_v3 = vpop.f32.mrf.mxu0 }
 0x541   : > { %v6074_v35 = vpop.f32.mrf.mxu2  ;;  %v15277_v44 = vadd.f32 %v5383_v3, %v15090_v45 }
 0x542   : > { %v6217_v27 = vadd.f32 %v6074_v35, %v5849_v61  ;;  %v6442_v18 = vpop.f32.mrf.mxu3  ;;  %v5709_v17 = vpop.f32.mrf.mxu1 }
 0x543   : > { %v5850_v0 = vadd.f32 %v5709_v17, %v15144_v2  ;;  %v5584_v17 = vld [vmem:[#allocation2 + $0xd0] sm:$0xff] }
 0x544   : > { %v15279_v7 = vadd.f32 %v6442_v18, %v6217_v27 }
 0x545   : > { %5748 = vmatmul.bf16.gmra.mxu1 %v5614_v48  ;;  %v5615_v48 = vpack.c.bf16 %v5585_v36, %v5584_v17  ;;  %v5587_v36 = vld [vmem:[#allocation2 + $0xe8] sm:$0xff]  ;;  %v5586_v17 = vld [vmem:[#allocation2 + $0xe0] sm:$0xff] }
 0x546   : > { %6116 = vmatmul.bf16.gmra.mxu2 %v6349_v21 }
 0x547   : > { %6484 = vmatmul.bf16.gmra.mxu3 %v6350_v34 }
 0x548   : > { %v5386_v45 = vpop.f32.mrf.mxu0 }
 0x549   : > { %v6077_v24 = vpop.f32.mrf.mxu2  ;;  %v15289_v6 = vadd.f32 %v5386_v45, %v15107_v47  ;;  %v6321_v47 = vld [vmem:[#allocation2 + $0xe9] sm:$0xff] }
 0x54a   : > { %v6218_v2 = vadd.f32 %v6077_v24, %v5850_v0  ;;  %v6445_v61 = vpop.f32.mrf.mxu3  ;;  %v5711_v1 = vpop.f32.mrf.mxu1  ;;  %v5234_v24 = vld [vmem:[#allocation2 + $0x15f] sm:$0xff] }
 0x54b   : > { %v5851_v3 = vadd.f32 %v5711_v1, %v15149_v8  ;;  %5425 = vmatmul.bf16.gmra.mxu0 %v15114_v43  ;;  %v6351_v8 = vpack.c.bf16 %v6321_v47, %v6320_v52  ;;  %v5235_v43 = vld [vmem:[#allocation2 + $0x167] sm:$0xff]  ;;  %v5616_v52 = vpack.c.bf16 %v5587_v36, %v5586_v17 }
 0x54c   : > { %v15291_v60 = vadd.f32 %v6445_v61, %v6218_v2  ;;  %v5256_v61 = vpack.c.bf16 %v5235_v43, %v5234_v24  ;;  %v6322_v43 = vld [vmem:[#allocation2 + $0xf1] sm:$0xff]  ;;  %v6325_v17 = vld [vmem:[#allocation2 + $0x109] sm:$0xff] }
 0x550   : > { %v5388_v21 = vpop.f32.mrf.mxu0 }
 0x551   : > { %v6079_v35 = vpop.f32.mrf.mxu2  ;;  %v15296_v46 = vadd.f32 %v5388_v21, %v15112_v40  ;;  %v13429_v40 = vld [vmem:[%s17095_s2 + $0x210] sm:$0xff] }
 0x552   : > { %v6219_v27 = vadd.f32 %v6079_v35, %v5851_v3  ;;  %v6447_v18 = vpop.f32.mrf.mxu3  ;;  %v5714_v9 = vpop.f32.mrf.mxu1  ;;  %7167 = vmatpush.bf16.msra.mxu1 %v13429_v40 }
 0x553   : > { %v5852_v0 = vadd.f32 %v5714_v9, %v15154_v59  ;;  %v6323_v9 = vld [vmem:[#allocation2 + $0xf9] sm:$0xff] }
 0x554   : > { %v15298_v57 = vadd.f32 %v6447_v18, %v6219_v27  ;;  %v6352_v40 = vpack.c.bf16 %v6323_v9, %v6322_v43 }
 0x555   : > { %5753 = vmatmul.bf16.gmra.mxu1 %v5615_v48 }
 0x556   : > { %6121 = vmatmul.bf16.gmra.mxu2 %v6350_v34 }
 0x557   : > { %6489 = vmatmul.bf16.gmra.mxu3 %v6351_v8 }
 0x558   : > { %v5391_v26 = vpop.f32.mrf.mxu0 }
 0x559   : > { %v6082_v45 = vpop.f32.mrf.mxu2  ;;  %v15305_v39 = vadd.f32 %v5391_v26, %v15121_v30  ;;  %v13448_v26 = vld [vmem:[%s17096_s3 + $0x68] sm:$0xff] }
 0x55a   : > { %v6220_v2 = vadd.f32 %v6082_v45, %v5852_v0  ;;  %v6450_v59 = vpop.f32.mrf.mxu3  ;;  %v5716_v1 = vpop.f32.mrf.mxu1  ;;  %8321 = vmatpush.bf16.msra.mxu3 %v13448_v26 }
 0x55b   : > { %v5853_v34 = vadd.f32 %v5716_v1, %v15160_v56  ;;  %5430 = vmatmul.bf16.gmra.mxu0 %v5256_v61  ;;  %v13440_v56 = vld [vmem:[%s17096_s3 + $0x28] sm:$0xff] }
 0x55c   : > { %v15307_v3 = vadd.f32 %v6450_v59, %v6220_v2  ;;  %8037 = vmatpush.bf16.msra.mxu2 %v13440_v56  ;;  %v6666_v2 = vld [vmem:[#allocation2 + $0x32] sm:$0xff] }
 0x560   : > { %v5393_v21 = vpop.f32.mrf.mxu0 }
 0x561   : > { %v6084_v35 = vpop.f32.mrf.mxu2  ;;  %v15311_v27 = vadd.f32 %v5393_v21, %v15125_v10  ;;  %v6667_v10 = vld [vmem:[#allocation2 + $0x3a] sm:$0xff] }
 0x562   : > { %v6221_v18 = vadd.f32 %v6084_v35, %v5853_v34  ;;  %v6452_v47 = vpop.f32.mrf.mxu3  ;;  %v5719_v30 = vpop.f32.mrf.mxu1  ;;  %v6708_v1 = vpack.c.bf16 %v6667_v10, %v6666_v2  ;;  %v6324_v10 = vld [vmem:[#allocation2 + $0x101] sm:$0xff] }
 0x563   : > { %v5854_v48 = vadd.f32 %v5719_v30, %v15168_v38  ;;  %v6353_v26 = vpack.c.bf16 %v6325_v17, %v6324_v10  ;;  %v6327_v17 = vld [vmem:[#allocation2 + $0x119] sm:$0xff]  ;;  %v6326_v10 = vld [vmem:[#allocation2 + $0x111] sm:$0xff] }
 0x564   : > { %v15313_v0 = vadd.f32 %v6452_v47, %v6221_v18  ;;  %v5589_v18 = vld [vmem:[#allocation2 + $0xf8] sm:$0xff] }
 0x565   : > { %5758 = vmatmul.bf16.gmra.mxu1 %v5616_v52  ;;  %v5588_v52 = vld [vmem:[#allocation2 + $0xf0] sm:$0xff] }
 0x566   : > { %6126 = vmatmul.bf16.gmra.mxu2 %v6351_v8  ;;  %v5617_v56 = vpack.c.bf16 %v5589_v18, %v5588_v52 }
 0x567   : > { %6494 = vmatmul.bf16.gmra.mxu3 %v6352_v40 }
 0x568   : > { %v5396_v45 = vpop.f32.mrf.mxu0 }
 0x569   : > { %v6087_v24 = vpop.f32.mrf.mxu2  ;;  %v15323_v38 = vadd.f32 %v5396_v45, %v15130_v29 }
 0x56a   : > { %v6222_v59 = vadd.f32 %v6087_v24, %v5854_v48  ;;  %v6455_v61 = vpop.f32.mrf.mxu3  ;;  %v5721_v34 = vpop.f32.mrf.mxu1 }
 0x56b   : > { %v5855_v8 = vadd.f32 %v5721_v34, %v15177_v32  ;;  %6802 = vmatmul.bf16.vlgmr.msra.gmra.mxu0 %v6708_v1  ;;  %v6669_v32 = vld [vmem:[#allocation2 + $0x4a] sm:$0xff] }
 0x56c   : > { %v15325_v21 = vadd.f32 %v6455_v61, %v6222_v59 }
 0x570   : > { %v5398_v35 = vpop.f32.mrf.mxu0 }
 0x571   : > { %v6089_v36 = vpop.f32.mrf.mxu2  ;;  %v15329_v47 = vadd.f32 %v5398_v35, %v15141_v22  ;;  %v6668_v22 = vld [vmem:[#allocation2 + $0x42] sm:$0xff] }
 0x572   : > { %v6223_v9 = vadd.f32 %v6089_v36, %v5855_v8  ;;  %v6457_v30 = vpop.f32.mrf.mxu3  ;;  %v5724_v29 = vpop.f32.mrf.mxu1  ;;  %v6709_v1 = vpack.c.bf16 %v6669_v32, %v6668_v22  ;;  %v6354_v32 = vpack.c.bf16 %v6327_v17, %v6326_v10  ;;  %v6670_v22 = vld [vmem:[#allocation2 + $0x52] sm:$0xff] }
 0x573   : > { %v5856_v43 = vadd.f32 %v5724_v29, %v15182_v33  ;;  %v5590_v29 = vld [vmem:[#allocation2 + $0x100] sm:$0xff] }
 0x574   : > { %v15331_v48 = vadd.f32 %v6457_v30, %v6223_v9 }
 0x575   : > { %5763 = vmatmul.bf16.gmra.mxu1 %v5617_v56 }
 0x576   : > { %6131 = vmatmul.bf16.gmra.mxu2 %v6352_v40  ;;  %v5591_v40 = vld [vmem:[#allocation2 + $0x108] sm:$0xff] }
 0x577   : > { %6499 = vmatmul.bf16.gmra.mxu3 %v6353_v26  ;;  %v5618_v56 = vpack.c.bf16 %v5591_v40, %v5590_v29 }
 0x578   : > { %v5401_v45 = vpop.f32.mrf.mxu0 }
 0x579   : > { %v6092_v24 = vpop.f32.mrf.mxu2  ;;  %v15335_v2 = vadd.f32 %v5401_v45, %v15146_v19 }
 0x57a   : > { %v6224_v59 = vadd.f32 %v6092_v24, %v5856_v43  ;;  %v6460_v61 = vpop.f32.mrf.mxu3  ;;  %v5726_v34 = vpop.f32.mrf.mxu1 }
 0x57b   : > { %v5857_v33 = vadd.f32 %v5726_v34, %v15188_v55  ;;  %6807 = vmatmul.bf16.gmra.mxu0 %v6709_v1  ;;  %v13428_v55 = vld [vmem:[%s17095_s2 + $0x208] sm:$0xff] }
 0x57c   : > { %v15337_v8 = vadd.f32 %v6460_v61, %v6224_v59  ;;  %7168 = vmatpush.bf16.msra.mxu1 %v13428_v55 }
 0x580   : > { %v5403_v35 = vpop.f32.mrf.mxu0 }
 0x581   : > { %v6094_v36 = vpop.f32.mrf.mxu2  ;;  %v15341_v18 = vadd.f32 %v5403_v35, %v15151_v12  ;;  %v6671_v12 = vld [vmem:[#allocation2 + $0x5a] sm:$0xff] }
 0x582   : > { %v6225_v9 = vadd.f32 %v6094_v36, %v5857_v33  ;;  %v6462_v30 = vpop.f32.mrf.mxu3  ;;  %v5729_v19 = vpop.f32.mrf.mxu1  ;;  %v6710_v1 = vpack.c.bf16 %v6671_v12, %v6670_v22  ;;  %v13447_v36 = vld [vmem:[%s17096_s3 + $0x60] sm:$0xff] }
 0x583   : > { %v5858_v43 = vadd.f32 %v5729_v19, %v15193_v58  ;;  %8322 = vmatpush.bf16.msra.mxu3 %v13447_v36  ;;  %v6328_v12 = vld [vmem:[#allocation2 + $0x121] sm:$0xff] }
 0x584   : > { %v15343_v52 = vadd.f32 %v6462_v30, %v6225_v9  ;;  %v5593_v9 = vld [vmem:[#allocation2 + $0x118] sm:$0xff] }
 0x585   : > { %5768 = vmatmul.bf16.gmra.mxu1 %v5618_v56 }
 0x586   : > { %6136 = vmatmul.bf16.gmra.mxu2 %v6353_v26  ;;  %v13439_v26 = vld [vmem:[%s17096_s3 + $0x20] sm:$0xff] }
 0x587   : > { %6504 = vmatmul.bf16.gmra.mxu3 %v6354_v32  ;;  %8038 = vmatpush.bf16.msra.mxu2 %v13439_v26 }
 0x588   : > { %v5406_v45 = vpop.f32.mrf.mxu0 }
 0x589   : > { %v6097_v24 = vpop.f32.mrf.mxu2  ;;  %v15350_v59 = vadd.f32 %v5406_v45, %v15156_v15 }
 0x58a   : > { %v6226_v61 = vadd.f32 %v6097_v24, %v5858_v43  ;;  %v6465_v58 = vpop.f32.mrf.mxu3  ;;  %v5731_v34 = vpop.f32.mrf.mxu1  ;;  %v5592_v43 = vld [vmem:[#allocation2 + $0x110] sm:$0xff] }
 0x58b   : > { %v5859_v35 = vadd.f32 %v5731_v34, %v15199_v42  ;;  %6812 = vmatmul.bf16.gmra.mxu0 %v6710_v1  ;;  %v6329_v42 = vld [vmem:[#allocation2 + $0x129] sm:$0xff]  ;;  %v5619_v55 = vpack.c.bf16 %v5593_v9, %v5592_v43 }
 0x58c   : > { %v15352_v33 = vadd.f32 %v6465_v58, %v6226_v61  ;;  %v6355_v45 = vpack.c.bf16 %v6329_v42, %v6328_v12  ;;  %v6673_v24 = vld [vmem:[#allocation2 + $0x6a] sm:$0xff]  ;;  %v6331_v42 = vld [vmem:[#allocation2 + $0x139] sm:$0xff] }
 0x58d   : > { %v6330_v12 = vld [vmem:[#allocation2 + $0x131] sm:$0xff] }
 0x590   : > { %v5408_v15 = vpop.f32.mrf.mxu0 }
 0x591   : > { %v6099_v40 = vpop.f32.mrf.mxu2  ;;  %v15362_v30 = vadd.f32 %v5408_v15, %v15162_v41  ;;  %v6672_v41 = vld [vmem:[#allocation2 + $0x62] sm:$0xff] }
 0x592   : > { %v6227_v17 = vadd.f32 %v6099_v40, %v5859_v35  ;;  %v6467_v19 = vpop.f32.mrf.mxu3  ;;  %v5734_v29 = vpop.f32.mrf.mxu1  ;;  %v6711_v35 = vpack.c.bf16 %v6673_v24, %v6672_v41  ;;  %v6356_v24 = vpack.c.bf16 %v6331_v42, %v6330_v12  ;;  %v6333_v42 = vld [vmem:[#allocation2 + $0x149] sm:$0xff]  ;;  %v6332_v12 = vld [vmem:[#allocation2 + $0x141] sm:$0xff] }
 0x593   : > { %v5860_v10 = vadd.f32 %v5734_v29, %v15210_v23  ;;  %v5594_v29 = vld [vmem:[#allocation2 + $0x120] sm:$0xff] }
 0x594   : > { %v15364_v56 = vadd.f32 %v6467_v19, %v6227_v17 }
 0x595   : > { %5773 = vmatmul.bf16.gmra.mxu1 %v5619_v55 }
 0x596   : > { %6141 = vmatmul.bf16.gmra.mxu2 %v6354_v32  ;;  %v5595_v32 = vld [vmem:[#allocation2 + $0x128] sm:$0xff] }
 0x597   : > { %6509 = vmatmul.bf16.gmra.mxu3 %v6355_v45  ;;  %v5620_v55 = vpack.c.bf16 %v5595_v32, %v5594_v29  ;;  %v5597_v32 = vld [vmem:[#allocation2 + $0x138] sm:$0xff]  ;;  %v5596_v29 = vld [vmem:[#allocation2 + $0x130] sm:$0xff] }
 0x598   : > { %v5411_v22 = vpop.f32.mrf.mxu0 }
 0x599   : > { %v6102_v61 = vpop.f32.mrf.mxu2  ;;  %v15368_v58 = vadd.f32 %v5411_v22, %v15170_v11 }
 0x59a   : > { %v6228_v1 = vadd.f32 %v6102_v61, %v5860_v10  ;;  %v6470_v34 = vpop.f32.mrf.mxu3  ;;  %v5736_v26 = vpop.f32.mrf.mxu1 }
 0x59b   : > { %v5861_v23 = vadd.f32 %v5736_v26, %v15219_v53  ;;  %6817 = vmatmul.bf16.gmra.mxu0 %v6711_v35  ;;  %v6675_v53 = vld [vmem:[#allocation2 + $0x7a] sm:$0xff] }
 0x59c   : > { %v15370_v36 = vadd.f32 %v6470_v34, %v6228_v1 }
 0x5a0   : > { %v5413_v15 = vpop.f32.mrf.mxu0 }
 0x5a1   : > { %v6104_v40 = vpop.f32.mrf.mxu2  ;;  %v15374_v9 = vadd.f32 %v5413_v15, %v15179_v5  ;;  %v6674_v5 = vld [vmem:[#allocation2 + $0x72] sm:$0xff] }
 0x5a2   : > { %v6229_v17 = vadd.f32 %v6104_v40, %v5861_v23  ;;  %v6472_v19 = vpop.f32.mrf.mxu3  ;;  %v5739_v11 = vpop.f32.mrf.mxu1  ;;  %v6712_v35 = vpack.c.bf16 %v6675_v53, %v6674_v5  ;;  %v6357_v53 = vpack.c.bf16 %v6333_v42, %v6332_v12  ;;  %v6335_v42 = vld [vmem:[#allocation2 + $0x159] sm:$0xff] }
 0x5a3   : > { %v5862_v10 = vadd.f32 %v5739_v11, %v15227_v16 }
 0x5a4   : > { %v15376_v43 = vadd.f32 %v6472_v19, %v6229_v17 }
 0x5a5   : > { %5778 = vmatmul.bf16.gmra.mxu1 %v5620_v55  ;;  %v5621_v55 = vpack.c.bf16 %v5597_v32, %v5596_v29  ;;  %v5598_v29 = vld [vmem:[#allocation2 + $0x140] sm:$0xff] }
 0x5a6   : > { %6146 = vmatmul.bf16.gmra.mxu2 %v6355_v45  ;;  %v13427_v45 = vld [vmem:[%s17095_s2 + $0x200] sm:$0xff] }
 0x5a7   : > { %6514 = vmatmul.bf16.gmra.mxu3 %v6356_v24  ;;  %7169 = vmatpush.bf16.msra.mxu1 %v13427_v45 }
 0x5a8   : > { %v5416_v22 = vpop.f32.mrf.mxu0 }
 0x5a9   : > { %v6107_v61 = vpop.f32.mrf.mxu2  ;;  %v15380_v41 = vadd.f32 %v5416_v22, %v15184_v14  ;;  %v6677_v22 = vld [vmem:[#allocation2 + $0x8a] sm:$0xff] }
 0x5aa   : > { %v6230_v1 = vadd.f32 %v6107_v61, %v5862_v10  ;;  %v6475_v34 = vpop.f32.mrf.mxu3  ;;  %v5741_v26 = vpop.f32.mrf.mxu1 }
 0x5ab   : > { %v5863_v16 = vadd.f32 %v5741_v26, %v15233_v54  ;;  %6822 = vmatmul.bf16.gmra.mxu0 %v6712_v35 }
 0x5ac   : > { %v15382_v23 = vadd.f32 %v6475_v34, %v6230_v1  ;;  %v6676_v1 = vld [vmem:[#allocation2 + $0x82] sm:$0xff] }
 0x5ad   : > { %v6713_v26 = vpack.c.bf16 %v6677_v22, %v6676_v1  ;;  %v6679_v22 = vld [vmem:[#allocation2 + $0x9a] sm:$0xff] }
 0x5b0   : > { %v5418_v15 = vpop.f32.mrf.mxu0 }
 0x5b1   : > { %v6109_v40 = vpop.f32.mrf.mxu2  ;;  %v15389_v14 = vadd.f32 %v5418_v15, %v15190_v63  ;;  %v13438_v63 = vld [vmem:[%s17096_s3 + $0x18] sm:$0xff] }
 0x5b2   : > { %v6231_v17 = vadd.f32 %v6109_v40, %v5863_v16  ;;  %v6477_v19 = vpop.f32.mrf.mxu3  ;;  %v5744_v11 = vpop.f32.mrf.mxu1  ;;  %8039 = vmatpush.bf16.msra.mxu2 %v13438_v63  ;;  %v13446_v15 = vld [vmem:[%s17096_s3 + $0x58] sm:$0xff] }
 0x5b3   : > { %v5864_v54 = vadd.f32 %v5744_v11, %v15243_v62  ;;  %8323 = vmatpush.bf16.msra.mxu3 %v13446_v15 }
 0x5b4   : > { %v15391_v10 = vadd.f32 %v6477_v19, %v6231_v17 }
 0x5b5   : > { %5783 = vmatmul.bf16.gmra.mxu1 %v5621_v55  ;;  %v6334_v55 = vld [vmem:[#allocation2 + $0x151] sm:$0xff] }
 0x5b6   : > { %6151 = vmatmul.bf16.gmra.mxu2 %v6356_v24  ;;  %v6358_v12 = vpack.c.bf16 %v6335_v42, %v6334_v55 }
 0x5b7   : > { %6519 = vmatmul.bf16.gmra.mxu3 %v6357_v53 }
 0x5b8   : > { %v5421_v61 = vpop.f32.mrf.mxu0 }
 0x5b9   : > { %v6112_v5 = vpop.f32.mrf.mxu2  ;;  %v15398_v34 = vadd.f32 %v5421_v61, %v15195_v50  ;;  %v5599_v50 = vld [vmem:[#allocation2 + $0x148] sm:$0xff] }
 0x5ba   : > { %v6232_v35 = vadd.f32 %v6112_v5, %v5864_v54  ;;  %v6480_v62 = vpop.f32.mrf.mxu3  ;;  %v5746_v16 = vpop.f32.mrf.mxu1  ;;  %v5622_v54 = vpack.c.bf16 %v5599_v50, %v5598_v29  ;;  %v6678_v5 = vld [vmem:[#allocation2 + $0x92] sm:$0xff] }
 0x5bb   : > { %v15403_v24 = vadd.f32 %v5746_v16, %v15255_v28  ;;  %6827 = vmatmul.bf16.gmra.mxu0 %v6713_v26 }
 0x5bc   : > { %v15400_v45 = vadd.f32 %v6480_v62, %v6232_v35  ;;  %v6714_v62 = vpack.c.bf16 %v6679_v22, %v6678_v5  ;;  %v6680_v5 = vld [vmem:[#allocation2 + $0xa2] sm:$0xff] }
 0x5c0   : > { %v5423_v40 = vpop.f32.mrf.mxu0 }
 0x5c1   : > { %v15408_v32 = vpop.f32.mrf.mxu2  ;;  %v15411_v17 = vadd.f32 %v5423_v40, %v15201_v13  ;;  %v5601_v40 = vld [vmem:[#allocation2 + $0x158] sm:$0xff] }
 0x5c2   : > { %v15413_v19 = vpop.f32.mrf.mxu3  ;;  %v5749_v11 = vpop.f32.mrf.mxu1 }
 0x5c3   : > { %v5866_v28 = vadd.f32 %v5749_v11, %v15261_v51  ;;  %v6337_v11 = vld [vmem:[#allocation2 + $0x169] sm:$0xff] }
 0x5c5   : > { %5788 = vmatmul.bf16.gmra.mxu1 %v5622_v54 }
 0x5c6   : > { %6156 = vmatmul.bf16.gmra.mxu2 %v6357_v53 }
 0x5c7   : > { %6524 = vmatmul.bf16.gmra.mxu3 %v6358_v12 }
 0x5c8   : > { %v5426_v63 = vpop.f32.mrf.mxu0 }
 0x5c9   : > { %v6117_v61 = vpop.f32.mrf.mxu2  ;;  %v15417_v13 = vadd.f32 %v5426_v63, %v15212_v37  ;;  %v6336_v37 = vld [vmem:[#allocation2 + $0x161] sm:$0xff] }
 0x5ca   : > { %v6234_v1 = vadd.f32 %v6117_v61, %v5866_v28  ;;  %v6485_v35 = vpop.f32.mrf.mxu3  ;;  %v5751_v26 = vpop.f32.mrf.mxu1  ;;  %v5600_v28 = vld [vmem:[#allocation2 + $0x150] sm:$0xff]  ;;  %v6359_v22 = vpack.c.bf16 %v6337_v11, %v6336_v37 }
 0x5cb   : > { %v15422_v51 = vadd.f32 %v5751_v26, %v15277_v44  ;;  %6832 = vmatmul.bf16.gmra.mxu0 %v6714_v62  ;;  %v5623_v55 = vpack.c.bf16 %v5601_v40, %v5600_v28  ;;  %v6681_v44 = vld [vmem:[#allocation2 + $0xaa] sm:$0xff] }
 0x5cc   : > { %v15419_v16 = vadd.f32 %v6485_v35, %v6234_v1  ;;  %v17228_v1 = vld [vmem:[#allocation25_spill] sm:$0xff]  ;;  %v6715_v26 = vpack.c.bf16 %v6681_v44, %v6680_v5  ;;  %v5602_v44 = vld [vmem:[#allocation2 + $0x160] sm:$0xff] }
 0x5cd   : > { %v6338_v40 = vld [vmem:[#allocation2 + $0x171] sm:$0xff] }
 0x5d0   : > { %v5428_v15 = vpop.f32.mrf.mxu0 }
 0x5d1   : > { %v15424_v53 = vpop.f32.mrf.mxu2  ;;  %v15427_v50 = vadd.f32 %v5428_v15, %v15221_v4 }
 0x5d2   : > { %v15429_v42 = vpop.f32.mrf.mxu3  ;;  %v5754_v29 = vpop.f32.mrf.mxu1 }
 0x5d3   : > { %17227 = vst [vmem:[#allocation26_spill] sm:$0xff] %v15429_v42  ;;  %v5868_v54 = vadd.f32 %v5754_v29, %v15289_v6  ;;  %v5603_v29 = vld [vmem:[#allocation2 + $0x168] sm:$0xff] }
 0x5d4   : > { %v5624_v5 = vpack.c.bf16 %v5603_v29, %v5602_v44 }
 0x5d5   : > { %5793 = vmatmul.bf16.gmra.mxu1 %v5623_v55 }
 0x5d6   : > { %6161 = vmatmul.bf16.gmra.mxu2 %v6358_v12  ;;  %v6339_v12 = vld [vmem:[#allocation2 + $0x179] sm:$0xff] }
 0x5d7   : > { %6529 = vmatmul.bf16.gmra.mxu3 %v6359_v22 }
 0x5d8   : > { %v5431_v63 = vpop.f32.mrf.mxu0 }
 0x5d9   : > { %v6122_v61 = vpop.f32.mrf.mxu2  ;;  %v15433_v4 = vadd.f32 %v5431_v63, %v17228_v1  ;;  %v6360_v63 = vpack.c.bf16 %v6339_v12, %v6338_v40  ;;  %v13445_v1 = vld [vmem:[%s17096_s3 + $0x50] sm:$0xff] }
 0x5da   : > { %v6236_v35 = vadd.f32 %v6122_v61, %v5868_v54  ;;  %v6490_v62 = vpop.f32.mrf.mxu3  ;;  %v5756_v15 = vpop.f32.mrf.mxu1  ;;  %8324 = vmatpush.bf16.msra.mxu3 %v13445_v1 }
 0x5db   : > { %v15438_v6 = vadd.f32 %v5756_v15, %v15296_v46  ;;  %6837 = vmatmul.bf16.gmra.mxu0 %v6715_v26  ;;  %v13437_v46 = vld [vmem:[%s17096_s3 + $0x10] sm:$0xff] }
 0x5dc   : > { %v15435_v42 = vadd.f32 %v6490_v62, %v6236_v35  ;;  %8040 = vmatpush.bf16.msra.mxu2 %v13437_v46  ;;  %v6682_v26 = vld [vmem:[#allocation2 + $0xb2] sm:$0xff] }
 0x5e0   : > { %v5433_v37 = vpop.f32.mrf.mxu0 }
 0x5e1   : > { %v15440_v11 = vpop.f32.mrf.mxu2  ;;  %v15443_v28 = vadd.f32 %v5433_v37, %v15237_v25  ;;  %v6683_v25 = vld [vmem:[#allocation2 + $0xba] sm:$0xff] }
 0x5e2   : > { %v15445_v55 = vpop.f32.mrf.mxu3  ;;  %v5759_v54 = vpop.f32.mrf.mxu1  ;;  %v6716_v12 = vpack.c.bf16 %v6683_v25, %v6682_v26  ;;  %v6684_v26 = vld [vmem:[#allocation2 + $0xc2] sm:$0xff] }
 0x5e3   : > { %v5870_v61 = vadd.f32 %v5759_v54, %v15305_v39 }
 0x5e5   : > { %5798 = vmatmul.bf16.gmra.mxu1 %v5624_v5 }
 0x5e6   : > { %6166 = vmatmul.bf16.gmra.mxu2 %v6359_v22 }
 0x5e7   : > { %6534 = vmatmul.bf16.gmra.mxu3 %v6360_v63  ;;  %v7035_v63 = vld [vmem:[#allocation2 + $0x3b] sm:$0xff] }
 0x5e8   : > { %v6803_v62 = vpop.f32.mrf.mxu0 }
 0x5e9   : > { %v6127_v35 = vpop.f32.mrf.mxu2  ;;  %v15455_v40 = vadd.f32 %v6803_v62, %v15245_v20  ;;  %v7034_v20 = vld [vmem:[#allocation2 + $0x33] sm:$0xff] }
 0x5ea   : > { %v6238_v15 = vadd.f32 %v6127_v35, %v5870_v61  ;;  %v6495_v39 = vpop.f32.mrf.mxu3  ;;  %v5761_v37 = vpop.f32.mrf.mxu1  ;;  %v7076_v25 = vpack.c.bf16 %v7035_v63, %v7034_v20  ;;  %v6685_v35 = vld [vmem:[#allocation2 + $0xca] sm:$0xff] }
 0x5eb   : > { %v15460_v54 = vadd.f32 %v5761_v37, %v15311_v27  ;;  %6842 = vmatmul.bf16.gmra.mxu0 %v6716_v12  ;;  %v6717_v37 = vpack.c.bf16 %v6685_v35, %v6684_v26  ;;  %v7037_v63 = vld [vmem:[#allocation2 + $0x4b] sm:$0xff] }
 0x5ec   : > { %v15457_v29 = vadd.f32 %v6495_v39, %v6238_v15 }
 0x5f0   : > { %v6805_v44 = vpop.f32.mrf.mxu0 }
 0x5f1   : > { %v15462_v22 = vpop.f32.mrf.mxu2  ;;  %v15467_v61 = vadd.f32 %v6805_v44, %v15257_v31 }
 0x5f2   : > { %17229 = vst [vmem:[#allocation27_spill] sm:$0xff] %v15462_v22  ;;  %v15464_v5 = vpop.f32.mrf.mxu3  ;;  %v5764_v46 = vpop.f32.mrf.mxu1 }
 0x5f3   : > { %17230 = vst [vmem:[#allocation28_spill] sm:$0xff] %v15464_v5  ;;  %v5872_v1 = vadd.f32 %v5764_v46, %v15323_v38 }
 0x5f5   : > { %7170 = vmatmul.bf16.vlgmr.msra.gmra.mxu1 %v7076_v25 }
 0x5f8   : > { %v6808_v27 = vpop.f32.mrf.mxu0 }
 0x5f9   : > { %v6132_v62 = vpop.f32.mrf.mxu2  ;;  %v15471_v12 = vadd.f32 %v6808_v27, %v15263_v49  ;;  %v7036_v49 = vld [vmem:[#allocation2 + $0x43] sm:$0xff] }
 0x5fa   : > { %v6240_v15 = vadd.f32 %v6132_v62, %v5872_v1  ;;  %v6500_v39 = vpop.f32.mrf.mxu3  ;;  %v5766_v5 = vpop.f32.mrf.mxu1  ;;  %v7077_v35 = vpack.c.bf16 %v7037_v63, %v7036_v49  ;;  %v6687_v62 = vld [vmem:[#allocation2 + $0xda] sm:$0xff] }
 0x5fb   : > { %v15476_v31 = vadd.f32 %v5766_v5, %v15329_v47  ;;  %6847 = vmatmul.bf16.gmra.mxu0 %v6717_v37  ;;  %v6686_v5 = vld [vmem:[#allocation2 + $0xd2] sm:$0xff] }
 0x5fc   : > { %v15473_v22 = vadd.f32 %v6500_v39, %v6240_v15  ;;  %v6718_v37 = vpack.c.bf16 %v6687_v62, %v6686_v5 }
 0x600   : > { %v6810_v44 = vpop.f32.mrf.mxu0 }
 0x601   : > { %v15478_v38 = vpop.f32.mrf.mxu2  ;;  %v15483_v20 = vadd.f32 %v6810_v44, %v15279_v7  ;;  %v13444_v44 = vld [vmem:[%s17096_s3 + $0x48] sm:$0xff] }
 0x602   : > { %17231 = vst [vmem:[#allocation29_spill] sm:$0xff] %v15478_v38  ;;  %v15480_v46 = vpop.f32.mrf.mxu3  ;;  %v5769_v1 = vpop.f32.mrf.mxu1  ;;  %8325 = vmatpush.bf16.msra.mxu3 %v13444_v44 }
 0x603   : > { %17232 = vst [vmem:[#allocation30_spill] sm:$0xff] %v15480_v46  ;;  %v5874_v25 = vadd.f32 %v5769_v1, %v15335_v2  ;;  %v13436_v2 = vld [vmem:[%s17096_s3 + $0x8] sm:$0xff]  ;;  %v7039_v1 = vld [vmem:[#allocation2 + $0x5b] sm:$0xff] }
 0x604   : > { %8041 = vmatpush.bf16.msra.mxu2 %v13436_v2 }
 0x605   : > { %7175 = vmatmul.bf16.gmra.mxu1 %v7077_v35 }
 0x608   : > { %v6813_v47 = vpop.f32.mrf.mxu0 }
 0x609   : > { %v6137_v27 = vpop.f32.mrf.mxu2  ;;  %v15487_v39 = vadd.f32 %v6813_v47, %v15291_v60 }
 0x60a   : > { %v6242_v26 = vadd.f32 %v6137_v27, %v5874_v25  ;;  %v6505_v15 = vpop.f32.mrf.mxu3  ;;  %v5771_v46 = vpop.f32.mrf.mxu1  ;;  %v7038_v25 = vld [vmem:[#allocation2 + $0x53] sm:$0xff]  ;;  %v6689_v27 = vld [vmem:[#allocation2 + $0xea] sm:$0xff] }
 0x60b   : > { %v15492_v7 = vadd.f32 %v5771_v46, %v15341_v18  ;;  %6852 = vmatmul.bf16.gmra.mxu0 %v6718_v37  ;;  %v7078_v62 = vpack.c.bf16 %v7039_v1, %v7038_v25  ;;  %v7041_v1 = vld [vmem:[#allocation2 + $0x6b] sm:$0xff] }
 0x60c   : > { %v15489_v38 = vadd.f32 %v6505_v15, %v6242_v26  ;;  %v6688_v26 = vld [vmem:[#allocation2 + $0xe2] sm:$0xff] }
 0x60d   : > { %v6719_v44 = vpack.c.bf16 %v6689_v27, %v6688_v26 }
 0x610   : > { %v6815_v63 = vpop.f32.mrf.mxu0 }
 0x611   : > { %v15500_v60 = vpop.f32.mrf.mxu2  ;;  %v15505_v18 = vadd.f32 %v6815_v63, %v15298_v57 }
 0x612   : > { %17233 = vst [vmem:[#allocation31_spill] sm:$0xff] %v15500_v60  ;;  %v15502_v49 = vpop.f32.mrf.mxu3  ;;  %v5774_v46 = vpop.f32.mrf.mxu1 }
 0x613   : > { %17234 = vst [vmem:[#allocation34_spill] sm:$0xff] %v15502_v49  ;;  %v5876_v35 = vadd.f32 %v5774_v46, %v15350_v59 }
 0x615   : > { %7180 = vmatmul.bf16.gmra.mxu1 %v7078_v62 }
 0x618   : > { %v6818_v5 = vpop.f32.mrf.mxu0 }
 0x619   : > { %v6142_v47 = vpop.f32.mrf.mxu2  ;;  %v15509_v2 = vadd.f32 %v6818_v5, %v15307_v3  ;;  %v7040_v3 = vld [vmem:[#allocation2 + $0x63] sm:$0xff] }
 0x61a   : > { %v6244_v15 = vadd.f32 %v6142_v47, %v5876_v35  ;;  %v6510_v37 = vpop.f32.mrf.mxu3  ;;  %v5776_v49 = vpop.f32.mrf.mxu1  ;;  %v7079_v27 = vpack.c.bf16 %v7041_v1, %v7040_v3  ;;  %v6691_v47 = vld [vmem:[#allocation2 + $0xfa] sm:$0xff] }
 0x61b   : > { %v15514_v57 = vadd.f32 %v5776_v49, %v15362_v30  ;;  %6857 = vmatmul.bf16.gmra.mxu0 %v6719_v44  ;;  %v6690_v49 = vld [vmem:[#allocation2 + $0xf2] sm:$0xff]  ;;  %v7043_v1 = vld [vmem:[#allocation2 + $0x7b] sm:$0xff] }
 0x61c   : > { %v15511_v60 = vadd.f32 %v6510_v37, %v6244_v15  ;;  %v6720_v44 = vpack.c.bf16 %v6691_v47, %v6690_v49  ;;  %v6692_v49 = vld [vmem:[#allocation2 + $0x102] sm:$0xff] }
 0x620   : > { %v6820_v63 = vpop.f32.mrf.mxu0 }
 0x621   : > { %v15516_v59 = vpop.f32.mrf.mxu2  ;;  %v15521_v25 = vadd.f32 %v6820_v63, %v15313_v0 }
 0x622   : > { %17235 = vst [vmem:[#allocation36_spill] sm:$0xff] %v15516_v59  ;;  %v15518_v46 = vpop.f32.mrf.mxu3  ;;  %v5779_v35 = vpop.f32.mrf.mxu1 }
 0x623   : > { %17236 = vst [vmem:[#allocation4_spill] sm:$0xff] %v15518_v46  ;;  %v5878_v62 = vadd.f32 %v5779_v35, %v15368_v58 }
 0x625   : > { %7185 = vmatmul.bf16.gmra.mxu1 %v7079_v27 }
 0x628   : > { %v6823_v30 = vpop.f32.mrf.mxu0 }
 0x629   : > { %v6147_v5 = vpop.f32.mrf.mxu2  ;;  %v15525_v37 = vadd.f32 %v6823_v30, %v15325_v21  ;;  %v7042_v21 = vld [vmem:[#allocation2 + $0x73] sm:$0xff] }
 0x62a   : > { %v6246_v26 = vadd.f32 %v6147_v5, %v5878_v62  ;;  %v6515_v15 = vpop.f32.mrf.mxu3  ;;  %v5781_v46 = vpop.f32.mrf.mxu1  ;;  %v7080_v47 = vpack.c.bf16 %v7043_v1, %v7042_v21  ;;  %v6693_v5 = vld [vmem:[#allocation2 + $0x10a] sm:$0xff] }
 0x62b   : > { %v15530_v0 = vadd.f32 %v5781_v46, %v15374_v9  ;;  %6862 = vmatmul.bf16.gmra.mxu0 %v6720_v44  ;;  %v13435_v9 = vld [vmem:[%s17096_s3] sm:$0xff]  ;;  %v6721_v44 = vpack.c.bf16 %v6693_v5, %v6692_v49 }
 0x62c   : > { %v15527_v59 = vadd.f32 %v6515_v15, %v6246_v26  ;;  %v13443_v46 = vld [vmem:[%s17096_s3 + $0x40] sm:$0xff]  ;;  %8042 = vmatpush.bf16.msra.mxu2 %v13435_v9  ;;  %v7045_v9 = vld [vmem:[#allocation2 + $0x8b] sm:$0xff] }
 0x62d   : > { %8326 = vmatpush.bf16.msra.mxu3 %v13443_v46  ;;  %v6695_v49 = vld [vmem:[#allocation2 + $0x11a] sm:$0xff] }
 0x630   : > { %v6825_v63 = vpop.f32.mrf.mxu0 }
 0x631   : > { %v15532_v58 = vpop.f32.mrf.mxu2  ;;  %v15537_v3 = vadd.f32 %v6825_v63, %v15331_v48 }
 0x632   : > { %v15534_v35 = vpop.f32.mrf.mxu3  ;;  %v5784_v62 = vpop.f32.mrf.mxu1 }
 0x633   : > { %17237 = vst [vmem:[#allocation32_spill] sm:$0xff] %v15534_v35  ;;  %v5880_v27 = vadd.f32 %v5784_v62, %v15380_v41 }
 0x635   : > { %7190 = vmatmul.bf16.gmra.mxu1 %v7080_v47 }
 0x638   : > { %v6828_v48 = vpop.f32.mrf.mxu0 }
 0x639   : > { %v6152_v30 = vpop.f32.mrf.mxu2  ;;  %v15547_v41 = vadd.f32 %v6828_v48, %v15337_v8  ;;  %v7044_v8 = vld [vmem:[#allocation2 + $0x83] sm:$0xff] }
 0x63a   : > { %v6248_v26 = vadd.f32 %v6152_v30, %v5880_v27  ;;  %v6520_v15 = vpop.f32.mrf.mxu3  ;;  %v5786_v63 = vpop.f32.mrf.mxu1  ;;  %v7081_v48 = vpack.c.bf16 %v7045_v9, %v7044_v8  ;;  %v7047_v9 = vld [vmem:[#allocation2 + $0x9b] sm:$0xff] }
 0x63b   : > { %v15552_v62 = vadd.f32 %v5786_v63, %v15389_v14  ;;  %6867 = vmatmul.bf16.gmra.mxu0 %v6721_v44 }
 0x63c   : > { %v15549_v1 = vadd.f32 %v6520_v15, %v6248_v26  ;;  %v6694_v15 = vld [vmem:[#allocation2 + $0x112] sm:$0xff] }
 0x63d   : > { %17239 = vst [vmem:[#allocation33_spill] sm:$0xff] %v15552_v62  ;;  %v6722_v62 = vpack.c.bf16 %v6695_v49, %v6694_v15 }
 0x63e   : > { %17238 = vst [vmem:[#allocation5_spill] sm:$0xff] %v15549_v1 }
 0x640   : > { %v6830_v47 = vpop.f32.mrf.mxu0 }
 0x641   : > { %v15554_v21 = vpop.f32.mrf.mxu2  ;;  %v15559_v27 = vadd.f32 %v6830_v47, %v15343_v52 }
 0x642   : > { %17240 = vst [vmem:[#allocation35_spill] sm:$0xff] %v15554_v21  ;;  %v15556_v46 = vpop.f32.mrf.mxu3  ;;  %v5789_v30 = vpop.f32.mrf.mxu1 }
 0x643   : > { %17241 = vst [vmem:[#allocation6_spill] sm:$0xff] %v15556_v46  ;;  %v5882_v5 = vadd.f32 %v5789_v30, %v15398_v34 }
 0x645   : > { %7195 = vmatmul.bf16.gmra.mxu1 %v7081_v48 }
 0x648   : > { %v6833_v14 = vpop.f32.mrf.mxu0 }
 0x649   : > { %v6157_v26 = vpop.f32.mrf.mxu2  ;;  %v15563_v21 = vadd.f32 %v6833_v14, %v15352_v33  ;;  %v7046_v33 = vld [vmem:[#allocation2 + $0x93] sm:$0xff] }
 0x64a   : > { %v6250_v44 = vadd.f32 %v6157_v26, %v5882_v5  ;;  %v6525_v63 = vpop.f32.mrf.mxu3  ;;  %v5791_v46 = vpop.f32.mrf.mxu1  ;;  %v7082_v49 = vpack.c.bf16 %v7047_v9, %v7046_v33  ;;  %v6697_v26 = vld [vmem:[#allocation2 + $0x12a] sm:$0xff] }
 0x64b   : > { %v15568_v52 = vadd.f32 %v5791_v46, %v15411_v17  ;;  %6872 = vmatmul.bf16.gmra.mxu0 %v6722_v62  ;;  %v7908_v14 = vld [vmem:[#allocation2 + $0xd] sm:$0xff]  ;;  %v7909_v17 = vld [vmem:[#allocation2 + $0x15] sm:$0xff] }
 0x64c   : > { %v15565_v1 = vadd.f32 %v6525_v63, %v6250_v44  ;;  %v8191_v46 = vld [vmem:[#allocation2 + $0xe] sm:$0xff]  ;;  %v6696_v44 = vld [vmem:[#allocation2 + $0x122] sm:$0xff]  ;;  %v7950_v63 = vpack.c.bf16 %v7909_v17, %v7908_v14 }
 0x64d   : > { %17243 = vst [vmem:[#allocation7_spill] sm:$0xff] %v15568_v52 }
 0x64e   : > { %17242 = vst [vmem:[#allocation22_spill] sm:$0xff] %v15565_v1  ;;  %8043 = vmatmul.bf16.vlgmr.msra.gmra.mxu2 %v7950_v63 }
 0x650   : > { %v6835_v47 = vpop.f32.mrf.mxu0 }
 0x651   : > { %v15570_v34 = vpop.f32.mrf.mxu2  ;;  %v15575_v8 = vadd.f32 %v6835_v47, %v15364_v56  ;;  %v6723_v47 = vpack.c.bf16 %v6697_v26, %v6696_v44 }
 0x652   : > { %17244 = vst [vmem:[#allocation9_spill] sm:$0xff] %v15570_v34  ;;  %v15572_v30 = vpop.f32.mrf.mxu3  ;;  %v5794_v5 = vpop.f32.mrf.mxu1  ;;  %v8192_v34 = vld [vmem:[#allocation2 + $0x16] sm:$0xff] }
 0x653   : > { %17245 = vst [vmem:[#allocation8_spill] sm:$0xff] %v15572_v30  ;;  %v5884_v48 = vadd.f32 %v5794_v5, %v15417_v13  ;;  %v8233_v1 = vpack.c.bf16 %v8192_v34, %v8191_v46  ;;  %v7048_v34 = vld [vmem:[#allocation2 + $0xa3] sm:$0xff] }
 0x655   : > { %7200 = vmatmul.bf16.gmra.mxu1 %v7082_v49  ;;  %8327 = vmatmul.bf16.vlgmr.msra.gmra.mxu3 %v8233_v1  ;;  %v7049_v49 = vld [vmem:[#allocation2 + $0xab] sm:$0xff]  ;;  %v13482_v1 = vld [vmem:[%s17096_s3 + $0x178] sm:$0xff] }
 0x656   : > { %9791 = vmatpush.bf16.msrb.mxu3 %v13482_v1  ;;  %v13780_v1 = vld [vmem:[%s17099_s6] sm:$0xf] }
 0x658   : > { %v6838_v15 = vpop.f32.mrf.mxu0 }
 0x659   : > { %v6162_v62 = vpop.f32.mrf.mxu2  ;;  %v15579_v56 = vadd.f32 %v6838_v15, %v15370_v36 }
 0x65a   : > { %v6252_v52 = vadd.f32 %v6162_v62, %v5884_v48  ;;  %v6530_v30 = vpop.f32.mrf.mxu3  ;;  %v5796_v35 = vpop.f32.mrf.mxu1 }
 0x65b   : > { %v15584_v9 = vadd.f32 %v5796_v35, %v15427_v50  ;;  %6877 = vmatmul.bf16.gmra.mxu0 %v6723_v47  ;;  %v13474_v50 = vld [vmem:[%s17096_s3 + $0x138] sm:$0xff] }
 0x65c   : > { %v15581_v13 = vadd.f32 %v6530_v30, %v6252_v52  ;;  %v7083_v52 = vpack.c.bf16 %v7049_v49, %v7048_v34  ;;  %v13458_v35 = vld [vmem:[%s17096_s3 + $0xb8] sm:$0xff]  ;;  %9423 = vmatpush.bf16.msrb.mxu2 %v13474_v50 }
 0x65d   : > { %8687 = vmatpush.bf16.msrb.mxu0 %v13458_v35  ;;  %v13466_v49 = vld [vmem:[%s17096_s3 + $0xf8] sm:$0xff] }
 0x65e   : > { %9055 = vmatpush.bf16.msrb.mxu1 %v13466_v49  ;;  %v7051_v34 = vld [vmem:[#allocation2 + $0xbb] sm:$0xff]  ;;  %v7050_v50 = vld [vmem:[#allocation2 + $0xb3] sm:$0xff]  ;;  %v7617_v49 = vpop.permute.xlu0 %7616 }
 0x660   : > { %v6840_v33 = vpop.f32.mrf.mxu0 }
 0x661   : > { %v15586_v5 = vpop.f32.mrf.mxu2  ;;  %v15591_v36 = vadd.f32 %v6840_v33, %v15376_v43  ;;  %v6699_v43 = vld [vmem:[#allocation2 + $0x13a] sm:$0xff] }
 0x662   : > { %v15588_v48 = vpop.f32.mrf.mxu3  ;;  %v5799_v26 = vpop.f32.mrf.mxu1 }
 0x663   : > { %v5886_v14 = vadd.f32 %v5799_v26, %v15433_v4  ;;  %v6698_v4 = vld [vmem:[#allocation2 + $0x132] sm:$0xff] }
 0x664   : > { %v6724_v44 = vpack.c.bf16 %v6699_v43, %v6698_v4  ;;  %v15626_v43 = vperm.slane %v13780_v1, 1 }
 0x665   : > { %7205 = vmatmul.bf16.gmra.mxu1 %v7083_v52 }
 0x668   : > { %v6843_v17 = vpop.f32.mrf.mxu0 }
 0x669   : > { %v6167_v30 = vpop.f32.mrf.mxu2  ;;  %v15604_v62 = vadd.f32 %v6843_v17, %v15382_v23  ;;  %v13779_v23 = vld [vmem:[%s17098_s5] sm:$0xf]  ;;  %v6701_v17 = vld [vmem:[#allocation2 + $0x14a] sm:$0xff] }
 0x66a   : > { %v6254_v46 = vadd.f32 %v6167_v30, %v5886_v14  ;;  %v6535_v15 = vpop.f32.mrf.mxu3  ;;  %v5801_v63 = vpop.f32.mrf.mxu1  ;;  %v15620_v52 = vperm.slane %v13779_v23, 1  ;;  %v7084_v30 = vpack.c.bf16 %v7051_v34, %v7050_v50  ;;  %v6233_v23 = vadd.f32 %v15408_v32, %v15403_v24  ;;  %v13457_v24 = vld [vmem:[%s17096_s3 + $0xb0] sm:$0xff] }
 0x66b   : > { %v15607_v47 = vadd.f32 %v5801_v63, %v15443_v28  ;;  %6882 = vmatmul.bf16.gmra.mxu0 %v6724_v44  ;;  %v7622_v32 = vpop.permute.xlu1 %7621 }
 0x66c   : > { %v15609_v33 = vadd.f32 %v6535_v15, %v6254_v46  ;;  %v6700_v15 = vld [vmem:[#allocation2 + $0x142] sm:$0xff]  ;;  %8688 = vmatpush.bf16.msrb.mxu0 %v13457_v24 }
 0x670   : > { %v6845_v26 = vpop.f32.mrf.mxu0 }
 0x671   : > { %v15615_v14 = vadd.f32 %v6845_v26, %v15391_v10 }
 0x672   : > { %v7171_v28 = vpop.f32.mrf.mxu1 }
 0x673   : > { %v7318_v35 = vadd.f32 %v7171_v28, %v15455_v40  ;;  %v6725_v40 = vpack.c.bf16 %v6701_v17, %v6700_v15 }
 0x675   : > { %v7445_v10 = vmul.f32 %v15620_v52, %v7318_v35  ;;  %7210 = vmatmul.bf16.gmra.mxu1 %v7084_v30  ;;  %v6601_v35 = vadd.f32 %v15413_v19, %v6233_v23 }
 0x677   : > { %v7488_v4 = vadd.f32 %v15626_v43, %v7445_v10 }
 0x678   : > { %v6848_v46 = vpop.f32.mrf.mxu0 }
 0x679   : > { %v7530_v44 = vmax.f32 %v7488_v4, 0.0  ;;  %v15631_v63 = vadd.f32 %v6848_v46, %v15400_v45  ;;  %v7053_v45 = vld [vmem:[#allocation2 + $0xcb] sm:$0xff] }
 0x67a   : > { %v7173_v26 = vpop.f32.mrf.mxu1 }
 0x67b   : > { %v7824_v28 = vmul.f32 %v7617_v49, %v7530_v44  ;;  %v7319_v34 = vadd.f32 %v7173_v26, %v15467_v61  ;;  %6887 = vmatmul.bf16.gmra.mxu0 %v6725_v40  ;;  %v7052_v61 = vld [vmem:[#allocation2 + $0xc3] sm:$0xff]  ;;  %v6703_v49 = vld [vmem:[#allocation2 + $0x15a] sm:$0xff] }
 0x67c   : > { %v7085_v44 = vpack.c.bf16 %v7053_v45, %v7052_v61  ;;  %v13456_v40 = vld [vmem:[%s17096_s3 + $0xa8] sm:$0xff]  ;;  %v6235_v45 = vadd.f32 %v15424_v53, %v15422_v51  ;;  %v13454_v51 = vld [vmem:[%s17096_s3 + $0x98] sm:$0xff]  ;;  %v17246_v53 = vld [vmem:[#allocation26_spill] sm:$0xff] }
 0x67d   : > { %7866 = vst [vmem:[#allocation2 + $0x20] sm:$0xff] %v7824_v28  ;;  %v7446_v50 = vmul.f32 %v15620_v52, %v7319_v34  ;;  %8689 = vmatpush.bf16.msrb.mxu0 %v13456_v40  ;;  %v6702_v28 = vld [vmem:[#allocation2 + $0x152] sm:$0xff] }
 0x67f   : > { %v7489_v1 = vadd.f32 %v15626_v43, %v7446_v50 }
 0x680   : > { %v6850_v30 = vpop.f32.mrf.mxu0 }
 0x681   : > { %v7531_v10 = vmax.f32 %v7489_v1, 0.0  ;;  %v15639_v17 = vadd.f32 %v6850_v30, %v6601_v35  ;;  %v13455_v35 = vld [vmem:[%s17096_s3 + $0xa0] sm:$0xff]  ;;  %v7627_v1 = vpop.permute.xlu2 %7626 }
 0x682   : > { %v7176_v4 = vpop.f32.mrf.mxu1  ;;  %8690 = vmatpush.bf16.msrb.mxu0 %v13455_v35 }
 0x683   : > { %v7825_v46 = vmul.f32 %v7622_v32, %v7531_v10  ;;  %v7320_v15 = vadd.f32 %v7176_v4, %v15471_v12  ;;  %v6726_v12 = vpack.c.bf16 %v6703_v49, %v6702_v28 }
 0x684   : > { %v7910_v32 = vld [vmem:[#allocation2 + $0x1d] sm:$0xff] }
 0x685   : > { %7867 = vst [vmem:[#allocation2 + $0x28] sm:$0xff] %v7825_v46  ;;  %v7447_v19 = vmul.f32 %v15620_v52, %v7320_v15  ;;  %7215 = vmatmul.bf16.gmra.mxu1 %v7085_v44  ;;  %v8193_v61 = vld [vmem:[#allocation2 + $0x1e] sm:$0xff] }
 0x686   : > { %8691 = vmatpush.bf16.msrb.mxu0 %v13454_v51 }
 0x687   : > { %v7490_v26 = vadd.f32 %v15626_v43, %v7447_v19  ;;  %v13473_v19 = vld [vmem:[%s17096_s3 + $0x130] sm:$0xff] }
 0x688   : > { %v6853_v23 = vpop.f32.mrf.mxu0  ;;  %9424 = vmatpush.bf16.msrb.mxu2 %v13473_v19 }
 0x689   : > { %v7532_v34 = vmax.f32 %v7490_v26, 0.0  ;;  %v15651_v50 = vadd.f32 %v6853_v23, %v15419_v16  ;;  %v7055_v26 = vld [vmem:[#allocation2 + $0xdb] sm:$0xff] }
 0x68a   : > { %v7178_v30 = vpop.f32.mrf.mxu1 }
 0x68b   : > { %v7826_v10 = vmul.f32 %v7627_v1, %v7532_v34  ;;  %v7321_v24 = vadd.f32 %v7178_v30, %v15483_v20  ;;  %6892 = vmatmul.bf16.gmra.mxu0 %v6726_v12  ;;  %v6603_v20 = vadd.f32 %v17246_v53, %v6235_v45  ;;  %v13453_v34 = vld [vmem:[%s17096_s3 + $0x90] sm:$0xff]  ;;  %v7632_v12 = vpop.permute.xlu0 %7631  ;;  %v13451_v53 = vld [vmem:[%s17096_s3 + $0x80] sm:$0xff] }
 0x68c   : > { %v7911_v4 = vld [vmem:[#allocation2 + $0x25] sm:$0xff]  ;;  %v7054_v1 = vld [vmem:[#allocation2 + $0xd3] sm:$0xff]  ;;  %8692 = vmatpush.bf16.msrb.mxu0 %v13453_v34 }
 0x68d   : > { %v8194_v46 = vld [vmem:[#allocation2 + $0x26] sm:$0xff]  ;;  %7868 = vst [vmem:[#allocation2 + $0x30] sm:$0xff] %v7826_v10  ;;  %v7448_v16 = vmul.f32 %v15620_v52, %v7321_v24  ;;  %v7951_v15 = vpack.c.bf16 %v7911_v4, %v7910_v32  ;;  %v7086_v10 = vpack.c.bf16 %v7055_v26, %v7054_v1  ;;  %v13481_v32 = vld [vmem:[%s17096_s3 + $0x170] sm:$0xff] }
 0x68e   : > { %v8234_v44 = vpack.c.bf16 %v8194_v46, %v8193_v61  ;;  %v13465_v4 = vld [vmem:[%s17096_s3 + $0xf0] sm:$0xff]  ;;  %v13452_v61 = vld [vmem:[%s17096_s3 + $0x88] sm:$0xff]  ;;  %9792 = vmatpush.bf16.msrb.mxu3 %v13481_v32 }
 0x68f   : > { %v7491_v40 = vadd.f32 %v15626_v43, %v7448_v16  ;;  %8048 = vmatmul.bf16.gmra.mxu2 %v7951_v15  ;;  %v6704_v46 = vld [vmem:[#allocation2 + $0x162] sm:$0xff]  ;;  %9056 = vmatpush.bf16.msrb.mxu1 %v13465_v4  ;;  %v7642_v4 = vpop.permute.xlu2 %7641 }
 0x690   : > { %8332 = vmatmul.bf16.gmra.mxu3 %v8234_v44  ;;  %v6855_v49 = vpop.f32.mrf.mxu0  ;;  %8693 = vmatpush.bf16.msrb.mxu0 %v13452_v61 }
 0x691   : > { %v7533_v23 = vmax.f32 %v7491_v40, 0.0  ;;  %v15668_v28 = vadd.f32 %v6855_v49, %v6603_v20  ;;  %v7637_v20 = vpop.permute.xlu1 %7636  ;;  %v6237_v49 = vadd.f32 %v15440_v11, %v15438_v6  ;;  %v7057_v11 = vld [vmem:[#allocation2 + $0xeb] sm:$0xff] }
 0x692   : > { %v7181_v35 = vpop.f32.mrf.mxu1 }
 0x693   : > { %v7827_v30 = vmul.f32 %v7632_v12, %v7533_v23  ;;  %v7322_v45 = vadd.f32 %v7181_v35, %v15487_v39  ;;  %v6705_v39 = vld [vmem:[#allocation2 + $0x16a] sm:$0xff] }
 0x694   : > { %v6727_v51 = vpack.c.bf16 %v6705_v39, %v6704_v46  ;;  %v7912_v34 = vld [vmem:[#allocation2 + $0x2d] sm:$0xff]  ;;  %8694 = vmatpush.bf16.msrb.mxu0 %v13451_v53  ;;  %v7056_v46 = vld [vmem:[#allocation2 + $0xe3] sm:$0xff] }
 0x695   : > { %7869 = vst [vmem:[#allocation2 + $0x38] sm:$0xff] %v7827_v30  ;;  %v7449_v24 = vmul.f32 %v15620_v52, %v7322_v45  ;;  %7220 = vmatmul.bf16.gmra.mxu1 %v7086_v10  ;;  %v8195_v35 = vld [vmem:[#allocation2 + $0x2e] sm:$0xff]  ;;  %v6605_v10 = vadd.f32 %v15445_v55, %v6237_v49 }
 0x697   : > { %v7492_v16 = vadd.f32 %v15626_v43, %v7449_v24 }
 0x698   : > { %v6858_v15 = vpop.f32.mrf.mxu0 }
 0x699   : > { %v7534_v44 = vmax.f32 %v7492_v16, 0.0  ;;  %v15686_v19 = vadd.f32 %v6858_v15, %v15435_v42  ;;  %v7087_v15 = vpack.c.bf16 %v7057_v11, %v7056_v46 }
 0x69a   : > { %v7183_v40 = vpop.f32.mrf.mxu1 }
 0x69b   : > { %v7828_v26 = vmul.f32 %v7637_v20, %v7534_v44  ;;  %v7323_v23 = vadd.f32 %v7183_v40, %v15505_v18  ;;  %6897 = vmatmul.bf16.gmra.mxu0 %v6727_v51  ;;  %v6706_v44 = vld [vmem:[#allocation2 + $0x172] sm:$0xff]  ;;  %v6707_v51 = vld [vmem:[#allocation2 + $0x17a] sm:$0xff] }
 0x69c   : > { %v7913_v12 = vld [vmem:[#allocation2 + $0x35] sm:$0xff]  ;;  %v6728_v20 = vpack.c.bf16 %v6707_v51, %v6706_v44 }
 0x69d   : > { %v8196_v1 = vld [vmem:[#allocation2 + $0x36] sm:$0xff]  ;;  %7870 = vst [vmem:[#allocation2 + $0x40] sm:$0xff] %v7828_v26  ;;  %v7450_v42 = vmul.f32 %v15620_v52, %v7323_v23  ;;  %v7952_v30 = vpack.c.bf16 %v7913_v12, %v7912_v34  ;;  %v7647_v23 = vpop.permute.xlu0 %7646  ;;  %v17247_v12 = vld [vmem:[#allocation27_spill] sm:$0xff] }
 0x69e   : > { %v8235_v45 = vpack.c.bf16 %v8196_v1, %v8195_v35 }
 0x69f   : > { %v7493_v24 = vadd.f32 %v15626_v43, %v7450_v42  ;;  %8053 = vmatmul.bf16.gmra.mxu2 %v7952_v30 }
 0x6a0   : > { %8337 = vmatmul.bf16.gmra.mxu3 %v8235_v45  ;;  %v6860_v6 = vpop.f32.mrf.mxu0 }
 0x6a1   : > { %v7535_v18 = vmax.f32 %v7493_v24, 0.0  ;;  %v15697_v32 = vadd.f32 %v6860_v6, %v6605_v10 }
 0x6a2   : > { %v7186_v61 = vpop.f32.mrf.mxu1 }
 0x6a3   : > { %v7829_v39 = vmul.f32 %v7642_v4, %v7535_v18  ;;  %v7324_v16 = vadd.f32 %v7186_v61, %v15509_v2  ;;  %v6239_v2 = vadd.f32 %v17247_v12, %v15460_v54  ;;  %v7059_v61 = vld [vmem:[#allocation2 + $0xfb] sm:$0xff] }
 0x6a4   : > { %v7914_v42 = vld [vmem:[#allocation2 + $0x3d] sm:$0xff] }
 0x6a5   : > { %7871 = vst [vmem:[#allocation2 + $0x48] sm:$0xff] %v7829_v39  ;;  %v7451_v55 = vmul.f32 %v15620_v52, %v7324_v16  ;;  %7225 = vmatmul.bf16.gmra.mxu1 %v7087_v15  ;;  %v8197_v45 = vld [vmem:[#allocation2 + $0x3e] sm:$0xff]  ;;  %v7652_v39 = vpop.permute.xlu1 %7651  ;;  %v7058_v15 = vld [vmem:[#allocation2 + $0xf3] sm:$0xff] }
 0x6a7   : > { %v7494_v53 = vadd.f32 %v15626_v43, %v7451_v55  ;;  %v7088_v55 = vpack.c.bf16 %v7059_v61, %v7058_v15 }
 0x6a8   : > { %v6863_v40 = vpop.f32.mrf.mxu0 }
 0x6a9   : > { %v7536_v49 = vmax.f32 %v7494_v53, 0.0  ;;  %v15703_v26 = vadd.f32 %v6863_v40, %v15457_v29  ;;  %v17248_v29 = vld [vmem:[#allocation28_spill] sm:$0xff] }
 0x6aa   : > { %v7188_v34 = vpop.f32.mrf.mxu1  ;;  %v6607_v18 = vadd.f32 %v17248_v29, %v6239_v2  ;;  %v8559_v53 = vld [vmem:[#allocation2 + $0xf] sm:$0xff] }
 0x6ab   : > { %v7830_v35 = vmul.f32 %v7647_v23, %v7536_v49  ;;  %v7325_v1 = vadd.f32 %v7188_v34, %v15521_v25  ;;  %6902 = vmatmul.bf16.gmra.mxu0 %v6728_v20  ;;  %v8560_v20 = vld [vmem:[#allocation2 + $0x17] sm:$0xff] }
 0x6ac   : > { %v7915_v30 = vld [vmem:[#allocation2 + $0x45] sm:$0xff]  ;;  %v8601_v23 = vpack.c.bf16 %v8560_v20, %v8559_v53 }
 0x6ad   : > { %v8198_v10 = vld [vmem:[#allocation2 + $0x46] sm:$0xff]  ;;  %7872 = vst [vmem:[#allocation2 + $0x50] sm:$0xff] %v7830_v35  ;;  %v7452_v24 = vmul.f32 %v15620_v52, %v7325_v1  ;;  %v7953_v6 = vpack.c.bf16 %v7915_v30, %v7914_v42  ;;  %v7657_v35 = vpop.permute.xlu2 %7656  ;;  %v17249_v42 = vld [vmem:[#allocation29_spill] sm:$0xff] }
 0x6ae   : > { %v8236_v11 = vpack.c.bf16 %v8198_v10, %v8197_v45  ;;  %v7060_v53 = vld [vmem:[#allocation2 + $0x103] sm:$0xff] }
 0x6af   : > { %v7495_v4 = vadd.f32 %v15626_v43, %v7452_v24  ;;  %8058 = vmatmul.bf16.gmra.mxu2 %v7953_v6 }
 0x6b0   : > { %8342 = vmatmul.bf16.gmra.mxu3 %v8236_v11  ;;  %v6865_v54 = vpop.f32.mrf.mxu0 }
 0x6b1   : > { %v7537_v46 = vmax.f32 %v7495_v4, 0.0  ;;  %v15711_v25 = vadd.f32 %v6865_v54, %v6607_v18  ;;  %v17250_v54 = vld [vmem:[#allocation30_spill] sm:$0xff] }
 0x6b2   : > { %v7191_v16 = vpop.f32.mrf.mxu1 }
 0x6b3   : > { %v7831_v44 = vmul.f32 %v7652_v39, %v7537_v46  ;;  %v7326_v51 = vadd.f32 %v7191_v16, %v15525_v37  ;;  %v6241_v37 = vadd.f32 %v17249_v42, %v15476_v31  ;;  %v13480_v31 = vld [vmem:[%s17096_s3 + $0x168] sm:$0xff] }
 0x6b4   : > { %v7916_v10 = vld [vmem:[#allocation2 + $0x4d] sm:$0xff]  ;;  %9793 = vmatpush.bf16.msrb.mxu3 %v13480_v31 }
 0x6b5   : > { %7873 = vst [vmem:[#allocation2 + $0x58] sm:$0xff] %v7831_v44  ;;  %v7453_v40 = vmul.f32 %v15620_v52, %v7326_v51  ;;  %7230 = vmatmul.bf16.gmra.mxu1 %v7088_v55  ;;  %v8199_v6 = vld [vmem:[#allocation2 + $0x4e] sm:$0xff]  ;;  %v6609_v61 = vadd.f32 %v17250_v54, %v6241_v37  ;;  %v7662_v51 = vpop.permute.xlu0 %7661  ;;  %v17252_v54 = vld [vmem:[#allocation34_spill] sm:$0xff] }
 0x6b6   : > { %v7061_v16 = vld [vmem:[#allocation2 + $0x10b] sm:$0xff] }
 0x6b7   : > { %v7496_v49 = vadd.f32 %v15626_v43, %v7453_v40 }
 0x6b8   : > { %v6868_v34 = vpop.f32.mrf.mxu0 }
 0x6b9   : > { %v7538_v12 = vmax.f32 %v7496_v49, 0.0  ;;  %v15717_v2 = vadd.f32 %v6868_v34, %v15473_v22  ;;  %v13472_v22 = vld [vmem:[%s17096_s3 + $0x128] sm:$0xff]  ;;  %v7089_v49 = vpack.c.bf16 %v7061_v16, %v7060_v53 }
 0x6ba   : > { %v7193_v1 = vpop.f32.mrf.mxu1  ;;  %9425 = vmatpush.bf16.msrb.mxu2 %v13472_v22  ;;  %v8562_v34 = vld [vmem:[#allocation2 + $0x27] sm:$0xff] }
 0x6bb   : > { %v7832_v30 = vmul.f32 %v7657_v35, %v7538_v12  ;;  %v7327_v45 = vadd.f32 %v7193_v1, %v15537_v3  ;;  %8695 = vmatmul.bf16.vlgmr.msrb.gmra.mxu0 %v8601_v23  ;;  %v13464_v3 = vld [vmem:[%s17096_s3 + $0xe8] sm:$0xff]  ;;  %v8561_v1 = vld [vmem:[#allocation2 + $0x1f] sm:$0xff] }
 0x6bc   : > { %v7917_v24 = vld [vmem:[#allocation2 + $0x55] sm:$0xff]  ;;  %9057 = vmatpush.bf16.msrb.mxu1 %v13464_v3 }
 0x6bd   : > { %v8200_v11 = vld [vmem:[#allocation2 + $0x56] sm:$0xff]  ;;  %7874 = vst [vmem:[#allocation2 + $0x60] sm:$0xff] %v7832_v30  ;;  %v7454_v29 = vmul.f32 %v15620_v52, %v7327_v45  ;;  %v7954_v18 = vpack.c.bf16 %v7917_v24, %v7916_v10  ;;  %v15742_v30 = vpack.c.bf16 %v8562_v34, %v8561_v1  ;;  %v7667_v45 = vpop.permute.xlu1 %7666 }
 0x6be   : > { %v8237_v4 = vpack.c.bf16 %v8200_v11, %v8199_v6 }
 0x6bf   : > { %v7497_v46 = vadd.f32 %v15626_v43, %v7454_v29  ;;  %8063 = vmatmul.bf16.gmra.mxu2 %v7954_v18 }
 0x6c0   : > { %8347 = vmatmul.bf16.gmra.mxu3 %v8237_v4  ;;  %v6870_v39 = vpop.f32.mrf.mxu0 }
 0x6c1   : > { %v7539_v15 = vmax.f32 %v7497_v46, 0.0  ;;  %v15734_v44 = vadd.f32 %v6870_v39, %v6609_v61  ;;  %v7063_v39 = vld [vmem:[#allocation2 + $0x11b] sm:$0xff] }
 0x6c2   : > { %v7196_v55 = vpop.f32.mrf.mxu1 }
 0x6c3   : > { %v7833_v20 = vmul.f32 %v7662_v51, %v7539_v15  ;;  %v7328_v40 = vadd.f32 %v7196_v55, %v15547_v41  ;;  %v17251_v41 = vld [vmem:[#allocation31_spill] sm:$0xff]  ;;  %v7672_v15 = vpop.permute.xlu2 %7671  ;;  %v7062_v55 = vld [vmem:[#allocation2 + $0x113] sm:$0xff] }
 0x6c4   : > { %v6243_v24 = vadd.f32 %v17251_v41, %v15492_v7  ;;  %v7918_v29 = vld [vmem:[#allocation2 + $0x5d] sm:$0xff] }
 0x6c5   : > { %7875 = vst [vmem:[#allocation2 + $0x68] sm:$0xff] %v7833_v20  ;;  %v7455_v23 = vmul.f32 %v15620_v52, %v7328_v40  ;;  %7235 = vmatmul.bf16.gmra.mxu1 %v7089_v49  ;;  %v8201_v4 = vld [vmem:[#allocation2 + $0x5e] sm:$0xff]  ;;  %v7090_v40 = vpack.c.bf16 %v7063_v39, %v7062_v55 }
 0x6c6   : > { %v6611_v61 = vadd.f32 %v17252_v54, %v6243_v24  ;;  %v7064_v55 = vld [vmem:[#allocation2 + $0x123] sm:$0xff] }
 0x6c7   : > { %v7498_v12 = vadd.f32 %v15626_v43, %v7455_v23  ;;  %v8564_v23 = vld [vmem:[#allocation2 + $0x37] sm:$0xff] }
 0x6c8   : > { %v6873_v35 = vpop.f32.mrf.mxu0 }
 0x6c9   : > { %v7540_v42 = vmax.f32 %v7498_v12, 0.0  ;;  %v15740_v37 = vadd.f32 %v6873_v35, %v15489_v38  ;;  %v8563_v35 = vld [vmem:[#allocation2 + $0x2f] sm:$0xff] }
 0x6ca   : > { %v7198_v10 = vpop.f32.mrf.mxu1 }
 0x6cb   : > { %v7834_v6 = vmul.f32 %v7667_v45, %v7540_v42  ;;  %v7329_v11 = vadd.f32 %v7198_v10, %v15559_v27  ;;  %8700 = vmatmul.bf16.gmra.mxu0 %v15742_v30  ;;  %v15759_v45 = vpack.c.bf16 %v8564_v23, %v8563_v35  ;;  %v7677_v10 = vpop.permute.xlu0 %7676  ;;  %v13471_v35 = vld [vmem:[%s17096_s3 + $0x120] sm:$0xff] }
 0x6cc   : > { %v7919_v18 = vld [vmem:[#allocation2 + $0x65] sm:$0xff]  ;;  %9426 = vmatpush.bf16.msrb.mxu2 %v13471_v35 }
 0x6cd   : > { %v8202_v22 = vld [vmem:[#allocation2 + $0x66] sm:$0xff]  ;;  %7876 = vst [vmem:[#allocation2 + $0x70] sm:$0xff] %v7834_v6  ;;  %v7456_v38 = vmul.f32 %v15620_v52, %v7329_v11  ;;  %v7955_v31 = vpack.c.bf16 %v7919_v18, %v7918_v29  ;;  %v15765_v18 = vpop.f32.mrf.mxu2 }
 0x6ce   : > { %v8238_v3 = vpack.c.bf16 %v8202_v22, %v8201_v4  ;;  %v15767_v4 = vpop.f32.mrf.mxu3 }
 0x6cf   : > { %v7499_v46 = vadd.f32 %v15626_v43, %v7456_v38  ;;  %8068 = vmatmul.bf16.gmra.mxu2 %v7955_v31 }
 0x6d0   : > { %8352 = vmatmul.bf16.gmra.mxu3 %v8238_v3  ;;  %v6875_v7 = vpop.f32.mrf.mxu0 }
 0x6d1   : > { %v7541_v27 = vmax.f32 %v7499_v46, 0.0  ;;  %v15751_v16 = vadd.f32 %v6875_v7, %v6611_v61  ;;  %v17254_v61 = vld [vmem:[#allocation4_spill] sm:$0xff] }
 0x6d2   : > { %v7201_v51 = vpop.f32.mrf.mxu1  ;;  %v7065_v7 = vld [vmem:[#allocation2 + $0x12b] sm:$0xff] }
 0x6d3   : > { %v7835_v53 = vmul.f32 %v7672_v15, %v7541_v27  ;;  %v7330_v20 = vadd.f32 %v7201_v51, %v15563_v21  ;;  %v17253_v21 = vld [vmem:[#allocation36_spill] sm:$0xff]  ;;  %v7682_v15 = vpop.permute.xlu1 %7681 }
 0x6d4   : > { %v6245_v24 = vadd.f32 %v17253_v21, %v15514_v57  ;;  %v7920_v29 = vld [vmem:[#allocation2 + $0x6d] sm:$0xff] }
 0x6d5   : > { %7877 = vst [vmem:[#allocation2 + $0x78] sm:$0xff] %v7835_v53  ;;  %v7457_v49 = vmul.f32 %v15620_v52, %v7330_v20  ;;  %7240 = vmatmul.bf16.gmra.mxu1 %v7090_v40  ;;  %v7091_v40 = vpack.c.bf16 %v7065_v7, %v7064_v55 }
 0x6d6   : > { %v6613_v57 = vadd.f32 %v17254_v61, %v6245_v24  ;;  %v8565_v24 = vld [vmem:[#allocation2 + $0x3f] sm:$0xff] }
 0x6d7   : > { %v7500_v34 = vadd.f32 %v15626_v43, %v7457_v49  ;;  %v8044_v49 = vpop.f32.mrf.mxu2 }
 0x6d8   : > { %v6878_v12 = vpop.f32.mrf.mxu0  ;;  %v8328_v23 = vpop.f32.mrf.mxu3 }
 0x6d9   : > { %v7542_v1 = vmax.f32 %v7500_v34, 0.0  ;;  %v15757_v42 = vadd.f32 %v6878_v12, %v15511_v60  ;;  %v8203_v60 = vld [vmem:[#allocation2 + $0x6e] sm:$0xff]  ;;  %v15776_v12 = vadd.f32 %v8328_v23, %v8044_v49 }
 0x6da   : > { %v7203_v41 = vpop.f32.mrf.mxu1 }
 0x6db   : > { %v7836_v6 = vmul.f32 %v7677_v10, %v7542_v1  ;;  %v7331_v11 = vadd.f32 %v7203_v41, %v15575_v8  ;;  %8705 = vmatmul.bf16.gmra.mxu0 %v15759_v45  ;;  %v13479_v1 = vld [vmem:[%s17096_s3 + $0x160] sm:$0xff] }
 0x6dc   : > { %v7921_v22 = vld [vmem:[#allocation2 + $0x75] sm:$0xff]  ;;  %v8566_v10 = vld [vmem:[#allocation2 + $0x47] sm:$0xff]  ;;  %9794 = vmatpush.bf16.msrb.mxu3 %v13479_v1 }
 0x6dd   : > { %v8204_v38 = vld [vmem:[#allocation2 + $0x76] sm:$0xff]  ;;  %7878 = vst [vmem:[#allocation2 + $0x80] sm:$0xff] %v7836_v6  ;;  %v7458_v31 = vmul.f32 %v15620_v52, %v7331_v11  ;;  %v7956_v3 = vpack.c.bf16 %v7921_v22, %v7920_v29  ;;  %v15791_v29 = vpack.c.bf16 %v8566_v10, %v8565_v24  ;;  %v7687_v22 = vpop.permute.xlu2 %7686 }
 0x6de   : > { %v8239_v54 = vpack.c.bf16 %v8204_v38, %v8203_v60  ;;  %v6247_v38 = vadd.f32 %v15532_v58, %v15530_v0  ;;  %v7067_v58 = vld [vmem:[#allocation2 + $0x13b] sm:$0xff] }
 0x6df   : > { %v7501_v46 = vadd.f32 %v15626_v43, %v7458_v31  ;;  %8073 = vmatmul.bf16.gmra.mxu2 %v7956_v3  ;;  %v8568_v1 = vld [vmem:[#allocation2 + $0x57] sm:$0xff] }
 0x6e0   : > { %8357 = vmatmul.bf16.gmra.mxu3 %v8239_v54  ;;  %v6880_v8 = vpop.f32.mrf.mxu0  ;;  %v17256_v24 = vld [vmem:[#allocation5_spill] sm:$0xff] }
 0x6e1   : > { %v7543_v39 = vmax.f32 %v7501_v46, 0.0  ;;  %v15772_v27 = vadd.f32 %v6880_v8, %v6613_v57 }
 0x6e2   : > { %v7206_v51 = vpop.f32.mrf.mxu1 }
 0x6e3   : > { %v7837_v53 = vmul.f32 %v7682_v15, %v7543_v39  ;;  %v7332_v20 = vadd.f32 %v7206_v51, %v15579_v56  ;;  %v13463_v56 = vld [vmem:[%s17096_s3 + $0xe0] sm:$0xff]  ;;  %v17255_v39 = vld [vmem:[#allocation32_spill] sm:$0xff] }
 0x6e4   : > { %9058 = vmatpush.bf16.msrb.mxu1 %v13463_v56  ;;  %v7922_v54 = vld [vmem:[#allocation2 + $0x7d] sm:$0xff]  ;;  %v6615_v15 = vadd.f32 %v17255_v39, %v6247_v38 }
 0x6e5   : > { %7879 = vst [vmem:[#allocation2 + $0x88] sm:$0xff] %v7837_v53  ;;  %v7459_v34 = vmul.f32 %v15620_v52, %v7332_v20  ;;  %7245 = vmatmul.bf16.gmra.mxu1 %v7091_v40  ;;  %v8205_v57 = vld [vmem:[#allocation2 + $0x7e] sm:$0xff]  ;;  %v7692_v53 = vpop.permute.xlu0 %7691  ;;  %v7066_v40 = vld [vmem:[#allocation2 + $0x133] sm:$0xff] }
 0x6e7   : > { %v7502_v41 = vadd.f32 %v15626_v43, %v7459_v34  ;;  %v7092_v34 = vpack.c.bf16 %v7067_v58, %v7066_v40  ;;  %v7702_v40 = vpop.permute.xlu2 %7701 }
 0x6e8   : > { %v6883_v21 = vpop.f32.mrf.mxu0 }
 0x6e9   : > { %v7544_v6 = vmax.f32 %v7502_v41, 0.0  ;;  %v15789_v11 = vadd.f32 %v6883_v21, %v15527_v59  ;;  %v8567_v41 = vld [vmem:[#allocation2 + $0x4f] sm:$0xff] }
 0x6ea   : > { %v7208_v60 = vpop.f32.mrf.mxu1 }
 0x6eb   : > { %v7838_v31 = vmul.f32 %v7687_v22, %v7544_v6  ;;  %v7333_v3 = vadd.f32 %v7208_v60, %v15591_v36  ;;  %8710 = vmatmul.bf16.gmra.mxu0 %v15791_v29  ;;  %v15808_v22 = vpack.c.bf16 %v8568_v1, %v8567_v41  ;;  %v7697_v60 = vpop.permute.xlu1 %7696 }
 0x6ec   : > { %v7923_v61 = vld [vmem:[#allocation2 + $0x85] sm:$0xff] }
 0x6ed   : > { %v8206_v46 = vld [vmem:[#allocation2 + $0x86] sm:$0xff]  ;;  %7880 = vst [vmem:[#allocation2 + $0x90] sm:$0xff] %v7838_v31  ;;  %v7460_v59 = vmul.f32 %v15620_v52, %v7333_v3  ;;  %v7957_v8 = vpack.c.bf16 %v7923_v61, %v7922_v54  ;;  %v17257_v31 = vld [vmem:[#allocation33_spill] sm:$0xff] }
 0x6ee   : > { %v8240_v7 = vpack.c.bf16 %v8206_v46, %v8205_v57 }
 0x6ef   : > { %v7503_v51 = vadd.f32 %v15626_v43, %v7460_v59  ;;  %8078 = vmatmul.bf16.gmra.mxu2 %v7957_v8 }
 0x6f0   : > { %8362 = vmatmul.bf16.gmra.mxu3 %v8240_v7  ;;  %v6885_v0 = vpop.f32.mrf.mxu0 }
 0x6f1   : > { %v7545_v36 = vmax.f32 %v7503_v51, 0.0  ;;  %v15800_v55 = vadd.f32 %v6885_v0, %v6615_v15  ;;  %v17259_v51 = vld [vmem:[#allocation6_spill] sm:$0xff] }
 0x6f2   : > { %v7211_v20 = vpop.f32.mrf.mxu1 }
 0x6f3   : > { %v7839_v49 = vmul.f32 %v7692_v53, %v7545_v36  ;;  %v7334_v23 = vadd.f32 %v7211_v20, %v15604_v62  ;;  %v17258_v62 = vld [vmem:[#allocation35_spill] sm:$0xff] }
 0x6f4   : > { %v6249_v3 = vadd.f32 %v17258_v62, %v17257_v31  ;;  %v7924_v57 = vld [vmem:[#allocation2 + $0x8d] sm:$0xff]  ;;  %v17260_v31 = vld [vmem:[#allocation22_spill] sm:$0xff] }
 0x6f5   : > { %7881 = vst [vmem:[#allocation2 + $0x98] sm:$0xff] %v7839_v49  ;;  %v7461_v35 = vmul.f32 %v15620_v52, %v7334_v23  ;;  %7250 = vmatmul.bf16.gmra.mxu1 %v7092_v34  ;;  %v8207_v59 = vld [vmem:[#allocation2 + $0x8e] sm:$0xff]  ;;  %v7068_v23 = vld [vmem:[#allocation2 + $0x143] sm:$0xff] }
 0x6f6   : > { %v6617_v0 = vadd.f32 %v17259_v51, %v6249_v3  ;;  %v7069_v53 = vld [vmem:[#allocation2 + $0x14b] sm:$0xff] }
 0x6f7   : > { %v7504_v56 = vadd.f32 %v15626_v43, %v7461_v35  ;;  %v7093_v1 = vpack.c.bf16 %v7069_v53, %v7068_v23 }
 0x6f8   : > { %v6888_v10 = vpop.f32.mrf.mxu0 }
 0x6f9   : > { %v7546_v21 = vmax.f32 %v7504_v56, 0.0  ;;  %v15806_v6 = vadd.f32 %v6888_v10, %v17256_v24  ;;  %v8570_v10 = vld [vmem:[#allocation2 + $0x67] sm:$0xff]  ;;  %v8569_v24 = vld [vmem:[#allocation2 + $0x5f] sm:$0xff] }
 0x6fa   : > { %v7213_v38 = vpop.f32.mrf.mxu1  ;;  %v15825_v3 = vpack.c.bf16 %v8570_v10, %v8569_v24  ;;  %v7070_v24 = vld [vmem:[#allocation2 + $0x153] sm:$0xff] }
 0x6fb   : > { %v7840_v54 = vmul.f32 %v7697_v60, %v7546_v21  ;;  %v7335_v61 = vadd.f32 %v7213_v38, %v15615_v14  ;;  %8715 = vmatmul.bf16.gmra.mxu0 %v15808_v22  ;;  %v7707_v60 = vpop.permute.xlu0 %7706 }
 0x6fc   : > { %v7925_v46 = vld [vmem:[#allocation2 + $0x95] sm:$0xff] }
 0x6fd   : > { %v8208_v8 = vld [vmem:[#allocation2 + $0x96] sm:$0xff]  ;;  %7882 = vst [vmem:[#allocation2 + $0xa0] sm:$0xff] %v7840_v54  ;;  %v7462_v7 = vmul.f32 %v15620_v52, %v7335_v61  ;;  %v7958_v39 = vpack.c.bf16 %v7925_v46, %v7924_v57  ;;  %v15827_v54 = vpop.f32.mrf.mxu2  ;;  %v17261_v61 = vld [vmem:[#allocation7_spill] sm:$0xff] }
 0x6fe   : > { %v8241_v15 = vpack.c.bf16 %v8208_v8, %v8207_v59  ;;  %v17262_v57 = vld [vmem:[#allocation9_spill] sm:$0xff]  ;;  %v15831_v8 = vpop.f32.mrf.mxu3 }
 0x6ff   : > { %v7505_v58 = vadd.f32 %v15626_v43, %v7462_v7  ;;  %8083 = vmatmul.bf16.gmra.mxu2 %v7958_v39  ;;  %v6251_v46 = vadd.f32 %v17262_v57, %v17261_v61 }
 0x700   : > { %8367 = vmatmul.bf16.gmra.mxu3 %v8241_v15  ;;  %v6890_v36 = vpop.f32.mrf.mxu0 }
 0x701   : > { %v7547_v14 = vmax.f32 %v7505_v58, 0.0  ;;  %v15817_v20 = vadd.f32 %v6890_v36, %v6617_v0 }
 0x702   : > { %v7216_v49 = vpop.f32.mrf.mxu1 }
 0x703   : > { %v7841_v34 = vmul.f32 %v7702_v40, %v7547_v14  ;;  %v7336_v35 = vadd.f32 %v7216_v49, %v15631_v63  ;;  %v13470_v14 = vld [vmem:[%s17096_s3 + $0x118] sm:$0xff] }
 0x704   : > { %v7926_v39 = vld [vmem:[#allocation2 + $0x9d] sm:$0xff]  ;;  %9427 = vmatpush.bf16.msrb.mxu2 %v13470_v14  ;;  %v6253_v14 = vadd.f32 %v15586_v5, %v15584_v9 }
 0x705   : > { %7883 = vst [vmem:[#allocation2 + $0xa8] sm:$0xff] %v7841_v34  ;;  %v7463_v56 = vmul.f32 %v15620_v52, %v7336_v35  ;;  %7255 = vmatmul.bf16.gmra.mxu1 %v7093_v1  ;;  %v8209_v51 = vld [vmem:[#allocation2 + $0x9e] sm:$0xff]  ;;  %v7712_v1 = vpop.permute.xlu1 %7711 }
 0x706   : > { %v13478_v40 = vld [vmem:[%s17096_s3 + $0x158] sm:$0xff] }
 0x707   : > { %v7506_v41 = vadd.f32 %v15626_v43, %v7463_v56  ;;  %v7071_v35 = vld [vmem:[#allocation2 + $0x15b] sm:$0xff]  ;;  %9795 = vmatpush.bf16.msrb.mxu3 %v13478_v40 }
 0x708   : > { %v6893_v21 = vpop.f32.mrf.mxu0 }
 0x709   : > { %v7548_v38 = vmax.f32 %v7506_v41, 0.0  ;;  %v15823_v62 = vadd.f32 %v6893_v21, %v17260_v31 }
 0x70a   : > { %v7218_v63 = vpop.f32.mrf.mxu1 }
 0x70b   : > { %v7842_v59 = vmul.f32 %v7707_v60, %v7548_v38  ;;  %v7337_v7 = vadd.f32 %v7218_v63, %v15639_v17  ;;  %8720 = vmatmul.bf16.gmra.mxu0 %v15825_v3  ;;  %v17263_v17 = vld [vmem:[#allocation8_spill] sm:$0xff]  ;;  %v7094_v63 = vpack.c.bf16 %v7071_v35, %v7070_v24  ;;  %v13460_v24 = vld [vmem:[%s17096_s3 + $0xc8] sm:$0xff] }
 0x70c   : > { %v7927_v15 = vld [vmem:[#allocation2 + $0xa5] sm:$0xff]  ;;  %v6619_v49 = vadd.f32 %v17263_v17, %v6251_v46  ;;  %v13462_v46 = vld [vmem:[%s17096_s3 + $0xd8] sm:$0xff] }
 0x70d   : > { %v8210_v0 = vld [vmem:[#allocation2 + $0xa6] sm:$0xff]  ;;  %7884 = vst [vmem:[#allocation2 + $0xb0] sm:$0xff] %v7842_v59  ;;  %v7464_v58 = vmul.f32 %v15620_v52, %v7337_v7  ;;  %v7959_v36 = vpack.c.bf16 %v7927_v15, %v7926_v39  ;;  %v8572_v59 = vld [vmem:[#allocation2 + $0x77] sm:$0xff]  ;;  %9059 = vmatpush.bf16.msrb.mxu1 %v13462_v46  ;;  %v8571_v15 = vld [vmem:[#allocation2 + $0x6f] sm:$0xff] }
 0x70e   : > { %v8242_v53 = vpack.c.bf16 %v8210_v0, %v8209_v51  ;;  %v7717_v51 = vpop.permute.xlu2 %7716 }
 0x70f   : > { %v7507_v23 = vadd.f32 %v15626_v43, %v7464_v58  ;;  %8088 = vmatmul.bf16.gmra.mxu2 %v7959_v36  ;;  %v15857_v58 = vpack.c.bf16 %v8572_v59, %v8571_v15 }
 0x710   : > { %8372 = vmatmul.bf16.gmra.mxu3 %v8242_v53  ;;  %v6895_v34 = vpop.f32.mrf.mxu0 }
 0x711   : > { %v7549_v56 = vmax.f32 %v7507_v23, 0.0  ;;  %v15844_v10 = vadd.f32 %v6895_v34, %v6619_v49  ;;  %v13461_v34 = vld [vmem:[%s17096_s3 + $0xd0] sm:$0xff] }
 0x712   : > { %v7221_v41 = vpop.f32.mrf.mxu1  ;;  %v8049_v21 = vpop.f32.mrf.mxu2  ;;  %9060 = vmatpush.bf16.msrb.mxu1 %v13461_v34 }
 0x713   : > { %v7843_v60 = vmul.f32 %v7712_v1, %v7549_v56  ;;  %v7338_v38 = vadd.f32 %v7221_v41, %v15651_v50  ;;  %v8333_v31 = vpop.f32.mrf.mxu3 }
 0x714   : > { %v15847_v61 = vadd.f32 %v8333_v31, %v8049_v21  ;;  %v7928_v23 = vld [vmem:[#allocation2 + $0xad] sm:$0xff] }
 0x715   : > { %7885 = vst [vmem:[#allocation2 + $0xb8] sm:$0xff] %v7843_v60  ;;  %v7465_v57 = vmul.f32 %v15620_v52, %v7338_v38  ;;  %7260 = vmatmul.bf16.gmra.mxu1 %v7094_v63  ;;  %v8211_v1 = vld [vmem:[#allocation2 + $0xae] sm:$0xff]  ;;  %v7072_v38 = vld [vmem:[#allocation2 + $0x163] sm:$0xff]  ;;  %v7722_v63 = vpop.permute.xlu0 %7721 }
 0x716   : > { %v7073_v31 = vld [vmem:[#allocation2 + $0x16b] sm:$0xff]  ;;  %9061 = vmatpush.bf16.msrb.mxu1 %v13460_v24 }
 0x717   : > { %v7508_v7 = vadd.f32 %v15626_v43, %v7465_v57 }
 0x718   : > { %v6898_v39 = vpop.f32.mrf.mxu0 }
 0x719   : > { %v7550_v50 = vmax.f32 %v7508_v7, 0.0  ;;  %v15855_v0 = vadd.f32 %v6898_v39, %v15581_v13 }
 0x71a   : > { %v7223_v36 = vpop.f32.mrf.mxu1  ;;  %v8051_v53 = vpop.f32.mrf.mxu2 }
 0x71b   : > { %v7844_v40 = vmul.f32 %v7717_v51, %v7550_v50  ;;  %v7339_v17 = vadd.f32 %v7223_v36, %v15668_v28  ;;  %v8335_v49 = vpop.f32.mrf.mxu3  ;;  %8725 = vmatmul.bf16.gmra.mxu0 %v15857_v58  ;;  %v6621_v28 = vadd.f32 %v15588_v48, %v6253_v14  ;;  %v7095_v51 = vpack.c.bf16 %v7073_v31, %v7072_v38  ;;  %v13459_v50 = vld [vmem:[%s17096_s3 + $0xc0] sm:$0xff] }
 0x71c   : > { %v15866_v13 = vadd.f32 %v8335_v49, %v8051_v53  ;;  %v7929_v35 = vld [vmem:[#allocation2 + $0xb5] sm:$0xff]  ;;  %v8574_v14 = vld [vmem:[#allocation2 + $0x87] sm:$0xff]  ;;  %9062 = vmatpush.bf16.msrb.mxu1 %v13459_v50  ;;  %v8573_v49 = vld [vmem:[#allocation2 + $0x7f] sm:$0xff] }
 0x71d   : > { %v8212_v56 = vld [vmem:[#allocation2 + $0xb6] sm:$0xff]  ;;  %7886 = vst [vmem:[#allocation2 + $0xc0] sm:$0xff] %v7844_v40  ;;  %v7466_v41 = vmul.f32 %v15620_v52, %v7339_v17  ;;  %v7960_v9 = vpack.c.bf16 %v7929_v35, %v7928_v23  ;;  %v7727_v23 = vpop.permute.xlu1 %7726  ;;  %v15887_v35 = vpack.c.bf16 %v8574_v14, %v8573_v49 }
 0x71e   : > { %v8243_v5 = vpack.c.bf16 %v8212_v56, %v8211_v1 }
 0x71f   : > { %v7509_v21 = vadd.f32 %v15626_v43, %v7466_v41  ;;  %8093 = vmatmul.bf16.gmra.mxu2 %v7960_v9  ;;  %v6255_v41 = vadd.f32 %v15765_v18, %v15607_v47 }
 0x720   : > { %8377 = vmatmul.bf16.gmra.mxu3 %v8243_v5  ;;  %v6900_v60 = vpop.f32.mrf.mxu0 }
 0x721   : > { %v7551_v57 = vmax.f32 %v7509_v21, 0.0  ;;  %v15874_v46 = vadd.f32 %v6900_v60, %v6621_v28  ;;  %v6623_v47 = vadd.f32 %v15767_v4, %v6255_v41  ;;  %v8575_v41 = vld [vmem:[#allocation2 + $0x8f] sm:$0xff] }
 0x722   : > { %v7226_v59 = vpop.f32.mrf.mxu1  ;;  %v8054_v7 = vpop.f32.mrf.mxu2 }
 0x723   : > { %v7845_v39 = vmul.f32 %v7722_v63, %v7551_v57  ;;  %v7340_v48 = vadd.f32 %v7226_v59, %v15686_v19  ;;  %v8338_v15 = vpop.f32.mrf.mxu3  ;;  %v7074_v59 = vld [vmem:[#allocation2 + $0x173] sm:$0xff] }
 0x724   : > { %v15880_v36 = vadd.f32 %v8338_v15, %v8054_v7  ;;  %v7930_v21 = vld [vmem:[#allocation2 + $0xbd] sm:$0xff] }
 0x725   : > { %7887 = vst [vmem:[#allocation2 + $0xc8] sm:$0xff] %v7845_v39  ;;  %v7467_v53 = vmul.f32 %v15620_v52, %v7340_v48  ;;  %7265 = vmatmul.bf16.gmra.mxu1 %v7095_v51  ;;  %v8213_v38 = vld [vmem:[#allocation2 + $0xbe] sm:$0xff]  ;;  %v7732_v39 = vpop.permute.xlu2 %7731 }
 0x726   : > { %v7075_v7 = vld [vmem:[#allocation2 + $0x17b] sm:$0xff] }
 0x727   : > { %v7510_v40 = vadd.f32 %v15626_v43, %v7467_v53  ;;  %v7096_v51 = vpack.c.bf16 %v7075_v7, %v7074_v59 }
 0x728   : > { %v6903_v17 = vpop.f32.mrf.mxu0 }
 0x729   : > { %v7552_v19 = vmax.f32 %v7510_v40, 0.0  ;;  %v15885_v34 = vadd.f32 %v6903_v17, %v15609_v33 }
 0x72a   : > { %v7228_v1 = vpop.f32.mrf.mxu1  ;;  %v8056_v56 = vpop.f32.mrf.mxu2 }
 0x72b   : > { %v7846_v9 = vmul.f32 %v7727_v23, %v7552_v19  ;;  %v7341_v5 = vadd.f32 %v7228_v1, %v15697_v32  ;;  %v8340_v28 = vpop.f32.mrf.mxu3  ;;  %8730 = vmatmul.bf16.gmra.mxu0 %v15887_v35  ;;  %v13469_v23 = vld [vmem:[%s17096_s3 + $0x110] sm:$0xff] }
 0x72c   : > { %v15893_v24 = vadd.f32 %v8340_v28, %v8056_v56  ;;  %v7931_v60 = vld [vmem:[#allocation2 + $0xc5] sm:$0xff]  ;;  %v8576_v19 = vld [vmem:[#allocation2 + $0x97] sm:$0xff]  ;;  %9428 = vmatpush.bf16.msrb.mxu2 %v13469_v23 }
 0x72d   : > { %v8214_v33 = vld [vmem:[#allocation2 + $0xc6] sm:$0xff]  ;;  %7888 = vst [vmem:[#allocation2 + $0xd0] sm:$0xff] %v7846_v9  ;;  %v7468_v31 = vmul.f32 %v15620_v52, %v7341_v5  ;;  %v7961_v63 = vpack.c.bf16 %v7931_v60, %v7930_v21  ;;  %v7737_v9 = vpop.permute.xlu0 %7736  ;;  %v15911_v28 = vpack.c.bf16 %v8576_v19, %v8575_v41 }
 0x72e   : > { %v8244_v57 = vpack.c.bf16 %v8214_v33, %v8213_v38 }
 0x72f   : > { %v7511_v32 = vadd.f32 %v15626_v43, %v7468_v31  ;;  %8098 = vmatmul.bf16.gmra.mxu2 %v7961_v63 }
 0x730   : > { %8382 = vmatmul.bf16.gmra.mxu3 %v8244_v57  ;;  %v6905_v18 = vpop.f32.mrf.mxu0 }
 0x731   : > { %v7553_v48 = vmax.f32 %v7511_v32, 0.0  ;;  %v15898_v15 = vadd.f32 %v6905_v18, %v6623_v47 }
 0x732   : > { %v7231_v50 = vpop.f32.mrf.mxu1  ;;  %v8059_v53 = vpop.f32.mrf.mxu2 }
 0x733   : > { %v7847_v14 = vmul.f32 %v7732_v39, %v7553_v48  ;;  %v7342_v40 = vadd.f32 %v7231_v50, %v15703_v26  ;;  %v8343_v17 = vpop.f32.mrf.mxu3  ;;  %v13477_v39 = vld [vmem:[%s17096_s3 + $0x150] sm:$0xff] }
 0x734   : > { %v15901_v49 = vadd.f32 %v8343_v17, %v8059_v53  ;;  %v7932_v63 = vld [vmem:[#allocation2 + $0xcd] sm:$0xff]  ;;  %9796 = vmatpush.bf16.msrb.mxu3 %v13477_v39 }
 0x735   : > { %7889 = vst [vmem:[#allocation2 + $0xd8] sm:$0xff] %v7847_v14  ;;  %v7469_v4 = vmul.f32 %v15620_v52, %v7342_v40  ;;  %7270 = vmatmul.bf16.gmra.mxu1 %v7096_v51  ;;  %v8215_v7 = vld [vmem:[#allocation2 + $0xce] sm:$0xff]  ;;  %v7742_v51 = vpop.permute.xlu1 %7741 }
 0x737   : > { %v7512_v1 = vadd.f32 %v15626_v43, %v7469_v4 }
 0x738   : > { %v8696_v56 = vpop.f32.mrf.mxu0 }
 0x739   : > { %v7554_v5 = vmax.f32 %v7512_v1, 0.0  ;;  %v15909_v26 = vadd.f32 %v8696_v56, %v15776_v12  ;;  %v8578_v1 = vld [vmem:[#allocation2 + $0xa7] sm:$0xff] }
 0x73a   : > { %v7233_v21 = vpop.f32.mrf.mxu1  ;;  %v8061_v60 = vpop.f32.mrf.mxu2 }
 0x73b   : > { %v7848_v38 = vmul.f32 %v7737_v9, %v7554_v5  ;;  %v7343_v33 = vadd.f32 %v7233_v21, %v15711_v25  ;;  %v8345_v31 = vpop.f32.mrf.mxu3  ;;  %8735 = vmatmul.bf16.gmra.mxu0 %v15911_v28  ;;  %v8577_v9 = vld [vmem:[#allocation2 + $0x9f] sm:$0xff]  ;;  %v7747_v5 = vpop.permute.xlu2 %7746 }
 0x73c   : > { %v15915_v57 = vadd.f32 %v8345_v31, %v8061_v60  ;;  %v7933_v59 = vld [vmem:[#allocation2 + $0xd5] sm:$0xff] }
 0x73d   : > { %v8216_v47 = vld [vmem:[#allocation2 + $0xd6] sm:$0xff]  ;;  %7890 = vst [vmem:[#allocation2 + $0xe0] sm:$0xff] %v7848_v38  ;;  %v7470_v12 = vmul.f32 %v15620_v52, %v7343_v33  ;;  %v7962_v32 = vpack.c.bf16 %v7933_v59, %v7932_v63  ;;  %v15933_v38 = vpack.c.bf16 %v8578_v1, %v8577_v9 }
 0x73e   : > { %v8245_v18 = vpack.c.bf16 %v8216_v47, %v8215_v7 }
 0x73f   : > { %v7513_v25 = vadd.f32 %v15626_v43, %v7470_v12  ;;  %8103 = vmatmul.bf16.gmra.mxu2 %v7962_v32 }
 0x740   : > { %8387 = vmatmul.bf16.gmra.mxu3 %v8245_v18  ;;  %v15922_v48 = vpop.f32.mrf.mxu0 }
 0x741   : > { %v7555_v50 = vmax.f32 %v7513_v25, 0.0 }
 0x742   : > { %v7236_v53 = vpop.f32.mrf.mxu1  ;;  %v8064_v14 = vpop.f32.mrf.mxu2 }
 0x743   : > { %v7849_v40 = vmul.f32 %v7742_v51, %v7555_v50  ;;  %v7344_v17 = vadd.f32 %v7236_v53, %v15717_v2  ;;  %v8348_v4 = vpop.f32.mrf.mxu3 }
 0x744   : > { %v15925_v23 = vadd.f32 %v8348_v4, %v8064_v14  ;;  %v8217_v12 = vld [vmem:[#allocation2 + $0xde] sm:$0xff] }
 0x745   : > { %7891 = vst [vmem:[#allocation2 + $0xe8] sm:$0xff] %v7849_v40  ;;  %v7471_v19 = vmul.f32 %v15620_v52, %v7344_v17  ;;  %9063 = vmatmul.bf16.vlgmr.msrb.gmra.mxu1 %v15742_v30  ;;  %v7934_v30 = vld [vmem:[#allocation2 + $0xdd] sm:$0xff] }
 0x747   : > { %v7514_v56 = vadd.f32 %v15626_v43, %v7471_v19 }
 0x748   : > { %v8701_v41 = vpop.f32.mrf.mxu0 }
 0x749   : > { %v7556_v21 = vmax.f32 %v7514_v56, 0.0  ;;  %v15931_v60 = vadd.f32 %v8701_v41, %v15847_v61  ;;  %v8580_v41 = vld [vmem:[#allocation2 + $0xb7] sm:$0xff] }
 0x74a   : > { %v7238_v2 = vpop.f32.mrf.mxu1  ;;  %v8066_v33 = vpop.f32.mrf.mxu2 }
 0x74b   : > { %v7850_v31 = vmul.f32 %v7747_v5, %v7556_v21  ;;  %v7345_v63 = vadd.f32 %v7238_v2, %v15734_v44  ;;  %v8350_v59 = vpop.f32.mrf.mxu3  ;;  %8740 = vmatmul.bf16.gmra.mxu0 %v15933_v38  ;;  %v7752_v44 = vpop.permute.xlu0 %7751  ;;  %v8579_v21 = vld [vmem:[#allocation2 + $0xaf] sm:$0xff] }
 0x74c   : > { %v15937_v7 = vadd.f32 %v8350_v59, %v8066_v33  ;;  %v7935_v47 = vld [vmem:[#allocation2 + $0xe5] sm:$0xff] }
 0x74d   : > { %v8218_v32 = vld [vmem:[#allocation2 + $0xe6] sm:$0xff]  ;;  %7892 = vst [vmem:[#allocation2 + $0xf0] sm:$0xff] %v7850_v31  ;;  %v7472_v61 = vmul.f32 %v15620_v52, %v7345_v63  ;;  %v7963_v18 = vpack.c.bf16 %v7935_v47, %v7934_v30  ;;  %v15953_v31 = vpack.c.bf16 %v8580_v41, %v8579_v21 }
 0x74e   : > { %v8246_v39 = vpack.c.bf16 %v8218_v32, %v8217_v12  ;;  %v8582_v21 = vld [vmem:[#allocation2 + $0xc7] sm:$0xff] }
 0x74f   : > { %v7515_v25 = vadd.f32 %v15626_v43, %v7472_v61  ;;  %8108 = vmatmul.bf16.gmra.mxu2 %v7963_v18 }
 0x750   : > { %8392 = vmatmul.bf16.gmra.mxu3 %v8246_v39  ;;  %v8703_v51 = vpop.f32.mrf.mxu0 }
 0x751   : > { %v7557_v50 = vmax.f32 %v7515_v25, 0.0  ;;  %v15942_v53 = vadd.f32 %v8703_v51, %v15866_v13  ;;  %v7757_v13 = vpop.permute.xlu1 %7756 }
 0x752   : > { %v7241_v14 = vpop.f32.mrf.mxu1  ;;  %v8069_v40 = vpop.f32.mrf.mxu2 }
 0x753   : > { %v7851_v17 = vmul.f32 %v7752_v44, %v7557_v50  ;;  %v7346_v4 = vadd.f32 %v7241_v14, %v15740_v37  ;;  %v8353_v19 = vpop.f32.mrf.mxu3 }
 0x754   : > { %v15945_v1 = vadd.f32 %v8353_v19, %v8069_v40  ;;  %v8219_v61 = vld [vmem:[#allocation2 + $0xee] sm:$0xff] }
 0x755   : > { %7893 = vst [vmem:[#allocation2 + $0xf8] sm:$0xff] %v7851_v17  ;;  %v7473_v56 = vmul.f32 %v15620_v52, %v7346_v4  ;;  %9068 = vmatmul.bf16.gmra.mxu1 %v15759_v45  ;;  %v7936_v45 = vld [vmem:[#allocation2 + $0xed] sm:$0xff] }
 0x757   : > { %v7516_v9 = vadd.f32 %v15626_v43, %v7473_v56 }
 0x758   : > { %v8706_v5 = vpop.f32.mrf.mxu0 }
 0x759   : > { %v7558_v2 = vmax.f32 %v7516_v9, 0.0  ;;  %v15951_v33 = vadd.f32 %v8706_v5, %v15880_v36  ;;  %v13468_v5 = vld [vmem:[%s17096_s3 + $0x108] sm:$0xff] }
 0x75a   : > { %v7243_v37 = vpop.f32.mrf.mxu1  ;;  %v8071_v63 = vpop.f32.mrf.mxu2  ;;  %9429 = vmatpush.bf16.msrb.mxu2 %v13468_v5 }
 0x75b   : > { %v7852_v59 = vmul.f32 %v7757_v13, %v7558_v2  ;;  %v7347_v30 = vadd.f32 %v7243_v37, %v15751_v16  ;;  %v8355_v47 = vpop.f32.mrf.mxu3  ;;  %8745 = vmatmul.bf16.gmra.mxu0 %v15953_v31  ;;  %v7762_v16 = vpop.permute.xlu2 %7761  ;;  %v8581_v2 = vld [vmem:[#allocation2 + $0xbf] sm:$0xff] }
 0x75c   : > { %v15957_v12 = vadd.f32 %v8355_v47, %v8071_v63  ;;  %v7937_v32 = vld [vmem:[#allocation2 + $0xf5] sm:$0xff]  ;;  %v7767_v37 = vpop.permute.xlu0 %7766 }
 0x75d   : > { %v8220_v18 = vld [vmem:[#allocation2 + $0xf6] sm:$0xff]  ;;  %7894 = vst [vmem:[#allocation2 + $0x100] sm:$0xff] %v7852_v59  ;;  %v7474_v36 = vmul.f32 %v15620_v52, %v7347_v30  ;;  %v7964_v39 = vpack.c.bf16 %v7937_v32, %v7936_v45 }
 0x75e   : > { %v8247_v25 = vpack.c.bf16 %v8220_v18, %v8219_v61 }
 0x75f   : > { %v7517_v51 = vadd.f32 %v15626_v43, %v7474_v36  ;;  %8113 = vmatmul.bf16.gmra.mxu2 %v7964_v39 }
 0x760   : > { %8397 = vmatmul.bf16.gmra.mxu3 %v8247_v25  ;;  %v8708_v44 = vpop.f32.mrf.mxu0 }
 0x761   : > { %v7559_v50 = vmax.f32 %v7517_v51, 0.0  ;;  %v15962_v14 = vadd.f32 %v8708_v44, %v15893_v24  ;;  %v13476_v24 = vld [vmem:[%s17096_s3 + $0x148] sm:$0xff] }
 0x762   : > { %v7246_v40 = vpop.f32.mrf.mxu1  ;;  %v8074_v17 = vpop.f32.mrf.mxu2  ;;  %9797 = vmatpush.bf16.msrb.mxu3 %v13476_v24 }
 0x763   : > { %v7853_v4 = vmul.f32 %v7762_v16, %v7559_v50  ;;  %v7348_v19 = vadd.f32 %v7246_v40, %v15757_v42  ;;  %v8358_v56 = vpop.f32.mrf.mxu3 }
 0x764   : > { %v15965_v41 = vadd.f32 %v8358_v56, %v8074_v17  ;;  %v7938_v18 = vld [vmem:[#allocation2 + $0xfd] sm:$0xff] }
 0x765   : > { %7895 = vst [vmem:[#allocation2 + $0x108] sm:$0xff] %v7853_v4  ;;  %v7475_v9 = vmul.f32 %v15620_v52, %v7348_v19  ;;  %9073 = vmatmul.bf16.gmra.mxu1 %v15791_v29  ;;  %v15979_v29 = vpack.c.bf16 %v8582_v21, %v8581_v2  ;;  %v8221_v25 = vld [vmem:[#allocation2 + $0xfe] sm:$0xff] }
 0x767   : > { %v7518_v13 = vadd.f32 %v15626_v43, %v7475_v9 }
 0x768   : > { %v8711_v42 = vpop.f32.mrf.mxu0 }
 0x769   : > { %v7560_v63 = vmax.f32 %v7518_v13, 0.0  ;;  %v15977_v59 = vadd.f32 %v8711_v42, %v15901_v49  ;;  %v8584_v42 = vld [vmem:[#allocation2 + $0xd7] sm:$0xff] }
 0x76a   : > { %v7248_v30 = vpop.f32.mrf.mxu1  ;;  %v8076_v47 = vpop.f32.mrf.mxu2 }
 0x76b   : > { %v7854_v45 = vmul.f32 %v7767_v37, %v7560_v63  ;;  %v7349_v32 = vadd.f32 %v7248_v30, %v15772_v27  ;;  %v8360_v61 = vpop.f32.mrf.mxu3  ;;  %8750 = vmatmul.bf16.gmra.mxu0 %v15979_v29  ;;  %v7772_v27 = vpop.permute.xlu1 %7771  ;;  %v8583_v63 = vld [vmem:[#allocation2 + $0xcf] sm:$0xff] }
 0x76c   : > { %v15983_v36 = vadd.f32 %v8360_v61, %v8076_v47  ;;  %v7939_v39 = vld [vmem:[#allocation2 + $0x105] sm:$0xff] }
 0x76d   : > { %v8222_v51 = vld [vmem:[#allocation2 + $0x106] sm:$0xff]  ;;  %7896 = vst [vmem:[#allocation2 + $0x110] sm:$0xff] %v7854_v45  ;;  %v7476_v49 = vmul.f32 %v15620_v52, %v7349_v32  ;;  %v7965_v44 = vpack.c.bf16 %v7939_v39, %v7938_v18  ;;  %v15999_v45 = vpack.c.bf16 %v8584_v42, %v8583_v63 }
 0x76e   : > { %v8248_v16 = vpack.c.bf16 %v8222_v51, %v8221_v25 }
 0x76f   : > { %v7519_v50 = vadd.f32 %v15626_v43, %v7476_v49  ;;  %8118 = vmatmul.bf16.gmra.mxu2 %v7965_v44 }
 0x770   : > { %8402 = vmatmul.bf16.gmra.mxu3 %v8248_v16  ;;  %v8713_v40 = vpop.f32.mrf.mxu0 }
 0x771   : > { %v7561_v17 = vmax.f32 %v7519_v50, 0.0  ;;  %v15988_v4 = vadd.f32 %v8713_v40, %v15915_v57  ;;  %v7777_v57 = vpop.permute.xlu2 %7776 }
 0x772   : > { %v7251_v19 = vpop.f32.mrf.mxu1  ;;  %v8079_v56 = vpop.f32.mrf.mxu2 }
 0x773   : > { %v7855_v9 = vmul.f32 %v7772_v27, %v7561_v17  ;;  %v7350_v5 = vadd.f32 %v7251_v19, %v15789_v11  ;;  %v8363_v24 = vpop.f32.mrf.mxu3 }
 0x774   : > { %v15991_v21 = vadd.f32 %v8363_v24, %v8079_v56  ;;  %v8223_v49 = vld [vmem:[#allocation2 + $0x10e] sm:$0xff] }
 0x775   : > { %7897 = vst [vmem:[#allocation2 + $0x118] sm:$0xff] %v7855_v9  ;;  %v7477_v13 = vmul.f32 %v15620_v52, %v7350_v5  ;;  %9078 = vmatmul.bf16.gmra.mxu1 %v15808_v22  ;;  %v7940_v22 = vld [vmem:[#allocation2 + $0x10d] sm:$0xff] }
 0x777   : > { %v7520_v2 = vadd.f32 %v15626_v43, %v7477_v13 }
 0x778   : > { %v8716_v37 = vpop.f32.mrf.mxu0 }
 0x779   : > { %v7562_v30 = vmax.f32 %v7520_v2, 0.0  ;;  %v15997_v47 = vadd.f32 %v8716_v37, %v15925_v23  ;;  %v8586_v37 = vld [vmem:[#allocation2 + $0xe7] sm:$0xff] }
 0x77a   : > { %v7253_v11 = vpop.f32.mrf.mxu1  ;;  %v8081_v32 = vpop.f32.mrf.mxu2 }
 0x77b   : > { %v7856_v61 = vmul.f32 %v7777_v57, %v7562_v30  ;;  %v7351_v18 = vadd.f32 %v7253_v11, %v15800_v55  ;;  %v8365_v39 = vpop.f32.mrf.mxu3  ;;  %8755 = vmatmul.bf16.gmra.mxu0 %v15999_v45  ;;  %v7782_v55 = vpop.permute.xlu0 %7781  ;;  %v8585_v30 = vld [vmem:[#allocation2 + $0xdf] sm:$0xff] }
 0x77c   : > { %v16003_v25 = vadd.f32 %v8365_v39, %v8081_v32  ;;  %v7941_v51 = vld [vmem:[#allocation2 + $0x115] sm:$0xff] }
 0x77d   : > { %v8224_v44 = vld [vmem:[#allocation2 + $0x116] sm:$0xff]  ;;  %7898 = vst [vmem:[#allocation2 + $0x120] sm:$0xff] %v7856_v61  ;;  %v7478_v23 = vmul.f32 %v15620_v52, %v7351_v18  ;;  %v7966_v16 = vpack.c.bf16 %v7941_v51, %v7940_v22  ;;  %v16019_v61 = vpack.c.bf16 %v8586_v37, %v8585_v30 }
 0x77e   : > { %v8249_v50 = vpack.c.bf16 %v8224_v44, %v8223_v49 }
 0x77f   : > { %v7521_v40 = vadd.f32 %v15626_v43, %v7478_v23  ;;  %8123 = vmatmul.bf16.gmra.mxu2 %v7966_v16 }
 0x780   : > { %8407 = vmatmul.bf16.gmra.mxu3 %v8249_v50  ;;  %v8718_v27 = vpop.f32.mrf.mxu0 }
 0x781   : > { %v7563_v17 = vmax.f32 %v7521_v40, 0.0  ;;  %v16008_v19 = vadd.f32 %v8718_v27, %v15937_v7  ;;  %v7787_v7 = vpop.permute.xlu1 %7786  ;;  %v13467_v27 = vld [vmem:[%s17096_s3 + $0x100] sm:$0xff] }
 0x782   : > { %v7256_v56 = vpop.f32.mrf.mxu1  ;;  %v8084_v9 = vpop.f32.mrf.mxu2  ;;  %9430 = vmatpush.bf16.msrb.mxu2 %v13467_v27 }
 0x783   : > { %v7857_v5 = vmul.f32 %v7782_v55, %v7563_v17  ;;  %v7352_v24 = vadd.f32 %v7256_v56, %v15806_v6  ;;  %v8368_v13 = vpop.f32.mrf.mxu3  ;;  %v7792_v56 = vpop.permute.xlu2 %7791 }
 0x784   : > { %v16011_v42 = vadd.f32 %v8368_v13, %v8084_v9  ;;  %v8225_v23 = vld [vmem:[#allocation2 + $0x11e] sm:$0xff] }
 0x785   : > { %7899 = vst [vmem:[#allocation2 + $0x128] sm:$0xff] %v7857_v5  ;;  %v7479_v2 = vmul.f32 %v15620_v52, %v7352_v24  ;;  %9083 = vmatmul.bf16.gmra.mxu1 %v15825_v3  ;;  %v7942_v3 = vld [vmem:[#allocation2 + $0x11d] sm:$0xff] }
 0x787   : > { %v7522_v63 = vadd.f32 %v15626_v43, %v7479_v2 }
 0x788   : > { %v8721_v57 = vpop.f32.mrf.mxu0 }
 0x789   : > { %v7564_v11 = vmax.f32 %v7522_v63, 0.0  ;;  %v16017_v32 = vadd.f32 %v8721_v57, %v15945_v1 }
 0x78a   : > { %v7258_v6 = vpop.f32.mrf.mxu1  ;;  %v8086_v18 = vpop.f32.mrf.mxu2 }
 0x78b   : > { %v7858_v39 = vmul.f32 %v7787_v7, %v7564_v11  ;;  %v7353_v22 = vadd.f32 %v7258_v6, %v15817_v20  ;;  %v8370_v51 = vpop.f32.mrf.mxu3  ;;  %8760 = vmatmul.bf16.gmra.mxu0 %v16019_v61  ;;  %v13475_v20 = vld [vmem:[%s17096_s3 + $0x140] sm:$0xff]  ;;  %v8588_v7 = vld [vmem:[#allocation2 + $0xf7] sm:$0xff] }
 0x78c   : > { %v16023_v49 = vadd.f32 %v8370_v51, %v8086_v18  ;;  %v7943_v44 = vld [vmem:[#allocation2 + $0x125] sm:$0xff]  ;;  %9798 = vmatpush.bf16.msrb.mxu3 %v13475_v20  ;;  %v8587_v18 = vld [vmem:[#allocation2 + $0xef] sm:$0xff] }
 0x78d   : > { %v8226_v16 = vld [vmem:[#allocation2 + $0x126] sm:$0xff]  ;;  %7900 = vst [vmem:[#allocation2 + $0x130] sm:$0xff] %v7858_v39  ;;  %v7480_v1 = vmul.f32 %v15620_v52, %v7353_v22  ;;  %v7967_v50 = vpack.c.bf16 %v7943_v44, %v7942_v3  ;;  %v16045_v51 = vpack.c.bf16 %v8588_v7, %v8587_v18 }
 0x78e   : > { %v8250_v40 = vpack.c.bf16 %v8226_v16, %v8225_v23 }
 0x78f   : > { %v7523_v55 = vadd.f32 %v15626_v43, %v7480_v1  ;;  %8128 = vmatmul.bf16.gmra.mxu2 %v7967_v50 }
 0x790   : > { %8412 = vmatmul.bf16.gmra.mxu3 %v8250_v40  ;;  %v8723_v17 = vpop.f32.mrf.mxu0 }
 0x791   : > { %v7565_v9 = vmax.f32 %v7523_v55, 0.0  ;;  %v16034_v5 = vadd.f32 %v8723_v17, %v15957_v12  ;;  %v7797_v12 = vpop.permute.xlu0 %7796 }
 0x792   : > { %v7261_v24 = vpop.f32.mrf.mxu1  ;;  %v8089_v13 = vpop.f32.mrf.mxu2 }
 0x793   : > { %v7859_v2 = vmul.f32 %v7792_v56, %v7565_v9  ;;  %v7354_v37 = vadd.f32 %v7261_v24, %v15823_v62  ;;  %v8373_v63 = vpop.f32.mrf.mxu3 }
 0x794   : > { %v16037_v57 = vadd.f32 %v8373_v63, %v8089_v13  ;;  %v8227_v40 = vld [vmem:[#allocation2 + $0x12e] sm:$0xff] }
 0x795   : > { %7901 = vst [vmem:[#allocation2 + $0x138] sm:$0xff] %v7859_v2  ;;  %v7481_v30 = vmul.f32 %v15620_v52, %v7354_v37  ;;  %9088 = vmatmul.bf16.gmra.mxu1 %v15857_v58  ;;  %v7944_v58 = vld [vmem:[#allocation2 + $0x12d] sm:$0xff] }
 0x797   : > { %v7524_v11 = vadd.f32 %v15626_v43, %v7481_v30 }
 0x798   : > { %v8726_v6 = vpop.f32.mrf.mxu0 }
 0x799   : > { %v7566_v39 = vmax.f32 %v7524_v11, 0.0  ;;  %v16043_v22 = vadd.f32 %v8726_v6, %v15965_v41  ;;  %v8590_v6 = vld [vmem:[#allocation2 + $0x107] sm:$0xff] }
 0x79a   : > { %v7263_v62 = vpop.f32.mrf.mxu1  ;;  %v8091_v3 = vpop.f32.mrf.mxu2 }
 0x79b   : > { %v7860_v44 = vmul.f32 %v7797_v12, %v7566_v39  ;;  %v7355_v23 = vadd.f32 %v7263_v62, %v15844_v10  ;;  %v8375_v16 = vpop.f32.mrf.mxu3  ;;  %8765 = vmatmul.bf16.gmra.mxu0 %v16045_v51  ;;  %v7802_v10 = vpop.permute.xlu1 %7801  ;;  %v8589_v39 = vld [vmem:[#allocation2 + $0xff] sm:$0xff] }
 0x79c   : > { %v16049_v1 = vadd.f32 %v8375_v16, %v8091_v3  ;;  %v7945_v50 = vld [vmem:[#allocation2 + $0x135] sm:$0xff] }
 0x79d   : > { %v8228_v27 = vld [vmem:[#allocation2 + $0x136] sm:$0xff]  ;;  %7902 = vst [vmem:[#allocation2 + $0x140] sm:$0xff] %v7860_v44  ;;  %v7482_v41 = vmul.f32 %v15620_v52, %v7355_v23  ;;  %v7968_v20 = vpack.c.bf16 %v7945_v50, %v7944_v58  ;;  %v16065_v44 = vpack.c.bf16 %v8590_v6, %v8589_v39 }
 0x79e   : > { %v8251_v55 = vpack.c.bf16 %v8228_v27, %v8227_v40 }
 0x79f   : > { %v7525_v17 = vadd.f32 %v15626_v43, %v7482_v41  ;;  %8133 = vmatmul.bf16.gmra.mxu2 %v7968_v20 }
 0x7a0   : > { %8417 = vmatmul.bf16.gmra.mxu3 %v8251_v55  ;;  %v8728_v56 = vpop.f32.mrf.mxu0 }
 0x7a1   : > { %v7567_v9 = vmax.f32 %v7525_v17, 0.0  ;;  %v16054_v24 = vadd.f32 %v8728_v56, %v15983_v36  ;;  %v7807_v36 = vpop.permute.xlu2 %7806 }
 0x7a2   : > { %v7266_v13 = vpop.f32.mrf.mxu1  ;;  %v8094_v2 = vpop.f32.mrf.mxu2 }
 0x7a3   : > { %v7861_v37 = vmul.f32 %v7802_v10, %v7567_v9  ;;  %v7356_v63 = vadd.f32 %v7266_v13, %v15855_v0  ;;  %v8378_v30 = vpop.f32.mrf.mxu3  ;;  %v7812_v9 = vpop.permute.xlu0 %7811 }
 0x7a4   : > { %v16057_v7 = vadd.f32 %v8378_v30, %v8094_v2  ;;  %v8229_v41 = vld [vmem:[#allocation2 + $0x13e] sm:$0xff] }
 0x7a5   : > { %7903 = vst [vmem:[#allocation2 + $0x148] sm:$0xff] %v7861_v37  ;;  %v7483_v11 = vmul.f32 %v15620_v52, %v7356_v63  ;;  %9093 = vmatmul.bf16.gmra.mxu1 %v15887_v35  ;;  %v7946_v35 = vld [vmem:[#allocation2 + $0x13d] sm:$0xff] }
 0x7a6   : > { %v13490_v37 = vld [vmem:[%s17096_s3 + $0x1b8] sm:$0xff] }
 0x7a7   : > { %v7526_v18 = vadd.f32 %v15626_v43, %v7483_v11  ;;  %v13535_v63 = vld [vmem:[%s17097_s4 + $0x38] sm:$0xff]  ;;  %10159 = vmatpush.bf16.msra.mxu0 %v13490_v37 }
 0x7a8   : > { %v8731_v12 = vpop.f32.mrf.mxu0  ;;  %11367 = vmatpush.bf16.msra.mxu3 %v13535_v63 }
 0x7a9   : > { %v7568_v62 = vmax.f32 %v7526_v18, 0.0  ;;  %v16063_v3 = vadd.f32 %v8731_v12, %v15991_v21 }
 0x7aa   : > { %v7268_v0 = vpop.f32.mrf.mxu1  ;;  %v8096_v23 = vpop.f32.mrf.mxu2 }
 0x7ab   : > { %v7862_v16 = vmul.f32 %v7807_v36, %v7568_v62  ;;  %v7357_v58 = vadd.f32 %v7268_v0, %v15874_v46  ;;  %v8380_v50 = vpop.f32.mrf.mxu3  ;;  %8770 = vmatmul.bf16.gmra.mxu0 %v16065_v44  ;;  %v13506_v46 = vld [vmem:[%s17096_s3 + $0x238] sm:$0xff] }
 0x7ac   : > { %v16069_v40 = vadd.f32 %v8380_v50, %v8096_v23  ;;  %v7947_v27 = vld [vmem:[#allocation2 + $0x145] sm:$0xff]  ;;  %10895 = vmatpush.bf16.msra.mxu2 %v13506_v46  ;;  %v8592_v62 = vld [vmem:[#allocation2 + $0x117] sm:$0xff] }
 0x7ad   : > { %v8230_v20 = vld [vmem:[#allocation2 + $0x146] sm:$0xff]  ;;  %7904 = vst [vmem:[#allocation2 + $0x150] sm:$0xff] %v7862_v16  ;;  %v7484_v21 = vmul.f32 %v15620_v52, %v7357_v58  ;;  %v7969_v55 = vpack.c.bf16 %v7947_v27, %v7946_v35  ;;  %v7817_v16 = vpop.permute.xlu1 %7816 }
 0x7ae   : > { %v8252_v17 = vpack.c.bf16 %v8230_v20, %v8229_v41 }
 0x7af   : > { %v7527_v56 = vadd.f32 %v15626_v43, %v7484_v21  ;;  %8138 = vmatmul.bf16.gmra.mxu2 %v7969_v55 }
 0x7b0   : > { %8422 = vmatmul.bf16.gmra.mxu3 %v8252_v17  ;;  %v8733_v10 = vpop.f32.mrf.mxu0 }
 0x7b1   : > { %v7569_v13 = vmax.f32 %v7527_v56, 0.0  ;;  %v16077_v2 = vadd.f32 %v8733_v10, %v16003_v25  ;;  %v13498_v25 = vld [vmem:[%s17096_s3 + $0x1f8] sm:$0xff] }
 0x7b2   : > { %v7271_v30 = vpop.f32.mrf.mxu1  ;;  %v8099_v11 = vpop.f32.mrf.mxu2  ;;  %10527 = vmatpush.bf16.msra.mxu1 %v13498_v25 }
 0x7b3   : > { %v7863_v6 = vmul.f32 %v7812_v9, %v7569_v13  ;;  %v7358_v18 = vadd.f32 %v7271_v30, %v15885_v34  ;;  %v8383_v12 = vpop.f32.mrf.mxu3  ;;  %v8591_v34 = vld [vmem:[#allocation2 + $0x10f] sm:$0xff] }
 0x7b4   : > { %v16086_v39 = vadd.f32 %v8383_v12, %v8099_v11  ;;  %v16097_v35 = vpack.c.bf16 %v8592_v62, %v8591_v34  ;;  %v8231_v46 = vld [vmem:[#allocation2 + $0x14e] sm:$0xff]  ;;  %v8476_v62 = vadd.f32 %v15831_v8, %v15827_v54  ;;  %v9295_v54 = vld [vmem:[#allocation2 + $0x20] sm:$0xff] }
 0x7b5   : > { %7905 = vst [vmem:[#allocation2 + $0x158] sm:$0xff] %v7863_v6  ;;  %v7485_v36 = vmul.f32 %v15620_v52, %v7358_v18  ;;  %9098 = vmatmul.bf16.gmra.mxu1 %v15911_v28  ;;  %v7948_v28 = vld [vmem:[#allocation2 + $0x14d] sm:$0xff]  ;;  %v9663_v8 = vld [vmem:[#allocation2 + $0x21] sm:$0xff] }
 0x7b7   : > { %v7528_v0 = vadd.f32 %v15626_v43, %v7485_v36 }
 0x7b8   : > { %v8736_v23 = vpop.f32.mrf.mxu0 }
 0x7b9   : > { %v7570_v58 = vmax.f32 %v7528_v0, 0.0  ;;  %v16095_v50 = vadd.f32 %v8736_v23, %v16011_v42  ;;  %v8593_v23 = vld [vmem:[#allocation2 + $0x11f] sm:$0xff] }
 0x7ba   : > { %v7273_v27 = vpop.f32.mrf.mxu1  ;;  %v8101_v41 = vpop.f32.mrf.mxu2 }
 0x7bb   : > { %v7864_v20 = vmul.f32 %v7817_v16, %v7570_v58  ;;  %v7359_v21 = vadd.f32 %v7273_v27, %v15898_v15  ;;  %v8385_v55 = vpop.f32.mrf.mxu3  ;;  %8775 = vmatmul.bf16.gmra.mxu0 %v16097_v35  ;;  %v7822_v15 = vpop.permute.xlu2 %7821  ;;  %v9296_v27 = vld [vmem:[#allocation2 + $0x28] sm:$0xff] }
 0x7bc   : > { %v16101_v17 = vadd.f32 %v8385_v55, %v8101_v41  ;;  %v7949_v56 = vld [vmem:[#allocation2 + $0x155] sm:$0xff]  ;;  %v9664_v41 = vld [vmem:[#allocation2 + $0x29] sm:$0xff]  ;;  %v9337_v55 = vpack.c.bf16 %v9296_v27, %v9295_v54 }
 0x7bd   : > { %v8232_v10 = vld [vmem:[#allocation2 + $0x156] sm:$0xff]  ;;  %7906 = vst [vmem:[#allocation2 + $0x160] sm:$0xff] %v7864_v20  ;;  %v7486_v42 = vmul.f32 %v15620_v52, %v7359_v21  ;;  %v7970_v9 = vpack.c.bf16 %v7949_v56, %v7948_v28 }
 0x7be   : > { %v8253_v13 = vpack.c.bf16 %v8232_v10, %v8231_v46  ;;  %v13489_v56 = vld [vmem:[%s17096_s3 + $0x1b0] sm:$0xff] }
 0x7bf   : > { %v7529_v37 = vadd.f32 %v15626_v43, %v7486_v42  ;;  %8143 = vmatmul.bf16.gmra.mxu2 %v7970_v9  ;;  %v8594_v43 = vld [vmem:[#allocation2 + $0x127] sm:$0xff]  ;;  %10160 = vmatpush.bf16.msra.mxu0 %v13489_v56 }
 0x7c0   : > { %8427 = vmatmul.bf16.gmra.mxu3 %v8253_v13  ;;  %v8738_v63 = vpop.f32.mrf.mxu0  ;;  %v16120_v16 = vpack.c.bf16 %v8594_v43, %v8593_v23  ;;  %v9666_v43 = vld [vmem:[#allocation2 + $0x39] sm:$0xff]  ;;  %v9665_v23 = vld [vmem:[#allocation2 + $0x31] sm:$0xff] }
 0x7c1   : > { %v7571_v30 = vmax.f32 %v7529_v37, 0.0  ;;  %v16106_v11 = vadd.f32 %v8738_v63, %v16023_v49  ;;  %v8844_v49 = vadd.f32 %v15922_v48, %v8476_v62  ;;  %v9705_v48 = vpack.c.bf16 %v9664_v41, %v9663_v8  ;;  %v13488_v37 = vld [vmem:[%s17096_s3 + $0x1a8] sm:$0xff]  ;;  %v13485_v8 = vld [vmem:[%s17096_s3 + $0x190] sm:$0xff] }
 0x7c2   : > { %v8104_v6 = vpop.f32.mrf.mxu2  ;;  %v9064_v18 = vpop.f32.mrf.mxu1  ;;  %v16168_v41 = vpack.c.bf16 %v9666_v43, %v9665_v23  ;;  %v9667_v43 = vld [vmem:[#allocation2 + $0x41] sm:$0xff] }
 0x7c3   : > { %v7865_v12 = vmul.f32 %v7822_v15, %v7571_v30  ;;  %v8388_v25 = vpop.f32.mrf.mxu3  ;;  %v16109_v36 = vadd.f32 %v9064_v18, %v15909_v26  ;;  %10161 = vmatpush.bf16.msra.mxu0 %v13488_v37  ;;  %v8595_v15 = vld [vmem:[#allocation2 + $0x12f] sm:$0xff]  ;;  %v8597_v37 = vld [vmem:[#allocation2 + $0x13f] sm:$0xff] }
 0x7c4   : > { %v16111_v52 = vadd.f32 %v8388_v25, %v8104_v6  ;;  %v13505_v18 = vld [vmem:[%s17096_s3 + $0x230] sm:$0xff] }
 0x7c5   : > { %7907 = vst [vmem:[#allocation2 + $0x168] sm:$0xff] %v7865_v12  ;;  %9103 = vmatmul.bf16.gmra.mxu1 %v15933_v38  ;;  %10896 = vmatpush.bf16.msra.mxu2 %v13505_v18  ;;  %v9300_v18 = vld [vmem:[#allocation2 + $0x48] sm:$0xff] }
 0x7c8   : > { %v8741_v0 = vpop.f32.mrf.mxu0 }
 0x7c9   : > { %v16118_v34 = vadd.f32 %v8741_v0, %v16037_v57 }
 0x7ca   : > { %v8106_v26 = vpop.f32.mrf.mxu2  ;;  %v9066_v58 = vpop.f32.mrf.mxu1 }
 0x7cb   : > { %v8390_v20 = vpop.f32.mrf.mxu3  ;;  %v16122_v21 = vadd.f32 %v9066_v58, %v8844_v49  ;;  %8780 = vmatmul.bf16.gmra.mxu0 %v16120_v16  ;;  %v13486_v58 = vld [vmem:[%s17096_s3 + $0x198] sm:$0xff] }
 0x7cc   : > { %v16125_v38 = vadd.f32 %v8390_v20, %v8106_v26  ;;  %v13534_v26 = vld [vmem:[%s17097_s4 + $0x30] sm:$0xff] }
 0x7cd   : > { %11368 = vmatpush.bf16.msra.mxu3 %v13534_v26 }
 0x7cf   : > { %9431 = vmatmul.bf16.vlgmr.msrb.gmra.mxu2 %v9337_v55 }
 0x7d0   : > { %9799 = vmatmul.bf16.vlgmr.msrb.gmra.mxu3 %v9705_v48  ;;  %v8743_v57 = vpop.f32.mrf.mxu0 }
 0x7d1   : > { %v16128_v28 = vadd.f32 %v8743_v57, %v16049_v1  ;;  %v8596_v1 = vld [vmem:[#allocation2 + $0x137] sm:$0xff] }
 0x7d2   : > { %v8109_v46 = vpop.f32.mrf.mxu2  ;;  %v9069_v10 = vpop.f32.mrf.mxu1  ;;  %v16145_v6 = vpack.c.bf16 %v8596_v1, %v8595_v15 }
 0x7d3   : > { %v8393_v42 = vpop.f32.mrf.mxu3  ;;  %v16134_v9 = vadd.f32 %v9069_v10, %v15931_v60  ;;  %v13487_v60 = vld [vmem:[%s17096_s3 + $0x1a0] sm:$0xff]  ;;  %v13484_v10 = vld [vmem:[%s17096_s3 + $0x188] sm:$0xff] }
 0x7d4   : > { %v16136_v13 = vadd.f32 %v8393_v42, %v8109_v46  ;;  %10162 = vmatpush.bf16.msra.mxu0 %v13487_v60 }
 0x7d5   : > { %9108 = vmatmul.bf16.gmra.mxu1 %v15953_v31  ;;  %v9298_v31 = vld [vmem:[#allocation2 + $0x38] sm:$0xff] }
 0x7d8   : > { %v8746_v63 = vpop.f32.mrf.mxu0  ;;  %10163 = vmatpush.bf16.msra.mxu0 %v13486_v58 }
 0x7d9   : > { %v16143_v30 = vadd.f32 %v8746_v63, %v16057_v7  ;;  %v9297_v7 = vld [vmem:[#allocation2 + $0x30] sm:$0xff] }
 0x7da   : > { %v8111_v12 = vpop.f32.mrf.mxu2  ;;  %v9071_v25 = vpop.f32.mrf.mxu1  ;;  %v9338_v27 = vpack.c.bf16 %v9298_v31, %v9297_v7 }
 0x7db   : > { %v8395_v62 = vpop.f32.mrf.mxu3  ;;  %v16154_v0 = vadd.f32 %v9071_v25, %v15942_v53  ;;  %8785 = vmatmul.bf16.gmra.mxu0 %v16145_v6  ;;  %v13497_v53 = vld [vmem:[%s17096_s3 + $0x1f0] sm:$0xff] }
 0x7dc   : > { %v16157_v49 = vadd.f32 %v8395_v62, %v8111_v12  ;;  %10528 = vmatpush.bf16.msra.mxu1 %v13497_v53  ;;  %10164 = vmatpush.bf16.msra.mxu0 %v13485_v8  ;;  %v9668_v12 = vld [vmem:[#allocation2 + $0x49] sm:$0xff]  ;;  %v8600_v8 = vld [vmem:[#allocation2 + $0x157] sm:$0xff] }
 0x7dd   : > { %v16200_v7 = vpack.c.bf16 %v9668_v12, %v9667_v43 }
 0x7df   : > { %9436 = vmatmul.bf16.gmra.mxu2 %v9338_v27 }
 0x7e0   : > { %9804 = vmatmul.bf16.gmra.mxu3 %v16168_v41  ;;  %v8748_v20 = vpop.f32.mrf.mxu0  ;;  %10165 = vmatpush.bf16.msra.mxu0 %v13484_v10 }
 0x7e1   : > { %v16172_v54 = vadd.f32 %v8748_v20, %v16069_v40  ;;  %v8598_v40 = vld [vmem:[#allocation2 + $0x147] sm:$0xff] }
 0x7e2   : > { %v8114_v55 = vpop.f32.mrf.mxu2  ;;  %v9074_v48 = vpop.f32.mrf.mxu1  ;;  %v16189_v63 = vpack.c.bf16 %v8598_v40, %v8597_v37  ;;  %v9670_v37 = vld [vmem:[#allocation2 + $0x59] sm:$0xff] }
 0x7e3   : > { %v8398_v57 = vpop.f32.mrf.mxu3  ;;  %v16178_v56 = vadd.f32 %v9074_v48, %v15951_v33  ;;  %v13483_v33 = vld [vmem:[%s17096_s3 + $0x180] sm:$0xff]  ;;  %v8599_v48 = vld [vmem:[#allocation2 + $0x14f] sm:$0xff] }
 0x7e4   : > { %v16180_v46 = vadd.f32 %v8398_v57, %v8114_v55  ;;  %10166 = vmatpush.bf16.msra.mxu0 %v13483_v33  ;;  %v16215_v10 = vpack.c.bf16 %v8600_v8, %v8599_v48  ;;  %v9304_v48 = vld [vmem:[#allocation2 + $0x68] sm:$0xff] }
 0x7e5   : > { %9113 = vmatmul.bf16.gmra.mxu1 %v15979_v29 }
 0x7e8   : > { %v8751_v42 = vpop.f32.mrf.mxu0 }
 0x7e9   : > { %v16187_v1 = vadd.f32 %v8751_v42, %v16086_v39  ;;  %v9299_v39 = vld [vmem:[#allocation2 + $0x40] sm:$0xff]  ;;  %v9302_v42 = vld [vmem:[#allocation2 + $0x58] sm:$0xff] }
 0x7ea   : > { %v8116_v15 = vpop.f32.mrf.mxu2  ;;  %v9076_v60 = vpop.f32.mrf.mxu1  ;;  %v9339_v62 = vpack.c.bf16 %v9300_v18, %v9299_v39 }
 0x7eb   : > { %v8400_v25 = vpop.f32.mrf.mxu3  ;;  %v16195_v29 = vadd.f32 %v9076_v60, %v15962_v14  ;;  %8790 = vmatmul.bf16.gmra.mxu0 %v16189_v63  ;;  %v9669_v60 = vld [vmem:[#allocation2 + $0x51] sm:$0xff] }
 0x7ec   : > { %v16198_v31 = vadd.f32 %v8400_v25, %v8116_v15  ;;  %v16223_v12 = vpack.c.bf16 %v9670_v37, %v9669_v60  ;;  %v9303_v37 = vld [vmem:[#allocation2 + $0x60] sm:$0xff] }
 0x7ef   : > { %9441 = vmatmul.bf16.gmra.mxu2 %v9339_v62 }
 0x7f0   : > { %9809 = vmatmul.bf16.gmra.mxu3 %v16200_v7  ;;  %v8753_v23 = vpop.f32.mrf.mxu0 }
 0x7f1   : > { %v16204_v26 = vadd.f32 %v8753_v23, %v16101_v17 }
 0x7f2   : > { %v8119_v58 = vpop.f32.mrf.mxu2  ;;  %v9079_v14 = vpop.f32.mrf.mxu1 }
 0x7f3   : > { %v8403_v53 = vpop.f32.mrf.mxu3  ;;  %v16207_v27 = vadd.f32 %v9079_v14, %v15977_v59  ;;  %v13533_v14 = vld [vmem:[%s17097_s4 + $0x28] sm:$0xff] }
 0x7f4   : > { %v16209_v20 = vadd.f32 %v8403_v53, %v8119_v58  ;;  %v13504_v58 = vld [vmem:[%s17096_s3 + $0x228] sm:$0xff]  ;;  %11369 = vmatpush.bf16.msra.mxu3 %v13533_v14 }
 0x7f5   : > { %9118 = vmatmul.bf16.gmra.mxu1 %v15999_v45  ;;  %v9301_v45 = vld [vmem:[#allocation2 + $0x50] sm:$0xff]  ;;  %10897 = vmatpush.bf16.msra.mxu2 %v13504_v58 }
 0x7f6   : > { %v9340_v18 = vpack.c.bf16 %v9302_v42, %v9301_v45  ;;  %v9341_v45 = vpack.c.bf16 %v9304_v48, %v9303_v37  ;;  %v9305_v48 = vld [vmem:[#allocation2 + $0x70] sm:$0xff] }
 0x7f8   : > { %v8756_v55 = vpop.f32.mrf.mxu0 }
 0x7f9   : > { %v16213_v57 = vadd.f32 %v8756_v55, %v16111_v52 }
 0x7fa   : > { %v8121_v17 = vpop.f32.mrf.mxu2  ;;  %v9081_v40 = vpop.f32.mrf.mxu1 }
 0x7fb   : > { %v8405_v33 = vpop.f32.mrf.mxu3  ;;  %v16218_v59 = vadd.f32 %v9081_v40, %v15988_v4  ;;  %8795 = vmatmul.bf16.gmra.mxu0 %v16215_v10 }
 0x7fc   : > { %v16221_v15 = vadd.f32 %v8405_v33, %v8121_v17  ;;  %v9672_v17 = vld [vmem:[#allocation2 + $0x69] sm:$0xff]  ;;  %v9671_v33 = vld [vmem:[#allocation2 + $0x61] sm:$0xff] }
 0x7fd   : > { %v16253_v60 = vpack.c.bf16 %v9672_v17, %v9671_v33  ;;  %v9673_v17 = vld [vmem:[#allocation2 + $0x71] sm:$0xff] }
 0x7ff   : > { %9446 = vmatmul.bf16.gmra.mxu2 %v9340_v18 }
 0x800   : > { %9814 = vmatmul.bf16.gmra.mxu3 %v16223_v12  ;;  %v8758_v52 = vpop.f32.mrf.mxu0 }
 0x801   : > { %v16227_v25 = vadd.f32 %v8758_v52, %v16125_v38  ;;  %v13496_v38 = vld [vmem:[%s17096_s3 + $0x1e8] sm:$0xff] }
 0x802   : > { %v8124_v39 = vpop.f32.mrf.mxu2  ;;  %v9084_v43 = vpop.f32.mrf.mxu1  ;;  %10529 = vmatpush.bf16.msra.mxu1 %v13496_v38 }
 0x803   : > { %v8408_v4 = vpop.f32.mrf.mxu3  ;;  %v16230_v62 = vadd.f32 %v9084_v43, %v15997_v47 }
 0x804   : > { %v16232_v23 = vadd.f32 %v8408_v4, %v8124_v39 }
 0x805   : > { %9123 = vmatmul.bf16.gmra.mxu1 %v16019_v61 }
 0x808   : > { %v8761_v47 = vpop.f32.mrf.mxu0 }
 0x809   : > { %v16245_v53 = vadd.f32 %v8761_v47, %v16136_v13  ;;  %v9306_v47 = vld [vmem:[#allocation2 + $0x78] sm:$0xff] }
 0x80a   : > { %v8126_v8 = vpop.f32.mrf.mxu2  ;;  %v9086_v55 = vpop.f32.mrf.mxu1 }
 0x80b   : > { %v8410_v61 = vpop.f32.mrf.mxu3  ;;  %v16248_v40 = vadd.f32 %v9086_v55, %v16008_v19  ;;  %10167 = vmatmul.bf16.vlgmr.msra.gmra.mxu0 %v16168_v41 }
 0x80c   : > { %v16251_v42 = vadd.f32 %v8410_v61, %v8126_v8  ;;  %v9674_v8 = vld [vmem:[#allocation2 + $0x79] sm:$0xff]  ;;  %v9342_v61 = vpack.c.bf16 %v9306_v47, %v9305_v48 }
 0x80f   : > { %9451 = vmatmul.bf16.gmra.mxu2 %v9341_v45 }
 0x810   : > { %9819 = vmatmul.bf16.gmra.mxu3 %v16253_v60  ;;  %v8763_v13 = vpop.f32.mrf.mxu0 }
 0x811   : > { %v16257_v18 = vadd.f32 %v8763_v13, %v16157_v49 }
 0x812   : > { %v8129_v52 = vpop.f32.mrf.mxu2  ;;  %v9089_v39 = vpop.f32.mrf.mxu1 }
 0x813   : > { %v8413_v19 = vpop.f32.mrf.mxu3  ;;  %v16260_v43 = vadd.f32 %v9089_v39, %v16017_v32 }
 0x814   : > { %v16262_v41 = vadd.f32 %v8413_v19, %v8129_v52 }
 0x815   : > { %9128 = vmatmul.bf16.gmra.mxu1 %v16045_v51  ;;  %v16274_v51 = vpack.c.bf16 %v9674_v8, %v9673_v17  ;;  %v9307_v8 = vld [vmem:[#allocation2 + $0x80] sm:$0xff] }
 0x818   : > { %v8766_v4 = vpop.f32.mrf.mxu0 }
 0x819   : > { %v16266_v58 = vadd.f32 %v8766_v4, %v16180_v46 }
 0x81a   : > { %v8131_v14 = vpop.f32.mrf.mxu2  ;;  %v9091_v38 = vpop.f32.mrf.mxu1 }
 0x81b   : > { %v8415_v49 = vpop.f32.mrf.mxu3  ;;  %v16269_v55 = vadd.f32 %v9091_v38, %v16034_v5  ;;  %10172 = vmatmul.bf16.gmra.mxu0 %v16200_v7  ;;  %v9676_v38 = vld [vmem:[#allocation2 + $0x89] sm:$0xff] }
 0x81c   : > { %v16272_v32 = vadd.f32 %v8415_v49, %v8131_v14  ;;  %v9308_v14 = vld [vmem:[#allocation2 + $0x88] sm:$0xff] }
 0x81d   : > { %v9675_v49 = vld [vmem:[#allocation2 + $0x81] sm:$0xff] }
 0x81e   : > { %v16298_v48 = vpack.c.bf16 %v9676_v38, %v9675_v49  ;;  %v9310_v38 = vld [vmem:[#allocation2 + $0x98] sm:$0xff] }
 0x81f   : > { %9456 = vmatmul.bf16.gmra.mxu2 %v9342_v61  ;;  %v13495_v61 = vld [vmem:[%s17096_s3 + $0x1e0] sm:$0xff] }
 0x820   : > { %9824 = vmatmul.bf16.gmra.mxu3 %v16274_v51  ;;  %v8768_v46 = vpop.f32.mrf.mxu0  ;;  %10530 = vmatpush.bf16.msra.mxu1 %v13495_v61 }
 0x821   : > { %v16278_v37 = vadd.f32 %v8768_v46, %v16198_v31 }
 0x822   : > { %v8134_v33 = vpop.f32.mrf.mxu2  ;;  %v9094_v45 = vpop.f32.mrf.mxu1 }
 0x823   : > { %v8418_v5 = vpop.f32.mrf.mxu3  ;;  %v16281_v13 = vadd.f32 %v9094_v45, %v16043_v22 }
 0x824   : > { %v16283_v7 = vadd.f32 %v8418_v5, %v8134_v33 }
 0x825   : > { %9133 = vmatmul.bf16.gmra.mxu1 %v16065_v44  ;;  %v13503_v44 = vld [vmem:[%s17096_s3 + $0x220] sm:$0xff] }
 0x826   : > { %10898 = vmatpush.bf16.msra.mxu2 %v13503_v44  ;;  %v9309_v44 = vld [vmem:[#allocation2 + $0x90] sm:$0xff] }
 0x828   : > { %v8771_v52 = vpop.f32.mrf.mxu0 }
 0x829   : > { %v16287_v39 = vadd.f32 %v8771_v52, %v16209_v20  ;;  %v9343_v20 = vpack.c.bf16 %v9308_v14, %v9307_v8 }
 0x82a   : > { %v8136_v19 = vpop.f32.mrf.mxu2  ;;  %v9096_v4 = vpop.f32.mrf.mxu1 }
 0x82b   : > { %v8420_v31 = vpop.f32.mrf.mxu3  ;;  %v16290_v47 = vadd.f32 %v9096_v4, %v16054_v24  ;;  %10177 = vmatmul.bf16.gmra.mxu0 %v16223_v12  ;;  %v13532_v24 = vld [vmem:[%s17097_s4 + $0x20] sm:$0xff] }
 0x82c   : > { %v16293_v22 = vadd.f32 %v8420_v31, %v8136_v19  ;;  %11370 = vmatpush.bf16.msra.mxu3 %v13532_v24  ;;  %v9678_v31 = vld [vmem:[#allocation2 + $0x99] sm:$0xff]  ;;  %v9344_v24 = vpack.c.bf16 %v9310_v38, %v9309_v44  ;;  %v9312_v38 = vld [vmem:[#allocation2 + $0xa8] sm:$0xff] }
 0x82d   : > { %v9311_v44 = vld [vmem:[#allocation2 + $0xa0] sm:$0xff] }
 0x82f   : > { %9461 = vmatmul.bf16.gmra.mxu2 %v9343_v20  ;;  %v9677_v20 = vld [vmem:[#allocation2 + $0x91] sm:$0xff] }
 0x830   : > { %9829 = vmatmul.bf16.gmra.mxu3 %v16298_v48  ;;  %v8773_v12 = vpop.f32.mrf.mxu0 }
 0x831   : > { %v16305_v17 = vadd.f32 %v8773_v12, %v16221_v15 }
 0x832   : > { %v8139_v46 = vpop.f32.mrf.mxu2  ;;  %v9099_v33 = vpop.f32.mrf.mxu1 }
 0x833   : > { %v8423_v45 = vpop.f32.mrf.mxu3  ;;  %v16311_v5 = vadd.f32 %v9099_v33, %v16063_v3 }
 0x834   : > { %v16313_v52 = vadd.f32 %v8423_v45, %v8139_v46 }
 0x835   : > { %9138 = vmatmul.bf16.gmra.mxu1 %v16097_v35  ;;  %v16325_v35 = vpack.c.bf16 %v9678_v31, %v9677_v20  ;;  %v9680_v31 = vld [vmem:[#allocation2 + $0xa9] sm:$0xff]  ;;  %v9679_v20 = vld [vmem:[#allocation2 + $0xa1] sm:$0xff] }
 0x838   : > { %v8776_v19 = vpop.f32.mrf.mxu0 }
 0x839   : > { %v16317_v15 = vadd.f32 %v8776_v19, %v16232_v23 }
 0x83a   : > { %v8141_v4 = vpop.f32.mrf.mxu2  ;;  %v9101_v14 = vpop.f32.mrf.mxu1 }
 0x83b   : > { %v8425_v8 = vpop.f32.mrf.mxu3  ;;  %v16320_v49 = vadd.f32 %v9101_v14, %v16077_v2  ;;  %10182 = vmatmul.bf16.gmra.mxu0 %v16253_v60 }
 0x83c   : > { %v16323_v3 = vadd.f32 %v8425_v8, %v8141_v4 }
 0x83f   : > { %9466 = vmatmul.bf16.gmra.mxu2 %v9344_v24  ;;  %v9345_v24 = vpack.c.bf16 %v9312_v38, %v9311_v44 }
 0x840   : > { %9834 = vmatmul.bf16.gmra.mxu3 %v16325_v35  ;;  %v8778_v23 = vpop.f32.mrf.mxu0 }
 0x841   : > { %v16329_v12 = vadd.f32 %v8778_v23, %v16251_v42 }
 0x842   : > { %v8144_v61 = vpop.f32.mrf.mxu2  ;;  %v9104_v46 = vpop.f32.mrf.mxu1 }
 0x843   : > { %v8428_v2 = vpop.f32.mrf.mxu3  ;;  %v16332_v33 = vadd.f32 %v9104_v46, %v16095_v50 }
 0x844   : > { %v16334_v60 = vadd.f32 %v8428_v2, %v8144_v61 }
 0x845   : > { %9143 = vmatmul.bf16.gmra.mxu1 %v16120_v16  ;;  %v16346_v16 = vpack.c.bf16 %v9680_v31, %v9679_v20  ;;  %v9314_v31 = vld [vmem:[#allocation2 + $0xb8] sm:$0xff] }
 0x848   : > { %v8781_v45 = vpop.f32.mrf.mxu0 }
 0x849   : > { %v16338_v19 = vadd.f32 %v8781_v45, %v16262_v41 }
 0x84a   : > { %v8146_v4 = vpop.f32.mrf.mxu2  ;;  %v9106_v14 = vpop.f32.mrf.mxu1 }
 0x84b   : > { %v8430_v42 = vpop.f32.mrf.mxu3  ;;  %v16341_v8 = vadd.f32 %v9106_v14, %v16106_v11  ;;  %10187 = vmatmul.bf16.gmra.mxu0 %v16274_v51 }
 0x84c   : > { %v16344_v50 = vadd.f32 %v8430_v42, %v8146_v4  ;;  %v13502_v4 = vld [vmem:[%s17096_s3 + $0x218] sm:$0xff] }
 0x84d   : > { %10899 = vmatpush.bf16.msra.mxu2 %v13502_v4  ;;  %v9682_v42 = vld [vmem:[#allocation2 + $0xb9] sm:$0xff] }
 0x84f   : > { %9471 = vmatmul.bf16.gmra.mxu2 %v9345_v24  ;;  %v9313_v24 = vld [vmem:[#allocation2 + $0xb0] sm:$0xff] }
 0x850   : > { %9839 = vmatmul.bf16.gmra.mxu3 %v16346_v16  ;;  %v8783_v41 = vpop.f32.mrf.mxu0 }
 0x851   : > { %v16350_v23 = vadd.f32 %v8783_v41, %v16272_v32 }
 0x852   : > { %v9109_v61 = vpop.f32.mrf.mxu1  ;;  %v9432_v46 = vpop.f32.mrf.mxu2 }
 0x853   : > { %v16353_v11 = vadd.f32 %v9109_v61, %v16118_v34  ;;  %v9579_v51 = vadd.f32 %v9432_v46, %v16109_v36  ;;  %v9800_v2 = vpop.f32.mrf.mxu3  ;;  %v13531_v34 = vld [vmem:[%s17097_s4 + $0x18] sm:$0xff]  ;;  %v9346_v61 = vpack.c.bf16 %v9314_v31, %v9313_v24 }
 0x854   : > { %11371 = vmatpush.bf16.msra.mxu3 %v13531_v34 }
 0x855   : > { %v16356_v45 = vadd.f32 %v9800_v2, %v9579_v51  ;;  %9148 = vmatmul.bf16.gmra.mxu1 %v16145_v6  ;;  %v13494_v51 = vld [vmem:[%s17096_s3 + $0x1d8] sm:$0xff] }
 0x856   : > { %10531 = vmatpush.bf16.msra.mxu1 %v13494_v51 }
 0x858   : > { %v8786_v14 = vpop.f32.mrf.mxu0 }
 0x859   : > { %v16363_v32 = vadd.f32 %v8786_v14, %v16283_v7  ;;  %v9681_v7 = vld [vmem:[#allocation2 + $0xb1] sm:$0xff] }
 0x85a   : > { %v9111_v38 = vpop.f32.mrf.mxu1  ;;  %v9434_v36 = vpop.f32.mrf.mxu2  ;;  %v16375_v46 = vpack.c.bf16 %v9682_v42, %v9681_v7 }
 0x85b   : > { %v16369_v44 = vadd.f32 %v9111_v38, %v16128_v28  ;;  %v9580_v6 = vadd.f32 %v9434_v36, %v16122_v21  ;;  %v9802_v20 = vpop.f32.mrf.mxu3  ;;  %10192 = vmatmul.bf16.gmra.mxu0 %v16298_v48 }
 0x85d   : > { %v16373_v41 = vadd.f32 %v9802_v20, %v9580_v6  ;;  %v9684_v20 = vld [vmem:[#allocation2 + $0xc9] sm:$0xff] }
 0x85f   : > { %9476 = vmatmul.bf16.gmra.mxu2 %v9346_v61  ;;  %v9683_v61 = vld [vmem:[#allocation2 + $0xc1] sm:$0xff] }
 0x860   : > { %9844 = vmatmul.bf16.gmra.mxu3 %v16375_v46  ;;  %v8788_v28 = vpop.f32.mrf.mxu0 }
 0x861   : > { %v16382_v21 = vadd.f32 %v8788_v28, %v16293_v22  ;;  %v9316_v22 = vld [vmem:[#allocation2 + $0xc8] sm:$0xff]  ;;  %v16404_v28 = vpack.c.bf16 %v9684_v20, %v9683_v61  ;;  %v9317_v61 = vld [vmem:[#allocation2 + $0xd0] sm:$0xff] }
 0x862   : > { %v9114_v48 = vpop.f32.mrf.mxu1  ;;  %v9437_v2 = vpop.f32.mrf.mxu2 }
 0x863   : > { %v16385_v4 = vadd.f32 %v9114_v48, %v16143_v30  ;;  %v9581_v14 = vadd.f32 %v9437_v2, %v16134_v9  ;;  %v9805_v34 = vpop.f32.mrf.mxu3  ;;  %v13493_v9 = vld [vmem:[%s17096_s3 + $0x1d0] sm:$0xff] }
 0x864   : > { %10532 = vmatpush.bf16.msra.mxu1 %v13493_v9 }
 0x865   : > { %v16388_v38 = vadd.f32 %v9805_v34, %v9581_v14  ;;  %9153 = vmatmul.bf16.gmra.mxu1 %v16189_v63  ;;  %v9315_v63 = vld [vmem:[#allocation2 + $0xc0] sm:$0xff] }
 0x866   : > { %v9347_v51 = vpack.c.bf16 %v9316_v22, %v9315_v63 }
 0x868   : > { %v8791_v36 = vpop.f32.mrf.mxu0 }
 0x869   : > { %v16392_v31 = vadd.f32 %v8791_v36, %v16313_v52 }
 0x86a   : > { %v9116_v42 = vpop.f32.mrf.mxu1  ;;  %v9439_v6 = vpop.f32.mrf.mxu2 }
 0x86b   : > { %v16395_v24 = vadd.f32 %v9116_v42, %v16172_v54  ;;  %v9582_v30 = vadd.f32 %v9439_v6, %v16154_v0  ;;  %v9807_v7 = vpop.f32.mrf.mxu3  ;;  %10197 = vmatmul.bf16.gmra.mxu0 %v16325_v35  ;;  %v13492_v54 = vld [vmem:[%s17096_s3 + $0x1c8] sm:$0xff]  ;;  %v13491_v42 = vld [vmem:[%s17096_s3 + $0x1c0] sm:$0xff] }
 0x86c   : > { %10533 = vmatpush.bf16.msra.mxu1 %v13492_v54 }
 0x86d   : > { %v16402_v52 = vadd.f32 %v9807_v7, %v9582_v30  ;;  %v9686_v7 = vld [vmem:[#allocation2 + $0xd9] sm:$0xff] }
 0x86f   : > { %9481 = vmatmul.bf16.gmra.mxu2 %v9347_v51  ;;  %v9685_v51 = vld [vmem:[#allocation2 + $0xd1] sm:$0xff] }
 0x870   : > { %9849 = vmatmul.bf16.gmra.mxu3 %v16404_v28  ;;  %v8793_v0 = vpop.f32.mrf.mxu0  ;;  %10534 = vmatpush.bf16.msra.mxu1 %v13491_v42 }
 0x871   : > { %v16411_v35 = vadd.f32 %v8793_v0, %v16323_v3  ;;  %v16433_v0 = vpack.c.bf16 %v9686_v7, %v9685_v51 }
 0x872   : > { %v9119_v48 = vpop.f32.mrf.mxu1  ;;  %v9442_v2 = vpop.f32.mrf.mxu2 }
 0x873   : > { %v16414_v14 = vadd.f32 %v9119_v48, %v16187_v1  ;;  %v9583_v34 = vadd.f32 %v9442_v2, %v16178_v56  ;;  %v9810_v36 = vpop.f32.mrf.mxu3  ;;  %v9318_v1 = vld [vmem:[#allocation2 + $0xd8] sm:$0xff]  ;;  %v8968_v48 = vld [vmem:[#allocation2 + $0x167] sm:$0xff] }
 0x874   : > { %v9348_v54 = vpack.c.bf16 %v9318_v1, %v9317_v61  ;;  %v9688_v61 = vld [vmem:[#allocation2 + $0xe9] sm:$0xff] }
 0x875   : > { %v16420_v6 = vadd.f32 %v9810_v36, %v9583_v34  ;;  %9158 = vmatmul.bf16.gmra.mxu1 %v16215_v10  ;;  %v8967_v34 = vld [vmem:[#allocation2 + $0x15f] sm:$0xff] }
 0x878   : > { %v8796_v3 = vpop.f32.mrf.mxu0 }
 0x879   : > { %v16424_v22 = vadd.f32 %v8796_v3, %v16334_v60 }
 0x87a   : > { %v9121_v20 = vpop.f32.mrf.mxu1  ;;  %v9444_v30 = vpop.f32.mrf.mxu2 }
 0x87b   : > { %v16427_v56 = vadd.f32 %v9121_v20, %v16204_v26  ;;  %v9584_v9 = vadd.f32 %v9444_v30, %v16195_v29  ;;  %v9812_v63 = vpop.f32.mrf.mxu3  ;;  %10202 = vmatmul.bf16.gmra.mxu0 %v16346_v16  ;;  %v13501_v29 = vld [vmem:[%s17096_s3 + $0x210] sm:$0xff]  ;;  %v8989_v20 = vpack.c.bf16 %v8968_v48, %v8967_v34  ;;  %v9687_v48 = vld [vmem:[#allocation2 + $0xe1] sm:$0xff] }
 0x87c   : > { %10900 = vmatpush.bf16.msra.mxu2 %v13501_v29  ;;  %v10400_v34 = vld [vmem:[#allocation2 + $0x3a] sm:$0xff] }
 0x87d   : > { %v16431_v10 = vadd.f32 %v9812_v63, %v9584_v9  ;;  %v9320_v63 = vld [vmem:[#allocation2 + $0xe8] sm:$0xff] }
 0x87f   : > { %9486 = vmatmul.bf16.gmra.mxu2 %v9348_v54 }
 0x880   : > { %9854 = vmatmul.bf16.gmra.mxu3 %v16433_v0  ;;  %v8798_v60 = vpop.f32.mrf.mxu0 }
 0x881   : > { %v16437_v26 = vadd.f32 %v8798_v60, %v16344_v50  ;;  %v13530_v50 = vld [vmem:[%s17097_s4 + $0x10] sm:$0xff]  ;;  %v9319_v60 = vld [vmem:[#allocation2 + $0xe0] sm:$0xff] }
 0x882   : > { %v9124_v16 = vpop.f32.mrf.mxu1  ;;  %v9447_v2 = vpop.f32.mrf.mxu2  ;;  %11372 = vmatpush.bf16.msra.mxu3 %v13530_v50 }
 0x883   : > { %v16443_v36 = vadd.f32 %v9124_v16, %v16213_v57  ;;  %v9585_v42 = vadd.f32 %v9447_v2, %v16207_v27  ;;  %v9815_v3 = vpop.f32.mrf.mxu3  ;;  %v9349_v16 = vpack.c.bf16 %v9320_v63, %v9319_v60  ;;  %v16461_v2 = vpack.c.bf16 %v9688_v61, %v9687_v48 }
 0x885   : > { %v16446_v30 = vadd.f32 %v9815_v3, %v9585_v42  ;;  %9163 = vmatmul.bf16.gmra.mxu1 %v8989_v20  ;;  %v10399_v3 = vld [vmem:[#allocation2 + $0x32] sm:$0xff] }
 0x888   : > { %v10168_v1 = vpop.f32.mrf.mxu0 }
 0x889   : > { %v16452_v7 = vadd.f32 %v10168_v1, %v16356_v45  ;;  %v10441_v1 = vpack.c.bf16 %v10400_v34, %v10399_v3 }
 0x88a   : > { %v9126_v9 = vpop.f32.mrf.mxu1  ;;  %v9449_v57 = vpop.f32.mrf.mxu2 }
 0x88b   : > { %v16455_v27 = vadd.f32 %v9126_v9, %v16227_v25  ;;  %v9586_v51 = vadd.f32 %v9449_v57, %v16218_v59  ;;  %v9817_v54 = vpop.f32.mrf.mxu3  ;;  %10207 = vmatmul.bf16.gmra.mxu0 %v16375_v46 }
 0x88d   : > { %v16459_v29 = vadd.f32 %v9817_v54, %v9586_v51  ;;  %v9322_v51 = vld [vmem:[#allocation2 + $0xf8] sm:$0xff] }
 0x88e   : > { %v9690_v54 = vld [vmem:[#allocation2 + $0xf9] sm:$0xff] }
 0x88f   : > { %9491 = vmatmul.bf16.gmra.mxu2 %v9349_v16  ;;  %v9689_v16 = vld [vmem:[#allocation2 + $0xf1] sm:$0xff] }
 0x890   : > { %9859 = vmatmul.bf16.gmra.mxu3 %v16461_v2  ;;  %v10170_v45 = vpop.f32.mrf.mxu0 }
 0x891   : > { %v16465_v25 = vadd.f32 %v10170_v45, %v16373_v41 }
 0x892   : > { %v9129_v42 = vpop.f32.mrf.mxu1  ;;  %v9452_v59 = vpop.f32.mrf.mxu2 }
 0x893   : > { %v16468_v46 = vadd.f32 %v9129_v42, %v16245_v53  ;;  %v9587_v20 = vadd.f32 %v9452_v59, %v16230_v62  ;;  %v9820_v50 = vpop.f32.mrf.mxu3  ;;  %v9321_v62 = vld [vmem:[#allocation2 + $0xf0] sm:$0xff]  ;;  %v16483_v42 = vpack.c.bf16 %v9690_v54, %v9689_v16 }
 0x894   : > { %v9350_v34 = vpack.c.bf16 %v9322_v51, %v9321_v62  ;;  %v10402_v59 = vld [vmem:[#allocation2 + $0x4a] sm:$0xff] }
 0x895   : > { %v16471_v9 = vadd.f32 %v9820_v50, %v9587_v20  ;;  %10535 = vmatmul.bf16.vlgmr.msra.gmra.mxu1 %v10441_v1  ;;  %v10401_v20 = vld [vmem:[#allocation2 + $0x42] sm:$0xff] }
 0x898   : > { %v10173_v57 = vpop.f32.mrf.mxu0 }
 0x899   : > { %v16474_v63 = vadd.f32 %v10173_v57, %v16388_v38  ;;  %v10442_v57 = vpack.c.bf16 %v10402_v59, %v10401_v20 }
 0x89a   : > { %v9131_v61 = vpop.f32.mrf.mxu1  ;;  %v9454_v41 = vpop.f32.mrf.mxu2 }
 0x89b   : > { %v16477_v60 = vadd.f32 %v9131_v61, %v16257_v18  ;;  %v9588_v53 = vadd.f32 %v9454_v41, %v16248_v40  ;;  %v9822_v48 = vpop.f32.mrf.mxu3  ;;  %10212 = vmatmul.bf16.gmra.mxu0 %v16404_v28 }
 0x89d   : > { %v16481_v45 = vadd.f32 %v9822_v48, %v9588_v53  ;;  %v9324_v53 = vld [vmem:[#allocation2 + $0x108] sm:$0xff] }
 0x89e   : > { %v9692_v48 = vld [vmem:[#allocation2 + $0x109] sm:$0xff] }
 0x89f   : > { %9496 = vmatmul.bf16.gmra.mxu2 %v9350_v34  ;;  %v9691_v34 = vld [vmem:[#allocation2 + $0x101] sm:$0xff] }
 0x8a0   : > { %9864 = vmatmul.bf16.gmra.mxu3 %v16483_v42  ;;  %v10175_v38 = vpop.f32.mrf.mxu0 }
 0x8a1   : > { %v16487_v18 = vadd.f32 %v10175_v38, %v16402_v52 }
 0x8a2   : > { %v9134_v3 = vpop.f32.mrf.mxu1  ;;  %v9457_v40 = vpop.f32.mrf.mxu2 }
 0x8a3   : > { %v16490_v28 = vadd.f32 %v9134_v3, %v16266_v58  ;;  %v9589_v50 = vadd.f32 %v9457_v40, %v16260_v43  ;;  %v9825_v1 = vpop.f32.mrf.mxu3  ;;  %v9323_v43 = vld [vmem:[#allocation2 + $0x100] sm:$0xff]  ;;  %v16505_v3 = vpack.c.bf16 %v9692_v48, %v9691_v34 }
 0x8a4   : > { %v9351_v59 = vpack.c.bf16 %v9324_v53, %v9323_v43  ;;  %v9326_v43 = vld [vmem:[#allocation2 + $0x118] sm:$0xff] }
 0x8a5   : > { %v16493_v61 = vadd.f32 %v9825_v1, %v9589_v50  ;;  %10540 = vmatmul.bf16.gmra.mxu1 %v10442_v57  ;;  %v10403_v1 = vld [vmem:[#allocation2 + $0x52] sm:$0xff] }
 0x8a6   : > { %v9694_v34 = vld [vmem:[#allocation2 + $0x119] sm:$0xff] }
 0x8a8   : > { %v10178_v41 = vpop.f32.mrf.mxu0 }
 0x8a9   : > { %v16496_v51 = vadd.f32 %v10178_v41, %v16420_v6  ;;  %v13500_v6 = vld [vmem:[%s17096_s3 + $0x208] sm:$0xff] }
 0x8aa   : > { %v9136_v54 = vpop.f32.mrf.mxu1  ;;  %v9459_v52 = vpop.f32.mrf.mxu2  ;;  %10901 = vmatpush.bf16.msra.mxu2 %v13500_v6 }
 0x8ab   : > { %v16499_v62 = vadd.f32 %v9136_v54, %v16278_v37  ;;  %v9590_v58 = vadd.f32 %v9459_v52, %v16269_v55  ;;  %v9827_v16 = vpop.f32.mrf.mxu3  ;;  %10217 = vmatmul.bf16.gmra.mxu0 %v16433_v0  ;;  %v13529_v37 = vld [vmem:[%s17097_s4 + $0x8] sm:$0xff]  ;;  %v10404_v0 = vld [vmem:[#allocation2 + $0x5a] sm:$0xff] }
 0x8ac   : > { %11373 = vmatpush.bf16.msra.mxu3 %v13529_v37  ;;  %v10443_v52 = vpack.c.bf16 %v10404_v0, %v10403_v1  ;;  %v9693_v37 = vld [vmem:[#allocation2 + $0x111] sm:$0xff] }
 0x8ad   : > { %v16503_v38 = vadd.f32 %v9827_v16, %v9590_v58 }
 0x8af   : > { %9501 = vmatmul.bf16.gmra.mxu2 %v9351_v59 }
 0x8b0   : > { %9869 = vmatmul.bf16.gmra.mxu3 %v16505_v3  ;;  %v10180_v55 = vpop.f32.mrf.mxu0 }
 0x8b1   : > { %v16515_v40 = vadd.f32 %v10180_v55, %v16431_v10 }
 0x8b2   : > { %v9139_v20 = vpop.f32.mrf.mxu1  ;;  %v9462_v50 = vpop.f32.mrf.mxu2 }
 0x8b3   : > { %v16518_v57 = vadd.f32 %v9139_v20, %v16287_v39  ;;  %v9591_v41 = vadd.f32 %v9462_v50, %v16281_v13  ;;  %v9830_v54 = vpop.f32.mrf.mxu3  ;;  %v9325_v13 = vld [vmem:[#allocation2 + $0x110] sm:$0xff]  ;;  %v16533_v20 = vpack.c.bf16 %v9694_v34, %v9693_v37 }
 0x8b4   : > { %v9352_v0 = vpack.c.bf16 %v9326_v43, %v9325_v13  ;;  %v10406_v50 = vld [vmem:[#allocation2 + $0x6a] sm:$0xff] }
 0x8b5   : > { %v16521_v53 = vadd.f32 %v9830_v54, %v9591_v41  ;;  %10545 = vmatmul.bf16.gmra.mxu1 %v10443_v52  ;;  %v10405_v41 = vld [vmem:[#allocation2 + $0x62] sm:$0xff] }
 0x8b8   : > { %v10183_v48 = vpop.f32.mrf.mxu0 }
 0x8b9   : > { %v16524_v58 = vadd.f32 %v10183_v48, %v16446_v30  ;;  %v10444_v48 = vpack.c.bf16 %v10406_v50, %v10405_v41 }
 0x8ba   : > { %v9141_v16 = vpop.f32.mrf.mxu1  ;;  %v9464_v10 = vpop.f32.mrf.mxu2 }
 0x8bb   : > { %v16527_v59 = vadd.f32 %v9141_v16, %v16305_v17  ;;  %v9592_v39 = vadd.f32 %v9464_v10, %v16290_v47  ;;  %v9832_v6 = vpop.f32.mrf.mxu3  ;;  %10222 = vmatmul.bf16.gmra.mxu0 %v16461_v2 }
 0x8bd   : > { %v16531_v55 = vadd.f32 %v9832_v6, %v9592_v39  ;;  %v9328_v39 = vld [vmem:[#allocation2 + $0x128] sm:$0xff] }
 0x8be   : > { %v9696_v6 = vld [vmem:[#allocation2 + $0x129] sm:$0xff] }
 0x8bf   : > { %9506 = vmatmul.bf16.gmra.mxu2 %v9352_v0  ;;  %v9695_v0 = vld [vmem:[#allocation2 + $0x121] sm:$0xff] }
 0x8c0   : > { %9874 = vmatmul.bf16.gmra.mxu3 %v16533_v20  ;;  %v10185_v30 = vpop.f32.mrf.mxu0 }
 0x8c1   : > { %v16537_v17 = vadd.f32 %v10185_v30, %v16459_v29 }
 0x8c2   : > { %v9144_v1 = vpop.f32.mrf.mxu1  ;;  %v9467_v47 = vpop.f32.mrf.mxu2 }
 0x8c3   : > { %v16540_v2 = vadd.f32 %v9144_v1, %v16317_v15  ;;  %v9593_v54 = vadd.f32 %v9467_v47, %v16311_v5  ;;  %v9835_v52 = vpop.f32.mrf.mxu3  ;;  %v9327_v5 = vld [vmem:[#allocation2 + $0x120] sm:$0xff]  ;;  %v16555_v1 = vpack.c.bf16 %v9696_v6, %v9695_v0 }
 0x8c4   : > { %v9353_v50 = vpack.c.bf16 %v9328_v39, %v9327_v5  ;;  %v10408_v47 = vld [vmem:[#allocation2 + $0x7a] sm:$0xff] }
 0x8c5   : > { %v16543_v16 = vadd.f32 %v9835_v52, %v9593_v54  ;;  %10550 = vmatmul.bf16.gmra.mxu1 %v10444_v48  ;;  %v10407_v54 = vld [vmem:[#allocation2 + $0x72] sm:$0xff] }
 0x8c8   : > { %v10188_v10 = vpop.f32.mrf.mxu0 }
 0x8c9   : > { %v16546_v43 = vadd.f32 %v10188_v10, %v16471_v9  ;;  %v10445_v10 = vpack.c.bf16 %v10408_v47, %v10407_v54  ;;  %v9697_v47 = vld [vmem:[#allocation2 + $0x131] sm:$0xff] }
 0x8ca   : > { %v9146_v34 = vpop.f32.mrf.mxu1  ;;  %v9469_v29 = vpop.f32.mrf.mxu2 }
 0x8cb   : > { %v16549_v13 = vadd.f32 %v9146_v34, %v16329_v12  ;;  %v9594_v15 = vadd.f32 %v9469_v29, %v16320_v49  ;;  %v9837_v37 = vpop.f32.mrf.mxu3  ;;  %10227 = vmatmul.bf16.gmra.mxu0 %v16483_v42  ;;  %v13499_v29 = vld [vmem:[%s17096_s3 + $0x200] sm:$0xff] }
 0x8cc   : > { %10902 = vmatpush.bf16.msra.mxu2 %v13499_v29 }
 0x8cd   : > { %v16553_v30 = vadd.f32 %v9837_v37, %v9594_v15  ;;  %v9330_v15 = vld [vmem:[#allocation2 + $0x138] sm:$0xff] }
 0x8ce   : > { %v9698_v37 = vld [vmem:[#allocation2 + $0x139] sm:$0xff] }
 0x8cf   : > { %9511 = vmatmul.bf16.gmra.mxu2 %v9353_v50  ;;  %v16583_v54 = vpack.c.bf16 %v9698_v37, %v9697_v47 }
 0x8d0   : > { %9879 = vmatmul.bf16.gmra.mxu3 %v16555_v1  ;;  %v10190_v9 = vpop.f32.mrf.mxu0 }
 0x8d1   : > { %v16559_v12 = vadd.f32 %v10190_v9, %v16481_v45  ;;  %v13528_v45 = vld [vmem:[%s17097_s4] sm:$0xff]  ;;  %v9329_v9 = vld [vmem:[#allocation2 + $0x130] sm:$0xff] }
 0x8d2   : > { %v9149_v41 = vpop.f32.mrf.mxu1  ;;  %v9472_v49 = vpop.f32.mrf.mxu2  ;;  %11374 = vmatpush.bf16.msra.mxu3 %v13528_v45 }
 0x8d3   : > { %v16562_v42 = vadd.f32 %v9149_v41, %v16338_v19  ;;  %v9595_v52 = vadd.f32 %v9472_v49, %v16332_v33  ;;  %v9840_v48 = vpop.f32.mrf.mxu3  ;;  %v9354_v49 = vpack.c.bf16 %v9330_v15, %v9329_v9 }
 0x8d5   : > { %v16565_v34 = vadd.f32 %v9840_v48, %v9595_v52  ;;  %10555 = vmatmul.bf16.gmra.mxu1 %v10445_v10  ;;  %v10410_v52 = vld [vmem:[#allocation2 + $0x8a] sm:$0xff]  ;;  %v10409_v10 = vld [vmem:[#allocation2 + $0x82] sm:$0xff] }
 0x8d8   : > { %v10193_v39 = vpop.f32.mrf.mxu0 }
 0x8d9   : > { %v16574_v19 = vadd.f32 %v10193_v39, %v16493_v61  ;;  %v10446_v39 = vpack.c.bf16 %v10410_v52, %v10409_v10 }
 0x8da   : > { %v9151_v33 = vpop.f32.mrf.mxu1  ;;  %v9474_v6 = vpop.f32.mrf.mxu2 }
 0x8db   : > { %v16577_v5 = vadd.f32 %v9151_v33, %v16350_v23  ;;  %v9596_v0 = vadd.f32 %v9474_v6, %v16341_v8  ;;  %v9842_v50 = vpop.f32.mrf.mxu3  ;;  %10232 = vmatmul.bf16.gmra.mxu0 %v16505_v3 }
 0x8dd   : > { %v16581_v41 = vadd.f32 %v9842_v50, %v9596_v0  ;;  %v9332_v0 = vld [vmem:[#allocation2 + $0x148] sm:$0xff] }
 0x8de   : > { %v9700_v50 = vld [vmem:[#allocation2 + $0x149] sm:$0xff] }
 0x8df   : > { %9516 = vmatmul.bf16.gmra.mxu2 %v9354_v49  ;;  %v9699_v49 = vld [vmem:[#allocation2 + $0x141] sm:$0xff] }
 0x8e0   : > { %9884 = vmatmul.bf16.gmra.mxu3 %v16583_v54  ;;  %v10195_v61 = vpop.f32.mrf.mxu0 }
 0x8e1   : > { %v16587_v23 = vadd.f32 %v10195_v61, %v16503_v38 }
 0x8e2   : > { %v9154_v48 = vpop.f32.mrf.mxu1  ;;  %v9477_v8 = vpop.f32.mrf.mxu2 }
 0x8e3   : > { %v16590_v3 = vadd.f32 %v9154_v48, %v16363_v32  ;;  %v9597_v29 = vadd.f32 %v9477_v8, %v16353_v11  ;;  %v9845_v45 = vpop.f32.mrf.mxu3  ;;  %v9331_v11 = vld [vmem:[#allocation2 + $0x140] sm:$0xff]  ;;  %v16605_v48 = vpack.c.bf16 %v9700_v50, %v9699_v49 }
 0x8e4   : > { %v9355_v52 = vpack.c.bf16 %v9332_v0, %v9331_v11  ;;  %v10412_v8 = vld [vmem:[#allocation2 + $0x9a] sm:$0xff] }
 0x8e5   : > { %v16593_v33 = vadd.f32 %v9845_v45, %v9597_v29  ;;  %10560 = vmatmul.bf16.gmra.mxu1 %v10446_v39  ;;  %v10411_v29 = vld [vmem:[#allocation2 + $0x92] sm:$0xff] }
 0x8e8   : > { %v10198_v6 = vpop.f32.mrf.mxu0 }
 0x8e9   : > { %v16596_v15 = vadd.f32 %v10198_v6, %v16521_v53  ;;  %v10447_v6 = vpack.c.bf16 %v10412_v8, %v10411_v29 }
 0x8ea   : > { %v9156_v37 = vpop.f32.mrf.mxu1  ;;  %v9479_v38 = vpop.f32.mrf.mxu2 }
 0x8eb   : > { %v16599_v9 = vadd.f32 %v9156_v37, %v16382_v21  ;;  %v9598_v32 = vadd.f32 %v9479_v38, %v16369_v44  ;;  %v9847_v47 = vpop.f32.mrf.mxu3  ;;  %10237 = vmatmul.bf16.gmra.mxu0 %v16533_v20 }
 0x8ed   : > { %v16603_v61 = vadd.f32 %v9847_v47, %v9598_v32  ;;  %v9334_v32 = vld [vmem:[#allocation2 + $0x158] sm:$0xff] }
 0x8ee   : > { %v9702_v47 = vld [vmem:[#allocation2 + $0x159] sm:$0xff] }
 0x8ef   : > { %9521 = vmatmul.bf16.gmra.mxu2 %v9355_v52  ;;  %v9701_v52 = vld [vmem:[#allocation2 + $0x151] sm:$0xff] }
 0x8f0   : > { %9889 = vmatmul.bf16.gmra.mxu3 %v16605_v48  ;;  %v10200_v53 = vpop.f32.mrf.mxu0 }
 0x8f1   : > { %v16609_v21 = vadd.f32 %v10200_v53, %v16531_v55 }
 0x8f2   : > { %v9159_v10 = vpop.f32.mrf.mxu1  ;;  %v9482_v44 = vpop.f32.mrf.mxu2 }
 0x8f3   : > { %v16612_v20 = vadd.f32 %v9159_v10, %v16392_v31  ;;  %v9599_v45 = vadd.f32 %v9482_v44, %v16385_v4  ;;  %v9850_v39 = vpop.f32.mrf.mxu3  ;;  %v9333_v4 = vld [vmem:[#allocation2 + $0x150] sm:$0xff]  ;;  %v16627_v10 = vpack.c.bf16 %v9702_v47, %v9701_v52 }
 0x8f4   : > { %v9356_v8 = vpack.c.bf16 %v9334_v32, %v9333_v4  ;;  %v10414_v44 = vld [vmem:[#allocation2 + $0xaa] sm:$0xff] }
 0x8f5   : > { %v16615_v37 = vadd.f32 %v9850_v39, %v9599_v45  ;;  %10565 = vmatmul.bf16.gmra.mxu1 %v10447_v6  ;;  %v10413_v45 = vld [vmem:[#allocation2 + $0xa2] sm:$0xff] }
 0x8f6   : > { %v9704_v4 = vld [vmem:[#allocation2 + $0x169] sm:$0xff] }
 0x8f8   : > { %v10203_v38 = vpop.f32.mrf.mxu0 }
 0x8f9   : > { %v16618_v0 = vadd.f32 %v10203_v38, %v16543_v16  ;;  %v10448_v38 = vpack.c.bf16 %v10414_v44, %v10413_v45 }
 0x8fa   : > { %v9161_v50 = vpop.f32.mrf.mxu1  ;;  %v9484_v55 = vpop.f32.mrf.mxu2 }
 0x8fb   : > { %v16621_v11 = vadd.f32 %v9161_v50, %v16411_v35  ;;  %v9600_v31 = vadd.f32 %v9484_v55, %v16395_v24  ;;  %v9852_v49 = vpop.f32.mrf.mxu3  ;;  %10242 = vmatmul.bf16.gmra.mxu0 %v16555_v1 }
 0x8fd   : > { %v16625_v53 = vadd.f32 %v9852_v49, %v9600_v31  ;;  %v9336_v31 = vld [vmem:[#allocation2 + $0x168] sm:$0xff] }
 0x8fe   : > { %v9703_v49 = vld [vmem:[#allocation2 + $0x161] sm:$0xff] }
 0x8ff   : > { %9526 = vmatmul.bf16.gmra.mxu2 %v9356_v8  ;;  %v9335_v8 = vld [vmem:[#allocation2 + $0x160] sm:$0xff] }
 0x900   : > { %9894 = vmatmul.bf16.gmra.mxu3 %v16627_v10  ;;  %v10205_v16 = vpop.f32.mrf.mxu0  ;;  %v9357_v44 = vpack.c.bf16 %v9336_v31, %v9335_v8 }
 0x901   : > { %v16631_v35 = vadd.f32 %v10205_v16, %v16553_v30 }
 0x902   : > { %v9164_v29 = vpop.f32.mrf.mxu1  ;;  %v9487_v24 = vpop.f32.mrf.mxu2 }
 0x903   : > { %v16634_v1 = vadd.f32 %v9164_v29, %v16424_v22  ;;  %v9601_v39 = vadd.f32 %v9487_v24, %v16414_v14  ;;  %v9855_v6 = vpop.f32.mrf.mxu3  ;;  %v16649_v29 = vpack.c.bf16 %v9704_v4, %v9703_v49  ;;  %v10416_v24 = vld [vmem:[#allocation2 + $0xba] sm:$0xff] }
 0x904   : > { %v10768_v49 = vld [vmem:[#allocation2 + $0x3b] sm:$0xff] }
 0x905   : > { %v16637_v50 = vadd.f32 %v9855_v6, %v9601_v39  ;;  %10570 = vmatmul.bf16.gmra.mxu1 %v10448_v38  ;;  %v10415_v39 = vld [vmem:[#allocation2 + $0xb2] sm:$0xff] }
 0x908   : > { %v10208_v55 = vpop.f32.mrf.mxu0 }
 0x909   : > { %v16640_v32 = vadd.f32 %v10208_v55, %v16565_v34  ;;  %v10449_v55 = vpack.c.bf16 %v10416_v24, %v10415_v39 }
 0x90a   : > { %v9166_v47 = vpop.f32.mrf.mxu1  ;;  %v9489_v30 = vpop.f32.mrf.mxu2 }
 0x90b   : > { %v16643_v52 = vadd.f32 %v9166_v47, %v16437_v26  ;;  %v9602_v22 = vadd.f32 %v9489_v30, %v16427_v56  ;;  %v9857_v14 = vpop.f32.mrf.mxu3  ;;  %10247 = vmatmul.bf16.gmra.mxu0 %v16583_v54 }
 0x90d   : > { %v16647_v16 = vadd.f32 %v9857_v14, %v9602_v22  ;;  %v10767_v14 = vld [vmem:[#allocation2 + $0x33] sm:$0xff] }
 0x90f   : > { %9531 = vmatmul.bf16.gmra.mxu2 %v9357_v44  ;;  %v10418_v44 = vld [vmem:[#allocation2 + $0xca] sm:$0xff] }
 0x910   : > { %9899 = vmatmul.bf16.gmra.mxu3 %v16649_v29  ;;  %v10210_v34 = vpop.f32.mrf.mxu0 }
 0x911   : > { %v16653_v45 = vadd.f32 %v10210_v34, %v16581_v41 }
 0x912   : > { %v9492_v26 = vpop.f32.mrf.mxu2  ;;  %v10536_v56 = vpop.f32.mrf.mxu1 }
 0x913   : > { %v9603_v54 = vadd.f32 %v9492_v26, %v16443_v36  ;;  %v9860_v6 = vpop.f32.mrf.mxu3  ;;  %v16657_v38 = vadd.f32 %v10536_v56, %v16452_v7  ;;  %v13507_v36 = vld [vmem:[%s13896_s18] sm:$0xff]  ;;  %v10809_v7 = vpack.c.bf16 %v10768_v49, %v10767_v14 }
 0x914   : > { %v10417_v26 = vld [vmem:[#allocation2 + $0xc2] sm:$0xff] }
 0x915   : > { %v16659_v47 = vadd.f32 %v9860_v6, %v9603_v54  ;;  %10575 = vmatmul.bf16.gmra.mxu1 %v10449_v55  ;;  %v10450_v39 = vpack.c.bf16 %v10418_v44, %v10417_v26  ;;  %v10770_v55 = vld [vmem:[#allocation2 + $0x4b] sm:$0xff] }
 0x916   : > { %v10419_v44 = vld [vmem:[#allocation2 + $0xd2] sm:$0xff] }
 0x91a   : > { %v9494_v30 = vpop.f32.mrf.mxu2  ;;  %v10538_v31 = vpop.f32.mrf.mxu1 }
 0x91b   : > { %v9604_v41 = vadd.f32 %v9494_v30, %v16455_v27  ;;  %v9862_v4 = vpop.f32.mrf.mxu3  ;;  %v16663_v22 = vadd.f32 %v10538_v31, %v16465_v25  ;;  %10252 = vmatmul.bf16.gmra.mxu0 %v16605_v48 }
 0x91d   : > { %v16667_v8 = vadd.f32 %v9862_v4, %v9604_v41  ;;  %v10769_v41 = vld [vmem:[#allocation2 + $0x43] sm:$0xff] }
 0x91f   : > { %10903 = vmatmul.bf16.vlgmr.msra.gmra.mxu2 %v10809_v7 }
 0x920   : > { %11375 = vmatmul.bf16.vlgmr.msra.gmra.mxu3 %v13507_v36  ;;  %v10420_v36 = vld [vmem:[#allocation2 + $0xda] sm:$0xff] }
 0x922   : > { %v9497_v34 = vpop.f32.mrf.mxu2  ;;  %v10541_v24 = vpop.f32.mrf.mxu1 }
 0x923   : > { %v9605_v27 = vadd.f32 %v9497_v34, %v16468_v46  ;;  %v9865_v56 = vpop.f32.mrf.mxu3  ;;  %v16671_v25 = vadd.f32 %v10541_v24, %v16474_v63  ;;  %v13508_v46 = vld [vmem:[%s13896_s18 + $0x8] sm:$0xff]  ;;  %v10810_v63 = vpack.c.bf16 %v10770_v55, %v10769_v41  ;;  %v10451_v24 = vpack.c.bf16 %v10420_v36, %v10419_v44  ;;  %v10771_v55 = vld [vmem:[#allocation2 + $0x53] sm:$0xff] }
 0x925   : > { %v16673_v48 = vadd.f32 %v9865_v56, %v9605_v27  ;;  %10580 = vmatmul.bf16.gmra.mxu1 %v10450_v39  ;;  %v10772_v56 = vld [vmem:[#allocation2 + $0x5b] sm:$0xff] }
 0x92a   : > { %v9499_v54 = vpop.f32.mrf.mxu2  ;;  %v10543_v6 = vpop.f32.mrf.mxu1 }
 0x92b   : > { %v9606_v30 = vadd.f32 %v9499_v54, %v16477_v60  ;;  %v9867_v31 = vpop.f32.mrf.mxu3  ;;  %v16677_v49 = vadd.f32 %v10543_v6, %v16487_v18  ;;  %10257 = vmatmul.bf16.gmra.mxu0 %v16627_v10 }
 0x92d   : > { %v16681_v4 = vadd.f32 %v9867_v31, %v9606_v30  ;;  %v10422_v31 = vld [vmem:[#allocation2 + $0xea] sm:$0xff] }
 0x92f   : > { %10908 = vmatmul.bf16.gmra.mxu2 %v10810_v63  ;;  %v10421_v63 = vld [vmem:[#allocation2 + $0xe2] sm:$0xff] }
 0x930   : > { %11380 = vmatmul.bf16.gmra.mxu3 %v13508_v46 }
 0x932   : > { %v9502_v14 = vpop.f32.mrf.mxu2  ;;  %v10546_v7 = vpop.f32.mrf.mxu1 }
 0x933   : > { %v9607_v60 = vadd.f32 %v9502_v14, %v16490_v28  ;;  %v9870_v34 = vpop.f32.mrf.mxu3  ;;  %v16685_v18 = vadd.f32 %v10546_v7, %v16496_v51  ;;  %v13509_v28 = vld [vmem:[%s13896_s18 + $0x10] sm:$0xff]  ;;  %v10811_v51 = vpack.c.bf16 %v10772_v56, %v10771_v55  ;;  %v10452_v14 = vpack.c.bf16 %v10422_v31, %v10421_v63  ;;  %v10072_v7 = vld [vmem:[#allocation2 + $0x179] sm:$0xff] }
 0x934   : > { %v10424_v55 = vld [vmem:[#allocation2 + $0xfa] sm:$0xff] }
 0x935   : > { %v16687_v10 = vadd.f32 %v9870_v34, %v9607_v60  ;;  %10585 = vmatmul.bf16.gmra.mxu1 %v10451_v24 }
 0x93a   : > { %v9504_v26 = vpop.f32.mrf.mxu2  ;;  %v10548_v27 = vpop.f32.mrf.mxu1 }
 0x93b   : > { %v9608_v39 = vadd.f32 %v9504_v26, %v16499_v62  ;;  %v9872_v54 = vpop.f32.mrf.mxu3  ;;  %v16691_v6 = vadd.f32 %v10548_v27, %v16515_v40  ;;  %10262 = vmatmul.bf16.gmra.mxu0 %v16649_v29  ;;  %v10071_v29 = vld [vmem:[#allocation2 + $0x171] sm:$0xff] }
 0x93c   : > { %v10093_v60 = vpack.c.bf16 %v10072_v7, %v10071_v29  ;;  %v10774_v26 = vld [vmem:[#allocation2 + $0x6b] sm:$0xff]  ;;  %v10776_v29 = vld [vmem:[#allocation2 + $0x7b] sm:$0xff] }
 0x93d   : > { %v16695_v30 = vadd.f32 %v9872_v54, %v9608_v39  ;;  %v13510_v39 = vld [vmem:[%s13896_s18 + $0x18] sm:$0xff] }
 0x93f   : > { %10913 = vmatmul.bf16.gmra.mxu2 %v10811_v51 }
 0x940   : > { %11385 = vmatmul.bf16.gmra.mxu3 %v13509_v28 }
 0x942   : > { %v9507_v46 = vpop.f32.mrf.mxu2  ;;  %v10551_v41 = vpop.f32.mrf.mxu1 }
 0x943   : > { %v9609_v36 = vadd.f32 %v9507_v46, %v16518_v57  ;;  %v9875_v62 = vpop.f32.mrf.mxu3  ;;  %v16699_v40 = vadd.f32 %v10551_v41, %v16524_v58  ;;  %v10773_v58 = vld [vmem:[#allocation2 + $0x63] sm:$0xff]  ;;  %v10423_v46 = vld [vmem:[#allocation2 + $0xf2] sm:$0xff] }
 0x944   : > { %v10812_v28 = vpack.c.bf16 %v10774_v26, %v10773_v58  ;;  %v10775_v26 = vld [vmem:[#allocation2 + $0x73] sm:$0xff]  ;;  %v10425_v58 = vld [vmem:[#allocation2 + $0x102] sm:$0xff] }
 0x945   : > { %v16701_v44 = vadd.f32 %v9875_v62, %v9609_v36  ;;  %10590 = vmatmul.bf16.gmra.mxu1 %v10452_v14 }
 0x94a   : > { %v9509_v34 = vpop.f32.mrf.mxu2  ;;  %v10553_v24 = vpop.f32.mrf.mxu1 }
 0x94b   : > { %v9610_v27 = vadd.f32 %v9509_v34, %v16527_v59  ;;  %v9877_v56 = vpop.f32.mrf.mxu3  ;;  %v16705_v57 = vadd.f32 %v10553_v24, %v16537_v17  ;;  %10267 = vmatmul.bf16.gmra.mxu0 %v10093_v60  ;;  %v10453_v17 = vpack.c.bf16 %v10424_v55, %v10423_v46  ;;  %v13511_v24 = vld [vmem:[%s13896_s18 + $0x20] sm:$0xff] }
 0x94d   : > { %v16708_v54 = vadd.f32 %v9877_v56, %v9610_v27  ;;  %v10813_v27 = vpack.c.bf16 %v10776_v29, %v10775_v26  ;;  %v10777_v29 = vld [vmem:[#allocation2 + $0x83] sm:$0xff]  ;;  %v10427_v26 = vld [vmem:[#allocation2 + $0x112] sm:$0xff] }
 0x94f   : > { %10918 = vmatmul.bf16.gmra.mxu2 %v10812_v28 }
 0x950   : > { %11390 = vmatmul.bf16.gmra.mxu3 %v13510_v39 }
 0x952   : > { %v9512_v51 = vpop.f32.mrf.mxu2  ;;  %v10556_v31 = vpop.f32.mrf.mxu1 }
 0x953   : > { %v9611_v41 = vadd.f32 %v9512_v51, %v16540_v2  ;;  %v9880_v59 = vpop.f32.mrf.mxu3  ;;  %v16712_v63 = vadd.f32 %v10556_v31, %v16546_v43  ;;  %v10426_v43 = vld [vmem:[#allocation2 + $0x10a] sm:$0xff] }
 0x955   : > { %v16714_v36 = vadd.f32 %v9880_v59, %v9611_v41  ;;  %10595 = vmatmul.bf16.gmra.mxu1 %v10453_v17  ;;  %v10778_v41 = vld [vmem:[#allocation2 + $0x8b] sm:$0xff] }
 0x95a   : > { %v9514_v62 = vpop.f32.mrf.mxu2  ;;  %v10558_v14 = vpop.f32.mrf.mxu1 }
 0x95b   : > { %v9612_v7 = vadd.f32 %v9514_v62, %v16549_v13  ;;  %v9882_v60 = vpop.f32.mrf.mxu3  ;;  %v16718_v34 = vadd.f32 %v10558_v14, %v16559_v12  ;;  %v10454_v12 = vpack.c.bf16 %v10426_v43, %v10425_v58  ;;  %v13512_v14 = vld [vmem:[%s13896_s18 + $0x28] sm:$0xff] }
 0x95d   : > { %v16721_v2 = vadd.f32 %v9882_v60, %v9612_v7  ;;  %v10814_v7 = vpack.c.bf16 %v10778_v41, %v10777_v29  ;;  %v10779_v41 = vld [vmem:[#allocation2 + $0x93] sm:$0xff]  ;;  %v10429_v29 = vld [vmem:[#allocation2 + $0x122] sm:$0xff] }
 0x95f   : > { %10923 = vmatmul.bf16.gmra.mxu2 %v10813_v27 }
 0x960   : > { %11395 = vmatmul.bf16.gmra.mxu3 %v13511_v24 }
 0x962   : > { %v9517_v56 = vpop.f32.mrf.mxu2  ;;  %v10561_v39 = vpop.f32.mrf.mxu1 }
 0x963   : > { %v9613_v28 = vadd.f32 %v9517_v56, %v16562_v42  ;;  %v9885_v55 = vpop.f32.mrf.mxu3  ;;  %v16725_v13 = vadd.f32 %v10561_v39, %v16574_v19  ;;  %v10428_v19 = vld [vmem:[#allocation2 + $0x11a] sm:$0xff] }
 0x965   : > { %v16727_v51 = vadd.f32 %v9885_v55, %v9613_v28  ;;  %10600 = vmatmul.bf16.gmra.mxu1 %v10454_v12  ;;  %v10780_v28 = vld [vmem:[#allocation2 + $0x9b] sm:$0xff] }
 0x96a   : > { %v9519_v31 = vpop.f32.mrf.mxu2  ;;  %v10563_v46 = vpop.f32.mrf.mxu1 }
 0x96b   : > { %v9614_v59 = vadd.f32 %v9519_v31, %v16577_v5  ;;  %v9887_v17 = vpop.f32.mrf.mxu3  ;;  %v16731_v62 = vadd.f32 %v10563_v46, %v16587_v23  ;;  %v10455_v23 = vpack.c.bf16 %v10428_v19, %v10427_v26  ;;  %v13513_v46 = vld [vmem:[%s13896_s18 + $0x30] sm:$0xff] }
 0x96d   : > { %v16734_v42 = vadd.f32 %v9887_v17, %v9614_v59  ;;  %v10815_v59 = vpack.c.bf16 %v10780_v28, %v10779_v41  ;;  %v10781_v28 = vld [vmem:[#allocation2 + $0xa3] sm:$0xff]  ;;  %v10431_v41 = vld [vmem:[#allocation2 + $0x132] sm:$0xff] }
 0x96f   : > { %10928 = vmatmul.bf16.gmra.mxu2 %v10814_v7 }
 0x970   : > { %11400 = vmatmul.bf16.gmra.mxu3 %v13512_v14 }
 0x972   : > { %v9522_v60 = vpop.f32.mrf.mxu2  ;;  %v10566_v24 = vpop.f32.mrf.mxu1 }
 0x973   : > { %v9615_v27 = vadd.f32 %v9522_v60, %v16590_v3  ;;  %v9890_v43 = vpop.f32.mrf.mxu3  ;;  %v16738_v5 = vadd.f32 %v10566_v24, %v16596_v15  ;;  %v10430_v15 = vld [vmem:[#allocation2 + $0x12a] sm:$0xff] }
 0x975   : > { %v16740_v56 = vadd.f32 %v9890_v43, %v9615_v27  ;;  %10605 = vmatmul.bf16.gmra.mxu1 %v10455_v23  ;;  %v10782_v27 = vld [vmem:[#allocation2 + $0xab] sm:$0xff] }
 0x97a   : > { %v9524_v39 = vpop.f32.mrf.mxu2  ;;  %v10568_v58 = vpop.f32.mrf.mxu1 }
 0x97b   : > { %v9616_v55 = vadd.f32 %v9524_v39, %v16599_v9  ;;  %v9892_v12 = vpop.f32.mrf.mxu3  ;;  %v16744_v31 = vadd.f32 %v10568_v58, %v16609_v21  ;;  %v10456_v21 = vpack.c.bf16 %v10430_v15, %v10429_v29  ;;  %v13514_v58 = vld [vmem:[%s13896_s18 + $0x38] sm:$0xff] }
 0x97d   : > { %v16747_v3 = vadd.f32 %v9892_v12, %v9616_v55  ;;  %v10816_v55 = vpack.c.bf16 %v10782_v27, %v10781_v28  ;;  %v10783_v27 = vld [vmem:[#allocation2 + $0xb3] sm:$0xff] }
 0x97f   : > { %10933 = vmatmul.bf16.gmra.mxu2 %v10815_v59 }
 0x980   : > { %11405 = vmatmul.bf16.gmra.mxu3 %v13513_v46 }
 0x982   : > { %v9527_v17 = vpop.f32.mrf.mxu2  ;;  %v10571_v14 = vpop.f32.mrf.mxu1 }
 0x983   : > { %v9617_v7 = vadd.f32 %v9527_v17, %v16612_v20  ;;  %v9895_v19 = vpop.f32.mrf.mxu3  ;;  %v16751_v9 = vadd.f32 %v10571_v14, %v16618_v0  ;;  %v10432_v0 = vld [vmem:[#allocation2 + $0x13a] sm:$0xff] }
 0x985   : > { %v16753_v60 = vadd.f32 %v9895_v19, %v9617_v7  ;;  %10610 = vmatmul.bf16.gmra.mxu1 %v10456_v21  ;;  %v10784_v7 = vld [vmem:[#allocation2 + $0xbb] sm:$0xff] }
 0x98a   : > { %v9529_v24 = vpop.f32.mrf.mxu2  ;;  %v10573_v26 = vpop.f32.mrf.mxu1 }
 0x98b   : > { %v9618_v43 = vadd.f32 %v9529_v24, %v16621_v11  ;;  %v9897_v23 = vpop.f32.mrf.mxu3  ;;  %v16757_v39 = vadd.f32 %v10573_v26, %v16631_v35  ;;  %v10457_v35 = vpack.c.bf16 %v10432_v0, %v10431_v41  ;;  %v13515_v26 = vld [vmem:[%s13896_s18 + $0x40] sm:$0xff] }
 0x98c   : > { %v13782_v41 = vld [vmem:[%s17099_s6] sm:$0xf] }
 0x98d   : > { %v16760_v20 = vadd.f32 %v9897_v23, %v9618_v43  ;;  %v10817_v43 = vpack.c.bf16 %v10784_v7, %v10783_v27 }
 0x98f   : > { %10938 = vmatmul.bf16.gmra.mxu2 %v10816_v55 }
 0x990   : > { %11410 = vmatmul.bf16.gmra.mxu3 %v13514_v58  ;;  %v10433_v58 = vld [vmem:[#allocation2 + $0x142] sm:$0xff] }
 0x992   : > { %v9532_v12 = vpop.f32.mrf.mxu2  ;;  %v10576_v46 = vpop.f32.mrf.mxu1 }
 0x993   : > { %v9619_v59 = vadd.f32 %v9532_v12, %v16634_v1  ;;  %v9900_v15 = vpop.f32.mrf.mxu3  ;;  %v16764_v11 = vadd.f32 %v10576_v46, %v16640_v32  ;;  %v10434_v32 = vld [vmem:[#allocation2 + $0x14a] sm:$0xff] }
 0x994   : > { %v10458_v12 = vpack.c.bf16 %v10434_v32, %v10433_v58 }
 0x995   : > { %v16766_v17 = vadd.f32 %v9900_v15, %v9619_v59  ;;  %10615 = vmatmul.bf16.gmra.mxu1 %v10457_v35  ;;  %v16787_v59 = vperm.slane %v13782_v41, 2  ;;  %v16790_v15 = vperm.slane %v13782_v41, 3 }
 0x99a   : > { %v9534_v14 = vpop.f32.mrf.mxu2  ;;  %v10578_v29 = vpop.f32.mrf.mxu1 }
 0x99b   : > { %v9620_v19 = vadd.f32 %v9534_v14, %v16643_v52  ;;  %v9902_v21 = vpop.f32.mrf.mxu3  ;;  %v16770_v24 = vadd.f32 %v10578_v29, %v16653_v45  ;;  %v13781_v52 = vld [vmem:[%s17098_s5] sm:$0xf]  ;;  %v10786_v14 = vld [vmem:[#allocation2 + $0xcb] sm:$0xff] }
 0x99c   : > { %v16779_v55 = vperm.slane %v13781_v52, 2  ;;  %v16781_v0 = vperm.slane %v13781_v52, 3 }
 0x99d   : > { %v16773_v1 = vadd.f32 %v9902_v21, %v9620_v19 }
 0x99f   : > { %10943 = vmatmul.bf16.gmra.mxu2 %v10817_v43  ;;  %v10785_v43 = vld [vmem:[#allocation2 + $0xc3] sm:$0xff] }
 0x9a0   : > { %11415 = vmatmul.bf16.gmra.mxu3 %v13515_v26  ;;  %v13516_v26 = vld [vmem:[%s13896_s18 + $0x48] sm:$0xff] }
 0x9a2   : > { %v10904_v23 = vpop.f32.mrf.mxu2 }
 0x9a3   : > { %v11051_v28 = vadd.f32 %v10904_v23, %v16657_v38  ;;  %v11376_v45 = vpop.f32.mrf.mxu3  ;;  %v10818_v23 = vpack.c.bf16 %v10786_v14, %v10785_v43 }
 0x9a4   : > { %v11610_v38 = vmul.f32 %v16781_v0, %v11376_v45  ;;  %v10436_v45 = vld [vmem:[#allocation2 + $0x15a] sm:$0xff] }
 0x9a5   : > { %10620 = vmatmul.bf16.gmra.mxu1 %v10458_v12  ;;  %v11524_v46 = vmul.f32 %v16779_v55, %v11051_v28 }
 0x9a6   : > { %v11653_v7 = vadd.f32 %v16790_v15, %v11610_v38 }
 0x9a7   : > { %v11567_v29 = vadd.f32 %v16787_v59, %v11524_v46 }
 0x9a9   : > { %v11695_v58 = vadd.f32 %v11653_v7, %v11567_v29 }
 0x9aa   : > { %v10906_v35 = vpop.f32.mrf.mxu2 }
 0x9ab   : > { %v11052_v19 = vadd.f32 %v10906_v35, %v16663_v22  ;;  %v11378_v21 = vpop.f32.mrf.mxu3  ;;  %v10435_v22 = vld [vmem:[#allocation2 + $0x152] sm:$0xff]  ;;  %v11737_v41 = vmax.f32 %v11695_v58, 0.0 }
 0x9ac   : > { %v11611_v27 = vmul.f32 %v16781_v0, %v11378_v21  ;;  %v13517_v58 = vld [vmem:[%s13896_s18 + $0x50] sm:$0xff] }
 0x9ad   : > { %v11525_v32 = vmul.f32 %v16779_v55, %v11052_v19  ;;  %v10459_v19 = vpack.c.bf16 %v10436_v45, %v10435_v22 }
 0x9ae   : > { %v11654_v52 = vadd.f32 %v16790_v15, %v11611_v27  ;;  %v10788_v27 = vld [vmem:[#allocation2 + $0xdb] sm:$0xff] }
 0x9af   : > { %v11568_v28 = vadd.f32 %v16787_v59, %v11525_v32  ;;  %10948 = vmatmul.bf16.gmra.mxu2 %v10818_v23 }
 0x9b0   : > { %11420 = vmatmul.bf16.gmra.mxu3 %v13516_v26 }
 0x9b1   : > { %v11696_v12 = vadd.f32 %v11654_v52, %v11568_v28  ;;  %v10787_v52 = vld [vmem:[#allocation2 + $0xd3] sm:$0xff] }
 0x9b2   : > { %v10909_v46 = vpop.f32.mrf.mxu2 }
 0x9b3   : > { %v11738_v38 = vmax.f32 %v11696_v12, 0.0  ;;  %v11053_v35 = vadd.f32 %v10909_v46, %v16671_v25  ;;  %v11381_v21 = vpop.f32.mrf.mxu3  ;;  %v10819_v12 = vpack.c.bf16 %v10788_v27, %v10787_v52 }
 0x9b4   : > { %v11612_v7 = vmul.f32 %v16781_v0, %v11381_v21 }
 0x9b5   : > { %v13623_v14 = vpack.c.bf16 %v11738_v38, %v11737_v41  ;;  %10625 = vmatmul.bf16.gmra.mxu1 %v10459_v19  ;;  %v11526_v29 = vmul.f32 %v16779_v55, %v11053_v35  ;;  %v10437_v38 = vld [vmem:[#allocation2 + $0x162] sm:$0xff]  ;;  %v10438_v35 = vld [vmem:[#allocation2 + $0x16a] sm:$0xff] }
 0x9b6   : > { %v11655_v43 = vadd.f32 %v16790_v15, %v11612_v7 }
 0x9b7   : > { %13624 = vst [vmem:[%s16806_s14] sm:$0xff] %v13623_v14   ;;  %v11569_v25 = vadd.f32 %v16787_v59, %v11526_v29 }
 0x9b9   : > { %v11697_v46 = vadd.f32 %v11655_v43, %v11569_v25 }
 0x9ba   : > { %v10911_v26 = vpop.f32.mrf.mxu2 }
 0x9bb   : > { %v11054_v32 = vadd.f32 %v10911_v26, %v16677_v49  ;;  %v11383_v23 = vpop.f32.mrf.mxu3  ;;  %v11739_v19 = vmax.f32 %v11697_v46, 0.0  ;;  %v10460_v26 = vpack.c.bf16 %v10438_v35, %v10437_v38  ;;  %v10789_v46 = vld [vmem:[#allocation2 + $0xe3] sm:$0xff]  ;;  %v10439_v38 = vld [vmem:[#allocation2 + $0x172] sm:$0xff]  ;;  %v10440_v35 = vld [vmem:[#allocation2 + $0x17a] sm:$0xff] }
 0x9bc   : > { %v11613_v28 = vmul.f32 %v16781_v0, %v11383_v23  ;;  %v10790_v23 = vld [vmem:[#allocation2 + $0xeb] sm:$0xff] }
 0x9bd   : > { %v11527_v45 = vmul.f32 %v16779_v55, %v11054_v32 }
 0x9be   : > { %v11656_v41 = vadd.f32 %v16790_v15, %v11613_v28 }
 0x9bf   : > { %v11570_v22 = vadd.f32 %v16787_v59, %v11527_v45  ;;  %10953 = vmatmul.bf16.gmra.mxu2 %v10819_v12  ;;  %v13518_v12 = vld [vmem:[%s13896_s18 + $0x58] sm:$0xff] }
 0x9c0   : > { %11425 = vmatmul.bf16.gmra.mxu3 %v13517_v58 }
 0x9c1   : > { %v11698_v21 = vadd.f32 %v11656_v41, %v11570_v22  ;;  %v10820_v41 = vpack.c.bf16 %v10790_v23, %v10789_v46  ;;  %v13519_v46 = vld [vmem:[%s13896_s18 + $0x60] sm:$0xff] }
 0x9c2   : > { %v10914_v49 = vpop.f32.mrf.mxu2 }
 0x9c3   : > { %v11740_v14 = vmax.f32 %v11698_v21, 0.0  ;;  %v11055_v29 = vadd.f32 %v10914_v49, %v16685_v18  ;;  %v11386_v7 = vpop.f32.mrf.mxu3 }
 0x9c4   : > { %v11614_v43 = vmul.f32 %v16781_v0, %v11386_v7 }
 0x9c5   : > { %v13628_v27 = vpack.c.bf16 %v11740_v14, %v11739_v19  ;;  %10630 = vmatmul.bf16.gmra.mxu1 %v10460_v26  ;;  %v11528_v25 = vmul.f32 %v16779_v55, %v11055_v29 }
 0x9c6   : > { %v11657_v28 = vadd.f32 %v16790_v15, %v11614_v43 }
 0x9c7   : > { %13745 = vst [vmem:[%s16806_s14 + $0x8] sm:$0xff] %v13628_v27   ;;  %v11571_v58 = vadd.f32 %v16787_v59, %v11528_v25 }
 0x9c9   : > { %v11699_v21 = vadd.f32 %v11657_v28, %v11571_v58  ;;  %v10792_v28 = vld [vmem:[#allocation2 + $0xfb] sm:$0xff] }
 0x9ca   : > { %v10916_v32 = vpop.f32.mrf.mxu2 }
 0x9cb   : > { %v11056_v52 = vadd.f32 %v10916_v32, %v16691_v6  ;;  %v11388_v45 = vpop.f32.mrf.mxu3  ;;  %v10461_v6 = vpack.c.bf16 %v10440_v35, %v10439_v38  ;;  %v11741_v7 = vmax.f32 %v11699_v21, 0.0 }
 0x9cc   : > { %v11615_v18 = vmul.f32 %v16781_v0, %v11388_v45 }
 0x9cd   : > { %v11529_v22 = vmul.f32 %v16779_v55, %v11056_v52 }
 0x9ce   : > { %v11658_v19 = vadd.f32 %v16790_v15, %v11615_v18 }
 0x9cf   : > { %v11572_v49 = vadd.f32 %v16787_v59, %v11529_v22  ;;  %10958 = vmatmul.bf16.gmra.mxu2 %v10820_v41  ;;  %v10791_v22 = vld [vmem:[#allocation2 + $0xf3] sm:$0xff] }
 0x9d0   : > { %11430 = vmatmul.bf16.gmra.mxu3 %v13518_v12  ;;  %v10821_v38 = vpack.c.bf16 %v10792_v28, %v10791_v22 }
 0x9d1   : > { %v11700_v14 = vadd.f32 %v11658_v19, %v11572_v49 }
 0x9d2   : > { %v10919_v29 = vpop.f32.mrf.mxu2 }
 0x9d3   : > { %v11742_v26 = vmax.f32 %v11700_v14, 0.0  ;;  %v11057_v27 = vadd.f32 %v10919_v29, %v16699_v40  ;;  %v11391_v25 = vpop.f32.mrf.mxu3 }
 0x9d4   : > { %v11616_v23 = vmul.f32 %v16781_v0, %v11391_v25 }
 0x9d5   : > { %v13633_v43 = vpack.c.bf16 %v11742_v26, %v11741_v7  ;;  %10635 = vmatmul.bf16.gmra.mxu1 %v10461_v6  ;;  %v11530_v32 = vmul.f32 %v16779_v55, %v11057_v27 }
 0x9d6   : > { %v11659_v45 = vadd.f32 %v16790_v15, %v11616_v23 }
 0x9d7   : > { %13746 = vst [vmem:[%s16806_s14 + $0x10] sm:$0xff] %v13633_v43   ;;  %v11573_v52 = vadd.f32 %v16787_v59, %v11530_v32  ;;  %v10794_v32 = vld [vmem:[#allocation2 + $0x10b] sm:$0xff] }
 0x9d9   : > { %v11701_v35 = vadd.f32 %v11659_v45, %v11573_v52  ;;  %v13520_v45 = vld [vmem:[%s13896_s18 + $0x68] sm:$0xff] }
 0x9da   : > { %v10921_v58 = vpop.f32.mrf.mxu2 }
 0x9db   : > { %v11058_v12 = vadd.f32 %v10921_v58, %v16705_v57  ;;  %v11393_v18 = vpop.f32.mrf.mxu3  ;;  %v11743_v57 = vmax.f32 %v11701_v35, 0.0 }
 0x9dc   : > { %v11617_v40 = vmul.f32 %v16781_v0, %v11393_v18 }
 0x9dd   : > { %v11531_v41 = vmul.f32 %v16779_v55, %v11058_v12 }
 0x9de   : > { %v11660_v49 = vadd.f32 %v16790_v15, %v11617_v40 }
 0x9df   : > { %v11574_v21 = vadd.f32 %v16787_v59, %v11531_v41  ;;  %10963 = vmatmul.bf16.gmra.mxu2 %v10821_v38 }
 0x9e0   : > { %11435 = vmatmul.bf16.gmra.mxu3 %v13519_v46 }
 0x9e1   : > { %v11702_v19 = vadd.f32 %v11660_v49, %v11574_v21 }
 0x9e2   : > { %v10924_v14 = vpop.f32.mrf.mxu2 }
 0x9e3   : > { %v11744_v6 = vmax.f32 %v11702_v19, 0.0  ;;  %v11059_v29 = vadd.f32 %v10924_v14, %v16712_v63  ;;  %v11396_v7 = vpop.f32.mrf.mxu3  ;;  %v10793_v63 = vld [vmem:[#allocation2 + $0x103] sm:$0xff] }
 0x9e4   : > { %v11618_v25 = vmul.f32 %v16781_v0, %v11396_v7  ;;  %v10822_v46 = vpack.c.bf16 %v10794_v32, %v10793_v63  ;;  %v10796_v7 = vld [vmem:[#allocation2 + $0x11b] sm:$0xff]  ;;  %v13521_v32 = vld [vmem:[%s13896_s18 + $0x70] sm:$0xff] }
 0x9e5   : > { %v13638_v26 = vpack.c.bf16 %v11744_v6, %v11743_v57  ;;  %v11532_v27 = vmul.f32 %v16779_v55, %v11059_v29 }
 0x9e6   : > { %v11661_v58 = vadd.f32 %v16790_v15, %v11618_v25 }
 0x9e7   : > { %13747 = vst [vmem:[%s16806_s14 + $0x18] sm:$0xff] %v13638_v26   ;;  %v11575_v23 = vadd.f32 %v16787_v59, %v11532_v27 }
 0x9e9   : > { %v11703_v40 = vadd.f32 %v11661_v58, %v11575_v23 }
 0x9ea   : > { %v10926_v43 = vpop.f32.mrf.mxu2 }
 0x9eb   : > { %v11060_v28 = vadd.f32 %v10926_v43, %v16718_v34  ;;  %v11398_v52 = vpop.f32.mrf.mxu3  ;;  %v11745_v34 = vmax.f32 %v11703_v40, 0.0 }
 0x9ec   : > { %v11619_v12 = vmul.f32 %v16781_v0, %v11398_v52  ;;  %v16865_v52 = vpop.f32.mrf.mxu0 }
 0x9ed   : > { %v11533_v18 = vmul.f32 %v16779_v55, %v11060_v28 }
 0x9ee   : > { %v11662_v41 = vadd.f32 %v16790_v15, %v11619_v12 }
 0x9ef   : > { %v11576_v22 = vadd.f32 %v16787_v59, %v11533_v18  ;;  %10968 = vmatmul.bf16.gmra.mxu2 %v10822_v46  ;;  %v16869_v18 = vpop.f32.mrf.mxu1 }
 0x9f0   : > { %11440 = vmatmul.bf16.gmra.mxu3 %v13520_v45 }
 0x9f1   : > { %v11704_v38 = vadd.f32 %v11662_v41, %v11576_v22 }
 0x9f2   : > { %v10929_v35 = vpop.f32.mrf.mxu2 }
 0x9f3   : > { %v11746_v21 = vmax.f32 %v11704_v38, 0.0  ;;  %v11061_v49 = vadd.f32 %v10929_v35, %v16725_v13  ;;  %v11401_v19 = vpop.f32.mrf.mxu3  ;;  %v10795_v13 = vld [vmem:[#allocation2 + $0x113] sm:$0xff] }
 0x9f4   : > { %v11620_v6 = vmul.f32 %v16781_v0, %v11401_v19  ;;  %v10823_v28 = vpack.c.bf16 %v10796_v7, %v10795_v13 }
 0x9f5   : > { %v13643_v14 = vpack.c.bf16 %v11746_v21, %v11745_v34  ;;  %v11534_v57 = vmul.f32 %v16779_v55, %v11061_v49  ;;  %v16875_v49 = vpop.f32.mrf.mxu0 }
 0x9f6   : > { %v11663_v27 = vadd.f32 %v16790_v15, %v11620_v6 }
 0x9f7   : > { %13748 = vst [vmem:[%s16806_s14 + $0x20] sm:$0xff] %v13643_v14   ;;  %v11577_v26 = vadd.f32 %v16787_v59, %v11534_v57  ;;  %v16877_v19 = vpop.f32.mrf.mxu1  ;;  %v10798_v57 = vld [vmem:[#allocation2 + $0x12b] sm:$0xff] }
 0x9f9   : > { %v11705_v45 = vadd.f32 %v11663_v27, %v11577_v26  ;;  %v13522_v26 = vld [vmem:[%s13896_s18 + $0x78] sm:$0xff] }
 0x9fa   : > { %v10931_v29 = vpop.f32.mrf.mxu2 }
 0x9fb   : > { %v11062_v25 = vadd.f32 %v10931_v29, %v16731_v62  ;;  %v11403_v43 = vpop.f32.mrf.mxu3  ;;  %v11747_v40 = vmax.f32 %v11705_v45, 0.0 }
 0x9fc   : > { %v11621_v23 = vmul.f32 %v16781_v0, %v11403_v43 }
 0x9fd   : > { %v11535_v58 = vmul.f32 %v16779_v55, %v11062_v25  ;;  %v10797_v25 = vld [vmem:[#allocation2 + $0x123] sm:$0xff]  ;;  %v16887_v45 = vpop.f32.mrf.mxu0 }
 0x9fe   : > { %v11664_v63 = vadd.f32 %v16790_v15, %v11621_v23 }
 0x9ff   : > { %v11578_v12 = vadd.f32 %v16787_v59, %v11535_v58  ;;  %10973 = vmatmul.bf16.gmra.mxu2 %v10823_v28 }
 0xa00   : > { %11445 = vmatmul.bf16.gmra.mxu3 %v13521_v32  ;;  %v10824_v32 = vpack.c.bf16 %v10798_v57, %v10797_v25 }
 0xa01   : > { %v11706_v62 = vadd.f32 %v11664_v63, %v11578_v12 }
 0xa02   : > { %v10934_v46 = vpop.f32.mrf.mxu2 }
 0xa03   : > { %v11748_v22 = vmax.f32 %v11706_v62, 0.0  ;;  %v11063_v41 = vadd.f32 %v10934_v46, %v16738_v5  ;;  %v11406_v38 = vpop.f32.mrf.mxu3 }
 0xa04   : > { %v11622_v21 = vmul.f32 %v16781_v0, %v11406_v38 }
 0xa05   : > { %v13648_v35 = vpack.c.bf16 %v11748_v22, %v11747_v40  ;;  %v11536_v34 = vmul.f32 %v16779_v55, %v11063_v41  ;;  %v16890_v40 = vpop.f32.mrf.mxu1 }
 0xa06   : > { %v11665_v29 = vadd.f32 %v16790_v15, %v11622_v21 }
 0xa07   : > { %13749 = vst [vmem:[%s16806_s14 + $0x28] sm:$0xff] %v13648_v35   ;;  %v11579_v6 = vadd.f32 %v16787_v59, %v11536_v34  ;;  %v10800_v34 = vld [vmem:[#allocation2 + $0x13b] sm:$0xff] }
 0xa09   : > { %v11707_v23 = vadd.f32 %v11665_v29, %v11579_v6  ;;  %v13523_v29 = vld [vmem:[%s13896_s18 + $0x80] sm:$0xff] }
 0xa0a   : > { %v10936_v14 = vpop.f32.mrf.mxu2 }
 0xa0b   : > { %v11064_v7 = vadd.f32 %v10936_v14, %v16744_v31  ;;  %v11408_v5 = vpop.f32.mrf.mxu3  ;;  %v11749_v12 = vmax.f32 %v11707_v23, 0.0 }
 0xa0c   : > { %v11623_v27 = vmul.f32 %v16781_v0, %v11408_v5  ;;  %v10799_v5 = vld [vmem:[#allocation2 + $0x133] sm:$0xff] }
 0xa0d   : > { %v11537_v43 = vmul.f32 %v16779_v55, %v11064_v7  ;;  %v16903_v25 = vpop.f32.mrf.mxu1 }
 0xa0e   : > { %v11666_v58 = vadd.f32 %v16790_v15, %v11623_v27  ;;  %v10825_v27 = vpack.c.bf16 %v10800_v34, %v10799_v5 }
 0xa0f   : > { %v11580_v13 = vadd.f32 %v16787_v59, %v11537_v43  ;;  %10978 = vmatmul.bf16.gmra.mxu2 %v10824_v32 }
 0xa10   : > { %11450 = vmatmul.bf16.gmra.mxu3 %v13522_v26 }
 0xa11   : > { %v11708_v28 = vadd.f32 %v11666_v58, %v11580_v13 }
 0xa12   : > { %v10939_v31 = vpop.f32.mrf.mxu2 }
 0xa13   : > { %v11750_v63 = vmax.f32 %v11708_v28, 0.0  ;;  %v11065_v62 = vadd.f32 %v10939_v31, %v16751_v9  ;;  %v11411_v46 = vpop.f32.mrf.mxu3  ;;  %v16899_v9 = vpop.f32.mrf.mxu0 }
 0xa14   : > { %v11624_v38 = vmul.f32 %v16781_v0, %v11411_v46 }
 0xa15   : > { %v13653_v22 = vpack.c.bf16 %v11750_v63, %v11749_v12  ;;  %v11538_v41 = vmul.f32 %v16779_v55, %v11065_v62 }
 0xa16   : > { %v11667_v14 = vadd.f32 %v16790_v15, %v11624_v38 }
 0xa17   : > { %13750 = vst [vmem:[%s16806_s14 + $0x30] sm:$0xff] %v13653_v22   ;;  %v11581_v21 = vadd.f32 %v16787_v59, %v11538_v41  ;;  %v16913_v41 = vpop.f32.mrf.mxu1 }
 0xa19   : > { %v11709_v43 = vadd.f32 %v11667_v14, %v11581_v21 }
 0xa1a   : > { %v10941_v35 = vpop.f32.mrf.mxu2 }
 0xa1b   : > { %v11066_v57 = vadd.f32 %v10941_v35, %v16757_v39  ;;  %v11413_v6 = vpop.f32.mrf.mxu3  ;;  %v11751_v58 = vmax.f32 %v11709_v43, 0.0  ;;  %v16908_v62 = vpop.f32.mrf.mxu0  ;;  %v10802_v35 = vld [vmem:[#allocation2 + $0x14b] sm:$0xff] }
 0xa1c   : > { %v11625_v7 = vmul.f32 %v16781_v0, %v11413_v6 }
 0xa1d   : > { %v11539_v26 = vmul.f32 %v16779_v55, %v11066_v57  ;;  %v13524_v57 = vld [vmem:[%s13896_s18 + $0x88] sm:$0xff] }
 0xa1e   : > { %v11668_v23 = vadd.f32 %v16790_v15, %v11625_v7 }
 0xa1f   : > { %v11582_v32 = vadd.f32 %v16787_v59, %v11539_v26  ;;  %10983 = vmatmul.bf16.gmra.mxu2 %v10825_v27  ;;  %v10333_v26 = vadd.f32 %v16865_v52, %v16593_v33 }
 0xa20   : > { %11455 = vmatmul.bf16.gmra.mxu3 %v13523_v29  ;;  %v10801_v29 = vld [vmem:[#allocation2 + $0x143] sm:$0xff] }
 0xa21   : > { %v11710_v39 = vadd.f32 %v11668_v23, %v11582_v32  ;;  %v10826_v5 = vpack.c.bf16 %v10802_v35, %v10801_v29  ;;  %v10701_v23 = vadd.f32 %v16869_v18, %v10333_v26 }
 0xa22   : > { %v10944_v13 = vpop.f32.mrf.mxu2 }
 0xa23   : > { %v11752_v28 = vmax.f32 %v11710_v39, 0.0  ;;  %v11067_v31 = vadd.f32 %v10944_v13, %v16764_v11  ;;  %v11416_v12 = vpop.f32.mrf.mxu3  ;;  %v16928_v13 = vpop.f32.mrf.mxu1 }
 0xa24   : > { %v11626_v22 = vmul.f32 %v16781_v0, %v11416_v12 }
 0xa25   : > { %v13658_v63 = vpack.c.bf16 %v11752_v28, %v11751_v58  ;;  %v11540_v46 = vmul.f32 %v16779_v55, %v11067_v31 }
 0xa26   : > { %v11669_v21 = vadd.f32 %v16790_v15, %v11626_v22 }
 0xa27   : > { %13751 = vst [vmem:[%s16806_s14 + $0x38] sm:$0xff] %v13658_v63   ;;  %v11583_v34 = vadd.f32 %v16787_v59, %v11540_v46  ;;  %v10334_v63 = vadd.f32 %v16875_v49, %v16603_v61  ;;  %v10803_v49 = vld [vmem:[#allocation2 + $0x153] sm:$0xff] }
 0xa29   : > { %v11711_v27 = vadd.f32 %v11669_v21, %v11583_v34  ;;  %v10702_v18 = vadd.f32 %v16877_v19, %v10334_v63  ;;  %v10804_v34 = vld [vmem:[#allocation2 + $0x15b] sm:$0xff]  ;;  %v10335_v19 = vadd.f32 %v16887_v45, %v16615_v37 }
 0xa2a   : > { %v10946_v38 = vpop.f32.mrf.mxu2 }
 0xa2b   : > { %v11068_v14 = vadd.f32 %v10946_v38, %v16770_v24  ;;  %v11418_v11 = vpop.f32.mrf.mxu3  ;;  %v16925_v24 = vpop.f32.mrf.mxu0  ;;  %v11753_v28 = vmax.f32 %v11711_v27, 0.0 }
 0xa2c   : > { %v11627_v6 = vmul.f32 %v16781_v0, %v11418_v11  ;;  %v16941_v29 = vpop.f32.mrf.mxu1 }
 0xa2d   : > { %v11541_v7 = vmul.f32 %v16779_v55, %v11068_v14 }
 0xa2e   : > { %v11670_v32 = vadd.f32 %v16790_v15, %v11627_v6  ;;  %v13525_v6 = vld [vmem:[%s13896_s18 + $0x90] sm:$0xff] }
 0xa2f   : > { %v11584_v43 = vadd.f32 %v16787_v59, %v11541_v7  ;;  %10988 = vmatmul.bf16.gmra.mxu2 %v10826_v5  ;;  %v10827_v5 = vpack.c.bf16 %v10804_v34, %v10803_v49 }
 0xa30   : > { %11460 = vmatmul.bf16.gmra.mxu3 %v13524_v57 }
 0xa31   : > { %v11712_v39 = vadd.f32 %v11670_v32, %v11584_v43  ;;  %v10703_v32 = vadd.f32 %v16890_v40, %v10335_v19 }
 0xa32   : > { %v10949_v58 = vpop.f32.mrf.mxu2 }
 0xa33   : > { %v11754_v31 = vmax.f32 %v11712_v39, 0.0  ;;  %v11069_v33 = vadd.f32 %v10949_v58, %v10701_v23  ;;  %v11421_v52 = vpop.f32.mrf.mxu3  ;;  %v16936_v38 = vpop.f32.mrf.mxu0 }
 0xa34   : > { %v11628_v22 = vmul.f32 %v16781_v0, %v11421_v52  ;;  %v16952_v45 = vpop.f32.mrf.mxu1 }
 0xa35   : > { %v13663_v12 = vpack.c.bf16 %v11754_v31, %v11753_v28  ;;  %v11542_v46 = vmul.f32 %v16779_v55, %v11069_v33 }
 0xa36   : > { %v11671_v14 = vadd.f32 %v16790_v15, %v11628_v22 }
 0xa37   : > { %13752 = vst [vmem:[%s16806_s14 + $0x40] sm:$0xff] %v13663_v12   ;;  %v11585_v21 = vadd.f32 %v16787_v59, %v11542_v46  ;;  %v10336_v12 = vadd.f32 %v16899_v9, %v16625_v53 }
 0xa39   : > { %v11713_v26 = vadd.f32 %v11671_v14, %v11585_v21  ;;  %v10704_v46 = vadd.f32 %v16903_v25, %v10336_v12  ;;  %v10808_v12 = vld [vmem:[#allocation2 + $0x17b] sm:$0xff] }
 0xa3a   : > { %v10951_v35 = vpop.f32.mrf.mxu2 }
 0xa3b   : > { %v11070_v11 = vadd.f32 %v10951_v35, %v10702_v18  ;;  %v11423_v57 = vpop.f32.mrf.mxu3  ;;  %v11755_v58 = vmax.f32 %v11713_v26, 0.0  ;;  %v16950_v52 = vpop.f32.mrf.mxu0  ;;  %v10805_v18 = vld [vmem:[#allocation2 + $0x163] sm:$0xff]  ;;  %v10806_v35 = vld [vmem:[#allocation2 + $0x16b] sm:$0xff] }
 0xa3c   : > { %v11629_v61 = vmul.f32 %v16781_v0, %v11423_v57  ;;  %v13526_v57 = vld [vmem:[%s13896_s18 + $0x98] sm:$0xff]  ;;  %v10828_v9 = vpack.c.bf16 %v10806_v35, %v10805_v18  ;;  %v10601_v19 = vpop.f32.mrf.mxu1 }
 0xa3d   : > { %v11543_v7 = vmul.f32 %v16779_v55, %v11070_v11 }
 0xa3e   : > { %v11672_v43 = vadd.f32 %v16790_v15, %v11629_v61  ;;  %v10337_v61 = vadd.f32 %v16908_v62, %v16637_v50  ;;  %v10338_v62 = vadd.f32 %v16925_v24, %v16647_v16  ;;  %v13527_v16 = vld [vmem:[%s13896_s18 + $0xa0] sm:$0xff] }
 0xa3f   : > { %v11586_v27 = vadd.f32 %v16787_v59, %v11543_v7  ;;  %10993 = vmatmul.bf16.gmra.mxu2 %v10827_v5 }
 0xa40   : > { %11465 = vmatmul.bf16.gmra.mxu3 %v13525_v6  ;;  %v10705_v26 = vadd.f32 %v16913_v41, %v10337_v61  ;;  %v10706_v41 = vadd.f32 %v16928_v13, %v10338_v62 }
 0xa41   : > { %v11714_v23 = vadd.f32 %v11672_v43, %v11586_v27 }
 0xa42   : > { %v10954_v39 = vpop.f32.mrf.mxu2 }
 0xa43   : > { %v11756_v28 = vmax.f32 %v11714_v23, 0.0  ;;  %v11071_v31 = vadd.f32 %v10954_v39, %v10703_v32  ;;  %v11426_v33 = vpop.f32.mrf.mxu3  ;;  %v16967_v49 = vpop.f32.mrf.mxu0 }
 0xa44   : > { %v11630_v40 = vmul.f32 %v16781_v0, %v11426_v33 }
 0xa45   : > { %v13668_v37 = vpack.c.bf16 %v11756_v28, %v11755_v58  ;;  %v11544_v63 = vmul.f32 %v16779_v55, %v11071_v31 }
 0xa46   : > { %v11673_v21 = vadd.f32 %v16790_v15, %v11630_v40 }
 0xa47   : > { %13753 = vst [vmem:[%s16806_s14 + $0x48] sm:$0xff] %v13668_v37   ;;  %v11587_v34 = vadd.f32 %v16787_v59, %v11544_v63  ;;  %v10807_v37 = vld [vmem:[#allocation2 + $0x173] sm:$0xff]  ;;  %v10603_v63 = vpop.f32.mrf.mxu1 }
 0xa49   : > { %v11715_v25 = vadd.f32 %v11673_v21, %v11587_v34  ;;  %v10829_v34 = vpack.c.bf16 %v10808_v12, %v10807_v37 }
 0xa4a   : > { %v10956_v22 = vpop.f32.mrf.mxu2 }
 0xa4b   : > { %v11072_v14 = vadd.f32 %v10956_v22, %v10704_v46  ;;  %v11428_v11 = vpop.f32.mrf.mxu3  ;;  %v11757_v32 = vmax.f32 %v11715_v25, 0.0  ;;  %v10235_v33 = vpop.f32.mrf.mxu0 }
 0xa4c   : > { %v11631_v6 = vmul.f32 %v16781_v0, %v11428_v11 }
 0xa4d   : > { %v11545_v53 = vmul.f32 %v16779_v55, %v11072_v14  ;;  %v10339_v14 = vadd.f32 %v16936_v38, %v16659_v47  ;;  %v10340_v47 = vadd.f32 %v16950_v52, %v16667_v8  ;;  %v10341_v52 = vadd.f32 %v16967_v49, %v16673_v48 }
 0xa4e   : > { %v11674_v5 = vadd.f32 %v16790_v15, %v11631_v6 }
 0xa4f   : > { %v11588_v7 = vadd.f32 %v16787_v59, %v11545_v53  ;;  %10998 = vmatmul.bf16.gmra.mxu2 %v10828_v9  ;;  %v10707_v6 = vadd.f32 %v16941_v29, %v10339_v14  ;;  %v10342_v14 = vadd.f32 %v10235_v33, %v16681_v4 }
 0xa50   : > { %11470 = vmatmul.bf16.gmra.mxu3 %v13526_v57 }
 0xa51   : > { %v11716_v27 = vadd.f32 %v11674_v5, %v11588_v7 }
 0xa52   : > { %v10959_v43 = vpop.f32.mrf.mxu2 }
 0xa53   : > { %v11758_v23 = vmax.f32 %v11716_v27, 0.0  ;;  %v11073_v39 = vadd.f32 %v10959_v43, %v10705_v26  ;;  %v11431_v58 = vpop.f32.mrf.mxu3  ;;  %v10238_v9 = vpop.f32.mrf.mxu0 }
 0xa54   : > { %v11632_v31 = vmul.f32 %v16781_v0, %v11431_v58  ;;  %v10606_v27 = vpop.f32.mrf.mxu1  ;;  %v10343_v4 = vadd.f32 %v10238_v9, %v16687_v10 }
 0xa55   : > { %v13673_v50 = vpack.c.bf16 %v11758_v23, %v11757_v32  ;;  %v11546_v28 = vmul.f32 %v16779_v55, %v11073_v39  ;;  %v10708_v23 = vadd.f32 %v16952_v45, %v10340_v47 }
 0xa56   : > { %v11675_v22 = vadd.f32 %v16790_v15, %v11632_v31 }
 0xa57   : > { %13754 = vst [vmem:[%s16806_s14 + $0x50] sm:$0xff] %v13673_v50   ;;  %v11589_v46 = vadd.f32 %v16787_v59, %v11546_v28 }
 0xa59   : > { %v11717_v11 = vadd.f32 %v11675_v22, %v11589_v46 }
 0xa5a   : > { %v10961_v40 = vpop.f32.mrf.mxu2 }
 0xa5b   : > { %v11074_v18 = vadd.f32 %v10961_v40, %v10706_v41  ;;  %v11433_v35 = vpop.f32.mrf.mxu3  ;;  %v11759_v25 = vmax.f32 %v11717_v11, 0.0  ;;  %v10240_v28 = vpop.f32.mrf.mxu0  ;;  %v10709_v40 = vadd.f32 %v10601_v19, %v10341_v52 }
 0xa5c   : > { %v11633_v24 = vmul.f32 %v16781_v0, %v11433_v35  ;;  %v10608_v8 = vpop.f32.mrf.mxu1 }
 0xa5d   : > { %v11547_v21 = vmul.f32 %v16779_v55, %v11074_v18 }
 0xa5e   : > { %v11676_v57 = vadd.f32 %v16790_v15, %v11633_v24 }
 0xa5f   : > { %v11590_v13 = vadd.f32 %v16787_v59, %v11547_v21  ;;  %11003 = vmatmul.bf16.gmra.mxu2 %v10829_v34 }
 0xa60   : > { %11475 = vmatmul.bf16.gmra.mxu3 %v13527_v16 }
 0xa61   : > { %v11718_v53 = vadd.f32 %v11676_v57, %v11590_v13  ;;  %v10710_v13 = vadd.f32 %v10603_v63, %v10342_v14 }
 0xa62   : > { %v10964_v61 = vpop.f32.mrf.mxu2 }
 0xa63   : > { %v11760_v7 = vmax.f32 %v11718_v53, 0.0  ;;  %v11075_v5 = vadd.f32 %v10964_v61, %v10707_v6  ;;  %v11436_v26 = vpop.f32.mrf.mxu3  ;;  %v10243_v21 = vpop.f32.mrf.mxu0 }
 0xa64   : > { %v11634_v32 = vmul.f32 %v16781_v0, %v11436_v26  ;;  %v10611_v49 = vpop.f32.mrf.mxu1 }
 0xa65   : > { %v13678_v43 = vpack.c.bf16 %v11760_v7, %v11759_v25  ;;  %v11548_v38 = vmul.f32 %v16779_v55, %v11075_v5 }
 0xa66   : > { %v11677_v58 = vadd.f32 %v16790_v15, %v11634_v32 }
 0xa67   : > { %13755 = vst [vmem:[%s16806_s14 + $0x58] sm:$0xff] %v13678_v43   ;;  %v11591_v39 = vadd.f32 %v16787_v59, %v11548_v38  ;;  %v10711_v43 = vadd.f32 %v10606_v27, %v10343_v4 }
 0xa69   : > { %v11719_v12 = vadd.f32 %v11677_v58, %v11591_v39 }
 0xa6a   : > { %v10966_v29 = vpop.f32.mrf.mxu2 }
 0xa6b   : > { %v11076_v50 = vadd.f32 %v10966_v29, %v10708_v23  ;;  %v11438_v62 = vpop.f32.mrf.mxu3  ;;  %v11761_v18 = vmax.f32 %v11719_v12, 0.0  ;;  %v10245_v63 = vpop.f32.mrf.mxu0 }
 0xa6c   : > { %v11635_v31 = vmul.f32 %v16781_v0, %v11438_v62  ;;  %v10613_v38 = vpop.f32.mrf.mxu1  ;;  %v10344_v62 = vadd.f32 %v10240_v28, %v16695_v30  ;;  %v10345_v30 = vadd.f32 %v10243_v21, %v16701_v44 }
 0xa6d   : > { %v11549_v37 = vmul.f32 %v16779_v55, %v11076_v50 }
 0xa6e   : > { %v11678_v41 = vadd.f32 %v16790_v15, %v11635_v31  ;;  %v10712_v31 = vadd.f32 %v10608_v8, %v10344_v62 }
 0xa6f   : > { %v11592_v45 = vadd.f32 %v16787_v59, %v11549_v37 }
 0xa71   : > { %v11720_v46 = vadd.f32 %v11678_v41, %v11592_v45 }
 0xa72   : > { %v10969_v22 = vpop.f32.mrf.mxu2 }
 0xa73   : > { %v11762_v35 = vmax.f32 %v11720_v46, 0.0  ;;  %v11077_v34 = vadd.f32 %v10969_v22, %v10709_v40  ;;  %v11441_v16 = vpop.f32.mrf.mxu3  ;;  %v10248_v37 = vpop.f32.mrf.mxu0 }
 0xa74   : > { %v11636_v48 = vmul.f32 %v16781_v0, %v11441_v16  ;;  %v10616_v40 = vpop.f32.mrf.mxu1 }
 0xa75   : > { %v13683_v24 = vpack.c.bf16 %v11762_v35, %v11761_v18  ;;  %v11550_v11 = vmul.f32 %v16779_v55, %v11077_v34  ;;  %v10713_v35 = vadd.f32 %v10611_v49, %v10345_v30 }
 0xa76   : > { %v11679_v6 = vadd.f32 %v16790_v15, %v11636_v48 }
 0xa77   : > { %13756 = vst [vmem:[%s16806_s14 + $0x60] sm:$0xff] %v13683_v24   ;;  %v11593_v19 = vadd.f32 %v16787_v59, %v11550_v11 }
 0xa79   : > { %v11721_v33 = vadd.f32 %v11679_v6, %v11593_v19  ;;  %v10346_v6 = vadd.f32 %v10245_v63, %v16708_v54  ;;  %v10347_v54 = vadd.f32 %v10248_v37, %v16714_v36 }
 0xa7a   : > { %v10971_v57 = vpop.f32.mrf.mxu2 }
 0xa7b   : > { %v11078_v53 = vadd.f32 %v10971_v57, %v10710_v13  ;;  %v11443_v61 = vpop.f32.mrf.mxu3  ;;  %v11763_v23 = vmax.f32 %v11721_v33, 0.0  ;;  %v10250_v13 = vpop.f32.mrf.mxu0 }
 0xa7c   : > { %v11637_v25 = vmul.f32 %v16781_v0, %v11443_v61  ;;  %v10618_v19 = vpop.f32.mrf.mxu1 }
 0xa7d   : > { %v11551_v7 = vmul.f32 %v16779_v55, %v11078_v53  ;;  %v10714_v53 = vadd.f32 %v10613_v38, %v10346_v6 }
 0xa7e   : > { %v11680_v26 = vadd.f32 %v16790_v15, %v11637_v25 }
 0xa7f   : > { %v11594_v5 = vadd.f32 %v16787_v59, %v11551_v7 }
 0xa81   : > { %v11722_v47 = vadd.f32 %v11680_v26, %v11594_v5 }
 0xa82   : > { %v10974_v32 = vpop.f32.mrf.mxu2 }
 0xa83   : > { %v11764_v29 = vmax.f32 %v11722_v47, 0.0  ;;  %v11079_v39 = vadd.f32 %v10974_v32, %v10711_v43  ;;  %v11446_v58 = vpop.f32.mrf.mxu3  ;;  %v10253_v26 = vpop.f32.mrf.mxu0  ;;  %v10715_v32 = vadd.f32 %v10616_v40, %v10347_v54 }
 0xa84   : > { %v11638_v9 = vmul.f32 %v16781_v0, %v11446_v58  ;;  %v10621_v38 = vpop.f32.mrf.mxu1 }
 0xa85   : > { %v13688_v50 = vpack.c.bf16 %v11764_v29, %v11763_v23  ;;  %v11552_v10 = vmul.f32 %v16779_v55, %v11079_v39 }
 0xa86   : > { %v11681_v12 = vadd.f32 %v16790_v15, %v11638_v9  ;;  %v10348_v9 = vadd.f32 %v10250_v13, %v16721_v2  ;;  %v10349_v2 = vadd.f32 %v10253_v26, %v16727_v51 }
 0xa87   : > { %13757 = vst [vmem:[%s16806_s14 + $0x68] sm:$0xff] %v13688_v50   ;;  %v11595_v27 = vadd.f32 %v16787_v59, %v11552_v10 }
 0xa89   : > { %v11723_v28 = vadd.f32 %v11681_v12, %v11595_v27 }
 0xa8a   : > { %v10976_v52 = vpop.f32.mrf.mxu2 }
 0xa8b   : > { %v11080_v45 = vadd.f32 %v10976_v52, %v10712_v31  ;;  %v11448_v41 = vpop.f32.mrf.mxu3  ;;  %v11765_v24 = vmax.f32 %v11723_v28, 0.0  ;;  %v10255_v37 = vpop.f32.mrf.mxu0  ;;  %v10716_v52 = vadd.f32 %v10618_v19, %v10348_v9 }
 0xa8c   : > { %v11639_v46 = vmul.f32 %v16781_v0, %v11448_v41  ;;  %v10623_v27 = vpop.f32.mrf.mxu1  ;;  %v10350_v6 = vadd.f32 %v10255_v37, %v16734_v42 }
 0xa8d   : > { %v11553_v22 = vmul.f32 %v16779_v55, %v11080_v45 }
 0xa8e   : > { %v11682_v8 = vadd.f32 %v16790_v15, %v11639_v46 }
 0xa8f   : > { %v11596_v18 = vadd.f32 %v16787_v59, %v11553_v22 }
 0xa91   : > { %v11724_v34 = vadd.f32 %v11682_v8, %v11596_v18 }
 0xa92   : > { %v10979_v16 = vpop.f32.mrf.mxu2 }
 0xa93   : > { %v11766_v14 = vmax.f32 %v11724_v34, 0.0  ;;  %v11081_v11 = vadd.f32 %v10979_v16, %v10713_v35  ;;  %v11451_v48 = vpop.f32.mrf.mxu3  ;;  %v10717_v35 = vadd.f32 %v10621_v38, %v10349_v2  ;;  %v10258_v16 = vpop.f32.mrf.mxu0 }
 0xa94   : > { %v11640_v21 = vmul.f32 %v16781_v0, %v11451_v48  ;;  %v10351_v26 = vadd.f32 %v10258_v16, %v16740_v56 }
 0xa95   : > { %v13693_v57 = vpack.c.bf16 %v11766_v14, %v11765_v24  ;;  %v11554_v44 = vmul.f32 %v16779_v55, %v11081_v11 }
 0xa96   : > { %v11683_v25 = vadd.f32 %v16790_v15, %v11640_v21  ;;  %v10718_v21 = vadd.f32 %v10623_v27, %v10350_v6 }
 0xa97   : > { %13758 = vst [vmem:[%s16806_s14 + $0x70] sm:$0xff] %v13693_v57   ;;  %v11597_v49 = vadd.f32 %v16787_v59, %v11554_v44  ;;  %v10626_v57 = vpop.f32.mrf.mxu1 }
 0xa99   : > { %v11725_v63 = vadd.f32 %v11683_v25, %v11597_v49 }
 0xa9a   : > { %v10981_v61 = vpop.f32.mrf.mxu2 }
 0xa9b   : > { %v11082_v7 = vadd.f32 %v10981_v61, %v10714_v53  ;;  %v11453_v4 = vpop.f32.mrf.mxu3  ;;  %v11767_v39 = vmax.f32 %v11725_v63, 0.0 }
 0xa9c   : > { %v11641_v33 = vmul.f32 %v16781_v0, %v11453_v4  ;;  %v10260_v4 = vpop.f32.mrf.mxu0 }
 0xa9d   : > { %v11555_v5 = vmul.f32 %v16779_v55, %v11082_v7 }
 0xa9e   : > { %v11684_v47 = vadd.f32 %v16790_v15, %v11641_v33 }
 0xa9f   : > { %v11598_v43 = vadd.f32 %v16787_v59, %v11555_v5  ;;  %v10628_v42 = vpop.f32.mrf.mxu1 }
 0xaa1   : > { %v11726_v23 = vadd.f32 %v11684_v47, %v11598_v43  ;;  %v10719_v47 = vadd.f32 %v10626_v57, %v10351_v26 }
 0xaa2   : > { %v10984_v29 = vpop.f32.mrf.mxu2 }
 0xaa3   : > { %v11768_v58 = vmax.f32 %v11726_v23, 0.0  ;;  %v11083_v50 = vadd.f32 %v10984_v29, %v10715_v32  ;;  %v11456_v62 = vpop.f32.mrf.mxu3 }
 0xaa4   : > { %v11642_v36 = vmul.f32 %v16781_v0, %v11456_v62  ;;  %v10263_v62 = vpop.f32.mrf.mxu0 }
 0xaa5   : > { %v13698_v10 = vpack.c.bf16 %v11768_v58, %v11767_v39  ;;  %v11556_v31 = vmul.f32 %v16779_v55, %v11083_v50 }
 0xaa6   : > { %v11685_v41 = vadd.f32 %v16790_v15, %v11642_v36 }
 0xaa7   : > { %13759 = vst [vmem:[%s16806_s14 + $0x78] sm:$0xff] %v13698_v10   ;;  %v11599_v45 = vadd.f32 %v16787_v59, %v11556_v31  ;;  %v10352_v10 = vadd.f32 %v10260_v4, %v16747_v3  ;;  %v10631_v31 = vpop.f32.mrf.mxu1  ;;  %v10353_v3 = vadd.f32 %v10263_v62, %v16753_v60 }
 0xaa9   : > { %v11727_v28 = vadd.f32 %v11685_v41, %v11599_v45  ;;  %v10720_v36 = vadd.f32 %v10628_v42, %v10352_v10 }
 0xaaa   : > { %v10986_v12 = vpop.f32.mrf.mxu2 }
 0xaab   : > { %v11084_v40 = vadd.f32 %v10986_v12, %v10716_v52  ;;  %v11458_v46 = vpop.f32.mrf.mxu3  ;;  %v11769_v14 = vmax.f32 %v11727_v28, 0.0  ;;  %v10721_v28 = vadd.f32 %v10631_v31, %v10353_v3 }
 0xaac   : > { %v11643_v22 = vmul.f32 %v16781_v0, %v11458_v46  ;;  %v10265_v2 = vpop.f32.mrf.mxu0 }
 0xaad   : > { %v11557_v30 = vmul.f32 %v16779_v55, %v11084_v40 }
 0xaae   : > { %v11686_v8 = vadd.f32 %v16790_v15, %v11643_v22 }
 0xaaf   : > { %v11600_v18 = vadd.f32 %v16787_v59, %v11557_v30 }
 0xab1   : > { %v11728_v34 = vadd.f32 %v11686_v8, %v11600_v18  ;;  %v10633_v8 = vpop.f32.mrf.mxu1 }
 0xab2   : > { %v10989_v24 = vpop.f32.mrf.mxu2 }
 0xab3   : > { %v11770_v11 = vmax.f32 %v11728_v34, 0.0  ;;  %v11085_v48 = vadd.f32 %v10989_v24, %v10717_v35  ;;  %v11461_v13 = vpop.f32.mrf.mxu3 }
 0xab4   : > { %v11644_v44 = vmul.f32 %v16781_v0, %v11461_v13 }
 0xab5   : > { %v13703_v19 = vpack.c.bf16 %v11770_v11, %v11769_v14  ;;  %v11558_v51 = vmul.f32 %v16779_v55, %v11085_v48  ;;  %v10354_v48 = vadd.f32 %v10265_v2, %v16760_v20 }
 0xab6   : > { %v11687_v49 = vadd.f32 %v16790_v15, %v11644_v44 }
 0xab7   : > { %13760 = vst [vmem:[%s16806_s14 + $0x80] sm:$0xff] %v13703_v19   ;;  %v11601_v61 = vadd.f32 %v16787_v59, %v11558_v51  ;;  %v10722_v57 = vadd.f32 %v10633_v8, %v10354_v48  ;;  %v10268_v19 = vpop.f32.mrf.mxu0 }
 0xab8   : > { %v10355_v20 = vadd.f32 %v10268_v19, %v16766_v17 }
 0xab9   : > { %v11729_v54 = vadd.f32 %v11687_v49, %v11601_v61  ;;  %v10636_v61 = vpop.f32.mrf.mxu1 }
 0xaba   : > { %v10991_v53 = vpop.f32.mrf.mxu2 }
 0xabb   : > { %v11086_v25 = vadd.f32 %v10991_v53, %v10718_v21  ;;  %v11463_v7 = vpop.f32.mrf.mxu3  ;;  %v11771_v23 = vmax.f32 %v11729_v54, 0.0 }
 0xabc   : > { %v11645_v33 = vmul.f32 %v16781_v0, %v11463_v7 }
 0xabd   : > { %v11559_v5 = vmul.f32 %v16779_v55, %v11086_v25 }
 0xabe   : > { %v11688_v43 = vadd.f32 %v16790_v15, %v11645_v33 }
 0xabf   : > { %v11602_v63 = vadd.f32 %v16787_v59, %v11559_v5  ;;  %v10723_v5 = vadd.f32 %v10636_v61, %v10355_v20 }
 0xac1   : > { %v11730_v38 = vadd.f32 %v11688_v43, %v11602_v63 }
 0xac2   : > { %v10994_v32 = vpop.f32.mrf.mxu2 }
 0xac3   : > { %v11772_v29 = vmax.f32 %v11730_v38, 0.0  ;;  %v11087_v39 = vadd.f32 %v10994_v32, %v10719_v47  ;;  %v11466_v58 = vpop.f32.mrf.mxu3  ;;  %v10270_v38 = vpop.f32.mrf.mxu0 }
 0xac4   : > { %v11646_v56 = vmul.f32 %v16781_v0, %v11466_v58 }
 0xac5   : > { %v13708_v50 = vpack.c.bf16 %v11772_v29, %v11771_v23  ;;  %v11560_v9 = vmul.f32 %v16779_v55, %v11087_v39  ;;  %v10638_v23 = vpop.f32.mrf.mxu1  ;;  %v10356_v29 = vadd.f32 %v10270_v38, %v16773_v1 }
 0xac6   : > { %v11689_v27 = vadd.f32 %v16790_v15, %v11646_v56 }
 0xac7   : > { %13761 = vst [vmem:[%s16806_s14 + $0x88] sm:$0xff] %v13708_v50   ;;  %v11603_v52 = vadd.f32 %v16787_v59, %v11560_v9  ;;  %v10724_v58 = vadd.f32 %v10638_v23, %v10356_v29 }
 0xac9   : > { %v11731_v46 = vadd.f32 %v11689_v27, %v11603_v52 }
 0xaca   : > { %v10996_v37 = vpop.f32.mrf.mxu2 }
 0xacb   : > { %v11088_v12 = vadd.f32 %v10996_v37, %v10720_v36  ;;  %v11468_v45 = vpop.f32.mrf.mxu3  ;;  %v11773_v34 = vmax.f32 %v11731_v46, 0.0 }
 0xacc   : > { %v11647_v41 = vmul.f32 %v16781_v0, %v11468_v45 }
 0xacd   : > { %v11561_v40 = vmul.f32 %v16779_v55, %v11088_v12 }
 0xace   : > { %v11690_v30 = vadd.f32 %v16790_v15, %v11647_v41 }
 0xacf   : > { %v11604_v22 = vadd.f32 %v16787_v59, %v11561_v40 }
 0xad1   : > { %v11732_v18 = vadd.f32 %v11690_v30, %v11604_v22 }
 0xad2   : > { %v10999_v35 = vpop.f32.mrf.mxu2 }
 0xad3   : > { %v11774_v16 = vmax.f32 %v11732_v18, 0.0  ;;  %v11089_v24 = vadd.f32 %v10999_v35, %v10721_v28  ;;  %v11471_v14 = vpop.f32.mrf.mxu3 }
 0xad4   : > { %v11648_v13 = vmul.f32 %v16781_v0, %v11471_v14 }
 0xad5   : > { %v13713_v11 = vpack.c.bf16 %v11774_v16, %v11773_v34  ;;  %v11562_v60 = vmul.f32 %v16779_v55, %v11089_v24 }
 0xad6   : > { %v11691_v44 = vadd.f32 %v16790_v15, %v11648_v13 }
 0xad7   : > { %13762 = vst [vmem:[%s16806_s14 + $0x90] sm:$0xff] %v13713_v11   ;;  %v11605_v51 = vadd.f32 %v16787_v59, %v11562_v60 }
 0xad9   : > { %v11733_v7 = vadd.f32 %v11691_v44, %v11605_v51 }
 0xada   : > { %v11001_v6 = vpop.f32.mrf.mxu2 }
 0xadb   : > { %v11090_v21 = vadd.f32 %v11001_v6, %v10722_v57  ;;  %v11473_v53 = vpop.f32.mrf.mxu3  ;;  %v11775_v54 = vmax.f32 %v11733_v7, 0.0 }
 0xadc   : > { %v11649_v49 = vmul.f32 %v16781_v0, %v11473_v53 }
 0xadd   : > { %v11563_v25 = vmul.f32 %v16779_v55, %v11090_v21 }
 0xade   : > { %v11692_v33 = vadd.f32 %v16790_v15, %v11649_v49 }
 0xadf   : > { %v11606_v4 = vadd.f32 %v16787_v59, %v11563_v25 }
 0xae1   : > { %v11734_v42 = vadd.f32 %v11692_v33, %v11606_v4 }
 0xae2   : > { %v11004_v26 = vpop.f32.mrf.mxu2 }
 0xae3   : > { %v11776_v63 = vmax.f32 %v11734_v42, 0.0  ;;  %v11091_v43 = vadd.f32 %v11004_v26, %v10723_v5  ;;  %v11476_v47 = vpop.f32.mrf.mxu3 }
 0xae4   : > { %v11650_v39 = vmul.f32 %v16781_v0, %v11476_v47 }
 0xae5   : > { %v13718_v32 = vpack.c.bf16 %v11776_v63, %v11775_v54  ;;  %v11564_v17 = vmul.f32 %v16779_v55, %v11091_v43 }
 0xae6   : > { %v11693_v10 = vadd.f32 %v16790_v15, %v11650_v39 }
 0xae7   : > { %13763 = vst [vmem:[%s16806_s14 + $0x98] sm:$0xff] %v13718_v32   ;;  %v11607_v62 = vadd.f32 %v16787_v59, %v11564_v17 }
 0xae9   : > { %v11735_v37 = vadd.f32 %v11693_v10, %v11607_v62 }
 0xaea   : > { %v11006_v50 = vpop.f32.mrf.mxu2 }
 0xaeb   : > { %v11092_v9 = vadd.f32 %v11006_v50, %v10724_v58  ;;  %v11478_v56 = vpop.f32.mrf.mxu3  ;;  %v11777_v12 = vmax.f32 %v11735_v37, 0.0 }
 0xaec   : > { %v11651_v31 = vmul.f32 %v16781_v0, %v11478_v56 }
 0xaed   : > { %v11565_v36 = vmul.f32 %v16779_v55, %v11092_v9 }
 0xaee   : > { %v11694_v52 = vadd.f32 %v16790_v15, %v11651_v31 }
 0xaef   : > { %v11608_v1 = vadd.f32 %v16787_v59, %v11565_v36 }
 0xaf1   : > { %v11736_v27 = vadd.f32 %v11694_v52, %v11608_v1 }
 0xaf3   : > { %v11778_v45 = vmax.f32 %v11736_v27, 0.0 }
 0xaf5   : > { %v13723_v41 = vpack.c.bf16 %v11778_v45, %v11777_v12 }
 0xaf7   : > { %13764 = vst [vmem:[%s16806_s14 + $0xa0] sm:$0xff] %v13723_v41  }
 0xaf8 PF: > { %s18_s27 = sadd.s32 1, %s13789_s27  }
 0xaf9   : > { %p15_p4 = scmp.ge.s32.totalorder %s18_s27, 4  }
 0xafb   :  { %17 = sbr.rel (!%p15_p4) target bundleno = 1 (0x1), region = 106 }

</bundles_post_ra>
